<compile_context>
chip_gen: v7x
topology: tpu7x:2x2x1
jax: 0.10.0
libtpu: 0.0.40
codegen_flags: <defaults>
</compile_context>

<pallas_src>
import functools
import math

import jax
import jax.numpy as jnp
import numpy as np
from jax.experimental import pallas as pl
from jax.experimental.pallas import tpu as pltpu


# ----------------------------------------------------------------------------
# Fused Pallas kernel: conv3x3+ReLU -> conv1x1+ReLU -> conv3x3+ReLU -> GAP -> FC
# ----------------------------------------------------------------------------
def _sewn_fused_kernel(xcols_ref, mask_ref, w1_ref, w2_ref, b2_ref, w3_ref,
                       fcw_ref, fcb_ref, o_ref, act2_ref,
                       *, n, h, w, rpi, margin):
    """Whole SewnConvNet forward, resident in VMEM.

    Row layout: flattened zero-padded NHWC positions, one image = `rpi`
    (8-aligned) rows, channels on lanes.  Each 3x3 'same' conv is ONE matmul
    whose contraction dim carries the 9 taps (+ a ones column for the bias).
    """
    hp, wp = h + 2, w + 2
    r = n * rpi
    m = margin
    c1 = w2_ref.shape[0]
    c3 = w3_ref.shape[1]
    mask = mask_ref[...]                                         # (r, 1) f32

    # --- net_before: 3x3 conv + ReLU as ONE K=9*Cin+1 MXU matmul (im2col,
    #     bf16 cast and bias fold were done once in the wrapper).
    act1 = jnp.maximum(
        jnp.dot(xcols_ref[...], w1_ref[...],
                preferred_element_type=jnp.float32), 0.0)        # (r, c1) f32

    # --- connector: 1x1 conv + ReLU, then the interior mask (the mask makes
    #     padding / alignment rows exact zeros -> they act as conv3's zero pad).
    a2 = jnp.dot(act1.astype(jnp.bfloat16), w2_ref[...],
                 preferred_element_type=jnp.float32) + b2_ref[...]
    act2 = (jnp.maximum(a2, 0.0) * mask).astype(jnp.bfloat16)    # (r, c1) bf16

    # Store once into the bf16 scratch (aligned: m and r are tile multiples);
    # zero the margin rows so conv3's boundary-row reads are well defined.
    act2_ref[0:m, :] = jnp.zeros((m, c1), jnp.bfloat16)
    act2_ref[m + r:m + r + m, :] = jnp.zeros((m, c1), jnp.bfloat16)
    act2_ref[m:m + r, :] = act2

    # --- net_after conv: 3x3 conv + ReLU as ONE K=9*C1+1 matmul.  The 9 tap
    #     shifts are paid once, lane-concatenated into a single bf16 LHS.
    offs = [(kh - 1) * wp + (kw - 1) for kh in range(3) for kw in range(3)]
    lhs3 = jnp.concatenate(
        [act2_ref[m + off:m + off + r, :] for off in offs]
        + [jnp.ones((r, 1), jnp.bfloat16)], axis=-1)             # (r, 9*c1+1)
    act3 = jnp.maximum(
        jnp.dot(lhs3, w3_ref[...],
                preferred_element_type=jnp.float32), 0.0)        # (r, c3) f32

    # --- Global average pool over interior pixels: masked per-image
    #     cross-sublane reduce (aligned per-image slices), then the classifier.
    act3 = act3 * mask
    pooled = jnp.concatenate(
        [jnp.sum(act3[i * rpi:(i + 1) * rpi, :], axis=0, keepdims=True)
         for i in range(n)], axis=0) * (1.0 / (h * w))           # (n, c3)
    o_ref[...] = jnp.dot(pooled, fcw_ref[...],
                         preferred_element_type=jnp.float32) + fcb_ref[...]


def sewn_convnet_forward(params, x_nchw):
    n, c0, h, w = x_nchw.shape
    # Merged-tap lowering assumes 3x3 'same' convs and a 1x1 connector.
    assert params["before_w"].shape[2:] == (3, 3), "net_before conv must be 3x3 (pad=1)"
    assert params["after_w"].shape[2:] == (3, 3), "net_after conv must be 3x3 (pad=1)"
    assert params["conn_w"].shape[2:] == (1, 1), "connector must be a 1x1 conv"

    hp, wp = h + 2, w + 2
    rpi = ((hp * wp + 7) // 8) * 8           # rows per image, sublane aligned
    r = n * rpi
    margin = ((wp + 1 + 15) // 16) * 16      # >= max tap shift, bf16-tile aligned
    c1 = params["before_w"].shape[0]
    c3 = params["after_w"].shape[0]
    nc = params["fc_w"].shape[0]

    # --- one-time layout plumbing in plain XLA (input is a few KB) ----------
    # im2col for conv1: 9 shifted views of the double-padded NHWC image,
    # tap-concatenated on the channel axis, plus a ones column folding the
    # conv1 bias into the matmul; per-image rows padded to `rpi`; bf16.
    x_nhwc = jnp.transpose(x_nchw.astype(jnp.float32), (0, 2, 3, 1))
    x_p2 = jnp.pad(x_nhwc, ((0, 0), (2, 2), (2, 2), (0, 0)))
    taps = [x_p2[:, kh:kh + hp, kw:kw + wp, :]
            for kh in range(3) for kw in range(3)]
    cols = jnp.concatenate(taps, axis=-1).reshape(n, hp * wp, 9 * c0)
    cols = jnp.concatenate([cols, jnp.ones((n, hp * wp, 1), jnp.float32)], -1)
    cols = jnp.pad(cols, ((0, 0), (0, rpi - hp * wp), (0, 0)))
    x_cols = cols.reshape(r, 9 * c0 + 1).astype(jnp.bfloat16)

    # Interior-pixel mask (r, 1): zero on conv-padding rows/cols and on the
    # per-image alignment rows (= conv3 zero padding and pool validity mask).
    interior = jnp.zeros((hp, wp), jnp.float32).at[1:h + 1, 1:w + 1].set(1.0)
    mask = jnp.pad(interior.reshape(1, hp * wp), ((0, 0), (0, rpi - hp * wp)))
    mask = jnp.tile(mask, (n, 1)).reshape(r, 1)

    # --- weight repack (once): taps folded into the contraction dim ---------
    w1 = jnp.transpose(params["before_w"], (2, 3, 1, 0)).reshape(9 * c0, c1)
    w1 = jnp.concatenate([w1, params["before_b"].reshape(1, c1)], axis=0)
    w1 = w1.astype(jnp.bfloat16)                                  # (9*c0+1, c1)
    w2 = params["conn_w"][:, :, 0, 0].T.astype(jnp.bfloat16)      # (c1, c1)
    b2 = params["conn_b"].reshape(1, c1).astype(jnp.float32)
    w3 = jnp.transpose(params["after_w"], (2, 3, 1, 0)).reshape(9 * c1, c3)
    w3 = jnp.concatenate([w3, params["after_b"].reshape(1, c3)], axis=0)
    w3 = w3.astype(jnp.bfloat16)                                  # (9*c1+1, c3)
    fcw = params["fc_w"].T.astype(jnp.float32)                    # (c3, nc)
    fcb = params["fc_b"].reshape(1, nc).astype(jnp.float32)

    vmem = pl.BlockSpec(memory_space=pltpu.MemorySpace.VMEM)
    kernel = functools.partial(_sewn_fused_kernel, n=n, h=h, w=w,
                               rpi=rpi, margin=margin)

    # Single pallas_call, grid=(): every activation lives in VMEM; only the
    # (n, nc) logits touch HBM.
    return pl.pallas_call(
        kernel,
        out_shape=jax.ShapeDtypeStruct((n, nc), jnp.float32),
        in_specs=[vmem] * 8,
        out_specs=vmem,
        scratch_shapes=[pltpu.VMEM((r + 2 * margin, c1), jnp.bfloat16)],
    )(x_cols, mask, w1, w2, b2, w3, fcw, fcb)


# ----------------------------------------------------------------------------
# SewnConvNet parameters + channel checks (mirrors the PyTorch module)
# ----------------------------------------------------------------------------
def _init_conv(key, cout, cin, kh, kw):
    k1, k2 = jax.random.split(key)
    bound = 1.0 / math.sqrt(cin * kh * kw)
    wgt = jax.random.uniform(k1, (cout, cin, kh, kw), jnp.float32, -bound, bound)
    b = jax.random.uniform(k2, (cout,), jnp.float32, -bound, bound)
    return wgt, b


def _init_linear(key, out_f, in_f):
    k1, k2 = jax.random.split(key)
    bound = 1.0 / math.sqrt(in_f)
    wgt = jax.random.uniform(k1, (out_f, in_f), jnp.float32, -bound, bound)
    b = jax.random.uniform(k2, (out_f,), jnp.float32, -bound, bound)
    return wgt, b


def init_sewn_params(key):
    ks = jax.random.split(key, 4)
    before_w, before_b = _init_conv(ks[0], 8, 4, 3, 3)       # net_before conv
    conn_w, conn_b = _init_conv(ks[1], 8, 8, 1, 1)           # connector 1x1 conv
    after_w, after_b = _init_conv(ks[2], 16, 8, 3, 3)        # net_after conv
    fc_w, fc_b = _init_linear(ks[3], 10, 16)                 # net_after classifier
    return dict(before_w=before_w, before_b=before_b,
                conn_w=conn_w, conn_b=conn_b,
                after_w=after_w, after_b=after_b,
                fc_w=fc_w, fc_b=fc_b)


def assert_channels(params):
    """Reproduces SewnConvNet._assert_channels (check_channels=True)."""
    before_out = params["before_w"].shape[0]
    connector_in = params["conn_w"].shape[1]
    if before_out != connector_in:
        raise ValueError("Connector has {} input channels, expected {}.".format(
            connector_in, before_out))
    connector_out = params["conn_w"].shape[0]
    after_in = params["after_w"].shape[1]
    if after_in != connector_out:
        raise ValueError("Connector has {} output channels, expected {}.".format(
            connector_out, after_in))


# ----------------------------------------------------------------------------
# Plain-JAX f32 reference (correctness check only)
# ----------------------------------------------------------------------------
def _ref_conv(x, wgt, b, pad):
    out = jax.lax.conv_general_dilated(
        x, wgt, window_strides=(1, 1), padding=[(pad, pad), (pad, pad)],
        dimension_numbers=("NCHW", "OIHW", "NCHW"))
    return jnp.maximum(out + b.reshape(1, -1, 1, 1), 0.0)


def sewn_convnet_reference(params, x):
    x = _ref_conv(x, params["before_w"], params["before_b"], 1)
    x = _ref_conv(x, params["conn_w"], params["conn_b"], 0)
    x = _ref_conv(x, params["after_w"], params["after_b"], 1)
    pooled = jnp.mean(x, axis=(2, 3))
    return pooled @ params["fc_w"].T + params["fc_b"]


if __name__ == "__main__":
    key = jax.random.PRNGKey(0)
    pkey, xkey = jax.random.split(key)
    params = init_sewn_params(pkey)
    assert_channels(params)  # check_channels=True behavior

    x = jax.random.normal(xkey, (2, 4, 16, 16), jnp.float32)  # NCHW

    out = jax.jit(sewn_convnet_forward)(params, x)
    out = jax.block_until_ready(out)

    ref = sewn_convnet_reference(params, x)
    # Tolerance loosened: MXU operands (activations, conv weights, folded
    # biases) are bf16 with f32 accumulation, while the reference is pure f32.
    np.testing.assert_allclose(np.asarray(out), np.asarray(ref),
                               rtol=5e-2, atol=5e-2)
    print("KERNEL_OK")
</pallas_src>

<mosaic_0001>
module attributes {stable_mosaic.version = 11 : i64} {
  func.func @_sewn_fused_kernel(%arg0: memref<656x37xbf16, #tpu.memory_space<vmem>>, %arg1: memref<656x1xf32, #tpu.memory_space<vmem>>, %arg2: memref<37x8xbf16, #tpu.memory_space<vmem>>, %arg3: memref<8x8xbf16, #tpu.memory_space<vmem>>, %arg4: memref<1x8xf32, #tpu.memory_space<vmem>>, %arg5: memref<73x16xbf16, #tpu.memory_space<vmem>>, %arg6: memref<16x10xf32, #tpu.memory_space<vmem>>, %arg7: memref<1x10xf32, #tpu.memory_space<vmem>>, %arg8: memref<2x10xf32, #tpu.memory_space<vmem>>, %arg9: memref<720x8xbf16, #tpu.memory_space<vmem>>) attributes {dimension_semantics = [], scalar_prefetch = 0 : i64, scratch_operands = 1 : i64, tpu.core_type = #tpu.core_type<tc>} {
    %c0 = arith.constant 0 : index
    %c0_0 = arith.constant 0 : index
    %0 = vector.load %arg1[%c0, %c0_0] : memref<656x1xf32, #tpu.memory_space<vmem>>, vector<656x1xf32>
    %c0_1 = arith.constant 0 : index
    %c0_2 = arith.constant 0 : index
    %1 = vector.load %arg0[%c0_1, %c0_2] : memref<656x37xbf16, #tpu.memory_space<vmem>>, vector<656x37xbf16>
    %c0_3 = arith.constant 0 : index
    %c0_4 = arith.constant 0 : index
    %2 = vector.load %arg2[%c0_3, %c0_4] : memref<37x8xbf16, #tpu.memory_space<vmem>>, vector<37x8xbf16>
    %cst = arith.constant dense<0.000000e+00> : vector<656x8xf32>
    %3 = tpu.matmul %1, %2, %cst {dimension_numbers = #tpu.dot_dimension_numbers<[1], [0], [0], [1], [0, 0, 1, 1], [], []>} : vector<656x37xbf16>, vector<37x8xbf16>, vector<656x8xf32> -> vector<656x8xf32>
    %cst_5 = arith.constant 0.000000e+00 : f32
    %4 = vector.broadcast %cst_5 : f32 to vector<656x8xf32>
    %5 = arith.maximumf %3, %4 : vector<656x8xf32>
    %6 = arith.truncf %5 : vector<656x8xf32> to vector<656x8xbf16>
    %c0_6 = arith.constant 0 : index
    %c0_7 = arith.constant 0 : index
    %7 = vector.load %arg3[%c0_6, %c0_7] : memref<8x8xbf16, #tpu.memory_space<vmem>>, vector<8x8xbf16>
    %cst_8 = arith.constant dense<0.000000e+00> : vector<656x8xf32>
    %8 = tpu.matmul %6, %7, %cst_8 {dimension_numbers = #tpu.dot_dimension_numbers<[1], [0], [0], [1], [0, 0, 1, 1], [], []>} : vector<656x8xbf16>, vector<8x8xbf16>, vector<656x8xf32> -> vector<656x8xf32>
    %c0_9 = arith.constant 0 : index
    %c0_10 = arith.constant 0 : index
    %9 = vector.load %arg4[%c0_9, %c0_10] : memref<1x8xf32, #tpu.memory_space<vmem>>, vector<1x8xf32>
    %10 = vector.broadcast %9 : vector<1x8xf32> to vector<656x8xf32>
    %11 = arith.addf %8, %10 : vector<656x8xf32>
    %cst_11 = arith.constant 0.000000e+00 : f32
    %12 = vector.broadcast %cst_11 : f32 to vector<656x8xf32>
    %13 = arith.maximumf %11, %12 : vector<656x8xf32>
    %14 = vector.broadcast %0 : vector<656x1xf32> to vector<656x8xf32>
    %15 = arith.mulf %13, %14 : vector<656x8xf32>
    %16 = arith.truncf %15 : vector<656x8xf32> to vector<656x8xbf16>
    %cst_12 = arith.constant 0.000000e+00 : bf16
    %17 = vector.broadcast %cst_12 : bf16 to vector<32x8xbf16>
    %c0_13 = arith.constant 0 : index
    %c0_14 = arith.constant 0 : index
    %18 = vector.load %arg9[%c0_13, %c0_14] : memref<720x8xbf16, #tpu.memory_space<vmem>>, vector<32x8xbf16>
    tpu.vector_store %arg9[%c0_13, %c0_14], %17 {strides = array<i32>} : memref<720x8xbf16, #tpu.memory_space<vmem>>, vector<32x8xbf16>,
    %cst_15 = arith.constant 0.000000e+00 : bf16
    %19 = vector.broadcast %cst_15 : bf16 to vector<32x8xbf16>
    %c688 = arith.constant 688 : index
    %c0_16 = arith.constant 0 : index
    %20 = vector.load %arg9[%c688, %c0_16] : memref<720x8xbf16, #tpu.memory_space<vmem>>, vector<32x8xbf16>
    tpu.vector_store %arg9[%c688, %c0_16], %19 {strides = array<i32>} : memref<720x8xbf16, #tpu.memory_space<vmem>>, vector<32x8xbf16>,
    %c32 = arith.constant 32 : index
    %c0_17 = arith.constant 0 : index
    %21 = vector.load %arg9[%c32, %c0_17] : memref<720x8xbf16, #tpu.memory_space<vmem>>, vector<656x8xbf16>
    tpu.vector_store %arg9[%c32, %c0_17], %16 {strides = array<i32>} : memref<720x8xbf16, #tpu.memory_space<vmem>>, vector<656x8xbf16>,
    %c13 = arith.constant 13 : index
    %c0_18 = arith.constant 0 : index
    %22 = vector.load %arg9[%c13, %c0_18] : memref<720x8xbf16, #tpu.memory_space<vmem>>, vector<656x8xbf16>
    %c14 = arith.constant 14 : index
    %c0_19 = arith.constant 0 : index
    %23 = vector.load %arg9[%c14, %c0_19] : memref<720x8xbf16, #tpu.memory_space<vmem>>, vector<656x8xbf16>
    %c15 = arith.constant 15 : index
    %c0_20 = arith.constant 0 : index
    %24 = vector.load %arg9[%c15, %c0_20] : memref<720x8xbf16, #tpu.memory_space<vmem>>, vector<656x8xbf16>
    %c31 = arith.constant 31 : index
    %c0_21 = arith.constant 0 : index
    %25 = vector.load %arg9[%c31, %c0_21] : memref<720x8xbf16, #tpu.memory_space<vmem>>, vector<656x8xbf16>
    %c32_22 = arith.constant 32 : index
    %c0_23 = arith.constant 0 : index
    %26 = vector.load %arg9[%c32_22, %c0_23] : memref<720x8xbf16, #tpu.memory_space<vmem>>, vector<656x8xbf16>
    %c33 = arith.constant 33 : index
    %c0_24 = arith.constant 0 : index
    %27 = vector.load %arg9[%c33, %c0_24] : memref<720x8xbf16, #tpu.memory_space<vmem>>, vector<656x8xbf16>
    %c49 = arith.constant 49 : index
    %c0_25 = arith.constant 0 : index
    %28 = vector.load %arg9[%c49, %c0_25] : memref<720x8xbf16, #tpu.memory_space<vmem>>, vector<656x8xbf16>
    %c50 = arith.constant 50 : index
    %c0_26 = arith.constant 0 : index
    %29 = vector.load %arg9[%c50, %c0_26] : memref<720x8xbf16, #tpu.memory_space<vmem>>, vector<656x8xbf16>
    %c51 = arith.constant 51 : index
    %c0_27 = arith.constant 0 : index
    %30 = vector.load %arg9[%c51, %c0_27] : memref<720x8xbf16, #tpu.memory_space<vmem>>, vector<656x8xbf16>
    %cst_28 = arith.constant 1.000000e+00 : bf16
    %31 = vector.broadcast %cst_28 : bf16 to vector<656x1xbf16>
    %32 = tpu.concatenate %22, %23, %24, %25, %26, %27, %28, %29, %30, %31 in 1 : vector<656x8xbf16>, vector<656x8xbf16>, vector<656x8xbf16>, vector<656x8xbf16>, vector<656x8xbf16>, vector<656x8xbf16>, vector<656x8xbf16>, vector<656x8xbf16>, vector<656x8xbf16>, vector<656x1xbf16> -> vector<656x73xbf16>
    %c0_29 = arith.constant 0 : index
    %c0_30 = arith.constant 0 : index
    %33 = vector.load %arg5[%c0_29, %c0_30] : memref<73x16xbf16, #tpu.memory_space<vmem>>, vector<73x16xbf16>
    %cst_31 = arith.constant dense<0.000000e+00> : vector<656x16xf32>
    %34 = tpu.matmul %32, %33, %cst_31 {dimension_numbers = #tpu.dot_dimension_numbers<[1], [0], [0], [1], [0, 0, 1, 1], [], []>} : vector<656x73xbf16>, vector<73x16xbf16>, vector<656x16xf32> -> vector<656x16xf32>
    %cst_32 = arith.constant 0.000000e+00 : f32
    %35 = vector.broadcast %cst_32 : f32 to vector<656x16xf32>
    %36 = arith.maximumf %34, %35 : vector<656x16xf32>
    %37 = vector.broadcast %0 : vector<656x1xf32> to vector<656x16xf32>
    %38 = arith.mulf %36, %37 : vector<656x16xf32>
    %39 = vector.extract_strided_slice %38 {offsets = [0, 0], sizes = [328, 16], strides = [1, 1]} : vector<656x16xf32> to vector<328x16xf32>
    %cst_33 = arith.constant dense<0.000000e+00> : vector<16xf32>
    %40 = vector.multi_reduction <add>, %39, %cst_33 [0] : vector<328x16xf32> to vector<16xf32>
    %41 = vector.shape_cast %40 : vector<16xf32> to vector<1x16xf32>
    %42 = vector.extract_strided_slice %38 {offsets = [328, 0], sizes = [328, 16], strides = [1, 1]} : vector<656x16xf32> to vector<328x16xf32>
    %cst_34 = arith.constant dense<0.000000e+00> : vector<16xf32>
    %43 = vector.multi_reduction <add>, %42, %cst_34 [0] : vector<328x16xf32> to vector<16xf32>
    %44 = vector.shape_cast %43 : vector<16xf32> to vector<1x16xf32>
    %45 = tpu.concatenate %41, %44 in 0 : vector<1x16xf32>, vector<1x16xf32> -> vector<2x16xf32>
    %cst_35 = arith.constant 3.906250e-03 : f32
    %46 = vector.broadcast %cst_35 : f32 to vector<2x16xf32>
    %47 = arith.mulf %45, %46 : vector<2x16xf32>
    %c0_36 = arith.constant 0 : index
    %c0_37 = arith.constant 0 : index
    %48 = vector.load %arg6[%c0_36, %c0_37] : memref<16x10xf32, #tpu.memory_space<vmem>>, vector<16x10xf32>
    %cst_38 = arith.constant dense<0.000000e+00> : vector<2x10xf32>
    %49 = tpu.matmul %47, %48, %cst_38 {dimension_numbers = #tpu.dot_dimension_numbers<[1], [0], [0], [1], [0, 0, 1, 1], [], []>} : vector<2x16xf32>, vector<16x10xf32>, vector<2x10xf32> -> vector<2x10xf32>
    %c0_39 = arith.constant 0 : index
    %c0_40 = arith.constant 0 : index
    %50 = vector.load %arg7[%c0_39, %c0_40] : memref<1x10xf32, #tpu.memory_space<vmem>>, vector<1x10xf32>
    %51 = vector.broadcast %50 : vector<1x10xf32> to vector<2x10xf32>
    %52 = arith.addf %49, %51 : vector<2x10xf32>
    %c0_41 = arith.constant 0 : index
    %c0_42 = arith.constant 0 : index
    %53 = vector.load %arg8[%c0_41, %c0_42] : memref<2x10xf32, #tpu.memory_space<vmem>>, vector<2x10xf32>
    tpu.vector_store %arg8[%c0_41, %c0_42], %52 {strides = array<i32>} : memref<2x10xf32, #tpu.memory_space<vmem>>, vector<2x10xf32>,
    return
  }
}

</mosaic_0001>

<bundles_post_ra>
// kernel: tile.8
= control target key start
LH: loop header
LB: loop body
LE: loop exit
PB: predicated region body
PF: predicated region fallthrough
CT: control target
= control target key end

     0   :  { %s46_s0 = inlined_call_operand.vmem [shape: f32[328], index: 0, kind: input, shape index: {}]   ;;  %s47_s1 = inlined_call_operand.vmem [shape: f32[2,1,1,328], index: 1, kind: output, shape index: {}]  }
   0x1   :  { %v4_v0 = vld [vmem:[%s46_s0] ss:$0 sm:$0xff]  ;;  %v14_v1 = vld [vmem:[%s46_s0 + $0x1] ss:$0 sm:$0xff]  ;;  %v16_v2 = vld [vmem:[%s46_s0 + $0x2] ss:$0 sm:$0xff] }
   0x2   :  { %5 = vst [vmem:[%s47_s1] sm:$0x3] %v4_v0  ;;  %15 = vst [vmem:[%s47_s1 + $0x2] sm:$0x3] %v14_v1 }
   0x3   :  { %17 = vst [vmem:[%s47_s1 + $0x4] sm:$0x3] %v16_v2 }

// kernel: tile.0
= control target key start
LH: loop header
LB: loop body
LE: loop exit
PB: predicated region body
PF: predicated region fallthrough
CT: control target
= control target key end

     0   :  { %vm31_vm0 = vcmask 1045508   ;;  %s1944_s12 = smov 125   ;;  %s1945_s13 = smov 126   ;;  %vm16_vm1 = vcmask 7168   ;;  %s3597_s0 = inlined_call_operand.vmem [shape: f32[2,1,1,328], index: 0, kind: input, shape index: {}]   ;;  %s3598_s1 = inlined_call_operand.vmem [shape: f32[656,1], index: 1, kind: output, shape index: {}]  }
   0x1   :  { %v1487_v0 = vld [vmem:[%s3597_s0 + $0x4] sm:$0x3]  ;;  %v1488_v1 = vld [vmem:[%s3597_s0 + $0x2] sm:$0x3]  ;;  %v13_v2 = vld [vmem:[%s3597_s0] sm:$0x3] }
   0x2   :  { %8 = vst [vmem:[#allocation0 + $0x10] sm:$0x3] %v1487_v0  ;;  %12 = vst [vmem:[#allocation0 + $0x8] sm:$0x3] %v1488_v1  ;;  %s1943_s0 = smov 127   ;;  %s1946_s14 = smov 124  }
   0x3   :  { %14 = vst [vmem:[#allocation0] sm:$0x3] %v13_v2  ;;  %s1947_s15 = smov 123   ;;  %s1948_s16 = smov 122  }
   0x4   :  { %s1949_s17 = smov 121   ;;  %s1950_s18 = smov 120  }
   0x5   :  { %s1951_s19 = smov 119   ;;  %s1952_s20 = smov 118  }
   0x6   :  { %s1953_s21 = smov 117   ;;  %s1954_s22 = smov 116  }
   0x7   :  { %s1955_s23 = smov 115   ;;  %s1956_s24 = smov 114  }
   0x8   :  { %s1957_s25 = smov 113   ;;  %s1958_s26 = smov 112  }
   0x9   :  { %v30_v4 = vld [vmem:[#allocation0 + $0xc] sm:$0x30]   ;;  %s1959_s27 = smov 111   ;;  %s1960_s28 = smov 110  }
   0xa   :  { %v2089_v3 = vld.sshfl [vmem:[#allocation0] sm:$0xff pattern:$0x99999810]   ;;  %v58_v6 = vld [vmem:[#allocation0 + $0xc] sm:$0x30]   ;;  %s1961_s29 = smov 109  }
   0xb   :  { %v32_v5 = vsel %vm31_vm0, %v30_v4, %v2089_v3  ;;  %v44_v7 = vld [vmem:[#allocation0 + $0xc] sm:$0x30]   ;;  %v60_v9 = vsel %vm31_vm0, %v58_v6, %v2089_v3  ;;  %s352_s30 = smov 48  ;;  %s1962_s2 = smov 108  }
   0xc   :  { %v72_v8 = vld [vmem:[#allocation0 + $0xc] sm:$0x30]   ;;  %33 = vrot.lane.b32.xlu0 %v32_v5, %s1943_s0  ;;  %61 = vrot.lane.b32.xlu1 %v60_v9, %s1944_s12  ;;  %v46_v10 = vsel %vm31_vm0, %v44_v7, %v2089_v3  ;;  %v2135_v49 = vld.sshfl [vmem:[#allocation0] sm:$0xff pattern:$0x88888901]   ;;  %s367_s3 = smov 48 }
   0xd   :  { %v74_v11 = vsel %vm31_vm0, %v72_v8, %v2089_v3  ;;  %v86_v12 = vld [vmem:[#allocation0 + $0xc] sm:$0x30]   ;;  %s1963_s4 = smov 107   ;;  %s382_s5 = smov 48 }
   0xe   :  { %v100_v13 = vld [vmem:[#allocation0 + $0xc] sm:$0x30]   ;;  %v88_v14 = vsel %vm31_vm0, %v86_v12, %v2089_v3  ;;  %s1964_s6 = smov 106   ;;  %s397_s7 = smov 48 }
   0xf   :  { %v102_v15 = vsel %vm31_vm0, %v100_v13, %v2089_v3  ;;  %v114_v16 = vld [vmem:[#allocation0 + $0xc] sm:$0x30]   ;;  %s1965_s8 = smov 105   ;;  %s412_s9 = smov 48 }
  0x10   :  { %47 = vrot.lane.b32.xlu0 %v46_v10, %s1945_s13  ;;  %75 = vrot.lane.b32.xlu1 %v74_v11, %s1946_s14  ;;  %v128_v17 = vld [vmem:[#allocation0 + $0xc] sm:$0x30]   ;;  %v116_v18 = vsel %vm31_vm0, %v114_v16, %v2089_v3  ;;  %s1966_s10 = smov 104   ;;  %s427_s11 = smov 48 }
  0x11   :  { %v130_v19 = vsel %vm31_vm0, %v128_v17, %v2089_v3  ;;  %v142_v20 = vld [vmem:[#allocation0 + $0xc] sm:$0x30]   ;;  %s1967_s0 = smov 103   ;;  %s442_s12 = smov 48 }
  0x12   :  { %v156_v21 = vld [vmem:[#allocation0 + $0xc] sm:$0x30]   ;;  %v144_v22 = vsel %vm31_vm0, %v142_v20, %v2089_v3  ;;  %s1968_s13 = smov 102   ;;  %s457_s14 = smov 48 }
  0x13   :  { %v158_v23 = vsel %vm31_vm0, %v156_v21, %v2089_v3  ;;  %v170_v24 = vld [vmem:[#allocation0 + $0xc] sm:$0x30]  }
  0x14   :  { %89 = vrot.lane.b32.xlu0 %v88_v14, %s1947_s15  ;;  %103 = vrot.lane.b32.xlu1 %v102_v15, %s1948_s16  ;;  %v184_v25 = vld [vmem:[#allocation0 + $0xc] sm:$0x30]   ;;  %v172_v26 = vsel %vm31_vm0, %v170_v24, %v2089_v3  ;;  %s1969_s15 = smov 101   ;;  %s1970_s16 = smov 100  }
  0x15   :  { %v186_v27 = vsel %vm31_vm0, %v184_v25, %v2089_v3  ;;  %v198_v28 = vld [vmem:[#allocation0 + $0xc] sm:$0x30]  }
  0x16   :  { %v212_v29 = vld [vmem:[#allocation0 + $0xc] sm:$0x30]   ;;  %v200_v30 = vsel %vm31_vm0, %v198_v28, %v2089_v3 }
  0x17   :  { %v214_v31 = vsel %vm31_vm0, %v212_v29, %v2089_v3  ;;  %v226_v32 = vld [vmem:[#allocation0 + $0xc] sm:$0x30]  }
  0x18   :  { %117 = vrot.lane.b32.xlu0 %v116_v18, %s1949_s17  ;;  %131 = vrot.lane.b32.xlu1 %v130_v19, %s1950_s18  ;;  %v240_v33 = vld [vmem:[#allocation0 + $0xc] sm:$0x30]   ;;  %v228_v34 = vsel %vm31_vm0, %v226_v32, %v2089_v3  ;;  %s1971_s17 = smov 99   ;;  %s1972_s18 = smov 98  }
  0x19   :  { %v242_v35 = vsel %vm31_vm0, %v240_v33, %v2089_v3  ;;  %v254_v36 = vld [vmem:[#allocation0 + $0xc] sm:$0x30]  }
  0x1a   :  { %v268_v37 = vld [vmem:[#allocation0 + $0xc] sm:$0x30]   ;;  %v256_v38 = vsel %vm31_vm0, %v254_v36, %v2089_v3 }
  0x1b   :  { %v270_v39 = vsel %vm31_vm0, %v268_v37, %v2089_v3  ;;  %v282_v40 = vld [vmem:[#allocation0 + $0xc] sm:$0x30]  }
  0x1c   :  { %145 = vrot.lane.b32.xlu0 %v144_v22, %s1951_s19  ;;  %159 = vrot.lane.b32.xlu1 %v158_v23, %s1952_s20  ;;  %v296_v41 = vld [vmem:[#allocation0 + $0xc] sm:$0x30]   ;;  %v284_v42 = vsel %vm31_vm0, %v282_v40, %v2089_v3  ;;  %s1973_s19 = smov 97   ;;  %s1974_s20 = smov 96  }
  0x1d   :  { %v298_v43 = vsel %vm31_vm0, %v296_v41, %v2089_v3  ;;  %v310_v44 = vld [vmem:[#allocation0 + $0xc] sm:$0x30]  }
  0x1e   :  { %v324_v45 = vld [vmem:[#allocation0 + $0xc] sm:$0x30]   ;;  %v312_v46 = vsel %vm31_vm0, %v310_v44, %v2089_v3 }
  0x1f   :  { %v326_v47 = vsel %vm31_vm0, %v324_v45, %v2089_v3  ;;  %v338_v48 = vld [vmem:[#allocation0 + $0xc] sm:$0x30]  }
  0x20   :  { %173 = vrot.lane.b32.xlu0 %v172_v26, %s1953_s21  ;;  %187 = vrot.lane.b32.xlu1 %v186_v27, %s1954_s22  ;;  %v353_v50 = vld [vmem:[#allocation0 + $0x15] ss:$-1 sm:%s352_s30]   ;;  %v340_v51 = vsel %vm31_vm0, %v338_v48, %v2089_v3  ;;  %s1975_s21 = smov 95   ;;  %s1976_s22 = smov 94  }
  0x21   :  { %v355_v52 = vsel %vm31_vm0, %v353_v50, %v2135_v49  ;;  %v368_v53 = vld [vmem:[#allocation0 + $0x15] ss:$-1 sm:%s367_s3]   ;;  %s1984_s30 = smov 86   ;;  %s1986_s3 = smov 84  }
  0x22   :  { %v383_v54 = vld [vmem:[#allocation0 + $0x15] ss:$-1 sm:%s382_s5]   ;;  %v370_v55 = vsel %vm31_vm0, %v368_v53, %v2135_v49  ;;  %s1988_s5 = smov 82  }
  0x23   :  { %v385_v56 = vsel %vm31_vm0, %v383_v54, %v2135_v49  ;;  %v398_v57 = vld [vmem:[#allocation0 + $0x15] ss:$-1 sm:%s397_s7]   ;;  %s1990_s7 = smov 80  }
  0x24   :  { %201 = vrot.lane.b32.xlu0 %v200_v30, %s1955_s23  ;;  %215 = vrot.lane.b32.xlu1 %v214_v31, %s1956_s24  ;;  %v413_v58 = vld [vmem:[#allocation0 + $0x15] ss:$-1 sm:%s412_s9]   ;;  %v400_v59 = vsel %vm31_vm0, %v398_v57, %v2135_v49  ;;  %s1977_s23 = smov 93   ;;  %s1978_s24 = smov 92  }
  0x25   :  { %v415_v60 = vsel %vm31_vm0, %v413_v58, %v2135_v49  ;;  %v428_v61 = vld [vmem:[#allocation0 + $0x15] ss:$-1 sm:%s427_s11]   ;;  %s1992_s9 = smov 78   ;;  %s808_s11 = smov 48 }
  0x26   :  { %v443_v62 = vld [vmem:[#allocation0 + $0x15] ss:$-1 sm:%s442_s12]   ;;  %v430_v63 = vsel %vm31_vm0, %v428_v61, %v2135_v49  ;;  %s823_s12 = smov 48 }
  0x27   :  { %v445_v0 = vsel %vm31_vm0, %v443_v62, %v2135_v49  ;;  %v458_v1 = vld [vmem:[#allocation0 + $0x15] ss:$-1 sm:%s457_s14]   ;;  %s838_s14 = smov 48 }
  0x28   :  { %229 = vrot.lane.b32.xlu0 %v228_v34, %s1957_s25  ;;  %243 = vrot.lane.b32.xlu1 %v242_v35, %s1958_s26  ;;  %v472_v2 = vld [vmem:[#allocation0 + $0xc] sm:$0x30]   ;;  %v460_v4 = vsel %vm31_vm0, %v458_v1, %v2135_v49  ;;  %s1979_s25 = smov 91   ;;  %s1980_s26 = smov 90  }
  0x29   :  { %v474_v5 = vsel %vm31_vm0, %v472_v2, %v2089_v3  ;;  %v486_v6 = vld [vmem:[#allocation0 + $0xc] sm:$0x30]  }
  0x2a   :  { %v500_v7 = vld [vmem:[#allocation0 + $0xc] sm:$0x30]   ;;  %v488_v8 = vsel %vm31_vm0, %v486_v6, %v2089_v3 }
  0x2b   :  { %v502_v9 = vsel %vm31_vm0, %v500_v7, %v2089_v3  ;;  %v514_v10 = vld [vmem:[#allocation0 + $0xc] sm:$0x30]  }
  0x2c   :  { %257 = vrot.lane.b32.xlu0 %v256_v38, %s1959_s27  ;;  %271 = vrot.lane.b32.xlu1 %v270_v39, %s1960_s28  ;;  %v528_v11 = vld [vmem:[#allocation0 + $0xc] sm:$0x30]   ;;  %v516_v12 = vsel %vm31_vm0, %v514_v10, %v2089_v3  ;;  %s1981_s27 = smov 89   ;;  %s1982_s28 = smov 88  }
  0x2d   :  { %v530_v13 = vsel %vm31_vm0, %v528_v11, %v2089_v3  ;;  %v542_v14 = vld [vmem:[#allocation0 + $0xc] sm:$0x30]  }
  0x2e   :  { %v556_v15 = vld [vmem:[#allocation0 + $0xc] sm:$0x30]   ;;  %v544_v16 = vsel %vm31_vm0, %v542_v14, %v2089_v3 }
  0x2f   :  { %v558_v17 = vsel %vm31_vm0, %v556_v15, %v2089_v3  ;;  %v570_v18 = vld [vmem:[#allocation0 + $0xc] sm:$0x30]  }
  0x30   :  { %285 = vrot.lane.b32.xlu0 %v284_v42, %s1961_s29  ;;  %299 = vrot.lane.b32.xlu1 %v298_v43, %s1962_s2  ;;  %v584_v19 = vld [vmem:[#allocation0 + $0xc] sm:$0x30]   ;;  %v572_v20 = vsel %vm31_vm0, %v570_v18, %v2089_v3  ;;  %s1983_s29 = smov 87   ;;  %s1985_s2 = smov 85  }
  0x31   :  { %v586_v21 = vsel %vm31_vm0, %v584_v19, %v2089_v3  ;;  %v598_v22 = vld [vmem:[#allocation0 + $0xc] sm:$0x30]  }
  0x32   :  { %v612_v23 = vld [vmem:[#allocation0 + $0xc] sm:$0x30]   ;;  %v600_v24 = vsel %vm31_vm0, %v598_v22, %v2089_v3 }
  0x33   :  { %v614_v25 = vsel %vm31_vm0, %v612_v23, %v2089_v3  ;;  %v626_v26 = vld [vmem:[#allocation0 + $0xc] sm:$0x30]  }
  0x34   :  { %313 = vrot.lane.b32.xlu0 %v312_v46, %s1963_s4  ;;  %327 = vrot.lane.b32.xlu1 %v326_v47, %s1964_s6  ;;  %v640_v27 = vld [vmem:[#allocation0 + $0xc] sm:$0x30]   ;;  %v628_v28 = vsel %vm31_vm0, %v626_v26, %v2089_v3  ;;  %s1987_s4 = smov 83   ;;  %s1989_s6 = smov 81  }
  0x35   :  { %v642_v29 = vsel %vm31_vm0, %v640_v27, %v2089_v3  ;;  %v654_v30 = vld [vmem:[#allocation0 + $0xc] sm:$0x30]  }
  0x36   :  { %v668_v31 = vld [vmem:[#allocation0 + $0xc] sm:$0x30]   ;;  %v656_v32 = vsel %vm31_vm0, %v654_v30, %v2089_v3 }
  0x37   :  { %v670_v33 = vsel %vm31_vm0, %v668_v31, %v2089_v3  ;;  %v682_v34 = vld [vmem:[#allocation0 + $0xc] sm:$0x30]  }
  0x38   :  { %341 = vrot.lane.b32.xlu0 %v340_v51, %s1965_s8  ;;  %356 = vrot.lane.b32.xlu1 %v355_v52, %s1966_s10  ;;  %v696_v35 = vld [vmem:[#allocation0 + $0xc] sm:$0x30]   ;;  %v684_v36 = vsel %vm31_vm0, %v682_v34, %v2089_v3  ;;  %s1991_s8 = smov 79   ;;  %s1993_s10 = smov 77  }
  0x39   :  { %v698_v37 = vsel %vm31_vm0, %v696_v35, %v2089_v3  ;;  %v710_v38 = vld [vmem:[#allocation0 + $0xc] sm:$0x30]  }
  0x3a   :  { %v724_v39 = vld [vmem:[#allocation0 + $0xc] sm:$0x30]   ;;  %v712_v40 = vsel %vm31_vm0, %v710_v38, %v2089_v3 }
  0x3b   :  { %v726_v41 = vsel %vm31_vm0, %v724_v39, %v2089_v3  ;;  %v738_v42 = vld [vmem:[#allocation0 + $0xc] sm:$0x30]  }
  0x3c   :  { %371 = vrot.lane.b32.xlu0 %v370_v55, %s1967_s0  ;;  %386 = vrot.lane.b32.xlu1 %v385_v56, %s1968_s13  ;;  %v752_v43 = vld [vmem:[#allocation0 + $0xc] sm:$0x30]   ;;  %v740_v44 = vsel %vm31_vm0, %v738_v42, %v2089_v3  ;;  %s1994_s0 = smov 76   ;;  %s1995_s13 = smov 75  }
  0x3d   :  { %v754_v45 = vsel %vm31_vm0, %v752_v43, %v2089_v3  ;;  %v766_v46 = vld [vmem:[#allocation0 + $0xc] sm:$0x30]  }
  0x3e   :  { %v780_v47 = vld [vmem:[#allocation0 + $0xc] sm:$0x30]   ;;  %v768_v48 = vsel %vm31_vm0, %v766_v46, %v2089_v3 }
  0x3f   :  { %v782_v50 = vsel %vm31_vm0, %v780_v47, %v2089_v3  ;;  %v794_v51 = vld [vmem:[#allocation0 + $0xc] sm:$0x30]   ;;  %v2534_v47 = vld.sshfl [vmem:[#allocation0] sm:$0xff pattern:$0x99999810]  }
  0x40   :  { %401 = vrot.lane.b32.xlu0 %v400_v59, %s1969_s15  ;;  %416 = vrot.lane.b32.xlu1 %v415_v60, %s1970_s16  ;;  %v809_v52 = vld [vmem:[#allocation0 + $0x15] ss:$-1 sm:%s808_s11]   ;;  %s1996_s15 = smov 74   ;;  %v796_v53 = vsel %vm31_vm0, %v794_v51, %v2089_v3  ;;  %s853_s16 = smov 48 }
  0x41   :  { %v811_v54 = vsel %vm31_vm0, %v809_v52, %v2135_v49  ;;  %v824_v55 = vld [vmem:[#allocation0 + $0x15] ss:$-1 sm:%s823_s12]   ;;  %s2024_s12 = smov 46   ;;  %s2028_s11 = smov 42  }
  0x42   :  { %v839_v56 = vld [vmem:[#allocation0 + $0x15] ss:$-1 sm:%s838_s14]   ;;  %v826_v57 = vsel %vm31_vm0, %v824_v55, %v2135_v49  ;;  %s2020_s14 = smov 50  }
  0x43   :  { %v841_v58 = vsel %vm31_vm0, %v839_v56, %v2135_v49  ;;  %v854_v59 = vld [vmem:[#allocation0 + $0x15] ss:$-1 sm:%s853_s16]   ;;  %s2016_s16 = smov 54  }
  0x44   :  { %431 = vrot.lane.b32.xlu0 %v430_v63, %s1971_s17  ;;  %446 = vrot.lane.b32.xlu1 %v445_v0, %s1972_s18  ;;  %s1997_s17 = smov 73   ;;  %s868_s18 = smov 48  ;;  %v856_v61 = vsel %vm31_vm0, %v854_v59, %v2135_v49  ;;  %v956_v15 = vld [vmem:[#allocation0 + $0xc] sm:$0x30]  }
  0x45   :  { %v869_v60 = vld [vmem:[#allocation0 + $0x15] ss:$-1 sm:%s868_s18]   ;;  %v958_v18 = vsel %vm31_vm0, %v956_v15, %v2089_v3  ;;  %s2012_s18 = smov 58  }
  0x46   :  { %v871_v63 = vsel %vm31_vm0, %v869_v60, %v2135_v49  ;;  %v970_v19 = vld [vmem:[#allocation0 + $0xc] sm:$0x30]  }
  0x47   :  { %v972_v22 = vsel %vm31_vm0, %v970_v19, %v2089_v3  ;;  %v1012_v27 = vld [vmem:[#allocation0 + $0xc] sm:$0x30]  }
  0x48   :  { %461 = vrot.lane.b32.xlu0 %v460_v4, %s1973_s19  ;;  %475 = vrot.lane.b32.xlu1 %v474_v5, %s1974_s20  ;;  %s1998_s19 = smov 72   ;;  %s883_s20 = smov 48  ;;  %v1014_v30 = vsel %vm31_vm0, %v1012_v27, %v2089_v3  ;;  %v1026_v31 = vld [vmem:[#allocation0 + $0xc] sm:$0x30]  }
  0x49   :  { %v884_v0 = vld [vmem:[#allocation0 + $0x15] ss:$-1 sm:%s883_s20]   ;;  %s2008_s20 = smov 62  }
  0x4a   :  { %v886_v4 = vsel %vm31_vm0, %v884_v0, %v2135_v49 }
  0x4c   :  { %489 = vrot.lane.b32.xlu0 %v488_v8, %s1975_s21  ;;  %503 = vrot.lane.b32.xlu1 %v502_v9, %s1976_s22  ;;  %s1999_s21 = smov 71   ;;  %s898_s22 = smov 48  ;;  %v928_v9 = vld [vmem:[#allocation0 + $0xc] sm:$0x30]  }
  0x4d   :  { %v899_v2 = vld [vmem:[#allocation0 + $0x15] ss:$-1 sm:%s898_s22]   ;;  %s2004_s22 = smov 66  }
  0x4e   :  { %v901_v6 = vsel %vm31_vm0, %v899_v2, %v2135_v49 }
  0x50   :  { %517 = vrot.lane.b32.xlu0 %v516_v12, %s1977_s23  ;;  %531 = vrot.lane.b32.xlu1 %v530_v13, %s1978_s24  ;;  %s2000_s23 = smov 70   ;;  %v930_v12 = vsel %vm31_vm0, %v928_v9, %v2089_v3  ;;  %v942_v13 = vld [vmem:[#allocation0 + $0xc] sm:$0x30]   ;;  %s2030_s24 = smov 40  }
  0x54   :  { %545 = vrot.lane.b32.xlu0 %v544_v16, %s1979_s25  ;;  %559 = vrot.lane.b32.xlu1 %v558_v17, %s1980_s26  ;;  %v944_v16 = vsel %vm31_vm0, %v942_v13, %v2089_v3  ;;  %s2013_s25 = smov 57   ;;  %s2026_s26 = smov 44  }
  0x58   :  { %573 = vrot.lane.b32.xlu0 %v572_v20, %s1981_s27  ;;  %587 = vrot.lane.b32.xlu1 %v586_v21, %s1982_s28  ;;  %v984_v21 = vld [vmem:[#allocation0 + $0xc] sm:$0x30]   ;;  %s2009_s27 = smov 61   ;;  %s2022_s28 = smov 48  }
  0x5c   :  { %601 = vrot.lane.b32.xlu0 %v600_v24, %s1983_s29  ;;  %615 = vrot.lane.b32.xlu1 %v614_v25, %s1984_s30  ;;  %s913_s30 = smov 48  ;;  %s2005_s29 = smov 65   ;;  %v986_v24 = vsel %vm31_vm0, %v984_v21, %v2089_v3  ;;  %v998_v25 = vld [vmem:[#allocation0 + $0xc] sm:$0x30]  }
  0x5d   :  { %v914_v7 = vld [vmem:[#allocation0 + $0x15] ss:$-1 sm:%s913_s30]   ;;  %s2018_s30 = smov 52  }
  0x5e   :  { %v916_v10 = vsel %vm31_vm0, %v914_v7, %v2135_v49 }
  0x60   :  { %629 = vrot.lane.b32.xlu0 %v628_v28, %s1985_s2  ;;  %643 = vrot.lane.b32.xlu1 %v642_v29, %s1986_s3  ;;  %s2001_s2 = smov 69   ;;  %v1000_v28 = vsel %vm31_vm0, %v998_v25, %v2089_v3  ;;  %s2014_s3 = smov 56   ;;  %v24_v25 = vld [vmem:[#allocation0 + $0x10] sm:$0x3]  }
  0x61   :  { %1490 = vst.msk [vmem:[%s3598_s1 + $0x100] ss:$328 sm:$0x3] %vm16_vm1, %v24_v25  }
  0x64   :  { %657 = vrot.lane.b32.xlu0 %v656_v32, %s1987_s4  ;;  %671 = vrot.lane.b32.xlu1 %v670_v33, %s1988_s5  ;;  %s2010_s5 = smov 60   ;;  %v1028_v33 = vsel %vm31_vm0, %v1026_v31, %v2089_v3  ;;  %s2027_s4 = smov 43  }
  0x68   :  { %685 = vrot.lane.b32.xlu0 %v684_v36, %s1989_s6  ;;  %699 = vrot.lane.b32.xlu1 %v698_v37, %s1990_s7  ;;  %s2006_s7 = smov 64   ;;  %s2023_s6 = smov 47  }
  0x6c   :  { %713 = vrot.lane.b32.xlu0 %v712_v40, %s1991_s8  ;;  %727 = vrot.lane.b32.xlu1 %v726_v41, %s1992_s9  ;;  %s2002_s9 = smov 68   ;;  %s2019_s8 = smov 51  }
  0x70   :  { %741 = vrot.lane.b32.xlu0 %v740_v44, %s1993_s10  ;;  %755 = vrot.lane.b32.xlu1 %v754_v45, %s1994_s0  ;;  %s2011_s0 = smov 59   ;;  %s2015_s10 = smov 55  }
  0x74   :  { %769 = vrot.lane.b32.xlu0 %v768_v48, %s1995_s13  ;;  %783 = vrot.lane.b32.xlu1 %v782_v50, %s1996_s15  ;;  %s2003_s15 = smov 67   ;;  %s2007_s13 = smov 63  }
  0x78   :  { %797 = vrot.lane.b32.xlu0 %v796_v53, %s1997_s17  ;;  %812 = vrot.lane.b32.xlu1 %v811_v54, %s1998_s19  ;;  %s2025_s19 = smov 45   ;;  %s2029_s17 = smov 41  }
  0x7c   :  { %827 = vrot.lane.b32.xlu0 %v826_v57, %s1999_s21  ;;  %842 = vrot.lane.b32.xlu1 %v841_v58, %s2000_s23  ;;  %s2017_s23 = smov 53   ;;  %s2021_s21 = smov 49  }
  0x7e   :  { %v34_v62 = vpop.permute.xlu0 %33   ;;  %v62_v1 = vpop.permute.xlu1 %61  }
  0x7f   :  { %1491 = vst.msk [vmem:[%s3598_s1 + $0x1] ss:$328 sm:$0x3] %vm16_vm1, %v34_v62   ;;  %1492 = vst.msk [vmem:[%s3598_s1 - $0x20f] ss:$328 sm:$0xc] %vm16_vm1, %v34_v62  }
  0x80   :  { %1493 = vst.msk [vmem:[%s3598_s1 - $0x41f] ss:$328 sm:$0x30] %vm16_vm1, %v34_v62   ;;  %857 = vrot.lane.b32.xlu0 %v856_v61, %s2001_s2  ;;  %1497 = vst.msk [vmem:[%s3598_s1 + $0x3] ss:$328 sm:$0x3] %vm16_vm1, %v62_v1   ;;  %872 = vrot.lane.b32.xlu1 %v871_v63, %s2002_s9 }
  0x81   :  { %1498 = vst.msk [vmem:[%s3598_s1 - $0x20d] ss:$328 sm:$0xc] %vm16_vm1, %v62_v1   ;;  %1499 = vst.msk [vmem:[%s3598_s1 - $0x41d] ss:$328 sm:$0x30] %vm16_vm1, %v62_v1  }
  0x82   :  { %v48_v5 = vpop.permute.xlu0 %47   ;;  %v76_v8 = vpop.permute.xlu1 %75   ;;  %s2031_s2 = smov 39   ;;  %s2032_s9 = smov 38  }
  0x83   :  { %1494 = vst.msk [vmem:[%s3598_s1 + $0x2] ss:$328 sm:$0x3] %vm16_vm1, %v48_v5   ;;  %1495 = vst.msk [vmem:[%s3598_s1 - $0x20e] ss:$328 sm:$0xc] %vm16_vm1, %v48_v5  }
  0x84   :  { %1496 = vst.msk [vmem:[%s3598_s1 - $0x41e] ss:$328 sm:$0x30] %vm16_vm1, %v48_v5   ;;  %887 = vrot.lane.b32.xlu0 %v886_v4, %s2003_s15  ;;  %1500 = vst.msk [vmem:[%s3598_s1 + $0x4] ss:$328 sm:$0x3] %vm16_vm1, %v76_v8   ;;  %902 = vrot.lane.b32.xlu1 %v901_v6, %s2004_s22 }
  0x85   :  { %1501 = vst.msk [vmem:[%s3598_s1 - $0x20c] ss:$328 sm:$0xc] %vm16_vm1, %v76_v8   ;;  %1502 = vst.msk [vmem:[%s3598_s1 - $0x41c] ss:$328 sm:$0x30] %vm16_vm1, %v76_v8  }
  0x86   :  { %v90_v11 = vpop.permute.xlu0 %89   ;;  %v104_v14 = vpop.permute.xlu1 %103   ;;  %s2033_s15 = smov 37   ;;  %s2034_s22 = smov 36  }
  0x87   :  { %1503 = vst.msk [vmem:[%s3598_s1 + $0x5] ss:$328 sm:$0x3] %vm16_vm1, %v90_v11   ;;  %1504 = vst.msk [vmem:[%s3598_s1 - $0x20b] ss:$328 sm:$0xc] %vm16_vm1, %v90_v11  }
  0x88   :  { %1505 = vst.msk [vmem:[%s3598_s1 - $0x41b] ss:$328 sm:$0x30] %vm16_vm1, %v90_v11   ;;  %917 = vrot.lane.b32.xlu0 %v916_v10, %s2005_s29  ;;  %1506 = vst.msk [vmem:[%s3598_s1 + $0x6] ss:$328 sm:$0x3] %vm16_vm1, %v104_v14   ;;  %931 = vrot.lane.b32.xlu1 %v930_v12, %s2006_s7 }
  0x89   :  { %1507 = vst.msk [vmem:[%s3598_s1 - $0x20a] ss:$328 sm:$0xc] %vm16_vm1, %v104_v14   ;;  %1508 = vst.msk [vmem:[%s3598_s1 - $0x41a] ss:$328 sm:$0x30] %vm16_vm1, %v104_v14  }
  0x8a   :  { %v118_v17 = vpop.permute.xlu0 %117   ;;  %v132_v20 = vpop.permute.xlu1 %131   ;;  %s2035_s29 = smov 35   ;;  %s2036_s7 = smov 34  }
  0x8b   :  { %1509 = vst.msk [vmem:[%s3598_s1 + $0x7] ss:$328 sm:$0x3] %vm16_vm1, %v118_v17   ;;  %1510 = vst.msk [vmem:[%s3598_s1 - $0x209] ss:$328 sm:$0xc] %vm16_vm1, %v118_v17  }
  0x8c   :  { %1511 = vst.msk [vmem:[%s3598_s1 - $0x419] ss:$328 sm:$0x30] %vm16_vm1, %v118_v17   ;;  %945 = vrot.lane.b32.xlu0 %v944_v16, %s2007_s13  ;;  %1512 = vst.msk [vmem:[%s3598_s1 + $0x8] ss:$328 sm:$0x3] %vm16_vm1, %v132_v20   ;;  %959 = vrot.lane.b32.xlu1 %v958_v18, %s2008_s20 }
  0x8d   :  { %1513 = vst.msk [vmem:[%s3598_s1 - $0x208] ss:$328 sm:$0xc] %vm16_vm1, %v132_v20   ;;  %1514 = vst.msk [vmem:[%s3598_s1 - $0x418] ss:$328 sm:$0x30] %vm16_vm1, %v132_v20  }
  0x8e   :  { %v146_v23 = vpop.permute.xlu0 %145   ;;  %v160_v26 = vpop.permute.xlu1 %159   ;;  %s2037_s13 = smov 33   ;;  %s2038_s20 = smov 32   ;;  %v1422_v20 = vld.sshfl [vmem:[#allocation0] sm:$0xff pattern:$0x88888901]  }
  0x8f   :  { %1515 = vst.msk [vmem:[%s3598_s1 + $0x9] ss:$328 sm:$0x3] %vm16_vm1, %v146_v23   ;;  %1516 = vst.msk [vmem:[%s3598_s1 - $0x207] ss:$328 sm:$0xc] %vm16_vm1, %v146_v23  }
  0x90   :  { %1517 = vst.msk [vmem:[%s3598_s1 - $0x417] ss:$328 sm:$0x30] %vm16_vm1, %v146_v23   ;;  %973 = vrot.lane.b32.xlu0 %v972_v22, %s2009_s27  ;;  %1518 = vst.msk [vmem:[%s3598_s1 + $0xa] ss:$328 sm:$0x3] %vm16_vm1, %v160_v26   ;;  %987 = vrot.lane.b32.xlu1 %v986_v24, %s2010_s5 }
  0x91   :  { %1519 = vst.msk [vmem:[%s3598_s1 - $0x206] ss:$328 sm:$0xc] %vm16_vm1, %v160_v26   ;;  %1520 = vst.msk [vmem:[%s3598_s1 - $0x416] ss:$328 sm:$0x30] %vm16_vm1, %v160_v26  }
  0x92   :  { %v174_v29 = vpop.permute.xlu0 %173   ;;  %v188_v32 = vpop.permute.xlu1 %187   ;;  %s2039_s27 = smov 31   ;;  %s2040_s5 = smov 30   ;;  %v15_v23 = vld [vmem:[#allocation0] sm:$0x3]   ;;  %v19_v24 = vld [vmem:[#allocation0 + $0x8] sm:$0x3]  }
  0x93   :  { %1521 = vst.msk [vmem:[%s3598_s1 + $0xb] ss:$328 sm:$0x3] %vm16_vm1, %v174_v29   ;;  %1522 = vst.msk [vmem:[%s3598_s1 - $0x205] ss:$328 sm:$0xc] %vm16_vm1, %v174_v29  }
  0x94   :  { %1523 = vst.msk [vmem:[%s3598_s1 - $0x415] ss:$328 sm:$0x30] %vm16_vm1, %v174_v29   ;;  %1001 = vrot.lane.b32.xlu0 %v1000_v28, %s2011_s0  ;;  %1524 = vst.msk [vmem:[%s3598_s1 + $0xc] ss:$328 sm:$0x3] %vm16_vm1, %v188_v32   ;;  %1015 = vrot.lane.b32.xlu1 %v1014_v30, %s2012_s18 }
  0x95   :  { %1525 = vst.msk [vmem:[%s3598_s1 - $0x204] ss:$328 sm:$0xc] %vm16_vm1, %v188_v32   ;;  %1526 = vst.msk [vmem:[%s3598_s1 - $0x414] ss:$328 sm:$0x30] %vm16_vm1, %v188_v32  }
  0x96   :  { %v202_v34 = vpop.permute.xlu0 %201   ;;  %v216_v35 = vpop.permute.xlu1 %215   ;;  %s2041_s0 = smov 29   ;;  %s2042_s18 = smov 28   ;;  %17 = vst.msk [vmem:[%s3598_s1] ss:$328 sm:$0x3] %vm16_vm1, %v15_v23  }
  0x97   :  { %1527 = vst.msk [vmem:[%s3598_s1 + $0xd] ss:$328 sm:$0x3] %vm16_vm1, %v202_v34   ;;  %1528 = vst.msk [vmem:[%s3598_s1 - $0x203] ss:$328 sm:$0xc] %vm16_vm1, %v202_v34  }
  0x98   :  { %1529 = vst.msk [vmem:[%s3598_s1 - $0x413] ss:$328 sm:$0x30] %vm16_vm1, %v202_v34   ;;  %1029 = vrot.lane.b32.xlu0 %v1028_v33, %s2013_s25  ;;  %1530 = vst.msk [vmem:[%s3598_s1 + $0xe] ss:$328 sm:$0x3] %vm16_vm1, %v216_v35   ;;  %1039 = vrot.lane.b32.xlu1 %v2089_v3, %s2014_s3 }
  0x99   :  { %1531 = vst.msk [vmem:[%s3598_s1 - $0x202] ss:$328 sm:$0xc] %vm16_vm1, %v216_v35   ;;  %1532 = vst.msk [vmem:[%s3598_s1 - $0x412] ss:$328 sm:$0x30] %vm16_vm1, %v216_v35  }
  0x9a   :  { %v230_v36 = vpop.permute.xlu0 %229   ;;  %v244_v37 = vpop.permute.xlu1 %243   ;;  %s2043_s25 = smov 27   ;;  %s2044_s3 = smov 26   ;;  %1489 = vst.msk [vmem:[%s3598_s1 + $0x80] ss:$328 sm:$0x3] %vm16_vm1, %v19_v24  }
  0x9b   :  { %1533 = vst.msk [vmem:[%s3598_s1 + $0xf] ss:$328 sm:$0x3] %vm16_vm1, %v230_v36   ;;  %1534 = vst.msk [vmem:[%s3598_s1 - $0x201] ss:$328 sm:$0xc] %vm16_vm1, %v230_v36  }
  0x9c   :  { %1535 = vst.msk [vmem:[%s3598_s1 - $0x411] ss:$328 sm:$0x30] %vm16_vm1, %v230_v36   ;;  %1047 = vrot.lane.b32.xlu0 %v2089_v3, %s2015_s10  ;;  %1536 = vst.msk [vmem:[%s3598_s1 + $0x10] ss:$328 sm:$0x3] %vm16_vm1, %v244_v37   ;;  %1055 = vrot.lane.b32.xlu1 %v2089_v3, %s2016_s16 }
  0x9d   :  { %1537 = vst.msk [vmem:[%s3598_s1 - $0x200] ss:$328 sm:$0xc] %vm16_vm1, %v244_v37   ;;  %1538 = vst.msk [vmem:[%s3598_s1 - $0x410] ss:$328 sm:$0x30] %vm16_vm1, %v244_v37  }
  0x9e   :  { %v258_v38 = vpop.permute.xlu0 %257   ;;  %v272_v39 = vpop.permute.xlu1 %271   ;;  %s2045_s10 = smov 25   ;;  %s2046_s16 = smov 24  }
  0x9f   :  { %1539 = vst.msk [vmem:[%s3598_s1 + $0x11] ss:$328 sm:$0x3] %vm16_vm1, %v258_v38   ;;  %1540 = vst.msk [vmem:[%s3598_s1 - $0x1ff] ss:$328 sm:$0xc] %vm16_vm1, %v258_v38  }
  0xa0   :  { %1541 = vst.msk [vmem:[%s3598_s1 - $0x40f] ss:$328 sm:$0x30] %vm16_vm1, %v258_v38   ;;  %1063 = vrot.lane.b32.xlu0 %v2089_v3, %s2017_s23  ;;  %1542 = vst.msk [vmem:[%s3598_s1 + $0x12] ss:$328 sm:$0x3] %vm16_vm1, %v272_v39   ;;  %1071 = vrot.lane.b32.xlu1 %v2089_v3, %s2018_s30 }
  0xa1   :  { %1543 = vst.msk [vmem:[%s3598_s1 - $0x1fe] ss:$328 sm:$0xc] %vm16_vm1, %v272_v39   ;;  %1544 = vst.msk [vmem:[%s3598_s1 - $0x40e] ss:$328 sm:$0x30] %vm16_vm1, %v272_v39  }
  0xa2   :  { %v286_v40 = vpop.permute.xlu0 %285   ;;  %v300_v41 = vpop.permute.xlu1 %299   ;;  %s2047_s23 = smov 23   ;;  %s2048_s30 = smov 22  }
  0xa3   :  { %1545 = vst.msk [vmem:[%s3598_s1 + $0x13] ss:$328 sm:$0x3] %vm16_vm1, %v286_v40   ;;  %1546 = vst.msk [vmem:[%s3598_s1 - $0x1fd] ss:$328 sm:$0xc] %vm16_vm1, %v286_v40  }
  0xa4   :  { %1547 = vst.msk [vmem:[%s3598_s1 - $0x40d] ss:$328 sm:$0x30] %vm16_vm1, %v286_v40   ;;  %1079 = vrot.lane.b32.xlu0 %v2089_v3, %s2019_s8  ;;  %1548 = vst.msk [vmem:[%s3598_s1 + $0x14] ss:$328 sm:$0x3] %vm16_vm1, %v300_v41   ;;  %1087 = vrot.lane.b32.xlu1 %v2089_v3, %s2020_s14 }
  0xa5   :  { %1549 = vst.msk [vmem:[%s3598_s1 - $0x1fc] ss:$328 sm:$0xc] %vm16_vm1, %v300_v41   ;;  %1550 = vst.msk [vmem:[%s3598_s1 - $0x40c] ss:$328 sm:$0x30] %vm16_vm1, %v300_v41  }
  0xa6   :  { %v314_v42 = vpop.permute.xlu0 %313   ;;  %v328_v43 = vpop.permute.xlu1 %327   ;;  %s2049_s8 = smov 21   ;;  %s2050_s14 = smov 20  }
  0xa7   :  { %1551 = vst.msk [vmem:[%s3598_s1 + $0x15] ss:$328 sm:$0x3] %vm16_vm1, %v314_v42   ;;  %1552 = vst.msk [vmem:[%s3598_s1 - $0x1fb] ss:$328 sm:$0xc] %vm16_vm1, %v314_v42  }
  0xa8   :  { %1553 = vst.msk [vmem:[%s3598_s1 - $0x40b] ss:$328 sm:$0x30] %vm16_vm1, %v314_v42   ;;  %1095 = vrot.lane.b32.xlu0 %v2089_v3, %s2021_s21  ;;  %1554 = vst.msk [vmem:[%s3598_s1 + $0x16] ss:$328 sm:$0x3] %vm16_vm1, %v328_v43   ;;  %1103 = vrot.lane.b32.xlu1 %v2089_v3, %s2022_s28 }
  0xa9   :  { %1555 = vst.msk [vmem:[%s3598_s1 - $0x1fa] ss:$328 sm:$0xc] %vm16_vm1, %v328_v43   ;;  %1556 = vst.msk [vmem:[%s3598_s1 - $0x40a] ss:$328 sm:$0x30] %vm16_vm1, %v328_v43  }
  0xaa   :  { %v342_v44 = vpop.permute.xlu0 %341   ;;  %v357_v45 = vpop.permute.xlu1 %356   ;;  %s2051_s21 = smov 19   ;;  %s2052_s28 = smov 18  }
  0xab   :  { %1557 = vst.msk [vmem:[%s3598_s1 + $0x17] ss:$328 sm:$0x3] %vm16_vm1, %v342_v44   ;;  %1558 = vst.msk [vmem:[%s3598_s1 - $0x1f9] ss:$328 sm:$0xc] %vm16_vm1, %v342_v44  }
  0xac   :  { %1559 = vst.msk [vmem:[%s3598_s1 - $0x409] ss:$328 sm:$0x30] %vm16_vm1, %v342_v44   ;;  %1111 = vrot.lane.b32.xlu0 %v2089_v3, %s2023_s6  ;;  %1560 = vst.msk [vmem:[%s3598_s1 + $0x160] ss:$-328 sm:$0x3] %vm16_vm1, %v357_v45   ;;  %1119 = vrot.lane.b32.xlu1 %v2089_v3, %s2024_s12 }
  0xad   :  { %1561 = vst.msk [vmem:[%s3598_s1 + $0x470] ss:$-328 sm:$0xc] %vm16_vm1, %v357_v45   ;;  %1562 = vst.msk [vmem:[%s3598_s1 + $0x780] ss:$-328 sm:$0x30] %vm16_vm1, %v357_v45  }
  0xae   :  { %v372_v46 = vpop.permute.xlu0 %371   ;;  %v387_v48 = vpop.permute.xlu1 %386   ;;  %s2053_s6 = smov 17   ;;  %s2054_s12 = smov 16  }
  0xaf   :  { %1563 = vst.msk [vmem:[%s3598_s1 + $0x161] ss:$-328 sm:$0x3] %vm16_vm1, %v372_v46   ;;  %1564 = vst.msk [vmem:[%s3598_s1 + $0x471] ss:$-328 sm:$0xc] %vm16_vm1, %v372_v46  }
  0xb0   :  { %1565 = vst.msk [vmem:[%s3598_s1 + $0x781] ss:$-328 sm:$0x30] %vm16_vm1, %v372_v46   ;;  %1127 = vrot.lane.b32.xlu0 %v2089_v3, %s2025_s19  ;;  %1566 = vst.msk [vmem:[%s3598_s1 + $0x162] ss:$-328 sm:$0x3] %vm16_vm1, %v387_v48   ;;  %1135 = vrot.lane.b32.xlu1 %v2534_v47, %s2026_s26 }
  0xb1   :  { %1567 = vst.msk [vmem:[%s3598_s1 + $0x472] ss:$-328 sm:$0xc] %vm16_vm1, %v387_v48   ;;  %1568 = vst.msk [vmem:[%s3598_s1 + $0x782] ss:$-328 sm:$0x30] %vm16_vm1, %v387_v48  }
  0xb2   :  { %v402_v3 = vpop.permute.xlu0 %401   ;;  %v417_v50 = vpop.permute.xlu1 %416   ;;  %s2055_s19 = smov 15   ;;  %s2056_s26 = smov 14  }
  0xb3   :  { %1569 = vst.msk [vmem:[%s3598_s1 + $0x163] ss:$-328 sm:$0x3] %vm16_vm1, %v402_v3   ;;  %1570 = vst.msk [vmem:[%s3598_s1 + $0x473] ss:$-328 sm:$0xc] %vm16_vm1, %v402_v3  }
  0xb4   :  { %1571 = vst.msk [vmem:[%s3598_s1 + $0x783] ss:$-328 sm:$0x30] %vm16_vm1, %v402_v3   ;;  %1143 = vrot.lane.b32.xlu0 %v2534_v47, %s2027_s4  ;;  %1572 = vst.msk [vmem:[%s3598_s1 + $0x164] ss:$-328 sm:$0x3] %vm16_vm1, %v417_v50   ;;  %1151 = vrot.lane.b32.xlu1 %v2534_v47, %s2028_s11 }
  0xb5   :  { %1573 = vst.msk [vmem:[%s3598_s1 + $0x474] ss:$-328 sm:$0xc] %vm16_vm1, %v417_v50   ;;  %1574 = vst.msk [vmem:[%s3598_s1 + $0x784] ss:$-328 sm:$0x30] %vm16_vm1, %v417_v50  }
  0xb6   :  { %v432_v51 = vpop.permute.xlu0 %431   ;;  %v447_v52 = vpop.permute.xlu1 %446   ;;  %s2057_s4 = smov 13   ;;  %s2058_s11 = smov 12  }
  0xb7   :  { %1575 = vst.msk [vmem:[%s3598_s1 + $0x165] ss:$-328 sm:$0x3] %vm16_vm1, %v432_v51   ;;  %1576 = vst.msk [vmem:[%s3598_s1 + $0x475] ss:$-328 sm:$0xc] %vm16_vm1, %v432_v51  }
  0xb8   :  { %1577 = vst.msk [vmem:[%s3598_s1 + $0x785] ss:$-328 sm:$0x30] %vm16_vm1, %v432_v51   ;;  %1159 = vrot.lane.b32.xlu0 %v2534_v47, %s2029_s17  ;;  %1578 = vst.msk [vmem:[%s3598_s1 + $0x166] ss:$-328 sm:$0x3] %vm16_vm1, %v447_v52   ;;  %1167 = vrot.lane.b32.xlu1 %v2135_v49, %s2030_s24 }
  0xb9   :  { %1579 = vst.msk [vmem:[%s3598_s1 + $0x476] ss:$-328 sm:$0xc] %vm16_vm1, %v447_v52   ;;  %1580 = vst.msk [vmem:[%s3598_s1 + $0x786] ss:$-328 sm:$0x30] %vm16_vm1, %v447_v52  }
  0xba   :  { %v462_v53 = vpop.permute.xlu0 %461   ;;  %v476_v54 = vpop.permute.xlu1 %475   ;;  %s2059_s17 = smov 11   ;;  %s2060_s24 = smov 10  }
  0xbb   :  { %1581 = vst.msk [vmem:[%s3598_s1 + $0x167] ss:$-328 sm:$0x3] %vm16_vm1, %v462_v53   ;;  %1582 = vst.msk [vmem:[%s3598_s1 + $0x477] ss:$-328 sm:$0xc] %vm16_vm1, %v462_v53  }
  0xbc   :  { %1583 = vst.msk [vmem:[%s3598_s1 + $0x787] ss:$-328 sm:$0x30] %vm16_vm1, %v462_v53   ;;  %1175 = vrot.lane.b32.xlu0 %v2135_v49, %s2031_s2  ;;  %1584 = vst.msk [vmem:[%s3598_s1 + $0x20] ss:$328 sm:$0x3] %vm16_vm1, %v476_v54   ;;  %1183 = vrot.lane.b32.xlu1 %v2135_v49, %s2032_s9 }
  0xbd   :  { %1585 = vst.msk [vmem:[%s3598_s1 - $0x1f0] ss:$328 sm:$0xc] %vm16_vm1, %v476_v54   ;;  %1586 = vst.msk [vmem:[%s3598_s1 - $0x400] ss:$328 sm:$0x30] %vm16_vm1, %v476_v54  }
  0xbe   :  { %v490_v55 = vpop.permute.xlu0 %489   ;;  %v504_v56 = vpop.permute.xlu1 %503   ;;  %s2061_s2 = smov 9   ;;  %s2062_s9 = smov 8  }
  0xbf   :  { %1587 = vst.msk [vmem:[%s3598_s1 + $0x21] ss:$328 sm:$0x3] %vm16_vm1, %v490_v55   ;;  %1588 = vst.msk [vmem:[%s3598_s1 - $0x1ef] ss:$328 sm:$0xc] %vm16_vm1, %v490_v55  }
  0xc0   :  { %1589 = vst.msk [vmem:[%s3598_s1 - $0x3ff] ss:$328 sm:$0x30] %vm16_vm1, %v490_v55   ;;  %1191 = vrot.lane.b32.xlu0 %v2135_v49, %s2033_s15  ;;  %1590 = vst.msk [vmem:[%s3598_s1 + $0x22] ss:$328 sm:$0x3] %vm16_vm1, %v504_v56   ;;  %1199 = vrot.lane.b32.xlu1 %v2135_v49, %s2034_s22 }
  0xc1   :  { %1591 = vst.msk [vmem:[%s3598_s1 - $0x1ee] ss:$328 sm:$0xc] %vm16_vm1, %v504_v56   ;;  %1592 = vst.msk [vmem:[%s3598_s1 - $0x3fe] ss:$328 sm:$0x30] %vm16_vm1, %v504_v56  }
  0xc2   :  { %v518_v57 = vpop.permute.xlu0 %517   ;;  %v532_v58 = vpop.permute.xlu1 %531  }
  0xc3   :  { %1593 = vst.msk [vmem:[%s3598_s1 + $0x23] ss:$328 sm:$0x3] %vm16_vm1, %v518_v57   ;;  %1594 = vst.msk [vmem:[%s3598_s1 - $0x1ed] ss:$328 sm:$0xc] %vm16_vm1, %v518_v57  }
  0xc4   :  { %1595 = vst.msk [vmem:[%s3598_s1 - $0x3fd] ss:$328 sm:$0x30] %vm16_vm1, %v518_v57   ;;  %1207 = vrot.lane.b32.xlu0 %v2135_v49, %s2035_s29  ;;  %1596 = vst.msk [vmem:[%s3598_s1 + $0x24] ss:$328 sm:$0x3] %vm16_vm1, %v532_v58   ;;  %1215 = vrot.lane.b32.xlu1 %v2135_v49, %s2036_s7 }
  0xc5   :  { %1597 = vst.msk [vmem:[%s3598_s1 - $0x1ec] ss:$328 sm:$0xc] %vm16_vm1, %v532_v58   ;;  %1598 = vst.msk [vmem:[%s3598_s1 - $0x3fc] ss:$328 sm:$0x30] %vm16_vm1, %v532_v58  }
  0xc6   :  { %v546_v59 = vpop.permute.xlu0 %545   ;;  %v560_v60 = vpop.permute.xlu1 %559  }
  0xc7   :  { %1599 = vst.msk [vmem:[%s3598_s1 + $0x25] ss:$328 sm:$0x3] %vm16_vm1, %v546_v59   ;;  %1600 = vst.msk [vmem:[%s3598_s1 - $0x1eb] ss:$328 sm:$0xc] %vm16_vm1, %v546_v59  }
  0xc8   :  { %1601 = vst.msk [vmem:[%s3598_s1 - $0x3fb] ss:$328 sm:$0x30] %vm16_vm1, %v546_v59   ;;  %1223 = vrot.lane.b32.xlu0 %v2135_v49, %s2037_s13  ;;  %1602 = vst.msk [vmem:[%s3598_s1 + $0x26] ss:$328 sm:$0x3] %vm16_vm1, %v560_v60   ;;  %1231 = vrot.lane.b32.xlu1 %v2534_v47, %s2038_s20 }
  0xc9   :  { %1603 = vst.msk [vmem:[%s3598_s1 - $0x1ea] ss:$328 sm:$0xc] %vm16_vm1, %v560_v60   ;;  %1604 = vst.msk [vmem:[%s3598_s1 - $0x3fa] ss:$328 sm:$0x30] %vm16_vm1, %v560_v60  }
  0xca   :  { %v574_v49 = vpop.permute.xlu0 %573   ;;  %v588_v61 = vpop.permute.xlu1 %587  }
  0xcb   :  { %1605 = vst.msk [vmem:[%s3598_s1 + $0x27] ss:$328 sm:$0x3] %vm16_vm1, %v574_v49   ;;  %1606 = vst.msk [vmem:[%s3598_s1 - $0x1e9] ss:$328 sm:$0xc] %vm16_vm1, %v574_v49  }
  0xcc   :  { %1607 = vst.msk [vmem:[%s3598_s1 - $0x3f9] ss:$328 sm:$0x30] %vm16_vm1, %v574_v49   ;;  %1239 = vrot.lane.b32.xlu0 %v2534_v47, %s2039_s27  ;;  %1608 = vst.msk [vmem:[%s3598_s1 + $0x28] ss:$328 sm:$0x3] %vm16_vm1, %v588_v61   ;;  %1247 = vrot.lane.b32.xlu1 %v2534_v47, %s2040_s5 }
  0xcd   :  { %1609 = vst.msk [vmem:[%s3598_s1 - $0x1e8] ss:$328 sm:$0xc] %vm16_vm1, %v588_v61   ;;  %1610 = vst.msk [vmem:[%s3598_s1 - $0x3f8] ss:$328 sm:$0x30] %vm16_vm1, %v588_v61  }
  0xce   :  { %v602_v62 = vpop.permute.xlu0 %601   ;;  %v616_v63 = vpop.permute.xlu1 %615  }
  0xcf   :  { %1611 = vst.msk [vmem:[%s3598_s1 + $0x29] ss:$328 sm:$0x3] %vm16_vm1, %v602_v62   ;;  %1612 = vst.msk [vmem:[%s3598_s1 - $0x1e7] ss:$328 sm:$0xc] %vm16_vm1, %v602_v62  }
  0xd0   :  { %1613 = vst.msk [vmem:[%s3598_s1 - $0x3f7] ss:$328 sm:$0x30] %vm16_vm1, %v602_v62   ;;  %1255 = vrot.lane.b32.xlu0 %v2534_v47, %s2041_s0  ;;  %1614 = vst.msk [vmem:[%s3598_s1 + $0x2a] ss:$328 sm:$0x3] %vm16_vm1, %v616_v63   ;;  %1263 = vrot.lane.b32.xlu1 %v2534_v47, %s2042_s18 }
  0xd1   :  { %1615 = vst.msk [vmem:[%s3598_s1 - $0x1e6] ss:$328 sm:$0xc] %vm16_vm1, %v616_v63   ;;  %1616 = vst.msk [vmem:[%s3598_s1 - $0x3f6] ss:$328 sm:$0x30] %vm16_vm1, %v616_v63  }
  0xd2   :  { %v630_v0 = vpop.permute.xlu0 %629   ;;  %v644_v1 = vpop.permute.xlu1 %643  }
  0xd3   :  { %1617 = vst.msk [vmem:[%s3598_s1 + $0x2b] ss:$328 sm:$0x3] %vm16_vm1, %v630_v0   ;;  %1618 = vst.msk [vmem:[%s3598_s1 - $0x1e5] ss:$328 sm:$0xc] %vm16_vm1, %v630_v0  }
  0xd4   :  { %1619 = vst.msk [vmem:[%s3598_s1 - $0x3f5] ss:$328 sm:$0x30] %vm16_vm1, %v630_v0   ;;  %1271 = vrot.lane.b32.xlu0 %v2534_v47, %s2043_s25  ;;  %1620 = vst.msk [vmem:[%s3598_s1 + $0x2c] ss:$328 sm:$0x3] %vm16_vm1, %v644_v1   ;;  %1279 = vrot.lane.b32.xlu1 %v2534_v47, %s2044_s3 }
  0xd5   :  { %1621 = vst.msk [vmem:[%s3598_s1 - $0x1e4] ss:$328 sm:$0xc] %vm16_vm1, %v644_v1   ;;  %1622 = vst.msk [vmem:[%s3598_s1 - $0x3f4] ss:$328 sm:$0x30] %vm16_vm1, %v644_v1  }
  0xd6   :  { %v658_v2 = vpop.permute.xlu0 %657   ;;  %v672_v4 = vpop.permute.xlu1 %671  }
  0xd7   :  { %1623 = vst.msk [vmem:[%s3598_s1 + $0x2d] ss:$328 sm:$0x3] %vm16_vm1, %v658_v2   ;;  %1624 = vst.msk [vmem:[%s3598_s1 - $0x1e3] ss:$328 sm:$0xc] %vm16_vm1, %v658_v2  }
  0xd8   :  { %1625 = vst.msk [vmem:[%s3598_s1 - $0x3f3] ss:$328 sm:$0x30] %vm16_vm1, %v658_v2   ;;  %1287 = vrot.lane.b32.xlu0 %v2534_v47, %s2045_s10  ;;  %1626 = vst.msk [vmem:[%s3598_s1 + $0x2e] ss:$328 sm:$0x3] %vm16_vm1, %v672_v4   ;;  %1295 = vrot.lane.b32.xlu1 %v2534_v47, %s2046_s16 }
  0xd9   :  { %1627 = vst.msk [vmem:[%s3598_s1 - $0x1e2] ss:$328 sm:$0xc] %vm16_vm1, %v672_v4   ;;  %1628 = vst.msk [vmem:[%s3598_s1 - $0x3f2] ss:$328 sm:$0x30] %vm16_vm1, %v672_v4  }
  0xda   :  { %v686_v5 = vpop.permute.xlu0 %685   ;;  %v700_v6 = vpop.permute.xlu1 %699  }
  0xdb   :  { %1629 = vst.msk [vmem:[%s3598_s1 + $0x2f] ss:$328 sm:$0x3] %vm16_vm1, %v686_v5   ;;  %1630 = vst.msk [vmem:[%s3598_s1 - $0x1e1] ss:$328 sm:$0xc] %vm16_vm1, %v686_v5  }
  0xdc   :  { %1631 = vst.msk [vmem:[%s3598_s1 - $0x3f1] ss:$328 sm:$0x30] %vm16_vm1, %v686_v5   ;;  %1303 = vrot.lane.b32.xlu0 %v2534_v47, %s2047_s23  ;;  %1632 = vst.msk [vmem:[%s3598_s1 + $0x30] ss:$328 sm:$0x3] %vm16_vm1, %v700_v6   ;;  %1311 = vrot.lane.b32.xlu1 %v2534_v47, %s2048_s30 }
  0xdd   :  { %1633 = vst.msk [vmem:[%s3598_s1 - $0x1e0] ss:$328 sm:$0xc] %vm16_vm1, %v700_v6   ;;  %1634 = vst.msk [vmem:[%s3598_s1 - $0x3f0] ss:$328 sm:$0x30] %vm16_vm1, %v700_v6  }
  0xde   :  { %v714_v7 = vpop.permute.xlu0 %713   ;;  %v728_v8 = vpop.permute.xlu1 %727  }
  0xdf   :  { %1635 = vst.msk [vmem:[%s3598_s1 + $0x31] ss:$328 sm:$0x3] %vm16_vm1, %v714_v7   ;;  %1636 = vst.msk [vmem:[%s3598_s1 - $0x1df] ss:$328 sm:$0xc] %vm16_vm1, %v714_v7  }
  0xe0   :  { %1637 = vst.msk [vmem:[%s3598_s1 - $0x3ef] ss:$328 sm:$0x30] %vm16_vm1, %v714_v7   ;;  %1319 = vrot.lane.b32.xlu0 %v2534_v47, %s2049_s8  ;;  %1638 = vst.msk [vmem:[%s3598_s1 + $0x32] ss:$328 sm:$0x3] %vm16_vm1, %v728_v8   ;;  %1327 = vrot.lane.b32.xlu1 %v2534_v47, %s2050_s14 }
  0xe1   :  { %1639 = vst.msk [vmem:[%s3598_s1 - $0x1de] ss:$328 sm:$0xc] %vm16_vm1, %v728_v8   ;;  %1640 = vst.msk [vmem:[%s3598_s1 - $0x3ee] ss:$328 sm:$0x30] %vm16_vm1, %v728_v8  }
  0xe2   :  { %v742_v9 = vpop.permute.xlu0 %741   ;;  %v756_v10 = vpop.permute.xlu1 %755  }
  0xe3   :  { %1641 = vst.msk [vmem:[%s3598_s1 + $0x33] ss:$328 sm:$0x3] %vm16_vm1, %v742_v9   ;;  %1642 = vst.msk [vmem:[%s3598_s1 - $0x1dd] ss:$328 sm:$0xc] %vm16_vm1, %v742_v9  }
  0xe4   :  { %1643 = vst.msk [vmem:[%s3598_s1 - $0x3ed] ss:$328 sm:$0x30] %vm16_vm1, %v742_v9   ;;  %1335 = vrot.lane.b32.xlu0 %v2534_v47, %s2051_s21  ;;  %1644 = vst.msk [vmem:[%s3598_s1 + $0x34] ss:$328 sm:$0x3] %vm16_vm1, %v756_v10   ;;  %1343 = vrot.lane.b32.xlu1 %v2534_v47, %s2052_s28 }
  0xe5   :  { %1645 = vst.msk [vmem:[%s3598_s1 - $0x1dc] ss:$328 sm:$0xc] %vm16_vm1, %v756_v10   ;;  %1646 = vst.msk [vmem:[%s3598_s1 - $0x3ec] ss:$328 sm:$0x30] %vm16_vm1, %v756_v10  }
  0xe6   :  { %v770_v11 = vpop.permute.xlu0 %769   ;;  %v784_v12 = vpop.permute.xlu1 %783   ;;  %s2063_s21 = smov 7   ;;  %s2064_s28 = smov 6  }
  0xe7   :  { %1647 = vst.msk [vmem:[%s3598_s1 + $0x35] ss:$328 sm:$0x3] %vm16_vm1, %v770_v11   ;;  %1648 = vst.msk [vmem:[%s3598_s1 - $0x1db] ss:$328 sm:$0xc] %vm16_vm1, %v770_v11  }
  0xe8   :  { %1649 = vst.msk [vmem:[%s3598_s1 - $0x3eb] ss:$328 sm:$0x30] %vm16_vm1, %v770_v11   ;;  %1351 = vrot.lane.b32.xlu0 %v2534_v47, %s2053_s6  ;;  %1650 = vst.msk [vmem:[%s3598_s1 + $0x36] ss:$328 sm:$0x3] %vm16_vm1, %v784_v12   ;;  %1359 = vrot.lane.b32.xlu1 %v2534_v47, %s2054_s12 }
  0xe9   :  { %1651 = vst.msk [vmem:[%s3598_s1 - $0x1da] ss:$328 sm:$0xc] %vm16_vm1, %v784_v12   ;;  %1652 = vst.msk [vmem:[%s3598_s1 - $0x3ea] ss:$328 sm:$0x30] %vm16_vm1, %v784_v12  }
  0xea   :  { %v798_v13 = vpop.permute.xlu0 %797   ;;  %v813_v14 = vpop.permute.xlu1 %812   ;;  %s2065_s6 = smov 5   ;;  %s2066_s12 = smov 4  }
  0xeb   :  { %1653 = vst.msk [vmem:[%s3598_s1 + $0x37] ss:$328 sm:$0x3] %vm16_vm1, %v798_v13   ;;  %1654 = vst.msk [vmem:[%s3598_s1 - $0x1d9] ss:$328 sm:$0xc] %vm16_vm1, %v798_v13  }
  0xec   :  { %1655 = vst.msk [vmem:[%s3598_s1 - $0x3e9] ss:$328 sm:$0x30] %vm16_vm1, %v798_v13   ;;  %1367 = vrot.lane.b32.xlu0 %v2534_v47, %s2055_s19  ;;  %1656 = vst.msk [vmem:[%s3598_s1 + $0x180] ss:$-328 sm:$0x3] %vm16_vm1, %v813_v14   ;;  %1375 = vrot.lane.b32.xlu1 %v2534_v47, %s2056_s26 }
  0xed   :  { %1657 = vst.msk [vmem:[%s3598_s1 + $0x490] ss:$-328 sm:$0xc] %vm16_vm1, %v813_v14   ;;  %1658 = vst.msk [vmem:[%s3598_s1 + $0x7a0] ss:$-328 sm:$0x30] %vm16_vm1, %v813_v14  }
  0xee   :  { %v828_v15 = vpop.permute.xlu0 %827   ;;  %v843_v16 = vpop.permute.xlu1 %842   ;;  %s2067_s19 = smov 3   ;;  %s2068_s26 = smov 2  }
  0xef   :  { %1659 = vst.msk [vmem:[%s3598_s1 + $0x181] ss:$-328 sm:$0x3] %vm16_vm1, %v828_v15   ;;  %1660 = vst.msk [vmem:[%s3598_s1 + $0x491] ss:$-328 sm:$0xc] %vm16_vm1, %v828_v15  }
  0xf0   :  { %1661 = vst.msk [vmem:[%s3598_s1 + $0x7a1] ss:$-328 sm:$0x30] %vm16_vm1, %v828_v15   ;;  %1383 = vrot.lane.b32.xlu0 %v2534_v47, %s2057_s4  ;;  %1662 = vst.msk [vmem:[%s3598_s1 + $0x182] ss:$-328 sm:$0x3] %vm16_vm1, %v843_v16   ;;  %1391 = vrot.lane.b32.xlu1 %v2534_v47, %s2058_s11 }
  0xf1   :  { %1663 = vst.msk [vmem:[%s3598_s1 + $0x492] ss:$-328 sm:$0xc] %vm16_vm1, %v843_v16   ;;  %1664 = vst.msk [vmem:[%s3598_s1 + $0x7a2] ss:$-328 sm:$0x30] %vm16_vm1, %v843_v16  }
  0xf2   :  { %v858_v17 = vpop.permute.xlu0 %857   ;;  %v873_v18 = vpop.permute.xlu1 %872   ;;  %s2069_s4 = smov 1  }
  0xf3   :  { %1665 = vst.msk [vmem:[%s3598_s1 + $0x183] ss:$-328 sm:$0x3] %vm16_vm1, %v858_v17   ;;  %1666 = vst.msk [vmem:[%s3598_s1 + $0x493] ss:$-328 sm:$0xc] %vm16_vm1, %v858_v17  }
  0xf4   :  { %1667 = vst.msk [vmem:[%s3598_s1 + $0x7a3] ss:$-328 sm:$0x30] %vm16_vm1, %v858_v17   ;;  %1399 = vrot.lane.b32.xlu0 %v2534_v47, %s2059_s17  ;;  %1668 = vst.msk [vmem:[%s3598_s1 + $0x184] ss:$-328 sm:$0x3] %vm16_vm1, %v873_v18   ;;  %1407 = vrot.lane.b32.xlu1 %v2534_v47, %s2060_s24 }
  0xf5   :  { %1669 = vst.msk [vmem:[%s3598_s1 + $0x494] ss:$-328 sm:$0xc] %vm16_vm1, %v873_v18   ;;  %1670 = vst.msk [vmem:[%s3598_s1 + $0x7a4] ss:$-328 sm:$0x30] %vm16_vm1, %v873_v18  }
  0xf6   :  { %v888_v19 = vpop.permute.xlu0 %887   ;;  %v903_v21 = vpop.permute.xlu1 %902  }
  0xf7   :  { %1671 = vst.msk [vmem:[%s3598_s1 + $0x185] ss:$-328 sm:$0x3] %vm16_vm1, %v888_v19   ;;  %1672 = vst.msk [vmem:[%s3598_s1 + $0x495] ss:$-328 sm:$0xc] %vm16_vm1, %v888_v19  }
  0xf8   :  { %1673 = vst.msk [vmem:[%s3598_s1 + $0x7a5] ss:$-328 sm:$0x30] %vm16_vm1, %v888_v19   ;;  %1415 = vrot.lane.b32.xlu0 %v2534_v47, %s2061_s2  ;;  %1674 = vst.msk [vmem:[%s3598_s1 + $0x186] ss:$-328 sm:$0x3] %vm16_vm1, %v903_v21   ;;  %1423 = vrot.lane.b32.xlu1 %v1422_v20, %s2062_s9 }
  0xf9   :  { %1675 = vst.msk [vmem:[%s3598_s1 + $0x496] ss:$-328 sm:$0xc] %vm16_vm1, %v903_v21   ;;  %1676 = vst.msk [vmem:[%s3598_s1 + $0x7a6] ss:$-328 sm:$0x30] %vm16_vm1, %v903_v21  }
  0xfa   :  { %v918_v22 = vpop.permute.xlu0 %917   ;;  %v932_v26 = vpop.permute.xlu1 %931  }
  0xfb   :  { %1677 = vst.msk [vmem:[%s3598_s1 + $0x187] ss:$-328 sm:$0x3] %vm16_vm1, %v918_v22   ;;  %1678 = vst.msk [vmem:[%s3598_s1 + $0x497] ss:$-328 sm:$0xc] %vm16_vm1, %v918_v22  }
  0xfc   :  { %1679 = vst.msk [vmem:[%s3598_s1 + $0x7a7] ss:$-328 sm:$0x30] %vm16_vm1, %v918_v22   ;;  %1431 = vrot.lane.b32.xlu0 %v1422_v20, %s2063_s21  ;;  %1680 = vst.msk [vmem:[%s3598_s1 + $0x40] ss:$328 sm:$0x3] %vm16_vm1, %v932_v26   ;;  %1439 = vrot.lane.b32.xlu1 %v1422_v20, %s2064_s28 }
  0xfd   :  { %1681 = vst.msk [vmem:[%s3598_s1 - $0x1d0] ss:$328 sm:$0xc] %vm16_vm1, %v932_v26   ;;  %1682 = vst.msk [vmem:[%s3598_s1 - $0x3e0] ss:$328 sm:$0x30] %vm16_vm1, %v932_v26  }
  0xfe   :  { %v946_v27 = vpop.permute.xlu0 %945   ;;  %v960_v28 = vpop.permute.xlu1 %959  }
  0xff   :  { %1683 = vst.msk [vmem:[%s3598_s1 + $0x41] ss:$328 sm:$0x3] %vm16_vm1, %v946_v27   ;;  %1684 = vst.msk [vmem:[%s3598_s1 - $0x1cf] ss:$328 sm:$0xc] %vm16_vm1, %v946_v27  }
 0x100   :  { %1685 = vst.msk [vmem:[%s3598_s1 - $0x3df] ss:$328 sm:$0x30] %vm16_vm1, %v946_v27   ;;  %1447 = vrot.lane.b32.xlu0 %v1422_v20, %s2065_s6  ;;  %1686 = vst.msk [vmem:[%s3598_s1 + $0x42] ss:$328 sm:$0x3] %vm16_vm1, %v960_v28   ;;  %1455 = vrot.lane.b32.xlu1 %v1422_v20, %s2066_s12 }
 0x101   :  { %1687 = vst.msk [vmem:[%s3598_s1 - $0x1ce] ss:$328 sm:$0xc] %vm16_vm1, %v960_v28   ;;  %1688 = vst.msk [vmem:[%s3598_s1 - $0x3de] ss:$328 sm:$0x30] %vm16_vm1, %v960_v28  }
 0x102   :  { %v974_v29 = vpop.permute.xlu0 %973   ;;  %v988_v30 = vpop.permute.xlu1 %987  }
 0x103   :  { %1689 = vst.msk [vmem:[%s3598_s1 + $0x43] ss:$328 sm:$0x3] %vm16_vm1, %v974_v29   ;;  %1690 = vst.msk [vmem:[%s3598_s1 - $0x1cd] ss:$328 sm:$0xc] %vm16_vm1, %v974_v29  }
 0x104   :  { %1691 = vst.msk [vmem:[%s3598_s1 - $0x3dd] ss:$328 sm:$0x30] %vm16_vm1, %v974_v29   ;;  %1463 = vrot.lane.b32.xlu0 %v1422_v20, %s2067_s19  ;;  %1692 = vst.msk [vmem:[%s3598_s1 + $0x44] ss:$328 sm:$0x3] %vm16_vm1, %v988_v30   ;;  %1471 = vrot.lane.b32.xlu1 %v1422_v20, %s2068_s26 }
 0x105   :  { %1693 = vst.msk [vmem:[%s3598_s1 - $0x1cc] ss:$328 sm:$0xc] %vm16_vm1, %v988_v30   ;;  %1694 = vst.msk [vmem:[%s3598_s1 - $0x3dc] ss:$328 sm:$0x30] %vm16_vm1, %v988_v30  }
 0x106   :  { %v1002_v31 = vpop.permute.xlu0 %1001   ;;  %v1016_v32 = vpop.permute.xlu1 %1015  }
 0x107   :  { %1695 = vst.msk [vmem:[%s3598_s1 + $0x45] ss:$328 sm:$0x3] %vm16_vm1, %v1002_v31   ;;  %1696 = vst.msk [vmem:[%s3598_s1 - $0x1cb] ss:$328 sm:$0xc] %vm16_vm1, %v1002_v31  }
 0x108   :  { %1697 = vst.msk [vmem:[%s3598_s1 - $0x3db] ss:$328 sm:$0x30] %vm16_vm1, %v1002_v31   ;;  %1479 = vrot.lane.b32.xlu0 %v1422_v20, %s2069_s4  ;;  %1698 = vst.msk [vmem:[%s3598_s1 + $0x46] ss:$328 sm:$0x3] %vm16_vm1, %v1016_v32  }
 0x109   :  { %1699 = vst.msk [vmem:[%s3598_s1 - $0x1ca] ss:$328 sm:$0xc] %vm16_vm1, %v1016_v32   ;;  %1700 = vst.msk [vmem:[%s3598_s1 - $0x3da] ss:$328 sm:$0x30] %vm16_vm1, %v1016_v32  }
 0x10a   :  { %v1030_v33 = vpop.permute.xlu0 %1029   ;;  %v1040_v34 = vpop.permute.xlu1 %1039  }
 0x10b   :  { %1701 = vst.msk [vmem:[%s3598_s1 + $0x47] ss:$328 sm:$0x3] %vm16_vm1, %v1030_v33   ;;  %1702 = vst.msk [vmem:[%s3598_s1 - $0x1c9] ss:$328 sm:$0xc] %vm16_vm1, %v1030_v33  }
 0x10c   :  { %1703 = vst.msk [vmem:[%s3598_s1 - $0x3d9] ss:$328 sm:$0x30] %vm16_vm1, %v1030_v33   ;;  %1704 = vst.msk [vmem:[%s3598_s1 + $0x48] ss:$328 sm:$0x3] %vm16_vm1, %v1040_v34  }
 0x10d   :  { %1705 = vst.msk [vmem:[%s3598_s1 - $0x1c8] ss:$328 sm:$0xc] %vm16_vm1, %v1040_v34  }
 0x10e   :  { %v1048_v35 = vpop.permute.xlu0 %1047   ;;  %v1056_v36 = vpop.permute.xlu1 %1055  }
 0x10f   :  { %1706 = vst.msk [vmem:[%s3598_s1 + $0x49] ss:$328 sm:$0x3] %vm16_vm1, %v1048_v35   ;;  %1707 = vst.msk [vmem:[%s3598_s1 - $0x1c7] ss:$328 sm:$0xc] %vm16_vm1, %v1048_v35  }
 0x110   :  { %1708 = vst.msk [vmem:[%s3598_s1 + $0x4a] ss:$328 sm:$0x3] %vm16_vm1, %v1056_v36   ;;  %1709 = vst.msk [vmem:[%s3598_s1 - $0x1c6] ss:$328 sm:$0xc] %vm16_vm1, %v1056_v36  }
 0x112   :  { %v1064_v37 = vpop.permute.xlu0 %1063   ;;  %v1072_v38 = vpop.permute.xlu1 %1071  }
 0x113   :  { %1710 = vst.msk [vmem:[%s3598_s1 + $0x4b] ss:$328 sm:$0x3] %vm16_vm1, %v1064_v37   ;;  %1711 = vst.msk [vmem:[%s3598_s1 - $0x1c5] ss:$328 sm:$0xc] %vm16_vm1, %v1064_v37  }
 0x114   :  { %1712 = vst.msk [vmem:[%s3598_s1 + $0x4c] ss:$328 sm:$0x3] %vm16_vm1, %v1072_v38   ;;  %1713 = vst.msk [vmem:[%s3598_s1 - $0x1c4] ss:$328 sm:$0xc] %vm16_vm1, %v1072_v38  }
 0x116   :  { %v1080_v39 = vpop.permute.xlu0 %1079   ;;  %v1088_v40 = vpop.permute.xlu1 %1087  }
 0x117   :  { %1714 = vst.msk [vmem:[%s3598_s1 + $0x4d] ss:$328 sm:$0x3] %vm16_vm1, %v1080_v39   ;;  %1715 = vst.msk [vmem:[%s3598_s1 - $0x1c3] ss:$328 sm:$0xc] %vm16_vm1, %v1080_v39  }
 0x118   :  { %1716 = vst.msk [vmem:[%s3598_s1 + $0x4e] ss:$328 sm:$0x3] %vm16_vm1, %v1088_v40   ;;  %1717 = vst.msk [vmem:[%s3598_s1 - $0x1c2] ss:$328 sm:$0xc] %vm16_vm1, %v1088_v40  }
 0x11a   :  { %v1096_v41 = vpop.permute.xlu0 %1095   ;;  %v1104_v42 = vpop.permute.xlu1 %1103  }
 0x11b   :  { %1718 = vst.msk [vmem:[%s3598_s1 + $0x4f] ss:$328 sm:$0x3] %vm16_vm1, %v1096_v41   ;;  %1719 = vst.msk [vmem:[%s3598_s1 - $0x1c1] ss:$328 sm:$0xc] %vm16_vm1, %v1096_v41  }
 0x11c   :  { %1720 = vst.msk [vmem:[%s3598_s1 + $0x50] ss:$328 sm:$0x3] %vm16_vm1, %v1104_v42   ;;  %1721 = vst.msk [vmem:[%s3598_s1 - $0x1c0] ss:$328 sm:$0xc] %vm16_vm1, %v1104_v42  }
 0x11e   :  { %v1112_v43 = vpop.permute.xlu0 %1111   ;;  %v1120_v44 = vpop.permute.xlu1 %1119  }
 0x11f   :  { %1722 = vst.msk [vmem:[%s3598_s1 + $0x51] ss:$328 sm:$0x3] %vm16_vm1, %v1112_v43   ;;  %1723 = vst.msk [vmem:[%s3598_s1 - $0x1bf] ss:$328 sm:$0xc] %vm16_vm1, %v1112_v43  }
 0x120   :  { %1724 = vst.msk [vmem:[%s3598_s1 + $0x52] ss:$328 sm:$0x3] %vm16_vm1, %v1120_v44   ;;  %1725 = vst.msk [vmem:[%s3598_s1 - $0x1be] ss:$328 sm:$0xc] %vm16_vm1, %v1120_v44  }
 0x122   :  { %v1128_v45 = vpop.permute.xlu0 %1127   ;;  %v1136_v46 = vpop.permute.xlu1 %1135  }
 0x123   :  { %1726 = vst.msk [vmem:[%s3598_s1 + $0x53] ss:$328 sm:$0x3] %vm16_vm1, %v1128_v45   ;;  %1727 = vst.msk [vmem:[%s3598_s1 - $0x1bd] ss:$328 sm:$0xc] %vm16_vm1, %v1128_v45  }
 0x124   :  { %1728 = vst.msk [vmem:[%s3598_s1 + $0x54] ss:$328 sm:$0x3] %vm16_vm1, %v1136_v46   ;;  %1729 = vst.msk [vmem:[%s3598_s1 - $0x1bc] ss:$328 sm:$0xc] %vm16_vm1, %v1136_v46  }
 0x126   :  { %v1144_v47 = vpop.permute.xlu0 %1143   ;;  %v1152_v48 = vpop.permute.xlu1 %1151  }
 0x127   :  { %1730 = vst.msk [vmem:[%s3598_s1 + $0x55] ss:$328 sm:$0x3] %vm16_vm1, %v1144_v47   ;;  %1731 = vst.msk [vmem:[%s3598_s1 - $0x1bb] ss:$328 sm:$0xc] %vm16_vm1, %v1144_v47  }
 0x128   :  { %1732 = vst.msk [vmem:[%s3598_s1 + $0x56] ss:$328 sm:$0x3] %vm16_vm1, %v1152_v48   ;;  %1733 = vst.msk [vmem:[%s3598_s1 - $0x1ba] ss:$328 sm:$0xc] %vm16_vm1, %v1152_v48  }
 0x12a   :  { %v1160_v3 = vpop.permute.xlu0 %1159   ;;  %v1168_v50 = vpop.permute.xlu1 %1167  }
 0x12b   :  { %1734 = vst.msk [vmem:[%s3598_s1 + $0x57] ss:$328 sm:$0x3] %vm16_vm1, %v1160_v3   ;;  %1735 = vst.msk [vmem:[%s3598_s1 - $0x1b9] ss:$328 sm:$0xc] %vm16_vm1, %v1160_v3  }
 0x12c   :  { %1736 = vst.msk [vmem:[%s3598_s1 + $0x1a0] ss:$-328 sm:$0x3] %vm16_vm1, %v1168_v50   ;;  %1737 = vst.msk [vmem:[%s3598_s1 + $0x4b0] ss:$-328 sm:$0xc] %vm16_vm1, %v1168_v50  }
 0x12e   :  { %v1176_v51 = vpop.permute.xlu0 %1175   ;;  %v1184_v52 = vpop.permute.xlu1 %1183  }
 0x12f   :  { %1738 = vst.msk [vmem:[%s3598_s1 + $0x1a1] ss:$-328 sm:$0x3] %vm16_vm1, %v1176_v51   ;;  %1739 = vst.msk [vmem:[%s3598_s1 + $0x4b1] ss:$-328 sm:$0xc] %vm16_vm1, %v1176_v51  }
 0x130   :  { %1740 = vst.msk [vmem:[%s3598_s1 + $0x1a2] ss:$-328 sm:$0x3] %vm16_vm1, %v1184_v52   ;;  %1741 = vst.msk [vmem:[%s3598_s1 + $0x4b2] ss:$-328 sm:$0xc] %vm16_vm1, %v1184_v52  }
 0x132   :  { %v1192_v53 = vpop.permute.xlu0 %1191   ;;  %v1200_v54 = vpop.permute.xlu1 %1199  }
 0x133   :  { %1742 = vst.msk [vmem:[%s3598_s1 + $0x1a3] ss:$-328 sm:$0x3] %vm16_vm1, %v1192_v53   ;;  %1743 = vst.msk [vmem:[%s3598_s1 + $0x4b3] ss:$-328 sm:$0xc] %vm16_vm1, %v1192_v53  }
 0x134   :  { %1744 = vst.msk [vmem:[%s3598_s1 + $0x1a4] ss:$-328 sm:$0x3] %vm16_vm1, %v1200_v54   ;;  %1745 = vst.msk [vmem:[%s3598_s1 + $0x4b4] ss:$-328 sm:$0xc] %vm16_vm1, %v1200_v54  }
 0x136   :  { %v1208_v55 = vpop.permute.xlu0 %1207   ;;  %v1216_v56 = vpop.permute.xlu1 %1215  }
 0x137   :  { %1746 = vst.msk [vmem:[%s3598_s1 + $0x1a5] ss:$-328 sm:$0x3] %vm16_vm1, %v1208_v55   ;;  %1747 = vst.msk [vmem:[%s3598_s1 + $0x4b5] ss:$-328 sm:$0xc] %vm16_vm1, %v1208_v55  }
 0x138   :  { %1748 = vst.msk [vmem:[%s3598_s1 + $0x1a6] ss:$-328 sm:$0x3] %vm16_vm1, %v1216_v56   ;;  %1749 = vst.msk [vmem:[%s3598_s1 + $0x4b6] ss:$-328 sm:$0xc] %vm16_vm1, %v1216_v56  }
 0x13a   :  { %v1224_v57 = vpop.permute.xlu0 %1223   ;;  %v1232_v58 = vpop.permute.xlu1 %1231  }
 0x13b   :  { %1750 = vst.msk [vmem:[%s3598_s1 + $0x1a7] ss:$-328 sm:$0x3] %vm16_vm1, %v1224_v57   ;;  %1751 = vst.msk [vmem:[%s3598_s1 + $0x4b7] ss:$-328 sm:$0xc] %vm16_vm1, %v1224_v57  }
 0x13c   :  { %1752 = vst.msk [vmem:[%s3598_s1 + $0x60] ss:$328 sm:$0x3] %vm16_vm1, %v1232_v58   ;;  %1753 = vst.msk [vmem:[%s3598_s1 - $0x1b0] ss:$328 sm:$0xc] %vm16_vm1, %v1232_v58  }
 0x13e   :  { %v1240_v59 = vpop.permute.xlu0 %1239   ;;  %v1248_v60 = vpop.permute.xlu1 %1247  }
 0x13f   :  { %1754 = vst.msk [vmem:[%s3598_s1 + $0x61] ss:$328 sm:$0x3] %vm16_vm1, %v1240_v59   ;;  %1755 = vst.msk [vmem:[%s3598_s1 - $0x1af] ss:$328 sm:$0xc] %vm16_vm1, %v1240_v59  }
 0x140   :  { %1756 = vst.msk [vmem:[%s3598_s1 + $0x62] ss:$328 sm:$0x3] %vm16_vm1, %v1248_v60   ;;  %1757 = vst.msk [vmem:[%s3598_s1 - $0x1ae] ss:$328 sm:$0xc] %vm16_vm1, %v1248_v60  }
 0x142   :  { %v1256_v49 = vpop.permute.xlu0 %1255   ;;  %v1264_v61 = vpop.permute.xlu1 %1263  }
 0x143   :  { %1758 = vst.msk [vmem:[%s3598_s1 + $0x63] ss:$328 sm:$0x3] %vm16_vm1, %v1256_v49   ;;  %1759 = vst.msk [vmem:[%s3598_s1 - $0x1ad] ss:$328 sm:$0xc] %vm16_vm1, %v1256_v49  }
 0x144   :  { %1760 = vst.msk [vmem:[%s3598_s1 + $0x64] ss:$328 sm:$0x3] %vm16_vm1, %v1264_v61   ;;  %1761 = vst.msk [vmem:[%s3598_s1 - $0x1ac] ss:$328 sm:$0xc] %vm16_vm1, %v1264_v61  }
 0x146   :  { %v1272_v62 = vpop.permute.xlu0 %1271   ;;  %v1280_v63 = vpop.permute.xlu1 %1279  }
 0x147   :  { %1762 = vst.msk [vmem:[%s3598_s1 + $0x65] ss:$328 sm:$0x3] %vm16_vm1, %v1272_v62   ;;  %1763 = vst.msk [vmem:[%s3598_s1 - $0x1ab] ss:$328 sm:$0xc] %vm16_vm1, %v1272_v62  }
 0x148   :  { %1764 = vst.msk [vmem:[%s3598_s1 + $0x66] ss:$328 sm:$0x3] %vm16_vm1, %v1280_v63   ;;  %1765 = vst.msk [vmem:[%s3598_s1 - $0x1aa] ss:$328 sm:$0xc] %vm16_vm1, %v1280_v63  }
 0x14a   :  { %v1288_v0 = vpop.permute.xlu0 %1287   ;;  %v1296_v1 = vpop.permute.xlu1 %1295  }
 0x14b   :  { %1766 = vst.msk [vmem:[%s3598_s1 + $0x67] ss:$328 sm:$0x3] %vm16_vm1, %v1288_v0   ;;  %1767 = vst.msk [vmem:[%s3598_s1 - $0x1a9] ss:$328 sm:$0xc] %vm16_vm1, %v1288_v0  }
 0x14c   :  { %1768 = vst.msk [vmem:[%s3598_s1 + $0x68] ss:$328 sm:$0x3] %vm16_vm1, %v1296_v1   ;;  %1769 = vst.msk [vmem:[%s3598_s1 - $0x1a8] ss:$328 sm:$0xc] %vm16_vm1, %v1296_v1  }
 0x14e   :  { %v1304_v2 = vpop.permute.xlu0 %1303   ;;  %v1312_v4 = vpop.permute.xlu1 %1311  }
 0x14f   :  { %1770 = vst.msk [vmem:[%s3598_s1 + $0x69] ss:$328 sm:$0x3] %vm16_vm1, %v1304_v2   ;;  %1771 = vst.msk [vmem:[%s3598_s1 - $0x1a7] ss:$328 sm:$0xc] %vm16_vm1, %v1304_v2  }
 0x150   :  { %1772 = vst.msk [vmem:[%s3598_s1 + $0x6a] ss:$328 sm:$0x3] %vm16_vm1, %v1312_v4   ;;  %1773 = vst.msk [vmem:[%s3598_s1 - $0x1a6] ss:$328 sm:$0xc] %vm16_vm1, %v1312_v4  }
 0x152   :  { %v1320_v5 = vpop.permute.xlu0 %1319   ;;  %v1328_v6 = vpop.permute.xlu1 %1327  }
 0x153   :  { %1774 = vst.msk [vmem:[%s3598_s1 + $0x6b] ss:$328 sm:$0x3] %vm16_vm1, %v1320_v5   ;;  %1775 = vst.msk [vmem:[%s3598_s1 - $0x1a5] ss:$328 sm:$0xc] %vm16_vm1, %v1320_v5  }
 0x154   :  { %1776 = vst.msk [vmem:[%s3598_s1 + $0x6c] ss:$328 sm:$0x3] %vm16_vm1, %v1328_v6   ;;  %1777 = vst.msk [vmem:[%s3598_s1 - $0x1a4] ss:$328 sm:$0xc] %vm16_vm1, %v1328_v6  }
 0x156   :  { %v1336_v7 = vpop.permute.xlu0 %1335   ;;  %v1344_v8 = vpop.permute.xlu1 %1343  }
 0x157   :  { %1778 = vst.msk [vmem:[%s3598_s1 + $0x6d] ss:$328 sm:$0x3] %vm16_vm1, %v1336_v7   ;;  %1779 = vst.msk [vmem:[%s3598_s1 - $0x1a3] ss:$328 sm:$0xc] %vm16_vm1, %v1336_v7  }
 0x158   :  { %1780 = vst.msk [vmem:[%s3598_s1 + $0x6e] ss:$328 sm:$0x3] %vm16_vm1, %v1344_v8   ;;  %1781 = vst.msk [vmem:[%s3598_s1 - $0x1a2] ss:$328 sm:$0xc] %vm16_vm1, %v1344_v8  }
 0x15a   :  { %v1352_v9 = vpop.permute.xlu0 %1351   ;;  %v1360_v10 = vpop.permute.xlu1 %1359  }
 0x15b   :  { %1782 = vst.msk [vmem:[%s3598_s1 + $0x6f] ss:$328 sm:$0x3] %vm16_vm1, %v1352_v9   ;;  %1783 = vst.msk [vmem:[%s3598_s1 - $0x1a1] ss:$328 sm:$0xc] %vm16_vm1, %v1352_v9  }
 0x15c   :  { %1784 = vst.msk [vmem:[%s3598_s1 + $0x70] ss:$328 sm:$0x3] %vm16_vm1, %v1360_v10   ;;  %1785 = vst.msk [vmem:[%s3598_s1 - $0x1a0] ss:$328 sm:$0xc] %vm16_vm1, %v1360_v10  }
 0x15e   :  { %v1368_v11 = vpop.permute.xlu0 %1367   ;;  %v1376_v12 = vpop.permute.xlu1 %1375  }
 0x15f   :  { %1786 = vst.msk [vmem:[%s3598_s1 + $0x71] ss:$328 sm:$0x3] %vm16_vm1, %v1368_v11   ;;  %1787 = vst.msk [vmem:[%s3598_s1 - $0x19f] ss:$328 sm:$0xc] %vm16_vm1, %v1368_v11  }
 0x160   :  { %1788 = vst.msk [vmem:[%s3598_s1 + $0x72] ss:$328 sm:$0x3] %vm16_vm1, %v1376_v12   ;;  %1789 = vst.msk [vmem:[%s3598_s1 - $0x19e] ss:$328 sm:$0xc] %vm16_vm1, %v1376_v12  }
 0x162   :  { %v1384_v13 = vpop.permute.xlu0 %1383   ;;  %v1392_v14 = vpop.permute.xlu1 %1391  }
 0x163   :  { %1790 = vst.msk [vmem:[%s3598_s1 + $0x73] ss:$328 sm:$0x3] %vm16_vm1, %v1384_v13   ;;  %1791 = vst.msk [vmem:[%s3598_s1 - $0x19d] ss:$328 sm:$0xc] %vm16_vm1, %v1384_v13  }
 0x164   :  { %1792 = vst.msk [vmem:[%s3598_s1 + $0x74] ss:$328 sm:$0x3] %vm16_vm1, %v1392_v14   ;;  %1793 = vst.msk [vmem:[%s3598_s1 - $0x19c] ss:$328 sm:$0xc] %vm16_vm1, %v1392_v14  }
 0x166   :  { %v1400_v15 = vpop.permute.xlu0 %1399   ;;  %v1408_v16 = vpop.permute.xlu1 %1407  }
 0x167   :  { %1794 = vst.msk [vmem:[%s3598_s1 + $0x75] ss:$328 sm:$0x3] %vm16_vm1, %v1400_v15   ;;  %1795 = vst.msk [vmem:[%s3598_s1 - $0x19b] ss:$328 sm:$0xc] %vm16_vm1, %v1400_v15  }
 0x168   :  { %1796 = vst.msk [vmem:[%s3598_s1 + $0x76] ss:$328 sm:$0x3] %vm16_vm1, %v1408_v16   ;;  %1797 = vst.msk [vmem:[%s3598_s1 - $0x19a] ss:$328 sm:$0xc] %vm16_vm1, %v1408_v16  }
 0x16a   :  { %v1416_v17 = vpop.permute.xlu0 %1415   ;;  %v1424_v18 = vpop.permute.xlu1 %1423  }
 0x16b   :  { %1798 = vst.msk [vmem:[%s3598_s1 + $0x77] ss:$328 sm:$0x3] %vm16_vm1, %v1416_v17   ;;  %1799 = vst.msk [vmem:[%s3598_s1 - $0x199] ss:$328 sm:$0xc] %vm16_vm1, %v1416_v17  }
 0x16c   :  { %1800 = vst.msk [vmem:[%s3598_s1 + $0x1c0] ss:$-328 sm:$0x3] %vm16_vm1, %v1424_v18   ;;  %1801 = vst.msk [vmem:[%s3598_s1 + $0x4d0] ss:$-328 sm:$0xc] %vm16_vm1, %v1424_v18  }
 0x16e   :  { %v1432_v19 = vpop.permute.xlu0 %1431   ;;  %v1440_v20 = vpop.permute.xlu1 %1439  }
 0x16f   :  { %1802 = vst.msk [vmem:[%s3598_s1 + $0x1c1] ss:$-328 sm:$0x3] %vm16_vm1, %v1432_v19   ;;  %1803 = vst.msk [vmem:[%s3598_s1 + $0x4d1] ss:$-328 sm:$0xc] %vm16_vm1, %v1432_v19  }
 0x170   :  { %1804 = vst.msk [vmem:[%s3598_s1 + $0x1c2] ss:$-328 sm:$0x3] %vm16_vm1, %v1440_v20   ;;  %1805 = vst.msk [vmem:[%s3598_s1 + $0x4d2] ss:$-328 sm:$0xc] %vm16_vm1, %v1440_v20  }
 0x172   :  { %v1448_v21 = vpop.permute.xlu0 %1447   ;;  %v1456_v22 = vpop.permute.xlu1 %1455  }
 0x173   :  { %1806 = vst.msk [vmem:[%s3598_s1 + $0x1c3] ss:$-328 sm:$0x3] %vm16_vm1, %v1448_v21   ;;  %1807 = vst.msk [vmem:[%s3598_s1 + $0x4d3] ss:$-328 sm:$0xc] %vm16_vm1, %v1448_v21  }
 0x174   :  { %1808 = vst.msk [vmem:[%s3598_s1 + $0x1c4] ss:$-328 sm:$0x3] %vm16_vm1, %v1456_v22   ;;  %1809 = vst.msk [vmem:[%s3598_s1 + $0x4d4] ss:$-328 sm:$0xc] %vm16_vm1, %v1456_v22  }
 0x176   :  { %v1464_v23 = vpop.permute.xlu0 %1463   ;;  %v1472_v24 = vpop.permute.xlu1 %1471  }
 0x177   :  { %1810 = vst.msk [vmem:[%s3598_s1 + $0x1c5] ss:$-328 sm:$0x3] %vm16_vm1, %v1464_v23   ;;  %1811 = vst.msk [vmem:[%s3598_s1 + $0x4d5] ss:$-328 sm:$0xc] %vm16_vm1, %v1464_v23  }
 0x178   :  { %1812 = vst.msk [vmem:[%s3598_s1 + $0x1c6] ss:$-328 sm:$0x3] %vm16_vm1, %v1472_v24   ;;  %1813 = vst.msk [vmem:[%s3598_s1 + $0x4d6] ss:$-328 sm:$0xc] %vm16_vm1, %v1472_v24  }
 0x17a   :  { %v1480_v25 = vpop.permute.xlu0 %1479  }
 0x17b   :  { %1814 = vst.msk [vmem:[%s3598_s1 + $0x1c7] ss:$-328 sm:$0x3] %vm16_vm1, %v1480_v25   ;;  %1815 = vst.msk [vmem:[%s3598_s1 + $0x4d7] ss:$-328 sm:$0xc] %vm16_vm1, %v1480_v25  }

// kernel: sewn_convnet_forward.1
= control target key start
LH: loop header
LB: loop body
LE: loop exit
PB: predicated region body
PF: predicated region fallthrough
CT: control target
= control target key end

     0   :  { %v11946_v1 = vmov 0.0   ;;  %vm545_vm0 = vcmask 1041408   ;;  %vm546_vm1 = vcmask 1042432   ;;  %v6912_v4 = vmov 65535   ;;  %s11935_s0 = inlined_call_operand.vmem [shape: bf16[656,37], index: 0, kind: input, shape index: {}]   ;;  %s11936_s1 = inlined_call_operand.vmem [shape: f32[656,1], index: 1, kind: input, shape index: {}]   ;;  %s11937_s2 = inlined_call_operand.vmem [shape: bf16[37,8], index: 2, kind: input, shape index: {}]   ;;  %s11938_s3 = inlined_call_operand.vmem [shape: bf16[8,8], index: 3, kind: input, shape index: {}]   ;;  %s11939_s4 = inlined_call_operand.vmem [shape: f32[1,8], index: 4, kind: input, shape index: {}]   ;;  %s11940_s5 = inlined_call_operand.vmem [shape: bf16[73,16], index: 5, kind: input, shape index: {}]   ;;  %s11941_s6 = inlined_call_operand.vmem [shape: f32[16,10], index: 6, kind: input, shape index: {}]   ;;  %s11942_s7 = inlined_call_operand.vmem [shape: f32[1,10], index: 7, kind: input, shape index: {}]   ;;  %s11943_s8 = inlined_call_operand.hbm [shape: f32[2,10], index: 8, kind: output, shape index: {}]  }
   0x1   :  { %v6795_v0 = vld [vmem:[%s11937_s2] sm:$0xff]   ;;  %6257 = vmatprep.subr.bf16.mxu0 %v11946_v1  ;;  %v6796_v2 = vld [vmem:[%s11937_s2 + $0x8] sm:$0xff]   ;;  %6777 = vmatprep.subr.bf16.mxu1 %v11946_v1  ;;  %v6797_v3 = vld [vmem:[%s11937_s2 + $0x10] ss:$0 sps:$4 sm:$0x77]   ;;  %v547_v5 = vsel %vm545_vm0, 4294967295, %v6912_v4 }
   0x2   :  { %6258 = vmatpush3.bf16.msra.mxu0 %v6795_v0  ;;  %vm12093_vm2 = vmmov 0   ;;  %v1036_v6 = vld [vmem:[%s11938_s3] sm:$0xf]  ;;  %vm1168_vm3 = vcmask 1043456   ;;  %v548_v7 = vsel %vm546_vm1, %v547_v5, 0  ;;  %vm421_vm4 = vcmask 302080  }
   0x3   :  { %6259 = vmatprep.subr.bf16.mxu0 %v11946_v1  ;;  %6263 = vmatprep.mubr.msk.bf16.mxu0 %vm12093_vm2, %v11946_v1  ;;  %v1170_v8 = vsel %vm1168_vm3, %v1036_v6, 0  ;;  %v6989_v9 = vsel %vm1168_vm3, 4294967295, %v6912_v4  ;;  %v550_v10 = vand.u32 %v6797_v3, %v548_v7  ;;  %v6798_v11 = vld [vmem:[%s11935_s0] sm:$0xff]   ;;  %v6799_v12 = vld [vmem:[%s11935_s0 + $0x8] sm:$0xff]   ;;  %v6800_v13 = vld [vmem:[%s11935_s0 + $0x10] sm:$0xff]  }
   0x4   :  { %6505 = vmatprep.mubr.msk.bf16.mxu1 %vm12093_vm2, %v11946_v1  ;;  %6778 = vmatpush3.bf16.msra.mxu1 %v1170_v8  ;;  %v6801_v14 = vld [vmem:[%s11935_s0 + $0x18] sm:$0xff]   ;;  %v6802_v15 = vld [vmem:[%s11935_s0 + $0x20] sm:$0xff]  }
   0x5   :  { %6593 = vmatprep.subr.bf16.mxu1 %v11946_v1 }
   0x6   :  { %6260 = vmatpush3.bf16.msra.mxu0 %v6796_v2 }
   0x7   :  { %6261 = vmatprep.subr.bf16.mxu0 %v11946_v1 }
   0xa   :  { %6262 = vmatpush3.bf16.msra.mxu0 %v550_v10 }
   0xb   :  { %6427 = vmatprep.subr.bf16.mxu0 %v11946_v1 }
   0xd   :  { %6264 = vmatmul.mubr.msk.bf16.vlgmr.msra.gmra.mrb[0].mxu0 %vm421_vm4, %v6798_v11 }
   0xe   :  { %6428 = vmatpush3.bf16.msra.mxu0 %v1170_v8  ;;  %6267 = vmatprep.mubr.msk.bf16.mxu0 %vm12093_vm2, %v11946_v1 }
  0x15   :  { %6268 = vmatmul.mubr.msk.bf16.gmra.mrb[4].mxu0 %vm421_vm4, %v6799_v12 }
  0x16   :  { %6271 = vmatprep.mubr.msk.bf16.mxu0 %vm12093_vm2, %v11946_v1 }
  0x1d   :  { %6272 = vmatmul.mubr.msk.bf16.gmra.mrb[8].mxu0 %vm421_vm4, %v6800_v13 }
  0x1e   :  { %6275 = vmatprep.mubr.msk.bf16.mxu0 %vm12093_vm2, %v11946_v1 }
  0x25   :  { %6276 = vmatmul.mubr.msk.bf16.gmra.mrb[12].mxu0 %vm421_vm4, %v6801_v14 }
  0x26   :  { %6279 = vmatprep.mubr.msk.bf16.mxu0 %vm12093_vm2, %v11946_v1 }
  0x27   :  { %13 = vsyncpa [#allocation4], 0  ;;  %v6803_v16 = vld [vmem:[%s11935_s0 + $0x28] sm:$0xff]   ;;  %v6804_v17 = vld [vmem:[%s11935_s0 + $0x30] sm:$0xff]   ;;  %v6914_v23 = vmov 0   ;;  %vm1044_vm5 = vcmask 64512  }
  0x28   :  { %v6805_v18 = vld [vmem:[%s11935_s0 + $0x38] sm:$0xff]   ;;  %v6806_v19 = vld [vmem:[%s11935_s0 + $0x40] sm:$0xff]   ;;  %v6807_v20 = vld [vmem:[%s11935_s0 + $0x48] sm:$0xff]   ;;  %6794 = vset.pattern.permute.xlu1 %v6914_v23  ;;  %2148 = vst.msk [vmem:[#allocation2] sm:$0xff] %vm1044_vm5, %v6914_v23  ;;  %6793 = vset.pattern.permute.xlu0 %v6914_v23  ;;  %vm12039_vm6 = vsmask.f32 7424 }
  0x29   :  { %v6808_v21 = vld [vmem:[%s11935_s0 + $0x50] sm:$0xff]   ;;  %v6809_v22 = vld [vmem:[%s11935_s0 + $0x58] sm:$0xff]   ;;  %2149 = vst.msk [vmem:[#allocation2 + $0x8] sm:$0xff] %vm1044_vm5, %v6914_v23  ;;  %2150 = vst.msk [vmem:[#allocation2 + $0x158] sm:$0xff] %vm1044_vm5, %v6914_v23  ;;  %s6915_s11 = smov 8   ;;  %vm2706_vm7 = vcmask 1046528  }
  0x2a   :  { %v34_v24 = vld [vmem:[%s11936_s1 + $0x10] sm:$0xff]  ;;  %2151 = vst.msk [vmem:[#allocation2 + $0x160] sm:$0xff] %vm1044_vm5, %v6914_v23  ;;  %v6810_v25 = vld [vmem:[%s11935_s0 + $0x60] sm:$0xff]   ;;  %v35_v26 = vld [vmem:[%s11936_s1 + $0x18] sm:$0xff]  ;;  %s6916_s13 = smov 16   ;;  %s6917_s29 = smov 40  }
  0x2b   :  { %1627 = vperm.xlu1 %6794, %v34_v24   ;;  %v32_v27 = vld [vmem:[%s11936_s1] sm:$0xff]  ;;  %v37_v28 = vld [vmem:[%s11936_s1 + $0x28] sm:$0xff]  ;;  %v39_v31 = vld [vmem:[%s11936_s1 + $0x38] sm:$0xff]  ;;  %s6918_s30 = smov 24   ;;  %s6919_s9 = smov 32   ;;  %vm12038_vm8 = vcmask 1045504  }
  0x2c   :  { %1617 = vperm.xlu0 %6793, %v32_v27   ;;  %v33_v29 = vld [vmem:[%s11936_s1 + $0x8] sm:$0xff]  ;;  %v36_v32 = vld [vmem:[%s11936_s1 + $0x20] sm:$0xff]  ;;  %v38_v34 = vld [vmem:[%s11936_s1 + $0x30] sm:$0xff]  ;;  %s6920_s10 = smov 48   ;;  %s6921_s12 = smov 64   ;;  %vm3750_vm10 = vcmask 1044480  }
  0x2d   :  { %6280 = vmatmul.mubr.msk.bf16.gmra.mrb[16].mxu0 %vm421_vm4, %v6802_v15  ;;  %v6811_v30 = vld [vmem:[%s11935_s0 + $0x68] sm:$0xff]   ;;  %v6812_v35 = vld [vmem:[%s11935_s0 + $0x70] sm:$0xff]   ;;  %v43_v36 = vld [vmem:[%s11936_s1 + $0x58] sm:$0xff]  ;;  %vm12042_vm9 = vsmask.f32 6400  ;;  %s6922_s2 = smov 56  }
  0x2e   :  { %6283 = vmatprep.mubr.msk.bf16.mxu0 %vm12093_vm2, %v11946_v1  ;;  %v41_v33 = vld [vmem:[%s11936_s1 + $0x48] sm:$0xff]  ;;  %v40_v37 = vld [vmem:[%s11936_s1 + $0x40] sm:$0xff]  ;;  %v42_v39 = vld [vmem:[%s11936_s1 + $0x50] sm:$0xff]  ;;  %vm12041_vm11 = vsmask.f32 5376  ;;  %vm4003_vm12 = vcmask 130048  }
  0x2f   :  { %1632 = vperm.xlu1 %6794, %v35_v26   ;;  %v45_v38 = vld [vmem:[%s11936_s1 + $0x68] sm:$0xff]  ;;  %v6813_v40 = vld [vmem:[%s11935_s0 + $0x78] sm:$0xff]   ;;  %v44_v42 = vld [vmem:[%s11936_s1 + $0x60] sm:$0xff]  ;;  %vm4088_vm13 = vcmask 195584   ;;  %vm4173_vm14 = vcmask 261120   ;;  %vm4258_vm15 = vcmask 326656  }
  0x30   :  { %1622 = vperm.xlu0 %6793, %v33_v29   ;;  %v47_v41 = vld [vmem:[%s11936_s1 + $0x78] sm:$0xff]  ;;  %v49_v43 = vld [vmem:[%s11936_s1 + $0x88] sm:$0xff]  ;;  %v46_v44 = vld [vmem:[%s11936_s1 + $0x70] sm:$0xff]  ;;  %vm4343_vm0 = vcmask 392192   ;;  %vm4428_vm1 = vcmask 457728   ;;  %vm4513_vm3 = vcmask 523264  }
  0x31   :  { %v6814_v45 = vld [vmem:[%s11935_s0 + $0x80] sm:$0xff]   ;;  %v51_v46 = vld [vmem:[%s11936_s1 + $0x98] sm:$0xff]  ;;  %v53_v48 = vld [vmem:[%s11936_s1 + $0xa8] sm:$0xff]  ;;  %s6924_s25 = smov [#allocation3]  }
  0x32   :  { %v48_v47 = vld [vmem:[%s11936_s1 + $0x80] sm:$0xff]  ;;  %v50_v49 = vld [vmem:[%s11936_s1 + $0x90] sm:$0xff]  ;;  %v6815_v50 = vld [vmem:[%s11935_s0 + $0x88] sm:$0xff]   ;;  %s5939_s26 = sshll.u32 %s6924_s25, 4  ;;  %s5940_s26 = int_to_ptr.vmem [resolvable:$true] %s5939_s26 }
  0x33   :  { %1642 = vperm.xlu1 %6794, %v37_v28   ;;  %v55_v51 = vld [vmem:[%s11936_s1 + $0xb8] sm:$0xff]  ;;  %v52_v52 = vld [vmem:[%s11936_s1 + $0xa0] sm:$0xff]  ;;  %v57_v53 = vld [vmem:[%s11936_s1 + $0xc8] sm:$0xff]  ;;  %s6887_s27 = scalar_lea.vmem %s5940_s26, 32  ;;  %p6892_p1 = scmp.lt.s32.totalorder %s5940_s26, %s5940_s26 }
  0x34   :  { %1637 = vperm.xlu0 %6793, %v36_v32   ;;  %v54_v54 = vld [vmem:[%s11936_s1 + $0xb0] sm:$0xff]  ;;  %v59_v56 = vld [vmem:[%s11936_s1 + $0xd8] sm:$0xff]  ;;  %v56_v57 = vld [vmem:[%s11936_s1 + $0xc0] sm:$0xff]  ;;  %p6888_p0 = scmp.ne.s32.totalorder %s5940_s26, %s6887_s27  ;;  %p6893_p2 = scmp.lt.s32.totalorder %s6887_s27, %s6887_s27 }
  0x35   :  { %6284 = vmatmul.mubr.msk.bf16.gmra.mrb[20].mxu0 %vm421_vm4, %v6803_v16  ;;  %v6816_v55 = vld [vmem:[%s11935_s0 + $0x90] sm:$0xff]   ;;  %v61_v58 = vld [vmem:[%s11936_s1 + $0xe8] sm:$0xff]  ;;  %v6817_v60 = vld [vmem:[%s11935_s0 + $0x98] sm:$0xff]  }
  0x36   :  { %6287 = vmatprep.mubr.msk.bf16.mxu0 %vm12093_vm2, %v11946_v1  ;;  %v58_v59 = vld [vmem:[%s11936_s1 + $0xd0] sm:$0xff]  ;;  %v63_v61 = vld [vmem:[%s11936_s1 + $0xf8] sm:$0xff]  ;;  %v60_v62 = vld [vmem:[%s11936_s1 + $0xe0] sm:$0xff]  ;;  %p6894_p3 = por %p6893_p2, %p6892_p1 }
  0x37   :  { %1652 = vperm.xlu1 %6794, %v39_v31   ;;  %v65_v63 = vld [vmem:[%s11936_s1 + $0x108] sm:$0xff]  ;;  %v62_v0 = vld [vmem:[%s11936_s1 + $0xf0] sm:$0xff]  ;;  %v6818_v2 = vld [vmem:[%s11935_s0 + $0xa0] sm:$0xff]  }
  0x38   :  { %1647 = vperm.xlu0 %6793, %v38_v34   ;;  %v67_v3 = vld [vmem:[%s11936_s1 + $0x118] sm:$0xff]  ;;  %v2235_v4 = vld [vmem:[#allocation2] sm:$0x80]  ;;  %v7226_v7 = vld [vmem:[#allocation2 + $0x8] sm:$0xff]  ;;  %p6895_p4 = pnand %p6894_p3, %p6888_p0 }
  0x39   :  { %v2248_v5 = vshll.u32 %v2235_v4, 16  ;;  %v64_v6 = vld [vmem:[%s11936_s1 + $0x100] sm:$0xff]  ;;  %v69_v8 = vld [vmem:[%s11936_s1 + $0x128] sm:$0xff]  ;;  %v2246_v10 = vshrl.u32 %v2235_v4, 16  ;;  %v2253_v12 = vshll.u32 %v7226_v7, 16  ;;  %v66_v15 = vld [vmem:[%s11936_s1 + $0x110] sm:$0xff] }
  0x3a   :  { %v6819_v16 = vld [vmem:[%s11935_s0 + $0xa8] sm:$0xff]   ;;  %v6820_v23 = vld [vmem:[%s11935_s0 + $0xb0] sm:$0xff]   ;;  %v71_v24 = vld [vmem:[%s11936_s1 + $0x138] sm:$0xff] }
  0x3b   :  { %1662 = vperm.xlu1 %6794, %v41_v33   ;;  %v2250_v11 = vrot.slane %v2248_v5, 1  ;;  %v7235_v14 = vrot.slane %v2253_v12, 1  ;;  %v73_v26 = vld [vmem:[%s11936_s1 + $0x148] sm:$0xff]  ;;  %v74_v27 = vld [vmem:[%s11936_s1 + $0x150] sm:$0xff]  ;;  %v6821_v28 = vld [vmem:[%s11935_s0 + $0xb8] sm:$0xff]  }
  0x3c   :  { %1657 = vperm.xlu0 %6793, %v40_v37   ;;  %v75_v29 = vld [vmem:[%s11936_s1 + $0x158] sm:$0xff]  ;;  %v77_v31 = vld [vmem:[%s11936_s1 + $0x168] sm:$0xff]  ;;  %v78_v32 = vld [vmem:[%s11936_s1 + $0x170] sm:$0xff] }
  0x3d   :  { %6288 = vmatmul.mubr.msk.bf16.gmra.mrb[24].mxu0 %vm421_vm4, %v6804_v17  ;;  %v2251_v13 = vor.u32 %v2250_v11, %v2246_v10  ;;  %v6822_v33 = vld [vmem:[%s11935_s0 + $0xc0] sm:$0xff]   ;;  %v79_v34 = vld [vmem:[%s11936_s1 + $0x178] sm:$0xff]  ;;  %v82_v37 = vld [vmem:[%s11936_s1 + $0x190] sm:$0xff] }
  0x3e   :  { %6291 = vmatprep.mubr.msk.bf16.mxu0 %vm12093_vm2, %v11946_v1  ;;  %v96_v5 = vld [vmem:[%s11936_s1 + $0x200] sm:$0xff]  ;;  %v98_v11 = vld [vmem:[%s11936_s1 + $0x210] sm:$0xff] }
  0x3f   :  { %1672 = vperm.xlu1 %6794, %v43_v36   ;;  %v2256_v17 = vsel %vm12039_vm6, %v2251_v13, %v7235_v14  ;;  %v81_v36 = vld [vmem:[%s11936_s1 + $0x188] sm:$0xff] }
  0x40   :  { %1667 = vperm.xlu0 %6793, %v42_v39   ;;  %v83_v39 = vld [vmem:[%s11936_s1 + $0x198] sm:$0xff]  ;;  %v6827_v13 = vld [vmem:[%s11935_s0 + $0xe8] sm:$0xff]  }
  0x43   :  { %1682 = vperm.xlu1 %6794, %v45_v38   ;;  %v6823_v38 = vld [vmem:[%s11935_s0 + $0xc8] sm:$0xff]  }
  0x44   :  { %1677 = vperm.xlu0 %6793, %v44_v42   ;;  %v86_v42 = vld [vmem:[%s11936_s1 + $0x1b0] sm:$0xff] }
  0x45   :  { %6292 = vmatmul.mubr.msk.bf16.gmra.mrb[28].mxu0 %vm421_vm4, %v6805_v18  ;;  %v2707_v18 = vrot.slane %v2235_v4, 1 }
  0x46   :  { %6295 = vmatprep.mubr.msk.bf16.mxu0 %vm12093_vm2, %v11946_v1 }
  0x47   :  { %1692 = vperm.xlu1 %6794, %v47_v41   ;;  %v85_v41 = vld [vmem:[%s11936_s1 + $0x1a8] sm:$0xff] }
  0x48   :  { %1687 = vperm.xlu0 %6793, %v46_v44   ;;  %v87_v44 = vld [vmem:[%s11936_s1 + $0x1b8] sm:$0xff] }
  0x4b   :  { %1702 = vperm.xlu1 %6794, %v49_v43   ;;  %v6824_v43 = vld [vmem:[%s11935_s0 + $0xd0] sm:$0xff]  }
  0x4c   :  { %1697 = vperm.xlu0 %6793, %v48_v47  }
  0x4d   :  { %6296 = vmatmul.mubr.msk.bf16.gmra.mrb[32].mxu0 %vm421_vm4, %v6806_v19  ;;  %v11944_v19 = vrot.slane %v7226_v7, 1 }
  0x4e   :  { %6299 = vmatprep.mubr.msk.bf16.mxu0 %vm12093_vm2, %v11946_v1 }
  0x4f   :  { %1712 = vperm.xlu1 %6794, %v51_v46   ;;  %v89_v46 = vld [vmem:[%s11936_s1 + $0x1c8] sm:$0xff] }
  0x50   :  { %1707 = vperm.xlu0 %6793, %v50_v49  }
  0x53   :  { %1722 = vperm.xlu1 %6794, %v53_v48   ;;  %v90_v48 = vld [vmem:[%s11936_s1 + $0x1d0] sm:$0xff] }
  0x54   :  { %1717 = vperm.xlu0 %6793, %v52_v52  }
  0x55   :  { %6300 = vmatmul.mubr.msk.bf16.gmra.mrb[36].mxu0 %vm421_vm4, %v6807_v20  ;;  %v68_v20 = vld [vmem:[%s11936_s1 + $0x120] sm:$0xff] }
  0x56   :  { %6303 = vmatprep.mubr.msk.bf16.mxu0 %vm12093_vm2, %v11946_v1 }
  0x57   :  { %1732 = vperm.xlu1 %6794, %v55_v51   ;;  %v91_v51 = vld [vmem:[%s11936_s1 + $0x1d8] sm:$0xff] }
  0x58   :  { %1727 = vperm.xlu0 %6793, %v54_v54  }
  0x5b   :  { %1742 = vperm.xlu1 %6794, %v57_v53  }
  0x5c   :  { %1737 = vperm.xlu0 %6793, %v56_v57  }
  0x5d   :  { %6304 = vmatmul.mubr.msk.bf16.gmra.mrb[40].mxu0 %vm421_vm4, %v6808_v21  ;;  %v2709_v21 = vsel %vm2706_vm7, %v2707_v18, %v11944_v19 }
  0x5e   :  { %6307 = vmatprep.mubr.msk.bf16.mxu0 %vm12093_vm2, %v11946_v1 }
  0x5f   :  { %1752 = vperm.xlu1 %6794, %v59_v56   ;;  %v92_v56 = vld [vmem:[%s11936_s1 + $0x1e0] sm:$0xff] }
  0x60   :  { %1747 = vperm.xlu0 %6793, %v58_v59  }
  0x63   :  { %1762 = vperm.xlu1 %6794, %v61_v58   ;;  %v93_v58 = vld [vmem:[%s11936_s1 + $0x1e8] sm:$0xff] }
  0x64   :  { %1757 = vperm.xlu0 %6793, %v60_v62   ;;  %v6826_v62 = vld [vmem:[%s11935_s0 + $0xe0] sm:$0xff]  }
  0x65   :  { %6308 = vmatmul.mubr.msk.bf16.gmra.mrb[44].mxu0 %vm421_vm4, %v6809_v22  ;;  %v70_v22 = vld [vmem:[%s11936_s1 + $0x130] sm:$0xff] }
  0x66   :  { %6311 = vmatprep.mubr.msk.bf16.mxu0 %vm12093_vm2, %v11946_v1 }
  0x67   :  { %1772 = vperm.xlu1 %6794, %v63_v61  }
  0x68   :  { %1767 = vperm.xlu0 %6793, %v62_v0  }
  0x6b   :  { %1782 = vperm.xlu1 %6794, %v65_v63   ;;  %v95_v63 = vld [vmem:[%s11936_s1 + $0x1f8] sm:$0xff] }
  0x6c   :  { %1777 = vperm.xlu0 %6793, %v64_v6  }
  0x6d   :  { %6312 = vmatmul.mubr.msk.bf16.gmra.mrb[48].mxu0 %vm421_vm4, %v6810_v25  ;;  %v72_v25 = vld [vmem:[%s11936_s1 + $0x140] sm:$0xff] }
  0x6e   :  { %6315 = vmatprep.mubr.msk.bf16.mxu0 %vm12093_vm2, %v11946_v1 }
  0x6f   :  { %1792 = vperm.xlu1 %6794, %v67_v3  }
  0x70   :  { %1787 = vperm.xlu0 %6793, %v66_v15   ;;  %v99_v15 = vld [vmem:[%s11936_s1 + $0x218] sm:$0xff] }
  0x73   :  { %1802 = vperm.xlu1 %6794, %v69_v8   ;;  %v97_v8 = vld [vmem:[%s11936_s1 + $0x208] sm:$0xff] }
  0x74   :  { %1797 = vperm.xlu0 %6793, %v68_v20  }
  0x75   :  { %6316 = vmatmul.mubr.msk.bf16.gmra.mrb[52].mxu0 %vm421_vm4, %v6811_v30  ;;  %v76_v30 = vld [vmem:[%s11936_s1 + $0x160] sm:$0xff] }
  0x76   :  { %6319 = vmatprep.mubr.msk.bf16.mxu0 %vm12093_vm2, %v11946_v1 }
  0x77   :  { %2580 = vrot.lane.b32.xlu1 %v2256_v17, %s6915_s11 }
  0x78   :  { %1807 = vperm.xlu0 %6793, %v70_v22  }
  0x7b   :  { %2790 = vrot.lane.b32.xlu1 %v2709_v21, %s6916_s13  ;;  %v100_v21 = vld [vmem:[%s11936_s1 + $0x220] sm:$0xff] }
  0x7c   :  { %1817 = vperm.xlu0 %6793, %v72_v25   ;;  %v102_v25 = vld [vmem:[%s11936_s1 + $0x230] sm:$0xff] }
  0x7d   :  { %6320 = vmatmul.mubr.msk.bf16.gmra.mrb[56].mxu0 %vm421_vm4, %v6812_v35  ;;  %v80_v35 = vld [vmem:[%s11936_s1 + $0x180] sm:$0xff] }
  0x7e   :  { %6323 = vmatprep.mubr.msk.bf16.mxu0 %vm12093_vm2, %v11946_v1 }
  0x7f   :  { %1812 = vperm.xlu1 %6794, %v71_v24  }
  0x80   :  { %1827 = vperm.xlu0 %6793, %v74_v27   ;;  %v6828_v27 = vld [vmem:[%s11935_s0 + $0xf0] sm:$0xff]  }
  0x83   :  { %1822 = vperm.xlu1 %6794, %v73_v26  }
  0x84   :  { %1837 = vperm.xlu0 %6793, %v76_v30  }
  0x85   :  { %6324 = vmatmul.mubr.msk.bf16.gmra.mrb[60].mxu0 %vm421_vm4, %v6813_v40  ;;  %v84_v40 = vld [vmem:[%s11936_s1 + $0x1a0] sm:$0xff] }
  0x86   :  { %6327 = vmatprep.mubr.msk.bf16.mxu0 %vm12093_vm2, %v11946_v1 }
  0x87   :  { %1832 = vperm.xlu1 %6794, %v75_v29  }
  0x88   :  { %1847 = vperm.xlu0 %6793, %v78_v32  }
  0x8b   :  { %1842 = vperm.xlu1 %6794, %v77_v31  }
  0x8c   :  { %1857 = vperm.xlu0 %6793, %v80_v35   ;;  %v105_v35 = vld [vmem:[%s11936_s1 + $0x248] sm:$0xff] }
  0x8d   :  { %6328 = vmatmul.mubr.msk.bf16.gmra.mrb[64].mxu0 %vm421_vm4, %v6814_v45  ;;  %v88_v45 = vld [vmem:[%s11936_s1 + $0x1c0] sm:$0xff] }
  0x8e   :  { %6331 = vmatprep.mubr.msk.bf16.mxu0 %vm12093_vm2, %v11946_v1 }
  0x8f   :  { %1852 = vperm.xlu1 %6794, %v79_v34  }
  0x90   :  { %1867 = vperm.xlu0 %6793, %v82_v37   ;;  %v106_v37 = vld [vmem:[%s11936_s1 + $0x250] sm:$0xff] }
  0x93   :  { %1862 = vperm.xlu1 %6794, %v81_v36  }
  0x94   :  { %1877 = vperm.xlu0 %6793, %v84_v40   ;;  %v107_v40 = vld [vmem:[%s11936_s1 + $0x258] sm:$0xff] }
  0x95   :  { %6332 = vmatmul.mubr.msk.bf16.gmra.mrb[68].mxu0 %vm421_vm4, %v6815_v50  ;;  %v6825_v50 = vld [vmem:[%s11935_s0 + $0xd8] sm:$0xff]  }
  0x96   :  { %6335 = vmatprep.mubr.msk.bf16.mxu0 %vm12093_vm2, %v11946_v1 }
  0x97   :  { %1872 = vperm.xlu1 %6794, %v83_v39   ;;  %v6829_v39 = vld [vmem:[%s11935_s0 + $0xf8] sm:$0xff]  }
  0x98   :  { %1887 = vperm.xlu0 %6793, %v86_v42  }
  0x9b   :  { %1882 = vperm.xlu1 %6794, %v85_v41  }
  0x9c   :  { %1897 = vperm.xlu0 %6793, %v88_v45   ;;  %v108_v45 = vld [vmem:[%s11936_s1 + $0x260] sm:$0xff] }
  0x9d   :  { %6336 = vmatmul.mubr.msk.bf16.gmra.mrb[72].mxu0 %vm421_vm4, %v6816_v55 }
  0x9e   :  { %6339 = vmatprep.mubr.msk.bf16.mxu0 %vm12093_vm2, %v11946_v1 }
  0x9f   :  { %1892 = vperm.xlu1 %6794, %v87_v44  }
  0xa0   :  { %1907 = vperm.xlu0 %6793, %v90_v48  }
  0xa3   :  { %1902 = vperm.xlu1 %6794, %v89_v46  }
  0xa4   :  { %1917 = vperm.xlu0 %6793, %v92_v56  }
  0xa5   :  { %6340 = vmatmul.mubr.msk.bf16.gmra.mrb[76].mxu0 %vm421_vm4, %v6817_v60  ;;  %v94_v60 = vld [vmem:[%s11936_s1 + $0x1f0] sm:$0xff] }
  0xa6   :  { %6343 = vmatprep.mubr.msk.bf16.mxu0 %vm12093_vm2, %v11946_v1 }
  0xa7   :  { %1912 = vperm.xlu1 %6794, %v91_v51   ;;  %v6830_v51 = vld [vmem:[%s11935_s0 + $0x100] sm:$0xff]  }
  0xa8   :  { %1927 = vperm.xlu0 %6793, %v94_v60   ;;  %v113_v60 = vld [vmem:[%s11936_s1 + $0x288] sm:$0xff] }
  0xab   :  { %1922 = vperm.xlu1 %6794, %v93_v58   ;;  %v112_v58 = vld [vmem:[%s11936_s1 + $0x280] sm:$0xff] }
  0xac   :  { %1937 = vperm.xlu0 %6793, %v96_v5  }
  0xad   :  { %6344 = vmatmul.mubr.msk.bf16.gmra.mrb[80].mxu0 %vm421_vm4, %v6818_v2 }
  0xae   :  { %6347 = vmatprep.mubr.msk.bf16.mxu0 %vm12093_vm2, %v11946_v1 }
  0xaf   :  { %1932 = vperm.xlu1 %6794, %v95_v63   ;;  %v6831_v63 = vld [vmem:[%s11935_s0 + $0x108] sm:$0xff]  }
  0xb0   :  { %1947 = vperm.xlu0 %6793, %v98_v11   ;;  %v6832_v11 = vld [vmem:[%s11935_s0 + $0x110] sm:$0xff]  }
  0xb3   :  { %1942 = vperm.xlu1 %6794, %v97_v8  }
  0xb4   :  { %1957 = vperm.xlu0 %6793, %v100_v21   ;;  %v6833_v21 = vld [vmem:[%s11935_s0 + $0x118] sm:$0xff]  }
  0xb5   :  { %6348 = vmatmul.mubr.msk.bf16.gmra.mrb[84].mxu0 %vm421_vm4, %v6819_v16 }
  0xb6   :  { %6351 = vmatprep.mubr.msk.bf16.mxu0 %vm12093_vm2, %v11946_v1 }
  0xb7   :  { %1952 = vperm.xlu1 %6794, %v99_v15  }
  0xb8   :  { %1967 = vperm.xlu0 %6793, %v102_v25  }
  0xbd   :  { %6352 = vmatmul.mubr.msk.bf16.gmra.mrb[88].mxu0 %vm421_vm4, %v6820_v23  ;;  %v101_v23 = vld [vmem:[%s11936_s1 + $0x228] sm:$0xff] }
  0xbe   :  { %6355 = vmatprep.mubr.msk.bf16.mxu0 %vm12093_vm2, %v11946_v1  ;;  %1962 = vperm.xlu1 %6794, %v101_v23  }
  0xc5   :  { %6356 = vmatmul.mubr.msk.bf16.gmra.mrb[92].mxu0 %vm421_vm4, %v6821_v28  ;;  %v103_v28 = vld [vmem:[%s11936_s1 + $0x238] sm:$0xff] }
  0xc6   :  { %6359 = vmatprep.mubr.msk.bf16.mxu0 %vm12093_vm2, %v11946_v1  ;;  %1972 = vperm.xlu1 %6794, %v103_v28  }
  0xca   :  { %1982 = vperm.xlu1 %6794, %v105_v35  }
  0xcd   :  { %6360 = vmatmul.mubr.msk.bf16.gmra.mrb[96].mxu0 %vm421_vm4, %v6822_v33  ;;  %v104_v33 = vld [vmem:[%s11936_s1 + $0x240] sm:$0xff] }
  0xce   :  { %6363 = vmatprep.mubr.msk.bf16.mxu0 %vm12093_vm2, %v11946_v1  ;;  %1977 = vperm.xlu0 %6793, %v104_v33  }
  0xcf   :  { %1992 = vperm.xlu1 %6794, %v107_v40  }
  0xd2   :  { %1987 = vperm.xlu0 %6793, %v106_v37  }
  0xd5   :  { %6364 = vmatmul.mubr.msk.bf16.gmra.mrb[100].mxu0 %vm421_vm4, %v6823_v38 }
  0xd6   :  { %6367 = vmatprep.mubr.msk.bf16.mxu0 %vm12093_vm2, %v11946_v1  ;;  %1997 = vperm.xlu0 %6793, %v108_v45  }
  0xdd   :  { %6368 = vmatmul.mubr.msk.bf16.gmra.mrb[104].mxu0 %vm421_vm4, %v6824_v43 }
  0xde   :  { %6371 = vmatprep.mubr.msk.bf16.mxu0 %vm12093_vm2, %v11946_v1 }
  0xe0   :  { %v586_v47 = vpop.f32.mrb[0].mxu0 }
  0xe1   :  { %v6265_v49 = vpop.f32.mrb[1].mxu0  ;;  %v913_v53 = vmax.f32 %v586_v47, 0.0  ;;  %v109_v47 = vld [vmem:[%s11936_s1 + $0x268] sm:$0xff] }
  0xe2   :  { %v589_v52 = vpop.f32.mrb[2].mxu0  ;;  %2002 = vperm.xlu1 %6794, %v109_v47   ;;  %v110_v49 = vld [vmem:[%s11936_s1 + $0x270] sm:$0xff] }
  0xe3   :  { %v914_v54 = vmax.f32 %v589_v52, 0.0  ;;  %v6266_v55 = vpop.f32.mrb[3].mxu0  ;;  %2007 = vperm.xlu0 %6793, %v110_v49   ;;  %v111_v52 = vld [vmem:[%s11936_s1 + $0x278] sm:$0xff] }
  0xe5   :  { %v7359_v57 = vpack.c.bf16 %v914_v54, %v913_v53  ;;  %6372 = vmatmul.mubr.msk.bf16.gmra.mrb[108].mxu0 %vm421_vm4, %v6825_v50 }
  0xe6   :  { %6375 = vmatprep.mubr.msk.bf16.mxu0 %vm12093_vm2, %v11946_v1  ;;  %2012 = vperm.xlu1 %6794, %v111_v52  }
  0xe7   :  { %2017 = vperm.xlu0 %6793, %v112_v58  }
  0xe8   :  { %v594_v59 = vpop.f32.mrb[4].mxu0 }
  0xe9   :  { %v6269_v61 = vpop.f32.mrb[5].mxu0  ;;  %v915_v2 = vmax.f32 %v594_v59, 0.0 }
  0xea   :  { %v597_v0 = vpop.f32.mrb[6].mxu0  ;;  %2022 = vperm.xlu1 %6794, %v113_v60  }
  0xeb   :  { %v916_v3 = vmax.f32 %v597_v0, 0.0  ;;  %v6270_v4 = vpop.f32.mrb[7].mxu0 }
  0xed   :  { %v7379_v6 = vpack.c.bf16 %v916_v3, %v915_v2  ;;  %6376 = vmatmul.mubr.msk.bf16.gmra.mrb[112].mxu0 %vm421_vm4, %v6826_v62 }
  0xee   :  { %6379 = vmatprep.mubr.msk.bf16.mxu0 %vm12093_vm2, %v11946_v1 }
  0xf0   :  { %v602_v10 = vpop.f32.mrb[8].mxu0 }
  0xf1   :  { %v6273_v12 = vpop.f32.mrb[9].mxu0  ;;  %v917_v17 = vmax.f32 %v602_v10, 0.0 }
  0xf2   :  { %v605_v16 = vpop.f32.mrb[10].mxu0 }
  0xf3   :  { %v918_v18 = vmax.f32 %v605_v16, 0.0  ;;  %v6274_v20 = vpop.f32.mrb[11].mxu0 }
  0xf5   :  { %v7399_v22 = vpack.c.bf16 %v918_v18, %v917_v17  ;;  %6380 = vmatmul.mubr.msk.bf16.gmra.mrb[116].mxu0 %vm421_vm4, %v6827_v13 }
  0xf6   :  { %6383 = vmatprep.mubr.msk.bf16.mxu0 %vm12093_vm2, %v11946_v1 }
  0xf8   :  { %v610_v24 = vpop.f32.mrb[12].mxu0 }
  0xf9   :  { %v6277_v26 = vpop.f32.mrb[13].mxu0  ;;  %v919_v30 = vmax.f32 %v610_v24, 0.0 }
  0xfa   :  { %v613_v29 = vpop.f32.mrb[14].mxu0 }
  0xfb   :  { %v920_v31 = vmax.f32 %v613_v29, 0.0  ;;  %v6278_v32 = vpop.f32.mrb[15].mxu0 }
  0xfd   :  { %v7419_v34 = vpack.c.bf16 %v920_v31, %v919_v30  ;;  %6384 = vmatmul.mubr.msk.bf16.gmra.mrb[120].mxu0 %vm421_vm4, %v6828_v27  ;;  %v6834_v30 = vld [vmem:[%s11935_s0 + $0x120] sm:$0xff]  }
  0xfe   :  { %6387 = vmatprep.mubr.msk.bf16.mxu0 %vm12093_vm2, %v11946_v1 }
 0x100   :  { %v618_v36 = vpop.f32.mrb[16].mxu0 }
 0x101   :  { %v6281_v38 = vpop.f32.mrb[17].mxu0  ;;  %v921_v42 = vmax.f32 %v618_v36, 0.0 }
 0x102   :  { %v621_v41 = vpop.f32.mrb[18].mxu0 }
 0x103   :  { %v922_v43 = vmax.f32 %v621_v41, 0.0  ;;  %v6282_v44 = vpop.f32.mrb[19].mxu0 }
 0x105   :  { %v7439_v46 = vpack.c.bf16 %v922_v43, %v921_v42  ;;  %6388 = vmatmul.mubr.msk.bf16.gmra.mrb[124].mxu0 %vm421_vm4, %v6829_v39  ;;  %v6835_v39 = vld [vmem:[%s11935_s0 + $0x128] sm:$0xff]  }
 0x106   :  { %6391 = vmatprep.mubr.msk.bf16.mxu0 %vm12093_vm2, %v11946_v1 }
 0x108   :  { %v626_v48 = vpop.f32.mrb[20].mxu0 }
 0x109   :  { %v6285_v50 = vpop.f32.mrb[21].mxu0  ;;  %v923_v54 = vmax.f32 %v626_v48, 0.0  ;;  %v6836_v48 = vld [vmem:[%s11935_s0 + $0x130] sm:$0xff]  }
 0x10a   :  { %v629_v53 = vpop.f32.mrb[22].mxu0 }
 0x10b   :  { %v924_v55 = vmax.f32 %v629_v53, 0.0  ;;  %v6286_v56 = vpop.f32.mrb[23].mxu0 }
 0x10c   :  { %v6837_v56 = vld [vmem:[%s11935_s0 + $0x138] sm:$0xff]  }
 0x10d   :  { %v7459_v59 = vpack.c.bf16 %v924_v55, %v923_v54  ;;  %6392 = vmatmul.mubr.msk.bf16.gmra.mrb[128].mxu0 %vm421_vm4, %v6830_v51 }
 0x10e   :  { %6395 = vmatprep.mubr.msk.bf16.mxu0 %vm12093_vm2, %v11946_v1 }
 0x110   :  { %v634_v61 = vpop.f32.mrb[24].mxu0 }
 0x111   :  { %v6289_v62 = vpop.f32.mrb[25].mxu0  ;;  %v925_v2 = vmax.f32 %v634_v61, 0.0 }
 0x112   :  { %v637_v0 = vpop.f32.mrb[26].mxu0 }
 0x113   :  { %v926_v3 = vmax.f32 %v637_v0, 0.0  ;;  %v6290_v4 = vpop.f32.mrb[27].mxu0 }
 0x115   :  { %v7470_v5 = vpack.c.bf16 %v926_v3, %v925_v2  ;;  %6396 = vmatmul.mubr.msk.bf16.gmra.mrb[132].mxu0 %vm421_vm4, %v6831_v63  ;;  %v6838_v3 = vld [vmem:[%s11935_s0 + $0x140] sm:$0xff]  }
 0x116   :  { %6399 = vmatprep.mubr.msk.bf16.mxu0 %vm12093_vm2, %v11946_v1 }
 0x118   :  { %v642_v8 = vpop.f32.mrb[28].mxu0 }
 0x119   :  { %v6293_v10 = vpop.f32.mrb[29].mxu0  ;;  %v927_v13 = vmax.f32 %v642_v8, 0.0 }
 0x11a   :  { %v645_v12 = vpop.f32.mrb[30].mxu0 }
 0x11b   :  { %v928_v15 = vmax.f32 %v645_v12, 0.0  ;;  %v6294_v16 = vpop.f32.mrb[31].mxu0 }
 0x11d   :  { %v7478_v17 = vpack.c.bf16 %v928_v15, %v927_v13  ;;  %6400 = vmatmul.mubr.msk.bf16.gmra.mrb[136].mxu0 %vm421_vm4, %v6832_v11 }
 0x11e   :  { %6403 = vmatprep.mubr.msk.bf16.mxu0 %vm12093_vm2, %v11946_v1 }
 0x120   :  { %v650_v18 = vpop.f32.mrb[32].mxu0 }
 0x121   :  { %v6297_v20 = vpop.f32.mrb[33].mxu0  ;;  %v929_v24 = vmax.f32 %v650_v18, 0.0 }
 0x122   :  { %v653_v23 = vpop.f32.mrb[34].mxu0 }
 0x123   :  { %v930_v25 = vmax.f32 %v653_v23, 0.0  ;;  %v6298_v26 = vpop.f32.mrb[35].mxu0 }
 0x125   :  { %v7486_v27 = vpack.c.bf16 %v930_v25, %v929_v24  ;;  %6404 = vmatmul.mubr.msk.bf16.gmra.mrb[140].mxu0 %vm421_vm4, %v6833_v21 }
 0x126   :  { %6407 = vmatprep.mubr.msk.bf16.mxu0 %vm12093_vm2, %v11946_v1 }
 0x128   :  { %v658_v28 = vpop.f32.mrb[36].mxu0 }
 0x129   :  { %v6301_v29 = vpop.f32.mrb[37].mxu0  ;;  %v931_v32 = vmax.f32 %v658_v28, 0.0 }
 0x12a   :  { %v661_v31 = vpop.f32.mrb[38].mxu0 }
 0x12b   :  { %v932_v33 = vmax.f32 %v661_v31, 0.0  ;;  %v6302_v35 = vpop.f32.mrb[39].mxu0 }
 0x12d   :  { %v7494_v36 = vpack.c.bf16 %v932_v33, %v931_v32  ;;  %6408 = vmatmul.mubr.msk.bf16.gmra.mrb[144].mxu0 %vm421_vm4, %v6834_v30 }
 0x12e   :  { %6411 = vmatprep.mubr.msk.bf16.mxu0 %vm12093_vm2, %v11946_v1 }
 0x130   :  { %v666_v37 = vpop.f32.mrb[40].mxu0 }
 0x131   :  { %v6305_v38 = vpop.f32.mrb[41].mxu0  ;;  %v933_v41 = vmax.f32 %v666_v37, 0.0 }
 0x132   :  { %v669_v40 = vpop.f32.mrb[42].mxu0 }
 0x133   :  { %v934_v42 = vmax.f32 %v669_v40, 0.0  ;;  %v6306_v43 = vpop.f32.mrb[43].mxu0 }
 0x135   :  { %v7502_v44 = vpack.c.bf16 %v934_v42, %v933_v41  ;;  %6412 = vmatmul.mubr.msk.bf16.gmra.mrb[148].mxu0 %vm421_vm4, %v6835_v39 }
 0x136   :  { %6415 = vmatprep.mubr.msk.bf16.mxu0 %vm12093_vm2, %v11946_v1 }
 0x138   :  { %v674_v45 = vpop.f32.mrb[44].mxu0 }
 0x139   :  { %v6309_v47 = vpop.f32.mrb[45].mxu0  ;;  %v935_v50 = vmax.f32 %v674_v45, 0.0 }
 0x13a   :  { %v677_v49 = vpop.f32.mrb[46].mxu0 }
 0x13b   :  { %v936_v51 = vmax.f32 %v677_v49, 0.0  ;;  %v6310_v52 = vpop.f32.mrb[47].mxu0 }
 0x13d   :  { %v7510_v53 = vpack.c.bf16 %v936_v51, %v935_v50  ;;  %6416 = vmatmul.mubr.msk.bf16.gmra.mrb[152].mxu0 %vm421_vm4, %v6836_v48 }
 0x13e   :  { %6419 = vmatprep.mubr.msk.bf16.mxu0 %vm12093_vm2, %v11946_v1 }
 0x140   :  { %v682_v54 = vpop.f32.mrb[48].mxu0 }
 0x141   :  { %v6313_v55 = vpop.f32.mrb[49].mxu0  ;;  %v937_v60 = vmax.f32 %v682_v54, 0.0 }
 0x142   :  { %v685_v58 = vpop.f32.mrb[50].mxu0 }
 0x143   :  { %v938_v61 = vmax.f32 %v685_v58, 0.0  ;;  %v6314_v62 = vpop.f32.mrb[51].mxu0 }
 0x145   :  { %v7518_v63 = vpack.c.bf16 %v938_v61, %v937_v60  ;;  %6420 = vmatmul.mubr.msk.bf16.gmra.mrb[156].mxu0 %vm421_vm4, %v6837_v56 }
 0x146   :  { %6423 = vmatprep.mubr.msk.bf16.mxu0 %vm12093_vm2, %v11946_v1 }
 0x148   :  { %v690_v0 = vpop.f32.mrb[52].mxu0 }
 0x149   :  { %v6317_v2 = vpop.f32.mrb[53].mxu0  ;;  %v939_v8 = vmax.f32 %v690_v0, 0.0 }
 0x14a   :  { %v693_v4 = vpop.f32.mrb[54].mxu0 }
 0x14b   :  { %v940_v10 = vmax.f32 %v693_v4, 0.0  ;;  %v6318_v11 = vpop.f32.mrb[55].mxu0 }
 0x14d   :  { %v7526_v12 = vpack.c.bf16 %v940_v10, %v939_v8  ;;  %6424 = vmatmul.mubr.msk.bf16.gmra.mrb[160].mxu0 %vm421_vm4, %v6838_v3  ;;  %vm4598_vm4 = vcmask 588800  }
 0x14e   :  { %6429 = vmatprep.mubr.msk.bf16.mxu0 %vm12093_vm2, %v11946_v1 }
 0x150   :  { %v698_v13 = vpop.f32.mrb[56].mxu0 }
 0x151   :  { %v6321_v15 = vpop.f32.mrb[57].mxu0  ;;  %v941_v18 = vmax.f32 %v698_v13, 0.0 }
 0x152   :  { %v701_v16 = vpop.f32.mrb[58].mxu0 }
 0x153   :  { %v942_v20 = vmax.f32 %v701_v16, 0.0  ;;  %v6322_v21 = vpop.f32.mrb[59].mxu0 }
 0x155   :  { %v7531_v23 = vpack.c.bf16 %v942_v20, %v941_v18  ;;  %6430 = vmatmul.mubr.msk.bf16.vlgmr.msra.gmra.mrb[164].mxu0 %vm1044_vm5, %v7359_v57 }
 0x156   :  { %6433 = vmatprep.mubr.msk.bf16.mxu0 %vm12093_vm2, %v11946_v1 }
 0x158   :  { %v706_v24 = vpop.f32.mrb[60].mxu0 }
 0x159   :  { %v6325_v25 = vpop.f32.mrb[61].mxu0  ;;  %v943_v28 = vmax.f32 %v706_v24, 0.0 }
 0x15a   :  { %v709_v26 = vpop.f32.mrb[62].mxu0 }
 0x15b   :  { %v944_v29 = vmax.f32 %v709_v26, 0.0  ;;  %v6326_v30 = vpop.f32.mrb[63].mxu0 }
 0x15d   :  { %v7537_v31 = vpack.c.bf16 %v944_v29, %v943_v28  ;;  %6434 = vmatmul.mubr.msk.bf16.gmra.mrb[168].mxu0 %vm1044_vm5, %v7379_v6 }
 0x15e   :  { %6437 = vmatprep.mubr.msk.bf16.mxu0 %vm12093_vm2, %v11946_v1 }
 0x160   :  { %v714_v32 = vpop.f32.mrb[64].mxu0 }
 0x161   :  { %v6329_v33 = vpop.f32.mrb[65].mxu0  ;;  %v945_v35 = vmax.f32 %v714_v32, 0.0 }
 0x162   :  { %v717_v57 = vpop.f32.mrb[66].mxu0 }
 0x163   :  { %v946_v37 = vmax.f32 %v717_v57, 0.0  ;;  %v6330_v38 = vpop.f32.mrb[67].mxu0 }
 0x165   :  { %v7543_v39 = vpack.c.bf16 %v946_v37, %v945_v35  ;;  %6438 = vmatmul.mubr.msk.bf16.gmra.mrb[172].mxu0 %vm1044_vm5, %v7399_v22 }
 0x166   :  { %6441 = vmatprep.mubr.msk.bf16.mxu0 %vm12093_vm2, %v11946_v1 }
 0x168   :  { %v722_v40 = vpop.f32.mrb[68].mxu0 }
 0x169   :  { %v6333_v41 = vpop.f32.mrb[69].mxu0  ;;  %v947_v42 = vmax.f32 %v722_v40, 0.0 }
 0x16a   :  { %v725_v6 = vpop.f32.mrb[70].mxu0 }
 0x16b   :  { %v948_v43 = vmax.f32 %v725_v6, 0.0  ;;  %v6334_v45 = vpop.f32.mrb[71].mxu0 }
 0x16d   :  { %v7549_v47 = vpack.c.bf16 %v948_v43, %v947_v42  ;;  %6442 = vmatmul.mubr.msk.bf16.gmra.mrb[176].mxu0 %vm1044_vm5, %v7419_v34 }
 0x16e   :  { %6445 = vmatprep.mubr.msk.bf16.mxu0 %vm12093_vm2, %v11946_v1 }
 0x170   :  { %v730_v48 = vpop.f32.mrb[72].mxu0 }
 0x171   :  { %v6337_v49 = vpop.f32.mrb[73].mxu0  ;;  %v949_v50 = vmax.f32 %v730_v48, 0.0 }
 0x172   :  { %v733_v22 = vpop.f32.mrb[74].mxu0 }
 0x173   :  { %v950_v51 = vmax.f32 %v733_v22, 0.0  ;;  %v6338_v52 = vpop.f32.mrb[75].mxu0 }
 0x175   :  { %v7555_v54 = vpack.c.bf16 %v950_v51, %v949_v50  ;;  %6446 = vmatmul.mubr.msk.bf16.gmra.mrb[180].mxu0 %vm1044_vm5, %v7439_v46 }
 0x176   :  { %6449 = vmatprep.mubr.msk.bf16.mxu0 %vm12093_vm2, %v11946_v1 }
 0x178   :  { %v738_v55 = vpop.f32.mrb[76].mxu0 }
 0x179   :  { %v6341_v56 = vpop.f32.mrb[77].mxu0  ;;  %v951_v58 = vmax.f32 %v738_v55, 0.0 }
 0x17a   :  { %v741_v34 = vpop.f32.mrb[78].mxu0 }
 0x17b   :  { %v952_v60 = vmax.f32 %v741_v34, 0.0  ;;  %v6342_v61 = vpop.f32.mrb[79].mxu0 }
 0x17d   :  { %v1014_v62 = vpack.c.bf16 %v952_v60, %v951_v58  ;;  %6450 = vmatmul.mubr.msk.bf16.gmra.mrb[184].mxu0 %vm1044_vm5, %v7459_v59 }
 0x17e   :  { %6453 = vmatprep.mubr.msk.bf16.mxu0 %vm12093_vm2, %v11946_v1 }
 0x17f   :  { %6506 = vmatmul.mubr.msk.bf16.vlgmr.msra.gmra.mrb[0].mxu1 %vm1044_vm5, %v1014_v62 }
 0x180   :  { %v746_v0 = vpop.f32.mrb[80].mxu0  ;;  %6509 = vmatprep.mubr.msk.bf16.mxu1 %vm12093_vm2, %v11946_v1 }
 0x181   :  { %v6345_v46 = vpop.f32.mrb[81].mxu0  ;;  %v953_v3 = vmax.f32 %v746_v0, 0.0 }
 0x182   :  { %v749_v2 = vpop.f32.mrb[82].mxu0 }
 0x183   :  { %v954_v4 = vmax.f32 %v749_v2, 0.0  ;;  %v6346_v8 = vpop.f32.mrb[83].mxu0 }
 0x185   :  { %v1015_v10 = vpack.c.bf16 %v954_v4, %v953_v3  ;;  %6454 = vmatmul.mubr.msk.bf16.gmra.mrb[188].mxu0 %vm1044_vm5, %v7470_v5 }
 0x186   :  { %6457 = vmatprep.mubr.msk.bf16.mxu0 %vm12093_vm2, %v11946_v1 }
 0x187   :  { %6510 = vmatmul.mubr.msk.bf16.gmra.mrb[4].mxu1 %vm1044_vm5, %v1015_v10 }
 0x188   :  { %v754_v59 = vpop.f32.mrb[84].mxu0  ;;  %6513 = vmatprep.mubr.msk.bf16.mxu1 %vm12093_vm2, %v11946_v1 }
 0x189   :  { %v6349_v11 = vpop.f32.mrb[85].mxu0  ;;  %v955_v15 = vmax.f32 %v754_v59, 0.0 }
 0x18a   :  { %v757_v13 = vpop.f32.mrb[86].mxu0 }
 0x18b   :  { %v956_v16 = vmax.f32 %v757_v13, 0.0  ;;  %v6350_v18 = vpop.f32.mrb[87].mxu0 }
 0x18d   :  { %v1016_v20 = vpack.c.bf16 %v956_v16, %v955_v15  ;;  %6458 = vmatmul.mubr.msk.bf16.gmra.mrb[192].mxu0 %vm1044_vm5, %v7478_v17  ;;  %v7586_v17 = vpop.permute.xlu1 %1627 }
 0x18e   :  { %6461 = vmatprep.mubr.msk.bf16.mxu0 %vm12093_vm2, %v11946_v1  ;;  %12107 = vst [vmem:[#allocation6_spill] sm:$0xff] %v7586_v17 }
 0x18f   :  { %6514 = vmatmul.mubr.msk.bf16.gmra.mrb[8].mxu1 %vm1044_vm5, %v1016_v20 }
 0x190   :  { %v762_v5 = vpop.f32.mrb[88].mxu0  ;;  %6517 = vmatprep.mubr.msk.bf16.mxu1 %vm12093_vm2, %v11946_v1 }
 0x191   :  { %v6353_v21 = vpop.f32.mrb[89].mxu0  ;;  %v957_v25 = vmax.f32 %v762_v5, 0.0  ;;  %v7591_v38 = vpop.permute.xlu1 %1632 }
 0x192   :  { %v765_v24 = vpop.f32.mrb[90].mxu0  ;;  %12108 = vst [vmem:[#allocation7_spill] sm:$0xff] %v7591_v38 }
 0x193   :  { %v958_v26 = vmax.f32 %v765_v24, 0.0  ;;  %v6354_v28 = vpop.f32.mrb[91].mxu0 }
 0x195   :  { %v1017_v29 = vpack.c.bf16 %v958_v26, %v957_v25  ;;  %6462 = vmatmul.mubr.msk.bf16.gmra.mrb[196].mxu0 %vm1044_vm5, %v7486_v27  ;;  %v7600_v42 = vpop.permute.xlu1 %1642 }
 0x196   :  { %6465 = vmatprep.mubr.msk.bf16.mxu0 %vm12093_vm2, %v11946_v1  ;;  %12109 = vst [vmem:[#allocation8_spill] sm:$0xff] %v7600_v42 }
 0x197   :  { %6518 = vmatmul.mubr.msk.bf16.gmra.mrb[12].mxu1 %vm1044_vm5, %v1017_v29 }
 0x198   :  { %v770_v30 = vpop.f32.mrb[92].mxu0  ;;  %6521 = vmatprep.mubr.msk.bf16.mxu1 %vm12093_vm2, %v11946_v1 }
 0x199   :  { %v6357_v32 = vpop.f32.mrb[93].mxu0  ;;  %v959_v57 = vmax.f32 %v770_v30, 0.0  ;;  %v7611_v50 = vpop.permute.xlu1 %1652 }
 0x19a   :  { %v773_v33 = vpop.f32.mrb[94].mxu0  ;;  %12111 = vst [vmem:[#allocation10_spill] sm:$0xff] %v7611_v50 }
 0x19b   :  { %v960_v35 = vmax.f32 %v773_v33, 0.0  ;;  %v6358_v37 = vpop.f32.mrb[95].mxu0 }
 0x19d   :  { %v1018_v40 = vpack.c.bf16 %v960_v35, %v959_v57  ;;  %6466 = vmatmul.mubr.msk.bf16.gmra.mrb[200].mxu0 %vm1044_vm5, %v7494_v36  ;;  %v7607_v36 = vpop.permute.xlu0 %1617  ;;  %v7619_v60 = vpop.permute.xlu1 %1662 }
 0x19e   :  { %6469 = vmatprep.mubr.msk.bf16.mxu0 %vm12093_vm2, %v11946_v1  ;;  %12110 = vst [vmem:[#allocation9_spill] sm:$0xff] %v7607_v36  ;;  %12113 = vst [vmem:[#allocation12_spill] sm:$0xff] %v7619_v60 }
 0x19f   :  { %6522 = vmatmul.mubr.msk.bf16.gmra.mrb[16].mxu1 %vm1044_vm5, %v1018_v40 }
 0x1a0   :  { %v778_v27 = vpop.f32.mrb[96].mxu0  ;;  %6525 = vmatprep.mubr.msk.bf16.mxu1 %vm12093_vm2, %v11946_v1 }
 0x1a1   :  { %v6361_v41 = vpop.f32.mrb[97].mxu0  ;;  %v961_v43 = vmax.f32 %v778_v27, 0.0 }
 0x1a2   :  { %v781_v6 = vpop.f32.mrb[98].mxu0 }
 0x1a3   :  { %v962_v45 = vmax.f32 %v781_v6, 0.0  ;;  %v6362_v48 = vpop.f32.mrb[99].mxu0 }
 0x1a5   :  { %v1019_v49 = vpack.c.bf16 %v962_v45, %v961_v43  ;;  %6470 = vmatmul.mubr.msk.bf16.gmra.mrb[204].mxu0 %vm1044_vm5, %v7502_v44  ;;  %v7615_v44 = vpop.permute.xlu0 %1622 }
 0x1a6   :  { %6473 = vmatprep.mubr.msk.bf16.mxu0 %vm12093_vm2, %v11946_v1  ;;  %12112 = vst [vmem:[#allocation11_spill] sm:$0xff] %v7615_v44 }
 0x1a7   :  { %6526 = vmatmul.mubr.msk.bf16.gmra.mrb[20].mxu1 %vm1044_vm5, %v1019_v49 }
 0x1a8   :  { %v786_v22 = vpop.f32.mrb[100].mxu0  ;;  %6529 = vmatprep.mubr.msk.bf16.mxu1 %vm12093_vm2, %v11946_v1 }
 0x1a9   :  { %v6365_v51 = vpop.f32.mrb[101].mxu0  ;;  %v963_v55 = vmax.f32 %v786_v22, 0.0  ;;  %v7624_v4 = vpop.permute.xlu0 %1637 }
 0x1aa   :  { %v789_v52 = vpop.f32.mrb[102].mxu0  ;;  %12114 = vst [vmem:[#allocation13_spill] sm:$0xff] %v7624_v4 }
 0x1ab   :  { %v964_v56 = vmax.f32 %v789_v52, 0.0  ;;  %v6366_v34 = vpop.f32.mrb[103].mxu0 }
 0x1ad   :  { %v1020_v58 = vpack.c.bf16 %v964_v56, %v963_v55  ;;  %6474 = vmatmul.mubr.msk.bf16.gmra.mrb[208].mxu0 %vm1044_vm5, %v7510_v53  ;;  %v7626_v53 = vpop.permute.xlu1 %1672  ;;  %v7635_v11 = vpop.permute.xlu0 %1647 }
 0x1ae   :  { %6477 = vmatprep.mubr.msk.bf16.mxu0 %vm12093_vm2, %v11946_v1  ;;  %12115 = vst [vmem:[#allocation14_spill] sm:$0xff] %v7626_v53  ;;  %12116 = vst [vmem:[#allocation15_spill] sm:$0xff] %v7635_v11 }
 0x1af   :  { %6530 = vmatmul.mubr.msk.bf16.gmra.mrb[24].mxu1 %vm1044_vm5, %v1020_v58 }
 0x1b0   :  { %v794_v61 = vpop.f32.mrb[104].mxu0  ;;  %6533 = vmatprep.mubr.msk.bf16.mxu1 %vm12093_vm2, %v11946_v1 }
 0x1b1   :  { %v6369_v62 = vpop.f32.mrb[105].mxu0  ;;  %v965_v46 = vmax.f32 %v794_v61, 0.0  ;;  %v7637_v15 = vpop.permute.xlu1 %1682 }
 0x1b2   :  { %v797_v0 = vpop.f32.mrb[106].mxu0  ;;  %12117 = vst [vmem:[#allocation16_spill] sm:$0xff] %v7637_v15 }
 0x1b3   :  { %v966_v2 = vmax.f32 %v797_v0, 0.0  ;;  %v6370_v3 = vpop.f32.mrb[107].mxu0 }
 0x1b5   :  { %v1021_v8 = vpack.c.bf16 %v966_v2, %v965_v46  ;;  %6478 = vmatmul.mubr.msk.bf16.gmra.mrb[212].mxu0 %vm1044_vm5, %v7518_v63  ;;  %v7644_v63 = vpop.permute.xlu0 %1657  ;;  %v7648_v24 = vpop.permute.xlu1 %1692 }
 0x1b6   :  { %6481 = vmatprep.mubr.msk.bf16.mxu0 %vm12093_vm2, %v11946_v1  ;;  %12118 = vst [vmem:[#allocation17_spill] sm:$0xff] %v7644_v63  ;;  %12119 = vst [vmem:[#allocation18_spill] sm:$0xff] %v7648_v24 }
 0x1b7   :  { %6534 = vmatmul.mubr.msk.bf16.gmra.mrb[28].mxu1 %vm1044_vm5, %v1021_v8 }
 0x1b8   :  { %v802_v10 = vpop.f32.mrb[108].mxu0  ;;  %6537 = vmatprep.mubr.msk.bf16.mxu1 %vm12093_vm2, %v11946_v1 }
 0x1b9   :  { %v6373_v59 = vpop.f32.mrb[109].mxu0  ;;  %v967_v16 = vmax.f32 %v802_v10, 0.0  ;;  %v7656_v33 = vpop.permute.xlu1 %1702 }
 0x1ba   :  { %v805_v13 = vpop.f32.mrb[110].mxu0  ;;  %12121 = vst [vmem:[#allocation20_spill] sm:$0xff] %v7656_v33 }
 0x1bb   :  { %v968_v18 = vmax.f32 %v805_v13, 0.0  ;;  %v6374_v20 = vpop.f32.mrb[111].mxu0 }
 0x1bd   :  { %v1022_v5 = vpack.c.bf16 %v968_v18, %v967_v16  ;;  %6482 = vmatmul.mubr.msk.bf16.gmra.mrb[216].mxu0 %vm1044_vm5, %v7526_v12  ;;  %v7652_v12 = vpop.permute.xlu0 %1667 }
 0x1be   :  { %6485 = vmatprep.mubr.msk.bf16.mxu0 %vm12093_vm2, %v11946_v1  ;;  %12120 = vst [vmem:[#allocation19_spill] sm:$0xff] %v7652_v12 }
 0x1bf   :  { %6538 = vmatmul.mubr.msk.bf16.gmra.mrb[32].mxu1 %vm1044_vm5, %v1022_v5 }
 0x1c0   :  { %v810_v21 = vpop.f32.mrb[112].mxu0  ;;  %6541 = vmatprep.mubr.msk.bf16.mxu1 %vm12093_vm2, %v11946_v1 }
 0x1c1   :  { %v6377_v25 = vpop.f32.mrb[113].mxu0  ;;  %v969_v28 = vmax.f32 %v810_v21, 0.0  ;;  %v7661_v6 = vpop.permute.xlu0 %1677 }
 0x1c2   :  { %v813_v26 = vpop.f32.mrb[114].mxu0  ;;  %12122 = vst [vmem:[#allocation21_spill] sm:$0xff] %v7661_v6 }
 0x1c3   :  { %v970_v29 = vmax.f32 %v813_v26, 0.0  ;;  %v6378_v30 = vpop.f32.mrb[115].mxu0 }
 0x1c5   :  { %v1023_v32 = vpack.c.bf16 %v970_v29, %v969_v28  ;;  %6486 = vmatmul.mubr.msk.bf16.gmra.mrb[220].mxu0 %vm1044_vm5, %v7531_v23  ;;  %v7663_v23 = vpop.permute.xlu1 %1712  ;;  %v7672_v49 = vpop.permute.xlu0 %1687 }
 0x1c6   :  { %6489 = vmatprep.mubr.msk.bf16.mxu0 %vm12093_vm2, %v11946_v1  ;;  %12123 = vst [vmem:[#allocation22_spill] sm:$0xff] %v7663_v23  ;;  %12124 = vst [vmem:[#allocation23_spill] sm:$0xff] %v7672_v49 }
 0x1c7   :  { %6542 = vmatmul.mubr.msk.bf16.gmra.mrb[36].mxu1 %vm1044_vm5, %v1023_v32 }
 0x1c8   :  { %v818_v57 = vpop.f32.mrb[116].mxu0  ;;  %6545 = vmatprep.mubr.msk.bf16.mxu1 %vm12093_vm2, %v11946_v1 }
 0x1c9   :  { %v6381_v35 = vpop.f32.mrb[117].mxu0  ;;  %v971_v40 = vmax.f32 %v818_v57, 0.0  ;;  %v7674_v51 = vpop.permute.xlu1 %1722 }
 0x1ca   :  { %v821_v37 = vpop.f32.mrb[118].mxu0  ;;  %12125 = vst [vmem:[#allocation24_spill] sm:$0xff] %v7674_v51 }
 0x1cb   :  { %v972_v27 = vmax.f32 %v821_v37, 0.0  ;;  %v6382_v41 = vpop.f32.mrb[119].mxu0 }
 0x1cd   :  { %v1024_v43 = vpack.c.bf16 %v972_v27, %v971_v40  ;;  %6490 = vmatmul.mubr.msk.bf16.gmra.mrb[224].mxu0 %vm1044_vm5, %v7537_v31  ;;  %v7681_v31 = vpop.permute.xlu0 %1697  ;;  %v7685_v61 = vpop.permute.xlu1 %1732 }
 0x1ce   :  { %6493 = vmatprep.mubr.msk.bf16.mxu0 %vm12093_vm2, %v11946_v1  ;;  %12126 = vst [vmem:[#allocation25_spill] sm:$0xff] %v7681_v31  ;;  %12127 = vst [vmem:[#allocation26_spill] sm:$0xff] %v7685_v61 }
 0x1cf   :  { %6546 = vmatmul.mubr.msk.bf16.gmra.mrb[40].mxu1 %vm1044_vm5, %v1024_v43 }
 0x1d0   :  { %v826_v45 = vpop.f32.mrb[120].mxu0  ;;  %6549 = vmatprep.mubr.msk.bf16.mxu1 %vm12093_vm2, %v11946_v1 }
 0x1d1   :  { %v6385_v48 = vpop.f32.mrb[121].mxu0  ;;  %v973_v52 = vmax.f32 %v826_v45, 0.0  ;;  %v7693_v10 = vpop.permute.xlu1 %1742 }
 0x1d2   :  { %v829_v22 = vpop.f32.mrb[122].mxu0  ;;  %12129 = vst [vmem:[#allocation28_spill] sm:$0xff] %v7693_v10 }
 0x1d3   :  { %v974_v55 = vmax.f32 %v829_v22, 0.0  ;;  %v6386_v56 = vpop.f32.mrb[123].mxu0 }
 0x1d5   :  { %v1025_v34 = vpack.c.bf16 %v974_v55, %v973_v52  ;;  %6494 = vmatmul.mubr.msk.bf16.gmra.mrb[228].mxu0 %vm1044_vm5, %v7543_v39  ;;  %v7689_v39 = vpop.permute.xlu0 %1707 }
 0x1d6   :  { %6497 = vmatprep.mubr.msk.bf16.mxu0 %vm12093_vm2, %v11946_v1  ;;  %12128 = vst [vmem:[#allocation27_spill] sm:$0xff] %v7689_v39 }
 0x1d7   :  { %6550 = vmatmul.mubr.msk.bf16.gmra.mrb[44].mxu1 %vm1044_vm5, %v1025_v34 }
 0x1d8   :  { %v834_v58 = vpop.f32.mrb[124].mxu0  ;;  %6553 = vmatprep.mubr.msk.bf16.mxu1 %vm12093_vm2, %v11946_v1 }
 0x1d9   :  { %v6389_v62 = vpop.f32.mrb[125].mxu0  ;;  %v975_v46 = vmax.f32 %v834_v58, 0.0  ;;  %v7698_v21 = vpop.permute.xlu0 %1717 }
 0x1da   :  { %v837_v0 = vpop.f32.mrb[126].mxu0  ;;  %12130 = vst [vmem:[#allocation29_spill] sm:$0xff] %v7698_v21 }
 0x1db   :  { %v976_v2 = vmax.f32 %v837_v0, 0.0  ;;  %v6390_v3 = vpop.f32.mrb[127].mxu0 }
 0x1dd   :  { %v1026_v8 = vpack.c.bf16 %v976_v2, %v975_v46  ;;  %6498 = vmatmul.mubr.msk.bf16.gmra.mrb[232].mxu0 %vm1044_vm5, %v7549_v47  ;;  %v7700_v47 = vpop.permute.xlu1 %1752  ;;  %v7709_v29 = vpop.permute.xlu0 %1727 }
 0x1de   :  { %6501 = vmatprep.mubr.msk.bf16.mxu0 %vm12093_vm2, %v11946_v1  ;;  %12131 = vst [vmem:[#allocation30_spill] sm:$0xff] %v7700_v47  ;;  %12132 = vst [vmem:[#allocation31_spill] sm:$0xff] %v7709_v29 }
 0x1df   :  { %6554 = vmatmul.mubr.msk.bf16.gmra.mrb[48].mxu1 %vm1044_vm5, %v1026_v8 }
 0x1e0   :  { %v842_v59 = vpop.f32.mrb[128].mxu0  ;;  %6557 = vmatprep.mubr.msk.bf16.mxu1 %vm12093_vm2, %v11946_v1 }
 0x1e1   :  { %v6393_v13 = vpop.f32.mrb[129].mxu0  ;;  %v977_v18 = vmax.f32 %v842_v59, 0.0  ;;  %v7711_v32 = vpop.permute.xlu1 %1762 }
 0x1e2   :  { %v845_v16 = vpop.f32.mrb[130].mxu0  ;;  %12133 = vst [vmem:[#allocation32_spill] sm:$0xff] %v7711_v32 }
 0x1e3   :  { %v978_v20 = vmax.f32 %v845_v16, 0.0  ;;  %v6394_v5 = vpop.f32.mrb[131].mxu0 }
 0x1e5   :  { %v1027_v25 = vpack.c.bf16 %v978_v20, %v977_v18  ;;  %6502 = vmatmul.mubr.msk.bf16.gmra.mrb[236].mxu0 %vm1044_vm5, %v7555_v54  ;;  %v7714_v54 = vpop.permute.xlu0 %1737  ;;  %v7718_v41 = vpop.permute.xlu1 %1772 }
 0x1e6   :  { %6771 = vmatprep.mubr.msk.f32.mxu0 %vm12093_vm2, %v11946_v1  ;;  %12134 = vst [vmem:[#allocation33_spill] sm:$0xff] %v7714_v54  ;;  %12135 = vst [vmem:[#allocation34_spill] sm:$0xff] %v7718_v41 }
 0x1e7   :  { %6558 = vmatmul.mubr.msk.bf16.gmra.mrb[52].mxu1 %vm1044_vm5, %v1027_v25 }
 0x1e8   :  { %v850_v26 = vpop.f32.mrb[132].mxu0  ;;  %6561 = vmatprep.mubr.msk.bf16.mxu1 %vm12093_vm2, %v11946_v1 }
 0x1e9   :  { %v6397_v28 = vpop.f32.mrb[133].mxu0  ;;  %v979_v57 = vmax.f32 %v850_v26, 0.0  ;;  %v7720_v56 = vpop.permute.xlu0 %1747 }
 0x1ea   :  { %v853_v30 = vpop.f32.mrb[134].mxu0  ;;  %12136 = vst [vmem:[#allocation35_spill] sm:$0xff] %v7720_v56  ;;  %v7722_v34 = vpop.permute.xlu1 %1782 }
 0x1eb   :  { %v980_v35 = vmax.f32 %v853_v30, 0.0  ;;  %v6398_v37 = vpop.f32.mrb[135].mxu0  ;;  %12137 = vst [vmem:[#allocation36_spill] sm:$0xff] %v7722_v34 }
 0x1ed   :  { %v1028_v40 = vpack.c.bf16 %v980_v35, %v979_v57  ;;  %v7727_v8 = vpop.permute.xlu0 %1757 }
 0x1ee   :  { %12138 = vst [vmem:[#allocation37_spill] sm:$0xff] %v7727_v8  ;;  %v7729_v59 = vpop.permute.xlu1 %1792 }
 0x1ef   :  { %6562 = vmatmul.mubr.msk.bf16.gmra.mrb[56].mxu1 %vm1044_vm5, %v1028_v40  ;;  %12139 = vst [vmem:[#allocation38_spill] sm:$0xff] %v7729_v59  ;;  %v2237_v59 = vld [vmem:[#allocation2 + $0x8] sm:$0x80] }
 0x1f0   :  { %v858_v27 = vpop.f32.mrb[136].mxu0  ;;  %6565 = vmatprep.mubr.msk.bf16.mxu1 %vm12093_vm2, %v11946_v1 }
 0x1f1   :  { %v6401_v43 = vpop.f32.mrb[137].mxu0  ;;  %v981_v48 = vmax.f32 %v858_v27, 0.0  ;;  %v7734_v20 = vpop.permute.xlu0 %1767 }
 0x1f2   :  { %v861_v45 = vpop.f32.mrb[138].mxu0  ;;  %12140 = vst [vmem:[#allocation39_spill] sm:$0xff] %v7734_v20  ;;  %v7736_v25 = vpop.permute.xlu1 %1802 }
 0x1f3   :  { %v982_v22 = vmax.f32 %v861_v45, 0.0  ;;  %v6402_v52 = vpop.f32.mrb[139].mxu0  ;;  %12141 = vst [vmem:[#allocation40_spill] sm:$0xff] %v7736_v25 }
 0x1f5   :  { %v1029_v55 = vpack.c.bf16 %v982_v22, %v981_v48  ;;  %v7739_v35 = vpop.permute.xlu0 %1777 }
 0x1f6   :  { %12142 = vst [vmem:[#allocation41_spill] sm:$0xff] %v7739_v35  ;;  %v7743_v40 = vpop.permute.xlu1 %2580 }
 0x1f7   :  { %6566 = vmatmul.mubr.msk.bf16.gmra.mrb[60].mxu1 %vm1044_vm5, %v1029_v55  ;;  %12143 = vst [vmem:[#allocation42_spill] sm:$0xff] %v7743_v40 }
 0x1f8   :  { %v866_v58 = vpop.f32.mrb[140].mxu0  ;;  %6569 = vmatprep.mubr.msk.bf16.mxu1 %vm12093_vm2, %v11946_v1 }
 0x1f9   :  { %v6405_v62 = vpop.f32.mrb[141].mxu0  ;;  %v983_v46 = vmax.f32 %v866_v58, 0.0  ;;  %v7745_v55 = vpop.permute.xlu0 %1787 }
 0x1fa   :  { %v869_v0 = vpop.f32.mrb[142].mxu0  ;;  %12144 = vst [vmem:[#allocation43_spill] sm:$0xff] %v7745_v55  ;;  %v7747_v58 = vpop.permute.xlu1 %2790 }
 0x1fb   :  { %v984_v2 = vmax.f32 %v869_v0, 0.0  ;;  %v6406_v3 = vpop.f32.mrb[143].mxu0  ;;  %12145 = vst [vmem:[#allocation44_spill] sm:$0xff] %v7747_v58 }
 0x1fd   :  { %v1030_v13 = vpack.c.bf16 %v984_v2, %v983_v46 }
 0x1ff   :  { %6570 = vmatmul.mubr.msk.bf16.gmra.mrb[64].mxu1 %vm1044_vm5, %v1030_v13 }
 0x200   :  { %v874_v16 = vpop.f32.mrb[144].mxu0  ;;  %6573 = vmatprep.mubr.msk.bf16.mxu1 %vm12093_vm2, %v11946_v1 }
 0x201   :  { %v6409_v18 = vpop.f32.mrb[145].mxu0  ;;  %v985_v26 = vmax.f32 %v874_v16, 0.0  ;;  %v7752_v16 = vpop.permute.xlu0 %1797 }
 0x202   :  { %v877_v5 = vpop.f32.mrb[146].mxu0  ;;  %12146 = vst [vmem:[#allocation45_spill] sm:$0xff] %v7752_v16  ;;  %v7754_v18 = vpop.permute.xlu1 %1812 }
 0x203   :  { %v986_v28 = vmax.f32 %v877_v5, 0.0  ;;  %v6410_v30 = vpop.f32.mrb[147].mxu0  ;;  %12147 = vst [vmem:[#allocation46_spill] sm:$0xff] %v7754_v18 }
 0x205   :  { %v1031_v57 = vpack.c.bf16 %v986_v28, %v985_v26  ;;  %v7759_v30 = vpop.permute.xlu0 %1807 }
 0x206   :  { %12148 = vst [vmem:[#allocation47_spill] sm:$0xff] %v7759_v30 }
 0x207   :  { %6574 = vmatmul.mubr.msk.bf16.gmra.mrb[68].mxu1 %vm1044_vm5, %v1031_v57 }
 0x208   :  { %v882_v37 = vpop.f32.mrb[148].mxu0  ;;  %6577 = vmatprep.mubr.msk.bf16.mxu1 %vm12093_vm2, %v11946_v1 }
 0x209   :  { %v6413_v27 = vpop.f32.mrb[149].mxu0  ;;  %v987_v45 = vmax.f32 %v882_v37, 0.0  ;;  %v7761_v37 = vpop.permute.xlu1 %1822 }
 0x20a   :  { %v885_v43 = vpop.f32.mrb[150].mxu0  ;;  %12149 = vst [vmem:[#allocation48_spill] sm:$0xff] %v7761_v37 }
 0x20b   :  { %v988_v48 = vmax.f32 %v885_v43, 0.0  ;;  %v6414_v22 = vpop.f32.mrb[151].mxu0 }
 0x20c   :  { %v7764_v22 = vpop.permute.xlu0 %1817 }
 0x20d   :  { %v1032_v52 = vpack.c.bf16 %v988_v48, %v987_v45  ;;  %12150 = vst [vmem:[#allocation49_spill] sm:$0xff] %v7764_v22 }
 0x20f   :  { %6578 = vmatmul.mubr.msk.bf16.gmra.mrb[72].mxu1 %vm1044_vm5, %v1032_v52 }
 0x210   :  { %v890_v62 = vpop.f32.mrb[152].mxu0  ;;  %6581 = vmatprep.mubr.msk.bf16.mxu1 %vm12093_vm2, %v11946_v1 }
 0x211   :  { %v6417_v0 = vpop.f32.mrb[153].mxu0  ;;  %v989_v2 = vmax.f32 %v890_v62, 0.0  ;;  %v7768_v62 = vpop.permute.xlu1 %1832 }
 0x212   :  { %v893_v46 = vpop.f32.mrb[154].mxu0  ;;  %12151 = vst [vmem:[#allocation50_spill] sm:$0xff] %v7768_v62 }
 0x213   :  { %v990_v3 = vmax.f32 %v893_v46, 0.0  ;;  %v6418_v13 = vpop.f32.mrb[155].mxu0 }
 0x215   :  { %v1033_v5 = vpack.c.bf16 %v990_v3, %v989_v2 }
 0x217   :  { %6582 = vmatmul.mubr.msk.bf16.gmra.mrb[76].mxu1 %vm1044_vm5, %v1033_v5 }
 0x218   :  { %v898_v26 = vpop.f32.mrb[156].mxu0  ;;  %6585 = vmatprep.mubr.msk.bf16.mxu1 %vm12093_vm2, %v11946_v1 }
 0x219   :  { %v6421_v28 = vpop.f32.mrb[157].mxu0  ;;  %v991_v27 = vmax.f32 %v898_v26, 0.0  ;;  %v7770_v26 = vpop.permute.xlu0 %1827 }
 0x21a   :  { %v901_v57 = vpop.f32.mrb[158].mxu0  ;;  %12152 = vst [vmem:[#allocation51_spill] sm:$0xff] %v7770_v26  ;;  %v7775_v28 = vld [vmem:[%s11939_s4] ss:$0 sm:$0xff] }
 0x21b   :  { %v992_v43 = vmax.f32 %v901_v57, 0.0  ;;  %v6422_v45 = vpop.f32.mrb[159].mxu0  ;;  %v7777_v57 = vpop.permute.xlu1 %1842 }
 0x21c   :  { %12153 = vst [vmem:[#allocation52_spill] sm:$0xff] %v7777_v57 }
 0x21d   :  { %v1034_v48 = vpack.c.bf16 %v992_v43, %v991_v27 }
 0x21f   :  { %6586 = vmatmul.mubr.msk.bf16.gmra.mrb[80].mxu1 %vm1044_vm5, %v1034_v48 }
 0x220   :  { %v906_v52 = vpop.f32.mrb[160].mxu0  ;;  %6589 = vmatprep.mubr.msk.bf16.mxu1 %vm12093_vm2, %v11946_v1 }
 0x221   :  { %v6425_v0 = vpop.f32.mrb[161].mxu0  ;;  %v993_v2 = vmax.f32 %v906_v52, 0.0 }
 0x222   :  { %v909_v46 = vpop.f32.mrb[162].mxu0 }
 0x223   :  { %v994_v3 = vmax.f32 %v909_v46, 0.0  ;;  %v6426_v13 = vpop.f32.mrb[163].mxu0 }
 0x225   :  { %v1035_v5 = vpack.c.bf16 %v994_v3, %v993_v2  ;;  %v7784_v2 = vpop.permute.xlu0 %1837  ;;  %v7786_v3 = vpop.permute.xlu1 %1852 }
 0x226   :  { %12154 = vst [vmem:[#allocation53_spill] sm:$0xff] %v7784_v2  ;;  %12155 = vst [vmem:[#allocation54_spill] sm:$0xff] %v7786_v3 }
 0x227   :  { %6590 = vmatmul.mubr.msk.bf16.gmra.mrb[84].mxu1 %vm1044_vm5, %v1035_v5 }
 0x228   :  { %v1206_v27 = vpop.f32.mrb[164].mxu0  ;;  %6603 = vmatprep.mubr.msk.bf16.mxu1 %vm12093_vm2, %v11946_v1 }
 0x229   :  { %v1207_v43 = vadd.f32 %v7775_v28, %v1206_v27  ;;  %v6431_v45 = vpop.f32.mrb[165].mxu0  ;;  %v7793_v16 = vpop.permute.xlu1 %1862 }
 0x22a   :  { %v1209_v48 = vpop.f32.mrb[166].mxu0  ;;  %v7791_v45 = vpop.permute.xlu0 %1847  ;;  %12157 = vst [vmem:[#allocation56_spill] sm:$0xff] %v7793_v16 }
 0x22b   :  { %v1533_v52 = vmax.f32 %v1207_v43, 0.0  ;;  %v1210_v0 = vadd.f32 %v7775_v28, %v1209_v48  ;;  %v6432_v46 = vpop.f32.mrb[167].mxu0  ;;  %12156 = vst [vmem:[#allocation55_spill] sm:$0xff] %v7791_v45 }
 0x22d   :  { %v1534_v13 = vmax.f32 %v1210_v0, 0.0  ;;  %v2025_v19 = vmul.f32 %v7607_v36, %v1533_v52 }
 0x22f   :  { %v2026_v5 = vmul.f32 %v7615_v44, %v1534_v13 }
 0x230   :  { %v1214_v58 = vpop.f32.mrb[168].mxu0 }
 0x231   :  { %v2107_v25 = vpack.c.bf16 %v2026_v5, %v2025_v19  ;;  %v1215_v1 = vadd.f32 %v7775_v28, %v1214_v58  ;;  %v6435_v27 = vpop.f32.mrb[169].mxu0  ;;  %v7799_v19 = vpop.permute.xlu0 %1857 }
 0x232   :  { %v1217_v43 = vpop.f32.mrb[170].mxu0  ;;  %12158 = vst [vmem:[#allocation57_spill] sm:$0xff] %v7799_v19  ;;  %v7801_v5 = vpop.permute.xlu1 %1872 }
 0x233   :  { %2152 = vst.msk [vmem:[#allocation2 + $0x10] sm:$0xff] %vm1044_vm5, %v2107_v25  ;;  %v1535_v48 = vmax.f32 %v1215_v1, 0.0  ;;  %v1218_v46 = vadd.f32 %v7775_v28, %v1217_v43  ;;  %v6436_v0 = vpop.f32.mrb[171].mxu0  ;;  %12159 = vst [vmem:[#allocation58_spill] sm:$0xff] %v7801_v5  ;;  %v6844_v25 = vld [vmem:[#allocation2 + $0x8] sm:$0xff] }
 0x234   :  { %v2257_v1 = vshrl.u32 %v6844_v25, 16  ;;  %v12160_v25 = vrot.slane %v7226_v7, 1 }
 0x235   :  { %v1536_v40 = vmax.f32 %v1218_v46, 0.0  ;;  %v2027_v52 = vmul.f32 %v7586_v17, %v1535_v48 }
 0x237   :  { %v2028_v13 = vmul.f32 %v7591_v38, %v1536_v40 }
 0x238   :  { %v1222_v58 = vpop.f32.mrb[172].mxu0 }
 0x239   :  { %v2108_v27 = vpack.c.bf16 %v2028_v13, %v2027_v52  ;;  %v1223_v44 = vadd.f32 %v7775_v28, %v1222_v58  ;;  %v6439_v36 = vpop.f32.mrb[173].mxu0  ;;  %v2876_v52 = vrot.slane %v2237_v59, 1  ;;  %v7822_v59 = vpop.permute.xlu1 %1882 }
 0x23a   :  { %v1225_v55 = vpop.f32.mrb[174].mxu0  ;;  %v7804_v43 = vld [vmem:[#allocation2 + $0x10] sm:$0xff]  ;;  %12162 = vst [vmem:[#allocation60_spill] sm:$0xff] %v7822_v59 }
 0x23b   :  { %2153 = vst.msk [vmem:[#allocation2 + $0x18] sm:$0xff] %vm1044_vm5, %v2108_v27  ;;  %v1537_v48 = vmax.f32 %v1223_v44, 0.0  ;;  %v1226_v40 = vadd.f32 %v7775_v28, %v1225_v55  ;;  %v6440_v46 = vpop.f32.mrb[175].mxu0  ;;  %v3224_v0 = vrot.slane %v7804_v43, 2  ;;  %v2710_v38 = vrot.slane %v7804_v43, 1  ;;  %v7817_v27 = vpop.permute.xlu0 %1867 }
 0x23c   :  { %v2261_v13 = vshll.u32 %v7804_v43, 16  ;;  %v2259_v55 = vor.u32 %v2257_v1, %v7235_v14  ;;  %12161 = vst [vmem:[#allocation59_spill] sm:$0xff] %v7817_v27  ;;  %v12163_v17 = vshrl.u32 %v7804_v43, 16 }
 0x23d   :  { %v1538_v58 = vmax.f32 %v1226_v40, 0.0  ;;  %3307 = vrot.lane.b32.xlu1 %v3224_v0, %s6917_s29  ;;  %v2711_v44 = vsel %vm2706_vm7, %v12160_v25, %v2710_v38  ;;  %v2029_v36 = vmul.f32 %v7624_v4, %v1537_v48  ;;  %v2877_v25 = vsel %vm2706_vm7, %v2876_v52, %v2710_v38 }
 0x23e   :  { %2792 = vrot.lane.b32.xlu0 %v2711_v44, %s6916_s13  ;;  %v7820_v46 = vrot.slane %v2261_v13, 1  ;;  %v2965_v34 = vrot.slane %v12163_v17, 1  ;;  %v2966_v7 = vrot.slane %v2261_v13, 2 }
 0x23f   :  { %v2030_v40 = vmul.f32 %v7600_v42, %v1538_v58 }
 0x240   :  { %v1230_v35 = vpop.f32.mrb[176].mxu0  ;;  %v2264_v44 = vsel %vm12039_vm6, %v2259_v55, %v7820_v46  ;;  %v7844_v55 = vpop.permute.xlu1 %1892 }
 0x241   :  { %v2109_v14 = vpack.c.bf16 %v2030_v40, %v2029_v36  ;;  %v1231_v1 = vadd.f32 %v7775_v28, %v1230_v35  ;;  %v6443_v41 = vpop.f32.mrb[177].mxu0  ;;  %2880 = vrot.lane.b32.xlu1 %v2877_v25, %s6918_s30  ;;  %v2967_v36 = vor.u32 %v2966_v7, %v2965_v34  ;;  %v7839_v35 = vpop.permute.xlu0 %1877  ;;  %12165 = vst [vmem:[#allocation62_spill] sm:$0xff] %v7844_v55 }
 0x242   :  { %v1233_v48 = vpop.f32.mrb[178].mxu0  ;;  %2582 = vrot.lane.b32.xlu0 %v2264_v44, %s6915_s11  ;;  %v7834_v58 = vld [vmem:[#allocation2 + $0x18] sm:$0xff]  ;;  %12164 = vst [vmem:[#allocation61_spill] sm:$0xff] %v7839_v35 }
 0x243   :  { %2154 = vst.msk [vmem:[#allocation2 + $0x20] sm:$0xff] %vm1044_vm5, %v2109_v14  ;;  %v1539_v17 = vmax.f32 %v1231_v1, 0.0  ;;  %v1234_v52 = vadd.f32 %v7775_v28, %v1233_v48  ;;  %v6444_v13 = vpop.f32.mrb[179].mxu0  ;;  %v11959_v41 = vrot.slane %v7834_v58, 1  ;;  %v7842_v40 = vrot.slane %v7834_v58, 2 }
 0x244   :  { %v2269_v34 = vshll.u32 %v7834_v58, 16  ;;  %v11963_v7 = vshrl.u32 %v7834_v58, 16  ;;  %v7855_v48 = vld [vmem:[#allocation2 + $0x18] sm:$0xfe] }
 0x245   :  { %v1540_v25 = vmax.f32 %v1234_v52, 0.0  ;;  %3138 = vrot.lane.b32.xlu1 %v2967_v36, %s6919_s9  ;;  %v2713_v14 = vsel %vm2706_vm7, %v2710_v38, %v11959_v41  ;;  %v2031_v1 = vmul.f32 %v7635_v11, %v1539_v17  ;;  %v3226_v13 = vsel %vm12038_vm8, %v3224_v0, %v7842_v40  ;;  %v7864_v11 = vpop.permute.xlu0 %1887  ;;  %v7868_v0 = vpop.permute.xlu1 %1902 }
 0x246   :  { %2882 = vrot.lane.b32.xlu0 %v2713_v14, %s6918_s30  ;;  %v2968_v4 = vrot.slane %v11963_v7, 1  ;;  %v2969_v17 = vrot.slane %v2269_v34, 2  ;;  %12166 = vst [vmem:[#allocation63_spill] sm:$0xff] %v7864_v11  ;;  %12167 = vst [vmem:[#allocation64_spill] sm:$0xff] %v7868_v0  ;;  %v3751_v7 = vrot.slane %v7855_v48, 3  ;;  %v7874_v20 = vrot.slane %v2269_v34, 1 }
 0x247   :  { %v2032_v44 = vmul.f32 %v7611_v50, %v1540_v25  ;;  %v3483_v50 = vshrl.u32 %v7855_v48, 16 }
 0x248   :  { %v1238_v52 = vpop.f32.mrb[180].mxu0 }
 0x249   :  { %v2110_v42 = vpack.c.bf16 %v2032_v44, %v2031_v1  ;;  %v1239_v38 = vadd.f32 %v7775_v28, %v1238_v52  ;;  %v6447_v41 = vpop.f32.mrb[181].mxu0  ;;  %3397 = vrot.lane.b32.xlu1 %v7842_v40, %s6920_s10  ;;  %v3486_v52 = vshll.u32 %v7855_v48, 16  ;;  %v3485_v48 = vrot.slane %v3483_v50, 2  ;;  %v7887_v0 = vpop.permute.xlu0 %1897 }
 0x24a   :  { %v1241_v25 = vpop.f32.mrb[182].mxu0  ;;  %3309 = vrot.lane.b32.xlu0 %v3226_v13, %s6917_s29  ;;  %v7877_v13 = vor.u32 %v2969_v17, %v2968_v4  ;;  %12169 = vst [vmem:[#allocation65_spill] sm:$0xff] %v7887_v0 }
 0x24b   :  { %2155 = vst.msk [vmem:[#allocation2 + $0x28] sm:$0xff] %vm1044_vm5, %v2110_v42  ;;  %v1541_v41 = vmax.f32 %v1239_v38, 0.0  ;;  %v1242_v1 = vadd.f32 %v7775_v28, %v1241_v25  ;;  %v6448_v44 = vpop.f32.mrb[183].mxu0  ;;  %v12168_v42 = vshrl.u32 %v7804_v43, 16  ;;  %v7883_v25 = vld [vmem:[#allocation2 + $0x20] sm:$0xff] }
 0x24d   :  { %v1542_v32 = vmax.f32 %v1242_v1, 0.0  ;;  %3834 = vrot.lane.b32.xlu1 %v3751_v7, %s6921_s12  ;;  %v2267_v38 = vor.u32 %v12168_v42, %v7820_v46  ;;  %v2033_v44 = vmul.f32 %v7644_v63, %v1541_v41  ;;  %v3488_v1 = vrot.slane %v3486_v52, 3 }
 0x24e   :  { %2794 = vrot.lane.b32.xlu0 %v2713_v14, %s6916_s13  ;;  %v7891_v14 = vpop.permute.xlu1 %1912  ;;  %v2971_v41 = vsel %vm12042_vm9, %v2967_v36, %v7877_v13  ;;  %v11975_v36 = vrot.slane %v7883_v25, 1  ;;  %v12174_v63 = vrot.slane %v7883_v25, 3 }
 0x24f   :  { %v2034_v34 = vmul.f32 %v7619_v60, %v1542_v32  ;;  %v2272_v4 = vsel %vm12039_vm6, %v2267_v38, %v7874_v20  ;;  %12170 = vst [vmem:[#allocation66_spill] sm:$0xff] %v7891_v14  ;;  %v7907_v60 = vshll.u32 %v7883_v25, 16 }
 0x250   :  { %v1246_v8 = vpop.f32.mrb[184].mxu0 }
 0x251   :  { %v2111_v17 = vpack.c.bf16 %v2034_v34, %v2033_v44  ;;  %v1247_v43 = vadd.f32 %v7775_v28, %v1246_v8  ;;  %v6451_v46 = vpop.f32.mrb[185].mxu0  ;;  %2584 = vrot.lane.b32.xlu1 %v2272_v4, %s6915_s11  ;;  %v7902_v4 = vor.u32 %v3488_v1, %v3485_v48  ;;  %v12171_v48 = vrot.slane %v7883_v25, 2 }
 0x252   :  { %v1249_v32 = vpop.f32.mrb[186].mxu0  ;;  %v1358_v52 = vpop.f32.mrb[0].mxu1  ;;  %3140 = vrot.lane.b32.xlu0 %v2971_v41, %s6919_s9  ;;  %v7910_v41 = vshrl.u32 %v7883_v25, 16 }
 0x253   :  { %2156 = vst.msk [vmem:[#allocation2 + $0x30] sm:$0xff] %vm1044_vm5, %v2111_v17  ;;  %v1543_v42 = vmax.f32 %v1247_v43, 0.0  ;;  %v1250_v38 = vadd.f32 %v7775_v28, %v1249_v32  ;;  %v1359_v8 = vadd.f32 %v7775_v28, %v1358_v52  ;;  %v6452_v44 = vpop.f32.mrb[187].mxu0  ;;  %v6507_v34 = vpop.f32.mrb[1].mxu1  ;;  %v3228_v1 = vsel %vm12038_vm8, %v7842_v40, %v12171_v48 }
 0x254   :  { %v1361_v46 = vpop.f32.mrb[2].mxu1  ;;  %v6839_v44 = vld [vmem:[%s11940_s5] sm:$0xff]   ;;  %v12173_v40 = vrot.slane %v7834_v58, 1 }
 0x255   :  { %v1544_v17 = vmax.f32 %v1250_v38, 0.0  ;;  %v1571_v43 = vmax.f32 %v1359_v8, 0.0  ;;  %v1362_v32 = vadd.f32 %v7775_v28, %v1361_v46  ;;  %v6508_v52 = vpop.f32.mrb[3].mxu1  ;;  %3664 = vrot.lane.b32.xlu1 %v7902_v4, %s6922_s2  ;;  %v2035_v38 = vmul.f32 %v7652_v12, %v1543_v42  ;;  %6594 = vmatpush3.bf16.msra.mxu1 %v6839_v44  ;;  %v6840_v46 = vld [vmem:[%s11940_s5 + $0x8] sm:$0xff]  }
 0x256   :  { %3399 = vrot.lane.b32.xlu0 %v3228_v1, %s6920_s10  ;;  %v7928_v52 = vpop.permute.xlu0 %1907  ;;  %v2715_v48 = vsel %vm2706_vm7, %v12173_v40, %v11975_v36  ;;  %v3753_v42 = vsel %vm3750_vm10, %v3751_v7, %v12174_v63  ;;  %v12175_v44 = vmov 0.0  }
 0x257   :  { %v2036_v8 = vmul.f32 %v7626_v53, %v1544_v17  ;;  %v1572_v34 = vmax.f32 %v1362_v32, 0.0  ;;  %12172 = vst [vmem:[#allocation67_spill] sm:$0xff] %v7928_v52  ;;  %v3490_v17 = vrot.slane %v7910_v41, 2  ;;  %v3491_v32 = vrot.slane %v7907_v60, 3  ;;  %6595 = vmatprep.subr.bf16.mxu1 %v12175_v44  ;;  %v7941_v53 = vpop.permute.xlu1 %1922 }
 0x258   :  { %v1254_v50 = vpop.f32.mrb[188].mxu0  ;;  %12176 = vst [vmem:[#allocation68_spill] sm:$0xff] %v7941_v53  ;;  %v2063_v14 = vmul.f32 %v7759_v30, %v1571_v43  ;;  %v2972_v30 = vrot.slane %v7910_v41, 1 }
 0x259   :  { %v2112_v12 = vpack.c.bf16 %v2036_v8, %v2035_v38  ;;  %v2064_v52 = vmul.f32 %v7754_v18, %v1572_v34  ;;  %v1255_v0 = vadd.f32 %v7775_v28, %v1254_v50  ;;  %v6455_v40 = vpop.f32.mrb[189].mxu0  ;;  %2884 = vrot.lane.b32.xlu1 %v2715_v48, %s6918_s30  ;;  %6596 = vmatpush3.bf16.msra.mxu1 %v6840_v46  ;;  %v7960_v46 = vld [vmem:[#allocation2 + $0x28] sm:$0xff] }
 0x25a   :  { %v1257_v36 = vpop.f32.mrb[190].mxu0  ;;  %v1366_v63 = vpop.f32.mrb[4].mxu1  ;;  %3836 = vrot.lane.b32.xlu0 %v3753_v42, %s6921_s12  ;;  %v11980_v40 = vrot.slane %v7907_v60, 1  ;;  %v7952_v18 = vor.u32 %v3491_v32, %v3490_v17  ;;  %v2973_v42 = vrot.slane %v7907_v60, 2  ;;  %6597 = vmatprep.subr.bf16.mxu1 %v12175_v44  ;;  %v12177_v17 = vshrl.u32 %v7834_v58, 16 }
 0x25b   :  { %2157 = vst.msk [vmem:[#allocation2 + $0x38] sm:$0xff] %vm1044_vm5, %v2112_v12  ;;  %v2126_v7 = vpack.c.bf16 %v2064_v52, %v2063_v14  ;;  %v1545_v55 = vmax.f32 %v1255_v0, 0.0  ;;  %v1258_v38 = vadd.f32 %v7775_v28, %v1257_v36  ;;  %v1367_v43 = vadd.f32 %v7775_v28, %v1366_v63  ;;  %v6456_v8 = vpop.f32.mrb[191].mxu0  ;;  %v6511_v34 = vpop.f32.mrb[5].mxu1  ;;  %v6841_v52 = vld [vmem:[%s11940_s5 + $0x10] sm:$0xff]  }
 0x25c   :  { %v1369_v50 = vpop.f32.mrb[6].mxu1  ;;  %v2275_v32 = vor.u32 %v12177_v17, %v7874_v20  ;;  %v3493_v20 = vsel %vm12041_vm11, %v7902_v4, %v7952_v18  ;;  %v11979_v58 = vrot.slane %v7960_v46, 1  ;;  %v7986_v34 = vpop.permute.xlu1 %1932 }
 0x25d   :  { %2171 = vst.msk [vmem:[#allocation2 + $0xa8] sm:$0xff] %vm1044_vm5, %v2126_v7  ;;  %v1546_v12 = vmax.f32 %v1258_v38, 0.0  ;;  %v1573_v0 = vmax.f32 %v1367_v43, 0.0  ;;  %v1370_v14 = vadd.f32 %v7775_v28, %v1369_v50  ;;  %v6512_v36 = vpop.f32.mrb[7].mxu1  ;;  %3311 = vrot.lane.b32.xlu1 %v3228_v1, %s6917_s29  ;;  %v2037_v63 = vmul.f32 %v7661_v6, %v1545_v55  ;;  %6598 = vmatpush3.bf16.msra.mxu1 %v6841_v52  ;;  %v6842_v1 = vld [vmem:[%s11940_s5 + $0x18] sm:$0xff]   ;;  %v7974_v43 = vpop.permute.xlu0 %1917 }
 0x25e   :  { %2796 = vrot.lane.b32.xlu0 %v2715_v48, %s6916_s13  ;;  %12178 = vst [vmem:[#allocation69_spill] sm:$0xff] %v7974_v43  ;;  %v2280_v48 = vsel %vm12039_vm6, %v2275_v32, %v11980_v40  ;;  %v7983_v55 = vor.u32 %v2973_v42, %v2972_v30  ;;  %6599 = vmatprep.subr.bf16.mxu1 %v12175_v44  ;;  %12179 = vst [vmem:[#allocation70_spill] sm:$0xff] %v7986_v34 }
 0x25f   :  { %v2038_v7 = vmul.f32 %v7637_v15, %v1546_v12  ;;  %v1574_v38 = vmax.f32 %v1370_v14, 0.0  ;;  %v2065_v12 = vmul.f32 %v7764_v22, %v1573_v0 }
 0x260   :  { %v1262_v8 = vpop.f32.mrb[192].mxu0 }
 0x261   :  { %v2113_v50 = vpack.c.bf16 %v2038_v7, %v2037_v63  ;;  %v2066_v14 = vmul.f32 %v7761_v37, %v1574_v38  ;;  %v1263_v36 = vadd.f32 %v7775_v28, %v1262_v8  ;;  %v6459_v52 = vpop.f32.mrb[193].mxu0  ;;  %2586 = vrot.lane.b32.xlu1 %v2280_v48, %s6915_s11  ;;  %6600 = vmatpush3.bf16.msra.mxu1 %v6842_v1  ;;  %v12180_v8 = vrot.slane %v7883_v25, 1 }
 0x262   :  { %v1265_v17 = vpop.f32.mrb[194].mxu0  ;;  %v1374_v4 = vpop.f32.mrb[8].mxu1  ;;  %3666 = vrot.lane.b32.xlu0 %v3493_v20, %s6922_s2  ;;  %v11982_v20 = vrot.slane %v7960_v46, 2  ;;  %6601 = vmatprep.subr.bf16.mxu1 %v12175_v44 }
 0x263   :  { %2158 = vst.msk [vmem:[#allocation2 + $0x40] sm:$0xff] %vm1044_vm5, %v2113_v50  ;;  %v2127_v30 = vpack.c.bf16 %v2066_v14, %v2065_v12  ;;  %v1547_v42 = vmax.f32 %v1263_v36, 0.0  ;;  %v1266_v32 = vadd.f32 %v7775_v28, %v1265_v17  ;;  %v1375_v63 = vadd.f32 %v7775_v28, %v1374_v4  ;;  %v6460_v0 = vpop.f32.mrb[195].mxu0  ;;  %v6515_v7 = vpop.f32.mrb[9].mxu1 }
 0x264   :  { %v1377_v38 = vpop.f32.mrb[10].mxu1  ;;  %v8001_v48 = vsel %vm2706_vm7, %v12180_v8, %v11979_v58  ;;  %v8005_v50 = vshll.u32 %v7960_v46, 16  ;;  %v8008_v12 = vshrl.u32 %v7960_v46, 16  ;;  %v2975_v17 = vsel %vm12042_vm9, %v7877_v13, %v7983_v55 }
 0x265   :  { %2172 = vst.msk [vmem:[#allocation2 + $0xb0] sm:$0xff] %vm1044_vm5, %v2127_v30  ;;  %v1548_v1 = vmax.f32 %v1266_v32, 0.0  ;;  %v1575_v14 = vmax.f32 %v1375_v63, 0.0  ;;  %v1378_v36 = vadd.f32 %v7775_v28, %v1377_v38  ;;  %v6516_v52 = vpop.f32.mrb[11].mxu1  ;;  %2886 = vrot.lane.b32.xlu1 %v8001_v48, %s6918_s30  ;;  %v2039_v4 = vmul.f32 %v7672_v49, %v1547_v42  ;;  %v8022_v32 = vpop.permute.xlu0 %1927 }
 0x266   :  { %3142 = vrot.lane.b32.xlu0 %v2975_v17, %s6919_s9  ;;  %12181 = vst [vmem:[#allocation71_spill] sm:$0xff] %v8022_v32  ;;  %v12182_v38 = vrot.slane %v7883_v25, 2  ;;  %v3494_v52 = vrot.slane %v8008_v12, 2  ;;  %v3495_v42 = vrot.slane %v8005_v50, 3  ;;  %v8032_v17 = vpop.permute.xlu1 %1942 }
 0x267   :  { %v2040_v0 = vmul.f32 %v7648_v24, %v1548_v1  ;;  %v1576_v7 = vmax.f32 %v1378_v36, 0.0  ;;  %12183 = vst [vmem:[#allocation72_spill] sm:$0xff] %v8032_v17  ;;  %v2067_v36 = vmul.f32 %v7770_v26, %v1575_v14  ;;  %v12185_v26 = vrot.slane %v8005_v50, 1 }
 0x268   :  { %v1270_v63 = vpop.f32.mrb[196].mxu0  ;;  %v3230_v8 = vsel %vm12038_vm8, %v12182_v38, %v11982_v20  ;;  %v12184_v20 = vrot.slane %v7907_v60, 1  ;;  %v2976_v60 = vrot.slane %v8008_v12, 1 }
 0x269   :  { %v2114_v1 = vpack.c.bf16 %v2040_v0, %v2039_v4  ;;  %v2068_v58 = vmul.f32 %v7768_v62, %v1576_v7  ;;  %v1271_v30 = vadd.f32 %v7775_v28, %v1270_v63  ;;  %v6463_v40 = vpop.f32.mrb[197].mxu0  ;;  %3313 = vrot.lane.b32.xlu1 %v3230_v8, %s6917_s29 }
 0x26a   :  { %v1273_v37 = vpop.f32.mrb[198].mxu0  ;;  %v1382_v38 = vpop.f32.mrb[12].mxu1  ;;  %3401 = vrot.lane.b32.xlu0 %v3230_v8, %s6920_s10  ;;  %v2283_v13 = vor.u32 %v7910_v41, %v12184_v20  ;;  %v8048_v8 = vor.u32 %v3495_v42, %v3494_v52  ;;  %v2977_v41 = vrot.slane %v8005_v50, 2 }
 0x26b   :  { %2159 = vst.msk [vmem:[#allocation2 + $0x48] sm:$0xff] %vm1044_vm5, %v2114_v1  ;;  %v2128_v4 = vpack.c.bf16 %v2068_v58, %v2067_v36  ;;  %v1549_v0 = vmax.f32 %v1271_v30, 0.0  ;;  %v1274_v14 = vadd.f32 %v7775_v28, %v1273_v37  ;;  %v1383_v7 = vadd.f32 %v7775_v28, %v1382_v38  ;;  %v6464_v63 = vpop.f32.mrb[199].mxu0  ;;  %v6519_v40 = vpop.f32.mrb[13].mxu1 }
 0x26c   :  { %v1385_v62 = vpop.f32.mrb[14].mxu1  ;;  %v2288_v22 = vsel %vm12039_vm6, %v2283_v13, %v12185_v26  ;;  %v12186_v1 = vrot.slane %v7960_v46, 3  ;;  %v12187_v36 = vrot.slane %v7883_v25, 3  ;;  %v8060_v13 = vld [vmem:[#allocation2 + $0x30] sm:$0xff] }
 0x26d   :  { %2173 = vst.msk [vmem:[#allocation2 + $0xb8] sm:$0xff] %vm1044_vm5, %v2128_v4  ;;  %v1550_v58 = vmax.f32 %v1274_v14, 0.0  ;;  %v1577_v20 = vmax.f32 %v1383_v7, 0.0  ;;  %v1386_v37 = vadd.f32 %v7775_v28, %v1385_v62  ;;  %v6520_v30 = vpop.f32.mrb[15].mxu1  ;;  %2588 = vrot.lane.b32.xlu1 %v2288_v22, %s6915_s11  ;;  %v2041_v52 = vmul.f32 %v7681_v31, %v1549_v0  ;;  %v8065_v4 = vpop.permute.xlu0 %1937 }
 0x26e   :  { %v3755_v26 = vsel %vm3750_vm10, %v12187_v36, %v12186_v1  ;;  %12188 = vst [vmem:[#allocation73_spill] sm:$0xff] %v8065_v4  ;;  %v3497_v22 = vsel %vm12041_vm11, %v7952_v18, %v8048_v8  ;;  %v11987_v25 = vrot.slane %v8060_v13, 1  ;;  %v8071_v14 = vor.u32 %v2977_v41, %v2976_v60  ;;  %v8073_v7 = vpop.permute.xlu1 %1952 }
 0x26f   :  { %3838 = vrot.lane.b32.xlu0 %v3755_v26, %s6921_s12  ;;  %v2042_v42 = vmul.f32 %v7656_v33, %v1550_v58  ;;  %v1578_v38 = vmax.f32 %v1386_v37, 0.0  ;;  %12189 = vst [vmem:[#allocation74_spill] sm:$0xff] %v8073_v7  ;;  %v2069_v40 = vmul.f32 %v7784_v2, %v1577_v20  ;;  %v11986_v18 = vrot.slane %v8060_v13, 2 }
 0x270   :  { %v1278_v62 = vpop.f32.mrb[200].mxu0 }
 0x271   :  { %v2115_v63 = vpack.c.bf16 %v2042_v42, %v2041_v52  ;;  %v2070_v0 = vmul.f32 %v7777_v57, %v1578_v38  ;;  %v1279_v58 = vadd.f32 %v7775_v28, %v1278_v62  ;;  %v6467_v37 = vpop.f32.mrb[201].mxu0  ;;  %3668 = vrot.lane.b32.xlu1 %v3497_v22, %s6922_s2  ;;  %v12190_v38 = vrot.slane %v7960_v46, 1 }
 0x272   :  { %v1281_v30 = vpop.f32.mrb[202].mxu0  ;;  %v1390_v1 = vpop.f32.mrb[16].mxu1  ;;  %v8096_v22 = vshrl.u32 %v8060_v13, 16  ;;  %v2979_v37 = vsel %vm12042_vm9, %v7983_v55, %v8071_v14  ;;  %v12194_v55 = vrot.slane %v8005_v50, 1 }
 0x273   :  { %2798 = vrot.lane.b32.xlu0 %v8001_v48, %s6916_s13  ;;  %2160 = vst.msk [vmem:[#allocation2 + $0x50] sm:$0xff] %vm1044_vm5, %v2115_v63  ;;  %v2129_v60 = vpack.c.bf16 %v2070_v0, %v2069_v40  ;;  %v1551_v41 = vmax.f32 %v1279_v58, 0.0  ;;  %v1282_v20 = vadd.f32 %v7775_v28, %v1281_v30  ;;  %v1391_v36 = vadd.f32 %v7775_v28, %v1390_v1  ;;  %v6468_v26 = vpop.f32.mrb[203].mxu0  ;;  %v6523_v52 = vpop.f32.mrb[17].mxu1 }
 0x274   :  { %v1393_v42 = vpop.f32.mrb[18].mxu1  ;;  %v8090_v62 = vsel %vm2706_vm7, %v12190_v38, %v11987_v25  ;;  %v8093_v48 = vshll.u32 %v8060_v13, 16  ;;  %v3498_v38 = vrot.slane %v8096_v22, 2  ;;  %v2291_v57 = vor.u32 %v8008_v12, %v12194_v55 }
 0x275   :  { %2174 = vst.msk [vmem:[#allocation2 + $0xc0] sm:$0xff] %vm1044_vm5, %v2129_v60  ;;  %v1552_v63 = vmax.f32 %v1282_v20, 0.0  ;;  %v1579_v40 = vmax.f32 %v1391_v36, 0.0  ;;  %v1394_v0 = vadd.f32 %v7775_v28, %v1393_v42  ;;  %v6524_v58 = vpop.f32.mrb[19].mxu1  ;;  %2888 = vrot.lane.b32.xlu1 %v8090_v62, %s6918_s30  ;;  %v2043_v30 = vmul.f32 %v7689_v39, %v1551_v41  ;;  %v8113_v36 = vpop.permute.xlu0 %1947 }
 0x276   :  { %v12191_v60 = vrot.slane %v7960_v46, 2  ;;  %12192 = vst [vmem:[#allocation75_spill] sm:$0xff] %v8113_v36  ;;  %v3499_v41 = vrot.slane %v8093_v48, 3  ;;  %v8119_v58 = vpop.permute.xlu1 %1962  ;;  %v2980_v50 = vrot.slane %v8096_v22, 1  ;;  %v2981_v12 = vrot.slane %v8093_v48, 2 }
 0x277   :  { %3144 = vrot.lane.b32.xlu0 %v2979_v37, %s6919_s9  ;;  %v2044_v1 = vmul.f32 %v7663_v23, %v1552_v63  ;;  %v1580_v26 = vmax.f32 %v1394_v0, 0.0  ;;  %12193 = vst [vmem:[#allocation76_spill] sm:$0xff] %v8119_v58  ;;  %v2071_v0 = vmul.f32 %v7791_v45, %v1579_v40  ;;  %v12195_v45 = vrot.slane %v8093_v48, 1 }
 0x278   :  { %v3232_v20 = vsel %vm12038_vm8, %v12191_v60, %v11986_v18  ;;  %v1286_v52 = vpop.f32.mrb[204].mxu0 }
 0x279   :  { %v2116_v63 = vpack.c.bf16 %v2044_v1, %v2043_v30  ;;  %v2072_v37 = vmul.f32 %v7786_v3, %v1580_v26  ;;  %v1287_v60 = vadd.f32 %v7775_v28, %v1286_v52  ;;  %v6471_v18 = vpop.f32.mrb[205].mxu0  ;;  %3315 = vrot.lane.b32.xlu1 %v3232_v20, %s6917_s29  ;;  %v2296_v2 = vsel %vm12039_vm6, %v2291_v57, %v12195_v45  ;;  %v8147_v45 = vld [vmem:[#allocation2 + $0x38] sm:$0xff] }
 0x27a   :  { %v1289_v25 = vpop.f32.mrb[206].mxu0  ;;  %v1398_v42 = vpop.f32.mrb[20].mxu1 }
 0x27b   :  { %3403 = vrot.lane.b32.xlu0 %v3232_v20, %s6920_s10  ;;  %2161 = vst.msk [vmem:[#allocation2 + $0x58] sm:$0xff] %vm1044_vm5, %v2116_v63  ;;  %v2130_v30 = vpack.c.bf16 %v2072_v37, %v2071_v0  ;;  %v1553_v1 = vmax.f32 %v1287_v60, 0.0  ;;  %v1290_v40 = vadd.f32 %v7775_v28, %v1289_v25  ;;  %v1399_v26 = vadd.f32 %v7775_v28, %v1398_v42  ;;  %v6472_v52 = vpop.f32.mrb[207].mxu0  ;;  %v6527_v18 = vpop.f32.mrb[21].mxu1 }
 0x27c   :  { %v1401_v3 = vpop.f32.mrb[22].mxu1  ;;  %v8135_v20 = vor.u32 %v3499_v41, %v3498_v38  ;;  %v12196_v0 = vrot.slane %v8060_v13, 3  ;;  %v12197_v37 = vrot.slane %v7960_v46, 3  ;;  %v11993_v46 = vrot.slane %v8147_v45, 1 }
 0x27d   :  { %2175 = vst.msk [vmem:[#allocation2 + $0xc8] sm:$0xff] %vm1044_vm5, %v2130_v30  ;;  %v1554_v55 = vmax.f32 %v1290_v40, 0.0  ;;  %v1581_v63 = vmax.f32 %v1399_v26, 0.0  ;;  %v1402_v25 = vadd.f32 %v7775_v28, %v1401_v3  ;;  %v6528_v42 = vpop.f32.mrb[23].mxu1  ;;  %2590 = vrot.lane.b32.xlu1 %v2296_v2, %s6915_s11  ;;  %v2045_v38 = vmul.f32 %v7698_v21, %v1553_v1  ;;  %v8152_v30 = vpop.permute.xlu0 %1957  ;;  %v12233_v21 = vld [vmem:[#allocation66_spill] sm:$0xff] }
 0x27e   :  { %v3757_v57 = vsel %vm3750_vm10, %v12197_v37, %v12196_v0  ;;  %12198 = vst [vmem:[#allocation77_spill] sm:$0xff] %v8152_v30  ;;  %v3501_v2 = vsel %vm12041_vm11, %v8048_v8, %v8135_v20  ;;  %v8158_v40 = vor.u32 %v2981_v12, %v2980_v50  ;;  %v8160_v26 = vpop.permute.xlu1 %1972  ;;  %v11992_v8 = vrot.slane %v8147_v45, 2 }
 0x27f   :  { %3840 = vrot.lane.b32.xlu0 %v3757_v57, %s6921_s12  ;;  %v2046_v41 = vmul.f32 %v7674_v51, %v1554_v55  ;;  %v1582_v60 = vmax.f32 %v1402_v25, 0.0  ;;  %12199 = vst [vmem:[#allocation78_spill] sm:$0xff] %v8160_v26  ;;  %v2073_v18 = vmul.f32 %v7799_v19, %v1581_v63 }
 0x280   :  { %v1294_v3 = vpop.f32.mrb[208].mxu0 }
 0x281   :  { %v2117_v52 = vpack.c.bf16 %v2046_v41, %v2045_v38  ;;  %v2074_v1 = vmul.f32 %v7793_v16, %v1582_v60  ;;  %v1295_v55 = vadd.f32 %v7775_v28, %v1294_v3  ;;  %v6475_v25 = vpop.f32.mrb[209].mxu0  ;;  %3670 = vrot.lane.b32.xlu1 %v3501_v2, %s6922_s2  ;;  %v12200_v60 = vrot.slane %v8060_v13, 1 }
 0x282   :  { %v1297_v42 = vpop.f32.mrb[210].mxu0  ;;  %v1406_v0 = vpop.f32.mrb[24].mxu1  ;;  %v8183_v2 = vshrl.u32 %v8147_v45, 16  ;;  %v2983_v25 = vsel %vm12042_vm9, %v8071_v14, %v8158_v40  ;;  %v12204_v14 = vrot.slane %v8093_v48, 1 }
 0x283   :  { %2800 = vrot.lane.b32.xlu0 %v8090_v62, %s6916_s13  ;;  %2162 = vst.msk [vmem:[#allocation2 + $0x60] sm:$0xff] %vm1044_vm5, %v2117_v52  ;;  %v2131_v50 = vpack.c.bf16 %v2074_v1, %v2073_v18  ;;  %v1555_v12 = vmax.f32 %v1295_v55, 0.0  ;;  %v1298_v63 = vadd.f32 %v7775_v28, %v1297_v42  ;;  %v1407_v37 = vadd.f32 %v7775_v28, %v1406_v0  ;;  %v6476_v57 = vpop.f32.mrb[211].mxu0  ;;  %v6531_v38 = vpop.f32.mrb[25].mxu1 }
 0x284   :  { %v1409_v41 = vpop.f32.mrb[26].mxu1  ;;  %v8177_v3 = vsel %vm2706_vm7, %v12200_v60, %v11993_v46  ;;  %v8180_v62 = vshll.u32 %v8147_v45, 16  ;;  %v3502_v60 = vrot.slane %v8183_v2, 2  ;;  %v2299_v16 = vor.u32 %v8096_v22, %v12204_v14 }
 0x285   :  { %2176 = vst.msk [vmem:[#allocation2 + $0xd0] sm:$0xff] %vm1044_vm5, %v2131_v50  ;;  %v1556_v52 = vmax.f32 %v1298_v63, 0.0  ;;  %v1583_v18 = vmax.f32 %v1407_v37, 0.0  ;;  %v1410_v1 = vadd.f32 %v7775_v28, %v1409_v41  ;;  %v6532_v55 = vpop.f32.mrb[27].mxu1  ;;  %2890 = vrot.lane.b32.xlu1 %v8177_v3, %s6918_s30  ;;  %v2047_v42 = vmul.f32 %v7709_v29, %v1555_v12  ;;  %v8200_v37 = vpop.permute.xlu0 %1967  ;;  %v12232_v29 = vld [vmem:[#allocation67_spill] sm:$0xff] }
 0x286   :  { %v12201_v50 = vrot.slane %v8060_v13, 2  ;;  %12202 = vst [vmem:[#allocation79_spill] sm:$0xff] %v8200_v37  ;;  %v3503_v12 = vrot.slane %v8180_v62, 3  ;;  %v8206_v55 = vpop.permute.xlu1 %1982  ;;  %v2984_v48 = vrot.slane %v8183_v2, 1  ;;  %v2985_v22 = vrot.slane %v8180_v62, 2 }
 0x287   :  { %3146 = vrot.lane.b32.xlu0 %v2983_v25, %s6919_s9  ;;  %v2048_v0 = vmul.f32 %v7685_v61, %v1556_v52  ;;  %v1584_v57 = vmax.f32 %v1410_v1, 0.0  ;;  %12203 = vst [vmem:[#allocation80_spill] sm:$0xff] %v8206_v55  ;;  %v2075_v1 = vmul.f32 %v7817_v27, %v1583_v18  ;;  %v12205_v27 = vrot.slane %v8180_v62, 1 }
 0x288   :  { %v3234_v63 = vsel %vm12038_vm8, %v12201_v50, %v11992_v8  ;;  %v1302_v38 = vpop.f32.mrb[212].mxu0 }
 0x289   :  { %v2118_v52 = vpack.c.bf16 %v2048_v0, %v2047_v42  ;;  %v2076_v25 = vmul.f32 %v7801_v5, %v1584_v57  ;;  %v1303_v50 = vadd.f32 %v7775_v28, %v1302_v38  ;;  %v6479_v8 = vpop.f32.mrb[213].mxu0  ;;  %3317 = vrot.lane.b32.xlu1 %v3234_v63, %s6917_s29  ;;  %v2304_v19 = vsel %vm12039_vm6, %v2299_v16, %v12205_v27  ;;  %v8234_v27 = vld [vmem:[#allocation2 + $0x40] sm:$0xff] }
 0x28a   :  { %v1305_v46 = vpop.f32.mrb[214].mxu0  ;;  %v1414_v41 = vpop.f32.mrb[28].mxu1 }
 0x28b   :  { %3405 = vrot.lane.b32.xlu0 %v3234_v63, %s6920_s10  ;;  %2163 = vst.msk [vmem:[#allocation2 + $0x68] sm:$0xff] %vm1044_vm5, %v2118_v52  ;;  %v2132_v42 = vpack.c.bf16 %v2076_v25, %v2075_v1  ;;  %v1557_v0 = vmax.f32 %v1303_v50, 0.0  ;;  %v1306_v18 = vadd.f32 %v7775_v28, %v1305_v46  ;;  %v1415_v57 = vadd.f32 %v7775_v28, %v1414_v41  ;;  %v6480_v38 = vpop.f32.mrb[215].mxu0  ;;  %v6535_v8 = vpop.f32.mrb[29].mxu1 }
 0x28c   :  { %v1417_v5 = vpop.f32.mrb[30].mxu1  ;;  %v8222_v63 = vor.u32 %v3503_v12, %v3502_v60  ;;  %v12206_v1 = vrot.slane %v8147_v45, 3  ;;  %v12207_v25 = vrot.slane %v8060_v13, 3  ;;  %v11998_v13 = vrot.slane %v8234_v27, 1 }
 0x28d   :  { %2177 = vst.msk [vmem:[#allocation2 + $0xd8] sm:$0xff] %vm1044_vm5, %v2132_v42  ;;  %v1558_v14 = vmax.f32 %v1306_v18, 0.0  ;;  %v1585_v52 = vmax.f32 %v1415_v57, 0.0  ;;  %v1418_v46 = vadd.f32 %v7775_v28, %v1417_v5  ;;  %v6536_v41 = vpop.f32.mrb[31].mxu1  ;;  %2592 = vrot.lane.b32.xlu1 %v2304_v19, %s6915_s11  ;;  %v2049_v60 = vmul.f32 %v7714_v54, %v1557_v0  ;;  %v8239_v42 = vpop.permute.xlu0 %1977 }
 0x28e   :  { %v3759_v16 = vsel %vm3750_vm10, %v12207_v25, %v12206_v1  ;;  %12208 = vst [vmem:[#allocation81_spill] sm:$0xff] %v8239_v42  ;;  %v3505_v19 = vsel %vm12041_vm11, %v8135_v20, %v8222_v63  ;;  %v8245_v18 = vor.u32 %v2985_v22, %v2984_v48  ;;  %v8247_v57 = vpop.permute.xlu1 %1992  ;;  %v5143_v41 = vsel %vm3750_vm10, %v6989_v9, 0  ;;  %v6843_v48 = vld [vmem:[%s11940_s5 + $0x20] sm:$0x1f]  }
 0x28f   :  { %3842 = vrot.lane.b32.xlu0 %v3759_v16, %s6921_s12  ;;  %v2050_v12 = vmul.f32 %v7693_v10, %v1558_v14  ;;  %v1586_v50 = vmax.f32 %v1418_v46, 0.0  ;;  %12209 = vst [vmem:[#allocation82_spill] sm:$0xff] %v8247_v57  ;;  %v2077_v8 = vmul.f32 %v7839_v35, %v1585_v52 }
 0x290   :  { %v1310_v5 = vpop.f32.mrb[216].mxu0 }
 0x291   :  { %v2119_v38 = vpack.c.bf16 %v2050_v12, %v2049_v60  ;;  %v2078_v0 = vmul.f32 %v7822_v59, %v1586_v50  ;;  %v1311_v14 = vadd.f32 %v7775_v28, %v1310_v5  ;;  %v6483_v46 = vpop.f32.mrb[217].mxu0  ;;  %3672 = vrot.lane.b32.xlu1 %v3505_v19, %s6922_s2  ;;  %v12210_v50 = vrot.slane %v8147_v45, 1 }
 0x292   :  { %v1313_v20 = vpop.f32.mrb[218].mxu0  ;;  %v1422_v1 = vpop.f32.mrb[32].mxu1  ;;  %v11999_v5 = vrot.slane %v8234_v27, 2  ;;  %v8272_v19 = vshll.u32 %v8234_v27, 16  ;;  %v2987_v46 = vsel %vm12042_vm9, %v8158_v40, %v8245_v18 }
 0x293   :  { %2802 = vrot.lane.b32.xlu0 %v8177_v3, %s6916_s13  ;;  %2164 = vst.msk [vmem:[#allocation2 + $0x70] sm:$0xff] %vm1044_vm5, %v2119_v38  ;;  %v2133_v22 = vpack.c.bf16 %v2078_v0, %v2077_v8  ;;  %v1559_v52 = vmax.f32 %v1311_v14, 0.0  ;;  %v1314_v25 = vadd.f32 %v7775_v28, %v1313_v20  ;;  %v1423_v16 = vadd.f32 %v7775_v28, %v1422_v1  ;;  %v6484_v60 = vpop.f32.mrb[219].mxu0  ;;  %v6539_v12 = vpop.f32.mrb[33].mxu1 }
 0x294   :  { %v1425_v9 = vpop.f32.mrb[34].mxu1  ;;  %v8268_v3 = vsel %vm2706_vm7, %v12210_v50, %v11998_v13  ;;  %v5145_v20 = vand.u32 %v6843_v48, %v5143_v41  ;;  %v12212_v12 = vrot.slane %v8147_v45, 2  ;;  %v12000_v50 = vrot.slane %v8272_v19, 1  ;;  %v8293_v41 = vpop.permute.xlu1 %2002  ;;  %v8299_v13 = vld [vmem:[#allocation2 + $0xb0] sm:$0xff] }
 0x295   :  { %2178 = vst.msk [vmem:[#allocation2 + $0xe0] sm:$0xff] %vm1044_vm5, %v2133_v22  ;;  %v1560_v38 = vmax.f32 %v1314_v25, 0.0  ;;  %v1587_v8 = vmax.f32 %v1423_v16, 0.0  ;;  %v1426_v0 = vadd.f32 %v7775_v28, %v1425_v9  ;;  %v6540_v14 = vpop.f32.mrb[35].mxu1  ;;  %2892 = vrot.lane.b32.xlu1 %v8268_v3, %s6918_s30  ;;  %v2051_v1 = vmul.f32 %v7720_v56, %v1559_v52  ;;  %v8284_v25 = vpop.permute.xlu0 %1987  ;;  %12213 = vst [vmem:[#allocation84_spill] sm:$0xff] %v8293_v41 }
 0x296   :  { %12211 = vst [vmem:[#allocation83_spill] sm:$0xff] %v8284_v25  ;;  %v3236_v9 = vsel %vm12038_vm8, %v12212_v12, %v11999_v5  ;;  %6602 = vmatpush3.bf16.msra.mxu1 %v5145_v20  ;;  %v12215_v20 = vrot.slane %v8180_v62, 1 }
 0x297   :  { %3148 = vrot.lane.b32.xlu0 %v2987_v46, %s6919_s9  ;;  %v2052_v60 = vmul.f32 %v7700_v47, %v1560_v38  ;;  %v1588_v22 = vmax.f32 %v1426_v0, 0.0  ;;  %v2079_v52 = vmul.f32 %v7864_v11, %v1587_v8  ;;  %v12214_v38 = vld [vmem:[#allocation62_spill] sm:$0xff] }
 0x298   :  { %v1318_v16 = vpop.f32.mrb[220].mxu0  ;;  %v2307_v40 = vor.u32 %v8183_v2, %v12215_v20  ;;  %v12217_v20 = vrot.slane %v8147_v45, 3  ;;  %v12221_v45 = vrot.slane %v8299_v13, 2 }
 0x299   :  { %v2120_v48 = vpack.c.bf16 %v2052_v60, %v2051_v1  ;;  %v2080_v0 = vmul.f32 %v12214_v38, %v1588_v22  ;;  %v1319_v14 = vadd.f32 %v7775_v28, %v1318_v16  ;;  %v6487_v46 = vpop.f32.mrb[221].mxu0  ;;  %3319 = vrot.lane.b32.xlu1 %v3236_v9, %s6917_s29  ;;  %v8309_v28 = vld [vmem:[%s11939_s4] ss:$0 sm:$0xff] }
 0x29a   :  { %v1321_v12 = vpop.f32.mrb[222].mxu0  ;;  %v1430_v5 = vpop.f32.mrb[36].mxu1  ;;  %v2312_v2 = vsel %vm12039_vm6, %v2307_v40, %v12000_v50 }
 0x29b   :  { %3407 = vrot.lane.b32.xlu0 %v3236_v9, %s6920_s10  ;;  %2165 = vst.msk [vmem:[#allocation2 + $0x78] sm:$0xff] %vm1044_vm5, %v2120_v48  ;;  %v2134_v8 = vpack.c.bf16 %v2080_v0, %v2079_v52  ;;  %v1561_v1 = vmax.f32 %v1319_v14, 0.0  ;;  %v1322_v60 = vadd.f32 %v8309_v28, %v1321_v12  ;;  %v1431_v22 = vadd.f32 %v8309_v28, %v1430_v5  ;;  %v6488_v16 = vpop.f32.mrb[223].mxu0  ;;  %v6543_v46 = vpop.f32.mrb[37].mxu1  ;;  %v8313_v9 = vld [vmem:[#allocation2 + $0xa8] sm:$0xff] }
 0x29c   :  { %v1433_v62 = vpop.f32.mrb[38].mxu1  ;;  %v12216_v5 = vrot.slane %v8234_v27, 3  ;;  %v12004_v40 = vrot.slane %v8313_v9, 2  ;;  %v8335_v50 = vpop.permute.xlu0 %1997 }
 0x29d   :  { %2179 = vst.msk [vmem:[#allocation2 + $0xe8] sm:$0xff] %vm1044_vm5, %v2134_v8  ;;  %v1562_v52 = vmax.f32 %v1322_v60, 0.0  ;;  %v1589_v0 = vmax.f32 %v1431_v22, 0.0  ;;  %v1434_v14 = vadd.f32 %v8309_v28, %v1433_v62  ;;  %v6544_v12 = vpop.f32.mrb[39].mxu1  ;;  %2594 = vrot.lane.b32.xlu1 %v2312_v2, %s6915_s11  ;;  %v8331_v8 = vshrl.u32 %v8234_v27, 16  ;;  %v12218_v60 = vld [vmem:[#allocation37_spill] sm:$0xff]  ;;  %v8344_v46 = vpop.permute.xlu1 %2012 }
 0x29e   :  { %v3761_v16 = vsel %vm3750_vm10, %v12217_v20, %v12216_v5  ;;  %v2053_v22 = vmul.f32 %v12218_v60, %v1561_v1  ;;  %v12219_v62 = vld [vmem:[#allocation32_spill] sm:$0xff]  ;;  %12220 = vst [vmem:[#allocation85_spill] sm:$0xff] %v8335_v50  ;;  %v3264_v5 = vsel %vm12038_vm8, %v12004_v40, %v12221_v45  ;;  %v12006_v20 = vrot.slane %v8313_v9, 3  ;;  %12222 = vst [vmem:[#allocation86_spill] sm:$0xff] %v8344_v46  ;;  %v12223_v1 = vld [vmem:[#allocation65_spill] sm:$0xff] }
 0x29f   :  { %3844 = vrot.lane.b32.xlu0 %v3761_v16, %s6921_s12  ;;  %v2054_v12 = vmul.f32 %v12219_v62, %v1562_v52  ;;  %v1590_v2 = vmax.f32 %v1434_v14, 0.0  ;;  %v2081_v11 = vmul.f32 %v12223_v1, %v1589_v0  ;;  %v12224_v52 = vld [vmem:[#allocation64_spill] sm:$0xff]  ;;  %v12225_v45 = vrot.slane %v8299_v13, 3 }
 0x2a0   :  { %v1326_v48 = vpop.f32.mrb[224].mxu0  ;;  %v2988_v47 = vrot.slane %v8331_v8, 1  ;;  %v8369_v0 = vshrl.u32 %v8299_v13, 16 }
 0x2a1   :  { %v2121_v38 = vpack.c.bf16 %v2054_v12, %v2053_v22  ;;  %v2082_v14 = vmul.f32 %v12224_v52, %v1590_v2  ;;  %v1327_v59 = vadd.f32 %v8309_v28, %v1326_v48  ;;  %v6491_v35 = vpop.f32.mrb[225].mxu0  ;;  %3435 = vrot.lane.b32.xlu1 %v3264_v5, %s6920_s10  ;;  %v3789_v22 = vsel %vm3750_vm10, %v12006_v20, %v12225_v45 }
 0x2a2   :  { %v1329_v62 = vpop.f32.mrb[226].mxu0  ;;  %v1438_v60 = vpop.f32.mrb[40].mxu1  ;;  %v3506_v12 = vrot.slane %v8331_v8, 2  ;;  %v3507_v48 = vrot.slane %v8272_v19, 3  ;;  %v2989_v45 = vrot.slane %v8272_v19, 2  ;;  %v8366_v20 = vshll.u32 %v8299_v13, 16 }
 0x2a3   :  { %2804 = vrot.lane.b32.xlu0 %v8268_v3, %s6916_s13  ;;  %2166 = vst.msk [vmem:[#allocation2 + $0x80] sm:$0xff] %vm1044_vm5, %v2121_v38  ;;  %v2135_v35 = vpack.c.bf16 %v2082_v14, %v2081_v11  ;;  %v1563_v2 = vmax.f32 %v1327_v59, 0.0  ;;  %v1330_v40 = vadd.f32 %v8309_v28, %v1329_v62  ;;  %v1439_v3 = vadd.f32 %v8309_v28, %v1438_v60  ;;  %v6492_v16 = vpop.f32.mrb[227].mxu0  ;;  %v6547_v52 = vpop.f32.mrb[41].mxu1 }
 0x2a4   :  { %v1441_v1 = vpop.f32.mrb[42].mxu1  ;;  %v12226_v62 = vrot.slane %v8299_v13, 1  ;;  %v12227_v16 = vrot.slane %v8313_v9, 1  ;;  %v8379_v14 = vpop.permute.xlu0 %2007  ;;  %v8382_v56 = vor.u32 %v3507_v48, %v3506_v12  ;;  %v8392_v61 = vor.u32 %v2989_v45, %v2988_v47 }
 0x2a5   :  { %2180 = vst.msk [vmem:[#allocation2 + $0xf0] sm:$0xff] %vm1044_vm5, %v2135_v35  ;;  %v1564_v11 = vmax.f32 %v1330_v40, 0.0  ;;  %v1591_v59 = vmax.f32 %v1439_v3, 0.0  ;;  %v1442_v38 = vadd.f32 %v8309_v28, %v1441_v1  ;;  %v6548_v60 = vpop.f32.mrb[43].mxu1  ;;  %3872 = vrot.lane.b32.xlu1 %v3789_v22, %s6921_s12  ;;  %12228 = vst [vmem:[#allocation87_spill] sm:$0xff] %v8379_v14  ;;  %v8385_v40 = vshll.u32 %v8313_v9, 16  ;;  %v8396_v12 = vpop.permute.xlu1 %2022 }
 0x2a6   :  { %v2751_v52 = vsel %vm2706_vm7, %v12227_v16, %v12226_v62  ;;  %v8388_v1 = vshrl.u32 %v8313_v9, 16  ;;  %v12229_v35 = vld [vmem:[#allocation39_spill] sm:$0xff]  ;;  %v12230_v3 = vld [vmem:[#allocation34_spill] sm:$0xff]  ;;  %v3044_v62 = vrot.slane %v8369_v0, 1  ;;  %v3045_v16 = vrot.slane %v8366_v20, 2  ;;  %12231 = vst [vmem:[#allocation88_spill] sm:$0xff] %v8396_v12 }
 0x2a7   :  { %2920 = vrot.lane.b32.xlu0 %v2751_v52, %s6918_s30  ;;  %v2055_v22 = vmul.f32 %v12229_v35, %v1563_v2  ;;  %v2056_v60 = vmul.f32 %v12230_v3, %v1564_v11  ;;  %v1592_v10 = vmax.f32 %v1442_v38, 0.0  ;;  %v2083_v51 = vmul.f32 %v12232_v29, %v1591_v59 }
 0x2a8   :  { %v1334_v54 = vpop.f32.mrb[228].mxu0  ;;  %v3509_v47 = vsel %vm12041_vm11, %v8222_v63, %v8382_v56  ;;  %v3040_v45 = vrot.slane %v8388_v1, 1  ;;  %v8414_v63 = vor.u32 %v3045_v16, %v3044_v62  ;;  %v3562_v35 = vrot.slane %v8369_v0, 2  ;;  %v8425_v16 = vld [vmem:[#allocation2 + $0x48] sm:$0xff] }
 0x2a9   :  { %v2122_v48 = vpack.c.bf16 %v2056_v60, %v2055_v22  ;;  %v2084_v23 = vmul.f32 %v12233_v21, %v1592_v10  ;;  %v1335_v39 = vadd.f32 %v8309_v28, %v1334_v54  ;;  %v6495_v2 = vpop.f32.mrb[229].mxu0  ;;  %2832 = vrot.lane.b32.xlu1 %v2751_v52, %s6916_s13  ;;  %v3041_v22 = vrot.slane %v8385_v40, 2  ;;  %v8412_v21 = vpop.permute.xlu0 %2017 }
 0x2aa   :  { %v1337_v11 = vpop.f32.mrb[230].mxu0  ;;  %v1446_v38 = vpop.f32.mrb[44].mxu1  ;;  %12234 = vst [vmem:[#allocation89_spill] sm:$0xff] %v8412_v21  ;;  %v3563_v59 = vrot.slane %v8366_v20, 3  ;;  %v2991_v62 = vsel %vm12042_vm9, %v8245_v18, %v8392_v61 }
 0x2ab   :  { %3347 = vrot.lane.b32.xlu0 %v3264_v5, %s6917_s29  ;;  %2167 = vst.msk [vmem:[#allocation2 + $0x88] sm:$0xff] %vm1044_vm5, %v2122_v48  ;;  %v2136_v10 = vpack.c.bf16 %v2084_v23, %v2083_v51  ;;  %v1565_v54 = vmax.f32 %v1335_v39, 0.0  ;;  %v1338_v52 = vadd.f32 %v8309_v28, %v1337_v11  ;;  %v1447_v60 = vadd.f32 %v8309_v28, %v1446_v38  ;;  %v6496_v2 = vpop.f32.mrb[231].mxu0  ;;  %v6551_v5 = vpop.f32.mrb[45].mxu1 }
 0x2ac   :  { %v1449_v29 = vpop.f32.mrb[46].mxu1  ;;  %v8428_v11 = vor.u32 %v3041_v22, %v3040_v45  ;;  %v12235_v38 = vrot.slane %v8385_v40, 1  ;;  %v12237_v2 = vld [vmem:[#allocation36_spill] sm:$0xff]  ;;  %v12238_v22 = vrot.slane %v8366_v20, 1 }
 0x2ad   :  { %2181 = vst.msk [vmem:[#allocation2 + $0xf8] sm:$0xff] %vm1044_vm5, %v2136_v10  ;;  %v1566_v23 = vmax.f32 %v1338_v52, 0.0  ;;  %v1593_v51 = vmax.f32 %v1447_v60, 0.0  ;;  %v1450_v39 = vadd.f32 %v8309_v28, %v1449_v29  ;;  %v6552_v48 = vpop.f32.mrb[47].mxu1  ;;  %3674 = vrot.lane.b32.xlu1 %v3509_v47, %s6922_s2  ;;  %v3558_v52 = vrot.slane %v8388_v1, 2  ;;  %v12236_v60 = vld [vmem:[#allocation41_spill] sm:$0xff] }
 0x2ae   :  { %v2419_v10 = vor.u32 %v8388_v1, %v12235_v38  ;;  %v3559_v29 = vrot.slane %v8385_v40, 3  ;;  %v2057_v47 = vmul.f32 %v12236_v60, %v1565_v54  ;;  %v3047_v45 = vsel %vm12042_vm9, %v8428_v11, %v8414_v63 }
 0x2af   :  { %3150 = vrot.lane.b32.xlu0 %v2991_v62, %s6919_s9  ;;  %v2058_v5 = vmul.f32 %v12237_v2, %v1566_v23  ;;  %v1594_v48 = vmax.f32 %v1450_v39, 0.0  ;;  %v8437_v18 = vpop.permute.xlu1 %3307  ;;  %v12020_v62 = vrot.slane %v8425_v16, 1  ;;  %v8448_v38 = vor.u32 %v3563_v59, %v3562_v35 }
 0x2b0   :  { %v1342_v3 = vpop.f32.mrb[232].mxu0  ;;  %v8439_v33 = vpop.permute.xlu0 %2792  ;;  %v2424_v1 = vsel %vm12039_vm6, %v2419_v10, %v12238_v22  ;;  %v2085_v23 = vmul.f32 %v7974_v43, %v1593_v51  ;;  %v8455_v49 = vor.u32 %v3559_v29, %v3558_v52  ;;  %v12023_v29 = vrot.slane %v8425_v16, 2 }
 0x2b1   :  { %v2123_v54 = vpack.c.bf16 %v2058_v5, %v2057_v47  ;;  %v2086_v39 = vmul.f32 %v7941_v53, %v1594_v48  ;;  %v1343_v2 = vadd.f32 %v8309_v28, %v1342_v3  ;;  %v6499_v60 = vpop.f32.mrb[233].mxu0  ;;  %3178 = vrot.lane.b32.xlu1 %v3047_v45, %s6919_s9  ;;  %v12239_v48 = vrot.slane %v8234_v27, 1 }
 0x2b2   :  { %v1345_v31 = vpop.f32.mrb[234].mxu0  ;;  %v1454_v24 = vpop.f32.mrb[48].mxu1  ;;  %v3565_v22 = vsel %vm12041_vm11, %v8455_v49, %v8448_v38 }
 0x2b3   :  { %2622 = vrot.lane.b32.xlu0 %v2424_v1, %s6915_s11  ;;  %2168 = vst.msk [vmem:[#allocation2 + $0x90] sm:$0xff] %vm1044_vm5, %v2123_v54  ;;  %v2137_v35 = vpack.c.bf16 %v2086_v39, %v2085_v23  ;;  %v1567_v59 = vmax.f32 %v1343_v2, 0.0  ;;  %v1346_v10 = vadd.f32 %v8309_v28, %v1345_v31  ;;  %v1455_v51 = vadd.f32 %v8309_v28, %v1454_v24  ;;  %v6500_v47 = vpop.f32.mrb[235].mxu0  ;;  %v6555_v5 = vpop.f32.mrb[49].mxu1  ;;  %v12240_v23 = vld [vmem:[#allocation43_spill] sm:$0xff] }
 0x2b4   :  { %v8460_v3 = vpop.permute.xlu1 %2880  ;;  %v1457_v60 = vpop.f32.mrb[50].mxu1  ;;  %v8467_v52 = vsel %vm2706_vm7, %v12239_v48, %v12020_v62  ;;  %v8471_v2 = vshll.u32 %v8425_v16, 16  ;;  %v12241_v47 = vld [vmem:[#allocation38_spill] sm:$0xff] }
 0x2b5   :  { %2182 = vst.msk [vmem:[#allocation2 + $0x100] sm:$0xff] %vm1044_vm5, %v2137_v35  ;;  %v1568_v24 = vmax.f32 %v1346_v10, 0.0  ;;  %v8474_v31 = vpop.permute.xlu0 %2582  ;;  %v6556_v45 = vpop.f32.mrb[51].mxu1  ;;  %2894 = vrot.lane.b32.xlu1 %v8467_v52, %s6918_s30  ;;  %v1595_v1 = vmax.f32 %v1455_v51, 0.0  ;;  %v1458_v54 = vadd.f32 %v8309_v28, %v1457_v60  ;;  %v2059_v39 = vmul.f32 %v12240_v23, %v1567_v59 }
 0x2b6   :  { %v12242_v45 = vrot.slane %v8234_v27, 2 }
 0x2b7   :  { %3702 = vrot.lane.b32.xlu0 %v3565_v22, %s6922_s2  ;;  %v2060_v35 = vmul.f32 %v12241_v47, %v1568_v24  ;;  %v1596_v10 = vmax.f32 %v1458_v54, 0.0  ;;  %v8498_v54 = vld [vmem:[#allocation2 + $0xb8] sm:$0xff]  ;;  %v2087_v43 = vmul.f32 %v8022_v32, %v1595_v1 }
 0x2b8   :  { %v8485_v5 = vpop.permute.xlu1 %3138  ;;  %v1350_v48 = vpop.f32.mrb[236].mxu0  ;;  %v3238_v62 = vsel %vm12038_vm8, %v12242_v45, %v12023_v29 }
 0x2b9   :  { %v2124_v53 = vpack.c.bf16 %v2060_v35, %v2059_v39  ;;  %v1351_v60 = vadd.f32 %v8309_v28, %v1350_v48  ;;  %v8494_v22 = vpop.permute.xlu0 %2882  ;;  %v6503_v59 = vpop.f32.mrb[237].mxu0  ;;  %3321 = vrot.lane.b32.xlu1 %v3238_v62, %s6917_s29  ;;  %v2088_v47 = vmul.f32 %v7986_v34, %v1596_v10  ;;  %v12243_v39 = vrot.slane %v8272_v19, 1  ;;  %v2193_v48 = vld [vmem:[#allocation2] sm:$0xc0] }
 0x2ba   :  { %v1353_v23 = vpop.f32.mrb[238].mxu0  ;;  %v1462_v45 = vpop.f32.mrb[52].mxu1 }
 0x2bb   :  { %3409 = vrot.lane.b32.xlu0 %v3238_v62, %s6920_s10  ;;  %v2315_v35 = vor.u32 %v8331_v8, %v12243_v39  ;;  %2169 = vst.msk [vmem:[#allocation2 + $0x98] sm:$0xff] %vm1044_vm5, %v2124_v53  ;;  %v1569_v59 = vmax.f32 %v1351_v60, 0.0  ;;  %v1354_v29 = vadd.f32 %v8309_v28, %v1353_v23  ;;  %v1463_v24 = vadd.f32 %v8309_v28, %v1462_v45  ;;  %v6504_v51 = vpop.f32.mrb[239].mxu0  ;;  %v6559_v1 = vpop.f32.mrb[53].mxu1 }
 0x2bc   :  { %v2138_v32 = vpack.c.bf16 %v2088_v47, %v2087_v43  ;;  %v8509_v10 = vpop.permute.xlu1 %3397  ;;  %v1465_v34 = vpop.f32.mrb[54].mxu1  ;;  %v12244_v62 = vrot.slane %v8471_v2, 1  ;;  %v12245_v23 = vrot.slane %v8425_v16, 3  ;;  %v12246_v43 = vrot.slane %v8234_v27, 3  ;;  %v12247_v51 = vld [vmem:[#allocation42_spill] sm:$0xff] }
 0x2bd   :  { %v1570_v39 = vmax.f32 %v1354_v29, 0.0  ;;  %v8515_v53 = vpop.permute.xlu0 %3309  ;;  %v6560_v60 = vpop.f32.mrb[55].mxu1  ;;  %v3920_v45 = vsel %vm1044_vm5, %v2193_v48, %v12247_v51  ;;  %v1466_v1 = vadd.f32 %v8309_v28, %v1465_v34  ;;  %v12251_v34 = vrot.slane %v8299_v13, 2 }
 0x2be   :  { %v2320_v19 = vsel %vm12039_vm6, %v2315_v35, %v12244_v62  ;;  %v3763_v47 = vsel %vm3750_vm10, %v12246_v43, %v12245_v23  ;;  %2183 = vst.msk [vmem:[#allocation2 + $0x108] sm:$0xff] %vm1044_vm5, %v2138_v32  ;;  %v1597_v35 = vmax.f32 %v1463_v24, 0.0  ;;  %v12248_v62 = vld [vmem:[#allocation45_spill] sm:$0xff]  ;;  %v12249_v60 = vld [vmem:[#allocation40_spill] sm:$0xff]  ;;  %v8533_v23 = vshrl.u32 %v8425_v16, 16 }
 0x2bf   :  { %2596 = vrot.lane.b32.xlu1 %v2320_v19, %s6915_s11  ;;  %3846 = vrot.lane.b32.xlu0 %v3763_v47, %s6921_s12  ;;  %v2061_v19 = vmul.f32 %v12248_v62, %v1569_v59  ;;  %v2062_v8 = vmul.f32 %v12249_v60, %v1570_v39  ;;  %v1598_v43 = vmax.f32 %v1466_v1, 0.0  ;;  %v12250_v32 = vrot.slane %v8498_v54, 2  ;;  %v12252_v47 = vld [vmem:[#allocation44_spill] sm:$0xff] }
 0x2c0   :  { %v8535_v48 = vpop.permute.xlu1 %3834  ;;  %v4005_v51 = vsel %vm4003_vm12, %v3920_v45, %v12252_v47  ;;  %v2089_v1 = vmul.f32 %v8065_v4, %v1597_v35  ;;  %v12255_v47 = vrot.slane %v8498_v54, 1  ;;  %v12256_v35 = vrot.slane %v8299_v13, 1 }
 0x2c1   :  { %v3266_v24 = vsel %vm12038_vm8, %v12251_v34, %v12250_v32  ;;  %v2125_v59 = vpack.c.bf16 %v2062_v8, %v2061_v19  ;;  %v8544_v39 = vpop.permute.xlu0 %2794  ;;  %v2090_v27 = vmul.f32 %v8032_v17, %v1598_v43  ;;  %v12253_v32 = vrot.slane %v8498_v54, 3 }
 0x2c2   :  { %v1470_v29 = vpop.f32.mrb[56].mxu1  ;;  %v12254_v34 = vrot.slane %v8299_v13, 3  ;;  %v2753_v43 = vsel %vm2706_vm7, %v12256_v35, %v12255_v47  ;;  %v3510_v17 = vrot.slane %v8533_v23, 2  ;;  %v4090_v13 = vsel %vm4088_vm13, %v4005_v51, %v8460_v3 }
 0x2c3   :  { %3437 = vrot.lane.b32.xlu1 %v3266_v24, %s6920_s10  ;;  %2806 = vrot.lane.b32.xlu0 %v8467_v52, %s6916_s13  ;;  %2170 = vst.msk [vmem:[#allocation2 + $0xa0] sm:$0xff] %vm1044_vm5, %v2125_v59  ;;  %v1471_v8 = vadd.f32 %v8309_v28, %v1470_v29  ;;  %v6563_v19 = vpop.f32.mrb[57].mxu1  ;;  %v3511_v52 = vrot.slane %v8471_v2, 3  ;;  %v2139_v4 = vpack.c.bf16 %v2090_v27, %v2089_v1  ;;  %v8569_v59 = vshll.u32 %v8498_v54, 16 }
 0x2c4   :  { %v3791_v45 = vsel %vm3750_vm10, %v12254_v34, %v12253_v32  ;;  %v8565_v60 = vpop.permute.xlu1 %2584  ;;  %v1473_v62 = vpop.f32.mrb[58].mxu1  ;;  %v2993_v32 = vrot.slane %v8471_v2, 2  ;;  %v8572_v29 = vshrl.u32 %v8498_v54, 16  ;;  %v2992_v27 = vrot.slane %v8533_v23, 1 }
 0x2c5   :  { %v1599_v34 = vmax.f32 %v1471_v8, 0.0  ;;  %v1474_v19 = vadd.f32 %v8309_v28, %v1473_v62  ;;  %v3141_v47 = vpop.permute.xlu0 %3140  ;;  %v6564_v35 = vpop.f32.mrb[59].mxu1  ;;  %v4175_v1 = vsel %vm4173_vm14, %v4090_v13, %v8485_v5  ;;  %2184 = vst.msk [vmem:[#allocation2 + $0x110] sm:$0xff] %vm1044_vm5, %v2139_v4  ;;  %v8583_v3 = vor.u32 %v3511_v52, %v3510_v17 }
 0x2c6   :  { %v3048_v51 = vrot.slane %v8572_v29, 1  ;;  %v4260_v8 = vsel %vm4258_vm15, %v4175_v1, %v8437_v18  ;;  %v8592_v35 = vor.u32 %v2993_v32, %v2992_v27  ;;  %v6846_v32 = vld [vmem:[#allocation2 + $0x8] sm:$0xff] }
 0x2c7   :  { %3874 = vrot.lane.b32.xlu1 %v3791_v45, %s6921_s12  ;;  %2922 = vrot.lane.b32.xlu0 %v2753_v43, %s6918_s30  ;;  %v1600_v15 = vmax.f32 %v1474_v19, 0.0  ;;  %v3049_v45 = vrot.slane %v8569_v59, 2  ;;  %v2091_v5 = vmul.f32 %v8113_v36, %v1599_v34  ;;  %v4345_v17 = vsel %vm4343_vm0, %v4260_v8, %v8509_v10  ;;  %v8609_v8 = vld [vmem:[#allocation2 + $0x50] sm:$0xff] }
 0x2c8   :  { %v3665_v62 = vpop.permute.xlu1 %3664  ;;  %v12032_v19 = vrot.slane %v8569_v59, 1  ;;  %v3922_v10 = vsel %vm1044_vm5, %v6846_v32, %v8474_v31  ;;  %v2995_v31 = vsel %vm12042_vm9, %v8392_v61, %v8592_v35  ;;  %v8628_v32 = vld [vmem:[#allocation2 + $0xc0] sm:$0xff] }
 0x2c9   :  { %v2092_v13 = vmul.f32 %v8073_v7, %v1600_v15  ;;  %v3400_v4 = vpop.permute.xlu0 %3399  ;;  %v4430_v18 = vsel %vm4428_vm1, %v4345_v17, %v3665_v62  ;;  %v3566_v62 = vrot.slane %v8572_v29, 2 }
 0x2ca   :  { %v1478_v52 = vpop.f32.mrb[60].mxu1 }
 0x2cb   :  { %2834 = vrot.lane.b32.xlu1 %v2753_v43, %s6916_s13  ;;  %3349 = vrot.lane.b32.xlu0 %v3266_v24, %s6917_s29  ;;  %v2140_v6 = vpack.c.bf16 %v2092_v13, %v2091_v5  ;;  %v1479_v34 = vadd.f32 %v8309_v28, %v1478_v52  ;;  %v6567_v15 = vpop.f32.mrb[61].mxu1  ;;  %v3513_v43 = vsel %vm12041_vm11, %v8382_v56, %v8583_v3  ;;  %v3567_v5 = vrot.slane %v8569_v59, 3 }
 0x2cc   :  { %v8605_v27 = vpop.permute.xlu1 %2884  ;;  %v1481_v1 = vpop.f32.mrb[62].mxu1  ;;  %v8607_v24 = vor.u32 %v3049_v45, %v3048_v51  ;;  %v4515_v51 = vsel %vm4513_vm3, %v4430_v18, %v8535_v48  ;;  %v12257_v45 = vrot.slane %v8366_v20, 1 }
 0x2cd   :  { %2185 = vst.msk [vmem:[#allocation2 + $0x118] sm:$0xff] %vm1044_vm5, %v2140_v6  ;;  %v1601_v13 = vmax.f32 %v1479_v34, 0.0  ;;  %v1482_v56 = vadd.f32 %v8309_v28, %v1481_v1  ;;  %v3837_v17 = vpop.permute.xlu0 %3836  ;;  %v6568_v52 = vpop.f32.mrb[63].mxu1  ;;  %v4007_v34 = vsel %vm4003_vm12, %v3922_v10, %v8439_v33  ;;  %v4600_v18 = vsel %vm4598_vm4, %v4515_v51, 1065369472 }
 0x2ce   :  { %v2427_v6 = vor.u32 %v8369_v0, %v12257_v45  ;;  %v4092_v61 = vsel %vm4088_vm13, %v4007_v34, %v8494_v22  ;;  %v3051_v48 = vsel %vm12042_vm9, %v8414_v63, %v8607_v24  ;;  %v8640_v0 = vor.u32 %v3567_v5, %v3566_v62 }
 0x2cf   :  { %3676 = vrot.lane.b32.xlu1 %v3513_v43, %s6922_s2  ;;  %3152 = vrot.lane.b32.xlu0 %v2995_v31, %s6919_s9  ;;  %v1602_v15 = vmax.f32 %v1482_v56, 0.0  ;;  %v12031_v43 = vrot.slane %v8609_v8, 1  ;;  %v4177_v33 = vsel %vm4173_vm14, %v4092_v61, %v3141_v47  ;;  %v2093_v10 = vmul.f32 %v8152_v30, %v1601_v13 }
 0x2d0   :  { %v8632_v1 = vpop.permute.xlu1 %3311  ;;  %v2432_v20 = vsel %vm12039_vm6, %v2427_v6, %v12032_v19  ;;  %v12030_v63 = vrot.slane %v8628_v32, 2  ;;  %v12033_v47 = vrot.slane %v8609_v8, 2  ;;  %v4653_v51 = vshrl.u32 %v4600_v18, 16 }
 0x2d1   :  { %v2094_v22 = vmul.f32 %v8119_v58, %v1602_v15  ;;  %v8646_v56 = vpop.permute.xlu0 %2796  ;;  %v4656_v45 = vshll.u32 %v4600_v18, 16  ;;  %v4262_v13 = vsel %vm4258_vm15, %v4177_v33, %v8515_v53  ;;  %v12258_v15 = vrot.slane %v8425_v16, 1 }
 0x2d2   :  { %v1486_v52 = vpop.f32.mrb[64].mxu1  ;;  %v3569_v53 = vsel %vm12041_vm11, %v8448_v38, %v8640_v0  ;;  %v12260_v38 = vrot.slane %v8425_v16, 2  ;;  %v2754_v19 = vrot.slane %v8628_v32, 1  ;;  %vm12106_vm6 = vcmask 596992  }
 0x2d3   :  { %3180 = vrot.lane.b32.xlu1 %v3051_v48, %s6919_s9  ;;  %2624 = vrot.lane.b32.xlu0 %v2432_v20, %s6915_s11  ;;  %v2141_v31 = vpack.c.bf16 %v2094_v22, %v2093_v10  ;;  %v1487_v62 = vadd.f32 %v8309_v28, %v1486_v52  ;;  %v6571_v5 = vpop.f32.mrb[65].mxu1  ;;  %v8662_v61 = vsel %vm2706_vm7, %v12258_v15, %v12031_v43  ;;  %v8692_v15 = vshll.u32 %v8609_v8, 16  ;;  %v6847_v43 = vld [vmem:[#allocation2 + $0x10] sm:$0xff] }
 0x2d4   :  { %v8655_v6 = vpop.permute.xlu1 %2586  ;;  %v1489_v34 = vpop.f32.mrb[66].mxu1  ;;  %v4347_v48 = vsel %vm4343_vm0, %v4262_v13, %v3400_v4  ;;  %v12259_v4 = vrot.slane %v8498_v54, 2 }
 0x2d5   :  { %2186 = vst.msk [vmem:[#allocation2 + $0x120] sm:$0xff] %vm1044_vm5, %v2141_v31  ;;  %v1603_v20 = vmax.f32 %v1487_v62, 0.0  ;;  %v1490_v18 = vadd.f32 %v8309_v28, %v1489_v34  ;;  %v3667_v10 = vpop.permute.xlu0 %3666  ;;  %v6572_v22 = vpop.f32.mrb[67].mxu1  ;;  %v12040_v31 = vrot.slane %v8628_v32, 3  ;;  %v3764_v62 = vrot.slane %v8609_v8, 3 }
 0x2d6   :  { %v4432_v33 = vsel %vm4428_vm1, %v4347_v48, %v3667_v10  ;;  %v8679_v52 = vsel %vm12038_vm8, %v12259_v4, %v12030_v63  ;;  %v8689_v34 = vsel %vm12038_vm8, %v12260_v38, %v12033_v47  ;;  %v4655_v48 = vrot.slane %v4653_v51, 6 }
 0x2d7   :  { %2808 = vrot.lane.b32.xlu1 %v8662_v61, %s6916_s13  ;;  %3704 = vrot.lane.b32.xlu0 %v3569_v53, %s6922_s2  ;;  %v1604_v5 = vmax.f32 %v1490_v18, 0.0  ;;  %v4517_v13 = vsel %vm4513_vm3, %v4432_v33, %v3837_v17  ;;  %v4658_v10 = vrot.slane %v4656_v45, 7  ;;  %v8698_v18 = vshrl.u32 %v8609_v8, 16 }
 0x2d8   :  { %v4601_v22 = vsel %vm4598_vm4, %v4517_v13, 1065369472  ;;  %v8695_v53 = vpop.permute.xlu1 %2886  ;;  %v2095_v17 = vmul.f32 %v8200_v37, %v1603_v20  ;;  %v3924_v51 = vsel %vm1044_vm5, %v6847_v43, %v8565_v60  ;;  %v12261_v20 = vrot.slane %v8498_v54, 3 }
 0x2d9   :  { %v2096_v33 = vmul.f32 %v8160_v26, %v1604_v5  ;;  %v4660_v4 = vshrl.u32 %v4601_v22, 16  ;;  %v4663_v63 = vshll.u32 %v4601_v22, 16  ;;  %v3143_v38 = vpop.permute.xlu0 %3142  ;;  %v12262_v13 = vrot.slane %v8425_v16, 3 }
 0x2da   :  { %v1494_v45 = vpop.f32.mrb[68].mxu1  ;;  %v3793_v5 = vsel %vm3750_vm10, %v12261_v20, %v12040_v31  ;;  %vm4652_vm8 = vsmask.f32 1280  ;;  %v3514_v20 = vrot.slane %v8698_v18, 2  ;;  %v3515_v31 = vrot.slane %v8692_v15, 3 }
 0x2db   :  { %3439 = vrot.lane.b32.xlu1 %v8679_v52, %s6920_s10  ;;  %3411 = vrot.lane.b32.xlu0 %v8689_v34, %s6920_s10  ;;  %v3765_v22 = vsel %vm3750_vm10, %v12262_v13, %v3764_v62  ;;  %v2142_v47 = vpack.c.bf16 %v2096_v33, %v2095_v17  ;;  %v4662_v60 = vrot.slane %v4660_v4, 6  ;;  %v4665_v43 = vrot.slane %v4663_v63, 7  ;;  %v6575_v37 = vpop.f32.mrb[69].mxu1 }
 0x2dc   :  { %v1495_v26 = vadd.f32 %v8309_v28, %v1494_v45  ;;  %v8720_v58 = vpop.permute.xlu1 %3313  ;;  %v1497_v30 = vpop.f32.mrb[70].mxu1  ;;  %v4659_v16 = vor.u32 %v4658_v10, %v4655_v48  ;;  %v4009_v37 = vsel %vm4003_vm12, %v3924_v51, %v8544_v39  ;;  %v12263_v48 = vrot.slane %v8498_v54, 1 }
 0x2dd   :  { %2187 = vst.msk [vmem:[#allocation2 + $0x128] sm:$0xff] %vm1044_vm5, %v2142_v47  ;;  %v8725_v13 = vor.u32 %v4665_v43, %v4662_v60  ;;  %v1498_v63 = vadd.f32 %v8309_v28, %v1497_v30  ;;  %v3402_v33 = vpop.permute.xlu0 %3401  ;;  %v6576_v4 = vpop.f32.mrb[71].mxu1  ;;  %v4094_v30 = vsel %vm4088_vm13, %v4009_v37, %v8605_v27  ;;  %v2997_v39 = vrot.slane %v8692_v15, 2 }
 0x2de   :  { %v1605_v17 = vmax.f32 %v1495_v26, 0.0  ;;  %v8737_v47 = vsel %vm2706_vm7, %v12263_v48, %v2754_v19  ;;  %v2996_v26 = vrot.slane %v8698_v18, 1  ;;  %v4179_v51 = vsel %vm4173_vm14, %v4094_v30, %v3143_v38 }
 0x2df   :  { %3876 = vrot.lane.b32.xlu1 %v3793_v5, %s6921_s12  ;;  %3848 = vrot.lane.b32.xlu0 %v3765_v22, %s6921_s12  ;;  %v1606_v10 = vmax.f32 %v1498_v63, 0.0  ;;  %v4667_v45 = vsel %vm4652_vm8, %v4659_v16, %v8725_v13  ;;  %v8749_v54 = vor.u32 %v3515_v31, %v3514_v20  ;;  %v8752_v22 = vshll.u32 %v8628_v32, 16 }
 0x2e0   :  { %v8746_v5 = vpop.permute.xlu1 %2588  ;;  %6604 = vmatmul.mubr.msk.bf16.vlgmr.msra.gmra.mrb[88].mxu1 %vm12106_vm6, %v4667_v45  ;;  %v8755_v60 = vshrl.u32 %v8628_v32, 16  ;;  %v2097_v27 = vmul.f32 %v8239_v42, %v1605_v17  ;;  %v4264_v20 = vsel %vm4258_vm15, %v4179_v51, %v8632_v1  ;;  %v8768_v4 = vor.u32 %v2997_v39, %v2996_v26 }
 0x2e1   :  { %v2098_v43 = vmul.f32 %v8206_v55, %v1606_v10  ;;  %v3839_v16 = vpop.permute.xlu0 %3838  ;;  %6607 = vmatprep.mubr.msk.bf16.mxu1 %vm12093_vm2, %v12175_v44  ;;  %v4349_v37 = vsel %vm4343_vm0, %v4264_v20, %v3402_v33  ;;  %v3517_v10 = vsel %vm12041_vm11, %v8583_v3, %v8749_v54  ;;  %vm12265_vm11 = vsmask.f32 7424 }
 0x2e2   :  { %v1502_v38 = vpop.f32.mrb[72].mxu1  ;;  %v3052_v45 = vrot.slane %v8755_v60, 1 }
 0x2e3   :  { %2836 = vrot.lane.b32.xlu1 %v8737_v47, %s6916_s13  ;;  %2896 = vrot.lane.b32.xlu0 %v8662_v61, %s6918_s30  ;;  %v2143_v31 = vpack.c.bf16 %v2098_v43, %v2097_v27  ;;  %v1503_v63 = vadd.f32 %v8309_v28, %v1502_v38  ;;  %v6579_v17 = vpop.f32.mrb[73].mxu1  ;;  %v3053_v61 = vrot.slane %v8752_v22, 2  ;;  %v2327_v27 = vrot.slane %v8692_v15, 1 }
 0x2e4   :  { %v3669_v48 = vpop.permute.xlu1 %3668  ;;  %v1505_v30 = vpop.f32.mrb[74].mxu1 }
 0x2e5   :  { %2188 = vst.msk [vmem:[#allocation2 + $0x130] sm:$0xff] %vm1044_vm5, %v2143_v31  ;;  %v1607_v1 = vmax.f32 %v1503_v63, 0.0  ;;  %v4434_v51 = vsel %vm4428_vm1, %v4349_v37, %v3669_v48  ;;  %v1506_v26 = vadd.f32 %v8309_v28, %v1505_v30  ;;  %v8779_v39 = vpop.permute.xlu0 %2798  ;;  %v6580_v33 = vpop.f32.mrb[75].mxu1  ;;  %v12264_v31 = vrot.slane %v8471_v2, 1 }
 0x2e6   :  { %v4519_v3 = vsel %vm4513_vm3, %v4434_v51, %v3839_v16  ;;  %v2999_v48 = vsel %vm12042_vm9, %v8592_v35, %v8768_v4  ;;  %v8795_v30 = vor.u32 %v3053_v61, %v3052_v45  ;;  %v6848_v35 = vld [vmem:[#allocation2 + $0x18] sm:$0xff] }
 0x2e7   :  { %3678 = vrot.lane.b32.xlu1 %v3517_v10, %s6922_s2  ;;  %3323 = vrot.lane.b32.xlu0 %v8689_v34, %s6917_s29  ;;  %v4602_v43 = vsel %vm4598_vm4, %v4519_v3, 1065369472  ;;  %v1608_v38 = vmax.f32 %v1506_v26, 0.0  ;;  %v2323_v20 = vor.u32 %v8533_v23, %v12264_v31  ;;  %v2099_v16 = vmul.f32 %v8284_v25, %v1607_v1  ;;  %v8803_v23 = vld [vmem:[#allocation2 + $0x58] sm:$0xff] }
 0x2e8   :  { %v4668_v63 = vshrl.u32 %v4602_v43, 16  ;;  %v4671_v17 = vshll.u32 %v4602_v43, 16  ;;  %v8790_v37 = vpop.permute.xlu1 %2888  ;;  %v3926_v45 = vsel %vm1044_vm5, %v6848_v35, %v8655_v6  ;;  %v3055_v31 = vsel %vm12042_vm9, %v8607_v24, %v8795_v30 }
 0x2e9   :  { %v2100_v34 = vmul.f32 %v8247_v57, %v1608_v38  ;;  %v3145_v10 = vpop.permute.xlu0 %3144  ;;  %v2328_v2 = vsel %vm12265_vm11, %v2323_v20, %v2327_v27  ;;  %vm12267_vm11 = vcmask 1045504   ;;  %v3766_v35 = vrot.slane %v8803_v23, 3 }
 0x2ea   :  { %v4670_v51 = vrot.slane %v4668_v63, 6  ;;  %v4673_v26 = vrot.slane %v4671_v17, 7  ;;  %v1510_v33 = vpop.f32.mrb[76].mxu1  ;;  %v3241_v63 = vrot.slane %v8803_v23, 2  ;;  %vm12273_vm9 = vcmask 1045504  }
 0x2eb   :  { %3154 = vrot.lane.b32.xlu1 %v2999_v48, %s6919_s9  ;;  %2598 = vrot.lane.b32.xlu0 %v2328_v2, %s6915_s11  ;;  %v2144_v61 = vpack.c.bf16 %v2100_v34, %v2099_v16  ;;  %v1511_v1 = vadd.f32 %v8309_v28, %v1510_v33  ;;  %v6583_v3 = vpop.f32.mrb[77].mxu1  ;;  %v4011_v34 = vsel %vm4003_vm12, %v3926_v45, %v8646_v56  ;;  %v12266_v56 = vrot.slane %v8609_v8, 2 }
 0x2ec   :  { %v8809_v43 = vpop.permute.xlu1 %3315  ;;  %v1513_v38 = vpop.f32.mrb[78].mxu1  ;;  %v8814_v20 = vor.u32 %v4673_v26, %v4670_v51  ;;  %v4096_v2 = vsel %vm4088_vm13, %v4011_v34, %v8695_v53 }
 0x2ed   :  { %2189 = vst.msk [vmem:[#allocation2 + $0x138] sm:$0xff] %vm1044_vm5, %v2144_v61  ;;  %v1609_v17 = vmax.f32 %v1511_v1, 0.0  ;;  %v1514_v6 = vadd.f32 %v8309_v28, %v1513_v38  ;;  %v3404_v48 = vpop.permute.xlu0 %3403  ;;  %v6584_v16 = vpop.f32.mrb[79].mxu1  ;;  %v4181_v26 = vsel %vm4173_vm14, %v4096_v2, %v3145_v10  ;;  %v3570_v61 = vrot.slane %v8755_v60, 2 }
 0x2ee   :  { %v4675_v24 = vsel %vm4652_vm8, %v8725_v13, %v8814_v20  ;;  %v2439_v13 = vrot.slane %v8752_v22, 1  ;;  %v3571_v1 = vrot.slane %v8752_v22, 3  ;;  %v12268_v38 = vrot.slane %v8569_v59, 1 }
 0x2ef   :  { %3182 = vrot.lane.b32.xlu1 %v3055_v31, %s6919_s9  ;;  %2924 = vrot.lane.b32.xlu0 %v8737_v47, %s6918_s30  ;;  %v1610_v51 = vmax.f32 %v1514_v6, 0.0  ;;  %v8838_v47 = vsel %vm12267_vm11, %v12266_v56, %v3241_v63  ;;  %v2101_v53 = vmul.f32 %v8335_v50, %v1609_v17  ;;  %v4266_v17 = vsel %vm4258_vm15, %v4181_v26, %v8720_v58 }
 0x2f0   :  { %6608 = vmatmul.mubr.msk.bf16.gmra.mrb[92].mxu1 %vm12106_vm6, %v4675_v24  ;;  %v8831_v33 = vpop.permute.xlu1 %2590  ;;  %v2435_v31 = vor.u32 %v8572_v29, %v12268_v38  ;;  %v4351_v24 = vsel %vm4343_vm0, %v4266_v17, %v3404_v48  ;;  %vm12269_vm11 = vsmask.f32 7424  ;;  %v2728_v29 = vrot.slane %v8803_v23, 1 }
 0x2f1   :  { %6611 = vmatprep.mubr.msk.bf16.mxu1 %vm12093_vm2, %v12175_v44  ;;  %v2102_v10 = vmul.f32 %v8293_v41, %v1610_v51  ;;  %v3841_v45 = vpop.permute.xlu0 %3840 }
 0x2f2   :  { %v1518_v3 = vpop.f32.mrb[80].mxu1  ;;  %v2440_v59 = vsel %vm12269_vm11, %v2435_v31, %v2439_v13  ;;  %vm12271_vm11 = vsmask.f32 5376 }
 0x2f3   :  { %3413 = vrot.lane.b32.xlu1 %v8838_v47, %s6920_s10  ;;  %3351 = vrot.lane.b32.xlu0 %v8679_v52, %s6917_s29  ;;  %v2145_v6 = vpack.c.bf16 %v2102_v10, %v2101_v53  ;;  %v1519_v16 = vadd.f32 %v8309_v28, %v1518_v3  ;;  %v6587_v34 = vpop.f32.mrb[81].mxu1  ;;  %v3767_v52 = vsel %vm3750_vm10, %v3764_v62, %v3766_v35  ;;  %v8876_v62 = vld [vmem:[#allocation2 + $0xc8] sm:$0xff] }
 0x2f4   :  { %v3671_v2 = vpop.permute.xlu1 %3670  ;;  %v1521_v51 = vpop.f32.mrb[82].mxu1  ;;  %v8874_v10 = vor.u32 %v3571_v1, %v3570_v61  ;;  %v12270_v34 = vrot.slane %v8609_v8, 1  ;;  %v3269_v1 = vrot.slane %v8876_v62, 2  ;;  %v12043_v8 = vrot.slane %v8876_v62, 3 }
 0x2f5   :  { %2190 = vst.msk [vmem:[#allocation2 + $0x140] sm:$0xff] %vm1044_vm5, %v2145_v6  ;;  %v1611_v58 = vmax.f32 %v1519_v16, 0.0  ;;  %v4436_v26 = vsel %vm4428_vm1, %v4351_v24, %v3671_v2  ;;  %v1522_v48 = vadd.f32 %v8309_v28, %v1521_v51  ;;  %v8871_v56 = vpop.permute.xlu0 %2800  ;;  %v6588_v53 = vpop.f32.mrb[83].mxu1 }
 0x2f6   :  { %v4521_v3 = vsel %vm4513_vm3, %v4436_v26, %v3841_v45  ;;  %v2729_v61 = vsel %vm2706_vm7, %v12270_v34, %v2728_v29  ;;  %v3573_v51 = vsel %vm12271_vm11, %v8640_v0, %v8874_v10  ;;  %v8913_v34 = vshrl.u32 %v8803_v23, 16 }
 0x2f7   :  { %3850 = vrot.lane.b32.xlu1 %v3767_v52, %s6921_s12  ;;  %2626 = vrot.lane.b32.xlu0 %v2440_v59, %s6915_s11  ;;  %v4603_v38 = vsel %vm4598_vm4, %v4521_v3, 1065369472  ;;  %v1612_v31 = vmax.f32 %v1522_v48, 0.0  ;;  %v2103_v24 = vmul.f32 %v8379_v14, %v1611_v58  ;;  %vm12276_vm11 = vsmask.f32 6400 }
 0x2f8   :  { %v4676_v6 = vshrl.u32 %v4603_v38, 16  ;;  %v4679_v17 = vshll.u32 %v4603_v38, 16  ;;  %v8881_v16 = vpop.permute.xlu1 %2890 }
 0x2f9   :  { %v2104_v45 = vmul.f32 %v8344_v46, %v1612_v31  ;;  %v3147_v2 = vpop.permute.xlu0 %3146  ;;  %v12272_v31 = vrot.slane %v8628_v32, 2 }
 0x2fa   :  { %v4678_v52 = vrot.slane %v4676_v6, 6  ;;  %v4681_v59 = vrot.slane %v4679_v17, 7  ;;  %v1526_v26 = vpop.f32.mrb[84].mxu1  ;;  %v8910_v17 = vshll.u32 %v8803_v23, 16 }
 0x2fb   :  { %2810 = vrot.lane.b32.xlu1 %v2729_v61, %s6916_s13  ;;  %3706 = vrot.lane.b32.xlu0 %v3573_v51, %s6922_s2  ;;  %v2146_v48 = vpack.c.bf16 %v2104_v45, %v2103_v24  ;;  %v1527_v53 = vadd.f32 %v8309_v28, %v1526_v26  ;;  %v6591_v58 = vpop.f32.mrb[85].mxu1  ;;  %v8905_v0 = vsel %vm12273_vm9, %v12272_v31, %v3269_v1  ;;  %v6849_v24 = vld [vmem:[#allocation2 + $0x20] sm:$0xff]  ;;  %vm12275_vm9 = vsmask.f32 7424 }
 0x2fc   :  { %v8898_v3 = vpop.permute.xlu1 %3317  ;;  %v1529_v38 = vpop.f32.mrb[86].mxu1  ;;  %v8907_v6 = vor.u32 %v4681_v59, %v4678_v52  ;;  %v3928_v45 = vsel %vm1044_vm5, %v6849_v24, %v8746_v5  ;;  %v12274_v5 = vrot.slane %v8628_v32, 3  ;;  %v3000_v24 = vrot.slane %v8913_v34, 1 }
 0x2fd   :  { %2191 = vst.msk [vmem:[#allocation2 + $0x148] sm:$0xff] %vm1044_vm5, %v2146_v48  ;;  %v1613_v51 = vmax.f32 %v1527_v53, 0.0  ;;  %v1530_v26 = vadd.f32 %v8309_v28, %v1529_v38  ;;  %v3406_v58 = vpop.permute.xlu0 %3405  ;;  %v6592_v31 = vpop.f32.mrb[87].mxu1  ;;  %v4013_v52 = vsel %vm4003_vm12, %v3928_v45, %v8779_v39  ;;  %v2756_v39 = vrot.slane %v8876_v62, 1 }
 0x2fe   :  { %v4683_v59 = vsel %vm4652_vm8, %v8814_v20, %v8907_v6  ;;  %v3795_v28 = vsel %vm3750_vm10, %v12274_v5, %v12043_v8  ;;  %v4098_v48 = vsel %vm4088_vm13, %v4013_v52, %v8790_v37  ;;  %v3001_v45 = vrot.slane %v8910_v17, 2 }
 0x2ff   :  { %3441 = vrot.lane.b32.xlu1 %v8905_v0, %s6920_s10  ;;  %2898 = vrot.lane.b32.xlu0 %v2729_v61, %s6918_s30  ;;  %v1614_v53 = vmax.f32 %v1530_v26, 0.0  ;;  %v8937_v61 = vshll.u32 %v8876_v62, 16  ;;  %v4183_v38 = vsel %vm4173_vm14, %v4098_v48, %v3147_v2  ;;  %v8945_v31 = vshrl.u32 %v8876_v62, 16 }
 0x300   :  { %6612 = vmatmul.mubr.msk.bf16.gmra.mrb[96].mxu1 %vm12106_vm6, %v4683_v59  ;;  %v8940_v20 = vpop.permute.xlu1 %2592  ;;  %v2105_v37 = vmul.f32 %v8412_v21, %v1613_v51  ;;  %v2335_v2 = vrot.slane %v8910_v17, 1  ;;  %v4268_v5 = vsel %vm4258_vm15, %v4183_v38, %v8809_v43  ;;  %v2757_v51 = vsel %vm2706_vm7, %v2754_v19, %v2756_v39 }
 0x301   :  { %6615 = vmatprep.mubr.msk.bf16.mxu1 %vm12093_vm2, %v12175_v44  ;;  %v2106_v26 = vmul.f32 %v8396_v12, %v1614_v53  ;;  %v3843_v52 = vpop.permute.xlu0 %3842  ;;  %v2331_v48 = vor.u32 %v8698_v18, %v2327_v27  ;;  %v8966_v8 = vor.u32 %v3001_v45, %v3000_v24 }
 0x303   :  { %3878 = vrot.lane.b32.xlu1 %v3795_v28, %s6921_s12  ;;  %3325 = vrot.lane.b32.xlu0 %v8838_v47, %s6917_s29  ;;  %v2147_v59 = vpack.c.bf16 %v2106_v26, %v2105_v37  ;;  %v4353_v28 = vsel %vm4343_vm0, %v4268_v5, %v3406_v58  ;;  %v3056_v47 = vrot.slane %v8945_v31, 1  ;;  %v3057_v37 = vrot.slane %v8937_v61, 2 }
 0x304   :  { %v3673_v53 = vpop.permute.xlu1 %3672  ;;  %v2336_v19 = vsel %vm12275_vm9, %v2331_v48, %v2335_v2  ;;  %v3003_v24 = vsel %vm12276_vm11, %v8768_v4, %v8966_v8  ;;  %v3519_v5 = vrot.slane %v8910_v17, 3  ;;  %vm12277_vm9 = vmmov %vm12276_vm11  ;;  %vm12278_vm11 = vcmask 1045504  }
 0x305   :  { %2192 = vst.msk [vmem:[#allocation2 + $0x150] sm:$0xff] %vm1044_vm5, %v2147_v59  ;;  %v4438_v43 = vsel %vm4428_vm1, %v4353_v28, %v3673_v53  ;;  %v8972_v32 = vpop.permute.xlu0 %2802  ;;  %v8986_v45 = vor.u32 %v3057_v37, %v3056_v47  ;;  %v8989_v59 = vld [vmem:[#allocation2 + $0x60] sm:$0xff] }
 0x306   :  { %v4523_v15 = vsel %vm4513_vm3, %v4438_v43, %v3843_v52  ;;  %v3518_v52 = vrot.slane %v8913_v34, 2  ;;  %v3243_v37 = vrot.slane %v8989_v59, 2  ;;  %v12297_v46 = vrot.slane %v8989_v59, 3 }
 0x307   :  { %2838 = vrot.lane.b32.xlu1 %v2757_v51, %s6916_s13  ;;  %2600 = vrot.lane.b32.xlu0 %v2336_v19, %s6915_s11  ;;  %v4604_v18 = vsel %vm4598_vm4, %v4523_v15, 1065369472  ;;  %v3059_v4 = vsel %vm12277_vm9, %v8795_v30, %v8986_v45  ;;  %vm12279_vm9 = vsmask.f32 5376 }
 0x308   :  { %v4684_v27 = vshrl.u32 %v4604_v18, 16  ;;  %v4687_v58 = vshll.u32 %v4604_v18, 16  ;;  %v8981_v38 = vpop.permute.xlu1 %2892  ;;  %v9003_v19 = vor.u32 %v3519_v5, %v3518_v52  ;;  %v3244_v30 = vsel %vm12278_vm11, %v3241_v63, %v3243_v37 }
 0x309   :  { %v3149_v26 = vpop.permute.xlu0 %3148  ;;  %v12047_v18 = vrot.slane %v8989_v59, 3  ;;  %v2443_v63 = vor.u32 %v8755_v60, %v2439_v13  ;;  %v12045_v5 = vrot.slane %v8989_v59, 1  ;;  %vm12280_vm11 = vsmask.f32 7424  ;;  %v9048_v60 = vld [vmem:[#allocation2 + $0xd0] sm:$0xff] }
 0x30a   :  { %v4686_v48 = vrot.slane %v4684_v27, 6  ;;  %v4689_v28 = vrot.slane %v4687_v58, 7  ;;  %v12048_v27 = vrot.slane %v8937_v61, 1  ;;  %v3574_v58 = vrot.slane %v8945_v31, 2 }
 0x30b   :  { %3156 = vrot.lane.b32.xlu1 %v3003_v24, %s6919_s9  ;;  %2926 = vrot.lane.b32.xlu0 %v2757_v51, %s6918_s30  ;;  %v3575_v24 = vrot.slane %v8937_v61, 3 }
 0x30c   :  { %v8994_v53 = vpop.permute.xlu1 %3319  ;;  %v8999_v47 = vor.u32 %v4689_v28, %v4686_v48  ;;  %v2448_v22 = vsel %vm12280_vm11, %v2443_v63, %v12048_v27  ;;  %vm12283_vm11 = vcmask 1045504  }
 0x30d   :  { %v3408_v43 = vpop.permute.xlu0 %3407  ;;  %v9046_v28 = vor.u32 %v3575_v24, %v3574_v58 }
 0x30e   :  { %v4691_v51 = vsel %vm4652_vm8, %v8907_v6, %v8999_v47  ;;  %v3521_v6 = vsel %vm12279_vm9, %v8749_v54, %v9003_v19  ;;  %v3769_v54 = vsel %vm3750_vm10, %v3766_v35, %v12047_v18  ;;  %v2731_v35 = vsel %vm2706_vm7, %v2728_v29, %v12045_v5 }
 0x30f   :  { %3184 = vrot.lane.b32.xlu1 %v3059_v4, %s6919_s9  ;;  %3353 = vrot.lane.b32.xlu0 %v8905_v0, %s6917_s29  ;;  %v12044_v4 = vrot.slane %v9048_v60, 2  ;;  %v3577_v24 = vsel %vm12279_vm9, %v8874_v10, %v9046_v28  ;;  %v12046_v29 = vrot.slane %v9048_v60, 3  ;;  %vm12287_vm9 = vsmask.f32 7424 }
 0x310   :  { %6616 = vmatmul.mubr.msk.bf16.gmra.mrb[100].mxu1 %vm12106_vm6, %v4691_v51  ;;  %v9011_v15 = vpop.permute.xlu1 %2594  ;;  %v6850_v51 = vld [vmem:[#allocation2 + $0x28] sm:$0xff] }
 0x311   :  { %6619 = vmatprep.mubr.msk.bf16.mxu1 %vm12093_vm2, %v12175_v44  ;;  %v3845_v0 = vpop.permute.xlu0 %3844  ;;  %v3272_v10 = vsel %vm12283_vm11, %v3269_v1, %v12044_v4  ;;  %vm12288_vm11 = vsmask.f32 6400 }
 0x313   :  { %3415 = vrot.lane.b32.xlu1 %v3244_v30, %s6920_s10  ;;  %3680 = vrot.lane.b32.xlu0 %v3521_v6, %s6922_s2  ;;  %v3930_v6 = vsel %vm1044_vm5, %v6850_v51, %v8831_v33 }
 0x314   :  { %v9032_v52 = vpop.permute.xlu1 %3435  ;;  %v4015_v63 = vsel %vm4003_vm12, %v3930_v6, %v8871_v56  ;;  %v9085_v56 = vshrl.u32 %v8989_v59, 16  ;;  %v12050_v6 = vrot.slane %v9048_v60, 1 }
 0x315   :  { %v9040_v48 = vpop.permute.xlu0 %2804  ;;  %v4100_v23 = vsel %vm4088_vm13, %v4015_v63, %v8881_v16 }
 0x316   :  { %v4185_v33 = vsel %vm4173_vm14, %v4100_v23, %v3149_v26  ;;  %v12285_v26 = vrot.slane %v8876_v62, 3  ;;  %v3004_v4 = vrot.slane %v9085_v56, 1 }
 0x317   :  { %3852 = vrot.lane.b32.xlu1 %v3769_v54, %s6921_s12  ;;  %2628 = vrot.lane.b32.xlu0 %v2448_v22, %s6915_s11  ;;  %v9082_v22 = vshll.u32 %v8989_v59, 16  ;;  %v4270_v16 = vsel %vm4258_vm15, %v4185_v33, %v8898_v3  ;;  %v9106_v3 = vshrl.u32 %v9048_v60, 16 }
 0x318   :  { %v9051_v13 = vpop.permute.xlu1 %3872  ;;  %v3797_v1 = vsel %vm3750_vm10, %v12285_v26, %v12046_v29  ;;  %v4355_v63 = vsel %vm4343_vm0, %v4270_v16, %v3408_v43  ;;  %v2759_v16 = vsel %vm2706_vm7, %v2756_v39, %v12050_v6 }
 0x319   :  { %12281 = vst [vmem:[#allocation42_spill] sm:$0xff] %v9051_v13  ;;  %v9061_v58 = vpop.permute.xlu0 %2920  ;;  %v12049_v26 = vrot.slane %v9082_v22, 1  ;;  %v3578_v6 = vrot.slane %v9106_v3, 2 }
 0x31a   :  { %12282 = vst [vmem:[#allocation44_spill] sm:$0xff] %v9061_v58 }
 0x31b   :  { %2812 = vrot.lane.b32.xlu1 %v2731_v35, %s6916_s13  ;;  %3708 = vrot.lane.b32.xlu0 %v3577_v24, %s6922_s2  ;;  %v9100_v24 = vshll.u32 %v9048_v60, 16 }
 0x31c   :  { %v9074_v54 = vpop.permute.xlu1 %2832 }
 0x31d   :  { %v9087_v51 = vpop.permute.xlu0 %3347 }
 0x31e   :  { %12284 = vst [vmem:[#allocation90_spill] sm:$0xff] %v9087_v51 }
 0x31f   :  { %3443 = vrot.lane.b32.xlu1 %v3272_v10, %s6920_s10  ;;  %2900 = vrot.lane.b32.xlu0 %v2731_v35, %s6918_s30  ;;  %v3005_v35 = vrot.slane %v9082_v22, 2 }
 0x320   :  { %v3675_v23 = vpop.permute.xlu1 %3674 }
 0x321   :  { %v4440_v33 = vsel %vm4428_vm1, %v4355_v63, %v3675_v23  ;;  %v9109_v5 = vpop.permute.xlu0 %3150  ;;  %v2339_v63 = vor.u32 %v8913_v34, %v2335_v2 }
 0x322   :  { %v4525_v29 = vsel %vm4513_vm3, %v4440_v33, %v3845_v0  ;;  %v9127_v0 = vor.u32 %v3005_v35, %v3004_v4  ;;  %v9146_v33 = vld [vmem:[#allocation2 + $0xf8] sm:$0xff] }
 0x323   :  { %3880 = vrot.lane.b32.xlu1 %v3797_v1, %s6921_s12  ;;  %3327 = vrot.lane.b32.xlu0 %v3244_v30, %s6917_s29  ;;  %v4605_v43 = vsel %vm4598_vm4, %v4525_v29, 1065369472  ;;  %v3061_v1 = vrot.slane %v9100_v24, 2  ;;  %v3060_v30 = vrot.slane %v9106_v3, 1  ;;  %v2344_v62 = vsel %vm12287_vm9, %v2339_v63, %v12049_v26  ;;  %v9151_v63 = vld [vmem:[#allocation2 + $0x68] sm:$0xff]  ;;  %vm12290_vm9 = vmmov %vm12288_vm11 }
 0x324   :  { %v4692_v23 = vshrl.u32 %v4605_v43, 16  ;;  %v4695_v18 = vshll.u32 %v4605_v43, 16  ;;  %v9125_v27 = vpop.permute.xlu1 %3178  ;;  %v3007_v2 = vsel %vm12288_vm11, %v8966_v8, %v9127_v0  ;;  %vm12291_vm11 = vcmask 1045504  }
 0x325   :  { %12286 = vst [vmem:[#allocation91_spill] sm:$0xff] %v9125_v27  ;;  %v9130_v29 = vpop.permute.xlu0 %2622  ;;  %v9144_v35 = vor.u32 %v3061_v1, %v3060_v30  ;;  %v9161_v1 = vshll.u32 %v9146_v33, 16  ;;  %v12060_v41 = vrot.slane %v9151_v63, 1 }
 0x326   :  { %v4694_v17 = vrot.slane %v4692_v23, 6  ;;  %v4697_v34 = vrot.slane %v4695_v18, 7  ;;  %v3522_v18 = vrot.slane %v9085_v56, 2  ;;  %v3523_v23 = vrot.slane %v9082_v22, 3 }
 0x327   :  { %2840 = vrot.lane.b32.xlu1 %v2759_v16, %s6916_s13  ;;  %2602 = vrot.lane.b32.xlu0 %v2344_v62, %s6915_s11  ;;  %v3063_v62 = vsel %vm12290_vm9, %v8986_v45, %v9144_v35  ;;  %vm12292_vm9 = vsmask.f32 5376  ;;  %v12294_v26 = vrot.slane %v9161_v1, 1 }
 0x328   :  { %v9137_v39 = vpop.permute.xlu1 %2894  ;;  %v9142_v4 = vor.u32 %v4697_v34, %v4694_v17  ;;  %v12051_v17 = vrot.slane %v9151_v63, 2  ;;  %v9174_v34 = vld [vmem:[#allocation2 + $0x100] sm:$0xff] }
 0x329   :  { %v9148_v43 = vpop.permute.xlu0 %3702  ;;  %v9226_v57 = vshrl.u32 %v9174_v34, 16 }
 0x32a   :  { %12289 = vst [vmem:[#allocation92_spill] sm:$0xff] %v9148_v43  ;;  %v4699_v8 = vsel %vm4652_vm8, %v8999_v47, %v9142_v4  ;;  %v9172_v47 = vor.u32 %v3523_v23, %v3522_v18  ;;  %v3246_v45 = vsel %vm12291_vm11, %v3243_v37, %v12051_v17  ;;  %v9188_v18 = vshll.u32 %v9174_v34, 16 }
 0x32b   :  { %3158 = vrot.lane.b32.xlu1 %v3007_v2, %s6919_s9  ;;  %2928 = vrot.lane.b32.xlu0 %v2759_v16, %s6918_s30  ;;  %v3579_v2 = vrot.slane %v9100_v24, 3  ;;  %v9197_v37 = vshrl.u32 %v9146_v33, 16  ;;  %v12293_v17 = vrot.slane %v8937_v61, 1  ;;  %v12298_v61 = vrot.slane %v9100_v24, 1 }
 0x32c   :  { %6620 = vmatmul.mubr.msk.bf16.gmra.mrb[104].mxu1 %vm12106_vm6, %v4699_v8  ;;  %v9163_v30 = vpop.permute.xlu1 %3321  ;;  %vm12299_vm11 = vsmask.f32 7424 }
 0x32d   :  { %6623 = vmatprep.mubr.msk.bf16.mxu1 %vm12093_vm2, %v12175_v44  ;;  %v3410_v16 = vpop.permute.xlu0 %3409  ;;  %v2499_v12 = vor.u32 %v9197_v37, %v12294_v26  ;;  %v9221_v26 = vor.u32 %v3579_v2, %v3578_v6  ;;  %v12302_v6 = vrot.slane %v8989_v59, 1 }
 0x32f   :  { %3186 = vrot.lane.b32.xlu1 %v3063_v62, %s6919_s9  ;;  %3355 = vrot.lane.b32.xlu0 %v3272_v10, %s6917_s29  ;;  %v3525_v10 = vsel %vm12292_vm9, %v9003_v19, %v9172_v47  ;;  %v2451_v62 = vor.u32 %v8945_v31, %v12293_v17  ;;  %v12296_v19 = vrot.slane %v9151_v63, 3  ;;  %v9223_v17 = vld [vmem:[#allocation2 + $0xd8] sm:$0xff]  ;;  %vm12300_vm9 = vmmov %vm12299_vm11  ;;  %v2733_v2 = vsel %vm2706_vm7, %v12302_v6, %v12060_v41 }
 0x330   :  { %v12065_v6 = vrot.slane %v9223_v17, 3  ;;  %v12304_v41 = vrot.slane %v9048_v60, 2 }
 0x331   :  { %v9178_v8 = vpop.permute.xlu1 %2596  ;;  %v3847_v23 = vpop.permute.xlu0 %3846  ;;  %v3771_v14 = vsel %vm3750_vm10, %v12297_v46, %v12296_v19  ;;  %v2456_v31 = vsel %vm12299_vm11, %v2451_v62, %v12298_v61  ;;  %v12061_v62 = vrot.slane %v9223_v17, 2  ;;  %v6851_v61 = vld [vmem:[#allocation2 + $0x30] sm:$0xff]  ;;  %vm12303_vm11 = vsmask.f32 5376 }
 0x333   :  { %3417 = vrot.lane.b32.xlu1 %v3246_v45, %s6920_s10  ;;  %3682 = vrot.lane.b32.xlu0 %v3525_v10, %s6922_s2  ;;  %v2503_v10 = vrot.slane %v9188_v18, 1 }
 0x335   :  { %v9206_v21 = vpop.permute.xlu1 %3437  ;;  %v9215_v50 = vpop.permute.xlu0 %2806  ;;  %v9230_v46 = vsel %vm12300_vm9, %v2499_v12, %v2503_v10  ;;  %v9233_v19 = vor.u32 %v9226_v57, %v2503_v10  ;;  %v3581_v12 = vsel %vm12303_vm11, %v9046_v28, %v9221_v26  ;;  %vm12305_vm9 = vcmask 1045504  }
 0x336   :  { %12295 = vst [vmem:[#allocation93_spill] sm:$0xff] %v9206_v21  ;;  %v3274_v28 = vsel %vm12305_vm9, %v12304_v41, %v12061_v62  ;;  %vm12310_vm11 = vsmask.f32 7424  ;;  %vm12311_vm9 = vsmask.f32 6400 }
 0x337   :  { %3854 = vrot.lane.b32.xlu1 %v3771_v14, %s6921_s12  ;;  %2630 = vrot.lane.b32.xlu0 %v2456_v31, %s6915_s11  ;;  %v3932_v31 = vsel %vm1044_vm5, %v6851_v61, %v8940_v20 }
 0x338   :  { %v4017_v10 = vsel %vm4003_vm12, %v3932_v31, %v8972_v32  ;;  %v9267_v32 = vshll.u32 %v9151_v63, 16  ;;  %v9270_v31 = vshrl.u32 %v9151_v63, 16 }
 0x339   :  { %v9235_v14 = vpop.permute.xlu1 %3874  ;;  %v9245_v25 = vpop.permute.xlu0 %2922  ;;  %v4102_v59 = vsel %vm4088_vm13, %v4017_v10, %v8981_v38  ;;  %v12067_v10 = vrot.slane %v9223_v17, 1 }
 0x33a   :  { %12301 = vst [vmem:[#allocation94_spill] sm:$0xff] %v9235_v14  ;;  %v4187_v20 = vsel %vm4173_vm14, %v4102_v59, %v9109_v5  ;;  %v9285_v59 = vshll.u32 %v9223_v17, 16  ;;  %v3008_v42 = vrot.slane %v9270_v31, 1  ;;  %v12308_v14 = vrot.slane %v9082_v22, 1 }
 0x33b   :  { %2814 = vrot.lane.b32.xlu1 %v2733_v2, %s6916_s13  ;;  %3710 = vrot.lane.b32.xlu0 %v3581_v12, %s6922_s2  ;;  %v4272_v5 = vsel %vm4258_vm15, %v4187_v20, %v8994_v53  ;;  %v12306_v12 = vrot.slane %v9048_v60, 3  ;;  %v9291_v53 = vshrl.u32 %v9223_v17, 16 }
 0x33c   :  { %v4357_v62 = vsel %vm4343_vm0, %v4272_v5, %v3410_v16  ;;  %v12307_v5 = vrot.slane %v9048_v60, 1  ;;  %v12309_v60 = vrot.slane %v9267_v32, 1 }
 0x33d   :  { %v9259_v61 = vpop.permute.xlu1 %2834  ;;  %v9272_v38 = vpop.permute.xlu0 %3349  ;;  %v3799_v41 = vsel %vm3750_vm10, %v12306_v12, %v12065_v6 }
 0x33e   :  { %v2761_v36 = vsel %vm2706_vm7, %v12307_v5, %v12067_v10  ;;  %v9332_v10 = vld [vmem:[#allocation2 + $0x70] sm:$0xff] }
 0x33f   :  { %3445 = vrot.lane.b32.xlu1 %v3274_v28, %s6920_s10  ;;  %2902 = vrot.lane.b32.xlu0 %v2733_v2, %s6918_s30  ;;  %v3009_v2 = vrot.slane %v9267_v32, 2 }
 0x341   :  { %v3677_v55 = vpop.permute.xlu1 %3676  ;;  %v3153_v7 = vpop.permute.xlu0 %3152 }
 0x342   :  { %v4442_v20 = vsel %vm4428_vm1, %v4357_v62, %v3677_v55  ;;  %v2347_v55 = vor.u32 %v9085_v56, %v12308_v14  ;;  %v3065_v62 = vrot.slane %v9285_v59, 2 }
 0x343   :  { %3882 = vrot.lane.b32.xlu1 %v3799_v41, %s6921_s12  ;;  %v4527_v6 = vsel %vm4513_vm3, %v4442_v20, %v3847_v23  ;;  %3329 = vrot.lane.b32.xlu0 %v3246_v45, %s6917_s29  ;;  %v9310_v23 = vor.u32 %v3009_v2, %v3008_v42  ;;  %v3064_v45 = vrot.slane %v9291_v53, 1 }
 0x344   :  { %v4606_v16 = vsel %vm4598_vm4, %v4527_v6, 1065369472  ;;  %v2352_v22 = vsel %vm12310_vm11, %v2347_v55, %v12309_v60  ;;  %v3527_v55 = vrot.slane %v9267_v32, 3  ;;  %vm12314_vm11 = vmmov %vm12311_vm9 }
 0x345   :  { %v4700_v41 = vshrl.u32 %v4606_v16, 16  ;;  %v4703_v12 = vshll.u32 %v4606_v16, 16  ;;  %v9308_v21 = vpop.permute.xlu1 %3180  ;;  %v9313_v6 = vpop.permute.xlu0 %2624  ;;  %v3011_v42 = vsel %vm12311_vm9, %v9127_v0, %v9310_v23  ;;  %v9327_v16 = vor.u32 %v3065_v62, %v3064_v45 }
 0x346   :  { %v12068_v45 = vrot.slane %v9332_v10, 2  ;;  %vm12317_vm9 = vcmask 1045504  }
 0x347   :  { %2842 = vrot.lane.b32.xlu1 %v2761_v36, %s6916_s13  ;;  %v4702_v20 = vrot.slane %v4700_v41, 6  ;;  %v4705_v56 = vrot.slane %v4703_v12, 7  ;;  %2604 = vrot.lane.b32.xlu0 %v2352_v22, %s6915_s11  ;;  %v3526_v12 = vrot.slane %v9270_v31, 2  ;;  %v3067_v41 = vsel %vm12314_vm11, %v9144_v35, %v9327_v16 }
 0x348   :  { %v12316_v22 = vrot.slane %v9151_v63, 2  ;;  %vm12318_vm11 = vsmask.f32 5376 }
 0x349   :  { %v9320_v14 = vpop.permute.xlu1 %2808  ;;  %v9325_v2 = vor.u32 %v4705_v56, %v4702_v20  ;;  %v9329_v5 = vpop.permute.xlu0 %3704 }
 0x34a   :  { %12312 = vst [vmem:[#allocation95_spill] sm:$0xff] %v9329_v5  ;;  %v3248_v35 = vsel %vm12317_vm9, %v12316_v22, %v12068_v45  ;;  %v12322_v5 = vrot.slane %v9151_v63, 3  ;;  %vm12324_vm9 = vsmask.f32 7424 }
 0x34b   :  { %3160 = vrot.lane.b32.xlu1 %v3011_v42, %s6919_s9  ;;  %2930 = vrot.lane.b32.xlu0 %v2761_v36, %s6918_s30  ;;  %v4707_v0 = vsel %vm4652_vm8, %v9142_v4, %v9325_v2  ;;  %v9350_v36 = vor.u32 %v3527_v55, %v3526_v12  ;;  %v6852_v42 = vld [vmem:[#allocation2 + $0x38] sm:$0xff]  ;;  %v3582_v55 = vrot.slane %v9291_v53, 2 }
 0x34c   :  { %6624 = vmatmul.mubr.msk.bf16.gmra.mrb[108].mxu1 %vm12106_vm6, %v4707_v0  ;;  %v3934_v0 = vsel %vm1044_vm5, %v6852_v42, %v9011_v15  ;;  %v12319_v15 = vrot.slane %v9100_v24, 1  ;;  %v12323_v24 = vrot.slane %v9285_v59, 1 }
 0x34d   :  { %v9341_v62 = vpop.permute.xlu1 %3439  ;;  %6627 = vmatprep.mubr.msk.bf16.mxu1 %vm12093_vm2, %v12175_v44  ;;  %v3412_v60 = vpop.permute.xlu0 %3411  ;;  %v4019_v22 = vsel %vm4003_vm12, %v3934_v0, %v9040_v48  ;;  %v12070_v48 = vrot.slane %v9332_v10, 1 }
 0x34e   :  { %12313 = vst [vmem:[#allocation96_spill] sm:$0xff] %v9341_v62  ;;  %v4104_v45 = vsel %vm4088_vm13, %v4019_v22, %v9137_v39  ;;  %v2459_v42 = vor.u32 %v9106_v3, %v12319_v15 }
 0x34f   :  { %3188 = vrot.lane.b32.xlu1 %v3067_v41, %s6919_s9  ;;  %3357 = vrot.lane.b32.xlu0 %v3274_v28, %s6917_s29  ;;  %v3529_v28 = vsel %vm12318_vm11, %v9172_v47, %v9350_v36  ;;  %v3583_v41 = vrot.slane %v9285_v59, 3  ;;  %v4189_v56 = vsel %vm4173_vm14, %v4104_v45, %v3153_v7  ;;  %v12321_v47 = vrot.slane %v9332_v10, 3  ;;  %v9395_v7 = vld [vmem:[#allocation2 + $0xe0] sm:$0xff] }
 0x350   :  { %v2464_v3 = vsel %vm12324_vm9, %v2459_v42, %v12323_v24  ;;  %v4274_v45 = vsel %vm4258_vm15, %v4189_v56, %v9163_v30  ;;  %v12069_v15 = vrot.slane %v9395_v7, 2  ;;  %v12071_v56 = vrot.slane %v9395_v7, 3 }
 0x351   :  { %v9353_v4 = vpop.permute.xlu1 %3876  ;;  %v3849_v12 = vpop.permute.xlu0 %3848  ;;  %v9393_v39 = vor.u32 %v3583_v41, %v3582_v55  ;;  %v9419_v42 = vshll.u32 %v9332_v10, 16  ;;  %vm12327_vm9 = vcmask 1045504  }
 0x352   :  { %12315 = vst [vmem:[#allocation97_spill] sm:$0xff] %v9353_v4  ;;  %v3773_v4 = vsel %vm3750_vm10, %v12322_v5, %v12321_v47  ;;  %v4359_v5 = vsel %vm4343_vm0, %v4274_v45, %v3412_v60  ;;  %v12326_v45 = vrot.slane %v9223_v17, 2 }
 0x353   :  { %3419 = vrot.lane.b32.xlu1 %v3248_v35, %s6920_s10  ;;  %3684 = vrot.lane.b32.xlu0 %v3529_v28, %s6922_s2  ;;  %v3585_v30 = vsel %vm12318_vm11, %v9221_v26, %v9393_v39  ;;  %vm12336_vm11 = vsmask.f32 7424 }
 0x354   :  { %v3276_v26 = vsel %vm12327_vm9, %v12326_v45, %v12069_v15  ;;  %vm12337_vm9 = vsmask.f32 6400 }
 0x355   :  { %v9379_v20 = vpop.permute.xlu1 %2836  ;;  %v9387_v0 = vpop.permute.xlu0 %2896 }
 0x356   :  { %12320 = vst [vmem:[#allocation98_spill] sm:$0xff] %v9379_v20  ;;  %v12332_v20 = vrot.slane %v9395_v7, 1 }
 0x357   :  { %3856 = vrot.lane.b32.xlu1 %v3773_v4, %s6921_s12  ;;  %2632 = vrot.lane.b32.xlu0 %v2464_v3, %s6915_s11  ;;  %v12325_v4 = vrot.slane %v9151_v63, 1 }
 0x359   :  { %v3679_v28 = vpop.permute.xlu1 %3678  ;;  %v2735_v22 = vsel %vm2706_vm7, %v12325_v4, %v12070_v48  ;;  %v9408_v41 = vpop.permute.xlu0 %3323 }
 0x35a   :  { %v4444_v55 = vsel %vm4428_vm1, %v4359_v5, %v3679_v28 }
 0x35b   :  { %2816 = vrot.lane.b32.xlu1 %v2735_v22, %s6916_s13  ;;  %v4529_v60 = vsel %vm4513_vm3, %v4444_v55, %v3849_v12  ;;  %3712 = vrot.lane.b32.xlu0 %v3585_v30, %s6922_s2  ;;  %v9429_v12 = vshrl.u32 %v9332_v10, 16  ;;  %v12328_v55 = vrot.slane %v9223_v17, 3 }
 0x35c   :  { %v4607_v63 = vsel %vm4598_vm4, %v4529_v60, 1065369472 }
 0x35d   :  { %v4708_v47 = vshrl.u32 %v4607_v63, 16  ;;  %v4711_v24 = vshll.u32 %v4607_v63, 16  ;;  %v9421_v3 = vpop.permute.xlu1 %3154  ;;  %v9431_v5 = vpop.permute.xlu0 %2598  ;;  %v3801_v30 = vsel %vm3750_vm10, %v12328_v55, %v12071_v56  ;;  %v3013_v63 = vrot.slane %v9419_v42, 2 }
 0x35e   :  { %v3012_v48 = vrot.slane %v9429_v12, 1 }
 0x35f   :  { %3447 = vrot.lane.b32.xlu1 %v3276_v26, %s6920_s10  ;;  %v4710_v28 = vrot.slane %v4708_v47, 6  ;;  %v4713_v4 = vrot.slane %v4711_v24, 7  ;;  %2904 = vrot.lane.b32.xlu0 %v2735_v22, %s6918_s30  ;;  %v9448_v47 = vshll.u32 %v9395_v7, 16  ;;  %v9451_v22 = vshrl.u32 %v9395_v7, 16 }
 0x360   :  { %v9472_v51 = vor.u32 %v3013_v63, %v3012_v48 }
 0x361   :  { %v9442_v45 = vpop.permute.xlu1 %3182  ;;  %v9444_v15 = vor.u32 %v4713_v4, %v4710_v28  ;;  %v9453_v24 = vpop.permute.xlu0 %2924  ;;  %v12331_v4 = vrot.slane %v9267_v32, 1 }
 0x362   :  { %12329 = vst [vmem:[#allocation99_spill] sm:$0xff] %v9442_v45  ;;  %12330 = vst [vmem:[#allocation100_spill] sm:$0xff] %v9453_v24 }
 0x363   :  { %3884 = vrot.lane.b32.xlu1 %v3801_v30, %s6921_s12  ;;  %3331 = vrot.lane.b32.xlu0 %v3248_v35, %s6917_s29  ;;  %v4715_v28 = vsel %vm4652_vm8, %v9325_v2, %v9444_v15  ;;  %v2355_v56 = vor.u32 %v9270_v31, %v12331_v4  ;;  %v12333_v30 = vrot.slane %v9223_v17, 1  ;;  %v3068_v35 = vrot.slane %v9451_v22, 1  ;;  %v9495_v4 = vld [vmem:[#allocation2 + $0x78] sm:$0xff] }
 0x364   :  { %6628 = vmatmul.mubr.msk.bf16.gmra.mrb[112].mxu1 %vm12106_vm6, %v4715_v28  ;;  %v3069_v2 = vrot.slane %v9448_v47, 2  ;;  %v12335_v31 = vrot.slane %v9419_v42, 1 }
 0x365   :  { %v9465_v60 = vpop.permute.xlu1 %3413  ;;  %v2763_v55 = vsel %vm2706_vm7, %v12333_v30, %v12332_v20  ;;  %6631 = vmatprep.mubr.msk.bf16.mxu1 %vm12093_vm2, %v12175_v44  ;;  %v9478_v32 = vpop.permute.xlu0 %3351  ;;  %v3015_v20 = vsel %vm12337_vm9, %v9310_v23, %v9472_v51  ;;  %v3530_v30 = vrot.slane %v9429_v12, 2 }
 0x366   :  { %12334 = vst [vmem:[#allocation101_spill] sm:$0xff] %v9478_v32  ;;  %v2360_v28 = vsel %vm12336_vm11, %v2355_v56, %v12335_v31  ;;  %v9490_v48 = vor.u32 %v3069_v2, %v3068_v35  ;;  %v3531_v56 = vrot.slane %v9419_v42, 3  ;;  %vm12339_vm11 = vmmov %vm12337_vm9  ;;  %v12072_v35 = vrot.slane %v9495_v4, 2 }
 0x367   :  { %2844 = vrot.lane.b32.xlu1 %v2763_v55, %s6916_s13  ;;  %2606 = vrot.lane.b32.xlu0 %v2360_v28, %s6915_s11  ;;  %vm12343_vm9 = vcmask 1045504  }
 0x368   :  { %v3071_v23 = vsel %vm12339_vm11, %v9327_v16, %v9490_v48  ;;  %v9509_v28 = vor.u32 %v3531_v56, %v3530_v30  ;;  %vm12344_vm11 = vsmask.f32 5376  ;;  %v3586_v56 = vrot.slane %v9451_v22, 2 }
 0x369   :  { %v9485_v17 = vpop.permute.xlu1 %3850  ;;  %v9492_v63 = vpop.permute.xlu0 %2626 }
 0x36a   :  { %12338 = vst [vmem:[#allocation102_spill] sm:$0xff] %v9492_v63  ;;  %v3533_v30 = vsel %vm12344_vm11, %v9350_v36, %v9509_v28 }
 0x36b   :  { %3162 = vrot.lane.b32.xlu1 %v3015_v20, %s6919_s9  ;;  %2932 = vrot.lane.b32.xlu0 %v2763_v55, %s6918_s30  ;;  %v12342_v55 = vrot.slane %v9332_v10, 2 }
 0x36d   :  { %v9500_v31 = vpop.permute.xlu1 %2810  ;;  %v9506_v2 = vpop.permute.xlu0 %3706  ;;  %v3250_v32 = vsel %vm12343_vm9, %v12342_v55, %v12072_v35  ;;  %v12345_v55 = vrot.slane %v9285_v59, 1  ;;  %vm12350_vm9 = vsmask.f32 7424 }
 0x36e   :  { %12340 = vst [vmem:[#allocation103_spill] sm:$0xff] %v9506_v2  ;;  %v12348_v2 = vrot.slane %v9332_v10, 3 }
 0x36f   :  { %3190 = vrot.lane.b32.xlu1 %v3071_v23, %s6919_s9  ;;  %3359 = vrot.lane.b32.xlu0 %v3276_v26, %s6917_s29  ;;  %v3587_v23 = vrot.slane %v9448_v47, 3  ;;  %v2467_v35 = vor.u32 %v9291_v53, %v12345_v55  ;;  %v12073_v26 = vrot.slane %v9495_v4, 1  ;;  %v9549_v53 = vld [vmem:[#allocation2 + $0xe8] sm:$0xff] }
 0x370   :  { %v12076_v45 = vrot.slane %v9549_v53, 1 }
 0x371   :  { %v9512_v20 = vpop.permute.xlu1 %3441  ;;  %v9520_v27 = vpop.permute.xlu0 %2898  ;;  %v9547_v63 = vor.u32 %v3587_v23, %v3586_v56  ;;  %v9569_v23 = vshrl.u32 %v9495_v4, 16 }
 0x372   :  { %12341 = vst [vmem:[#allocation104_spill] sm:$0xff] %v9512_v20  ;;  %v12347_v20 = vrot.slane %v9495_v4, 3 }
 0x373   :  { %3421 = vrot.lane.b32.xlu1 %v3250_v32, %s6920_s10  ;;  %3686 = vrot.lane.b32.xlu0 %v3533_v30, %s6922_s2  ;;  %v12349_v30 = vrot.slane %v9448_v47, 1 }
 0x374   :  { %v3775_v36 = vsel %vm3750_vm10, %v12348_v2, %v12347_v20  ;;  %v12352_v2 = vrot.slane %v9332_v10, 1 }
 0x375   :  { %v9533_v16 = vpop.permute.xlu1 %3878  ;;  %v9541_v58 = vpop.permute.xlu0 %3325  ;;  %v2472_v59 = vsel %vm12350_vm9, %v2467_v35, %v12349_v30  ;;  %v3589_v35 = vsel %vm12344_vm11, %v9393_v39, %v9547_v63  ;;  %v12353_v30 = vrot.slane %v9395_v7, 2  ;;  %vm12354_vm9 = vcmask 1045504   ;;  %v6853_v39 = vld [vmem:[#allocation2 + $0x40] sm:$0xff] }
 0x376   :  { %12346 = vst [vmem:[#allocation105_spill] sm:$0xff] %v9533_v16  ;;  %v2737_v20 = vsel %vm2706_vm7, %v12352_v2, %v12073_v26  ;;  %v9579_v2 = vshll.u32 %v9495_v4, 16  ;;  %vm12363_vm11 = vsmask.f32 7424 }
 0x377   :  { %3858 = vrot.lane.b32.xlu1 %v3775_v36, %s6921_s12  ;;  %2634 = vrot.lane.b32.xlu0 %v2472_v59, %s6915_s11  ;;  %v12074_v36 = vrot.slane %v9549_v53, 2 }
 0x379   :  { %v9552_v55 = vpop.permute.xlu1 %2838  ;;  %v9560_v16 = vpop.permute.xlu0 %2600  ;;  %v3278_v59 = vsel %vm12354_vm9, %v12353_v30, %v12074_v36  ;;  %v12357_v30 = vrot.slane %v9395_v7, 3  ;;  %vm12364_vm9 = vsmask.f32 6400 }
 0x37a   :  { %12351 = vst [vmem:[#allocation106_spill] sm:$0xff] %v9552_v55  ;;  %v12356_v55 = vrot.slane %v9549_v53, 3 }
 0x37b   :  { %2818 = vrot.lane.b32.xlu1 %v2737_v20, %s6916_s13  ;;  %3714 = vrot.lane.b32.xlu0 %v3589_v35, %s6922_s2  ;;  %v3936_v35 = vsel %vm1044_vm5, %v6853_v39, %v9178_v8  ;;  %v3017_v8 = vrot.slane %v9579_v2, 2 }
 0x37c   :  { %v4021_v56 = vsel %vm4003_vm12, %v3936_v35, %v9215_v50  ;;  %v3803_v36 = vsel %vm3750_vm10, %v12357_v30, %v12356_v55  ;;  %v9605_v50 = vshrl.u32 %v9549_v53, 16  ;;  %v12361_v30 = vrot.slane %v9419_v42, 1 }
 0x37d   :  { %v9571_v10 = vpop.permute.xlu1 %3156  ;;  %v9581_v26 = vpop.permute.xlu0 %2926  ;;  %v4106_v24 = vsel %vm4088_vm13, %v4021_v56, %v9387_v0  ;;  %v12360_v0 = vrot.slane %v9395_v7, 1  ;;  %v12362_v42 = vrot.slane %v9579_v2, 1 }
 0x37e   :  { %12355 = vst [vmem:[#allocation107_spill] sm:$0xff] %v9581_v26  ;;  %v3016_v26 = vrot.slane %v9569_v23, 1  ;;  %v4191_v55 = vsel %vm4173_vm14, %v4106_v24, %v9421_v3  ;;  %v3072_v35 = vrot.slane %v9605_v50, 1 }
 0x37f   :  { %3449 = vrot.lane.b32.xlu1 %v3278_v59, %s6920_s10  ;;  %2906 = vrot.lane.b32.xlu0 %v2737_v20, %s6918_s30  ;;  %v9602_v20 = vshll.u32 %v9549_v53, 16  ;;  %v2765_v56 = vsel %vm2706_vm7, %v12360_v0, %v12076_v45  ;;  %v4276_v3 = vsel %vm4258_vm15, %v4191_v55, %v9408_v41 }
 0x380   :  { %v4361_v7 = vsel %vm4343_vm0, %v4276_v3, %v9465_v60 }
 0x381   :  { %v9598_v13 = vpop.permute.xlu1 %3184  ;;  %v9609_v39 = vpop.permute.xlu0 %3353 }
 0x382   :  { %12358 = vst [vmem:[#allocation108_spill] sm:$0xff] %v9598_v13  ;;  %12359 = vst [vmem:[#allocation109_spill] sm:$0xff] %v9609_v39  ;;  %v2363_v13 = vor.u32 %v9429_v12, %v12361_v30 }
 0x383   :  { %3886 = vrot.lane.b32.xlu1 %v3803_v36, %s6921_s12  ;;  %3333 = vrot.lane.b32.xlu0 %v3250_v32, %s6917_s29  ;;  %v9626_v36 = vor.u32 %v3017_v8, %v3016_v26  ;;  %v3073_v32 = vrot.slane %v9602_v20, 2 }
 0x384   :  { %v2368_v12 = vsel %vm12363_vm11, %v2363_v13, %v12362_v42  ;;  %vm12366_vm11 = vmmov %vm12364_vm9 }
 0x385   :  { %v9624_v24 = vpop.permute.xlu1 %3415  ;;  %v3681_v39 = vpop.permute.xlu0 %3680  ;;  %v3019_v60 = vsel %vm12364_vm9, %v9472_v51, %v9626_v36  ;;  %v9646_v0 = vor.u32 %v3073_v32, %v3072_v35  ;;  %vm12370_vm9 = vcmask 1045504  }
 0x386   :  { %v4446_v41 = vsel %vm4428_vm1, %v4361_v7, %v3681_v39  ;;  %v9651_v39 = vld [vmem:[#allocation2 + $0x80] sm:$0xff]  ;;  %v3535_v7 = vrot.slane %v9579_v2, 3 }
 0x387   :  { %2846 = vrot.lane.b32.xlu1 %v2765_v56, %s6916_s13  ;;  %2608 = vrot.lane.b32.xlu0 %v2368_v12, %s6915_s11  ;;  %v4531_v26 = vsel %vm4513_vm3, %v4446_v41, %v9485_v17  ;;  %v3534_v17 = vrot.slane %v9569_v23, 2  ;;  %v3075_v51 = vsel %vm12366_vm11, %v9490_v48, %v9646_v0  ;;  %v12075_v35 = vrot.slane %v9651_v39, 2 }
 0x388   :  { %v4608_v8 = vsel %vm4598_vm4, %v4531_v26, 1065369472  ;;  %v12369_v48 = vrot.slane %v9495_v4, 2  ;;  %vm12371_vm11 = vsmask.f32 5376 }
 0x389   :  { %v9641_v55 = vpop.permute.xlu1 %3852  ;;  %v4716_v30 = vshrl.u32 %v4608_v8, 16  ;;  %v4719_v3 = vshll.u32 %v4608_v8, 16  ;;  %v9648_v13 = vpop.permute.xlu0 %2628  ;;  %v9667_v8 = vor.u32 %v3535_v7, %v3534_v17  ;;  %v3590_v7 = vrot.slane %v9605_v50, 2 }
 0x38a   :  { %12365 = vst [vmem:[#allocation110_spill] sm:$0xff] %v9648_v13  ;;  %v12386_v13 = vrot.slane %v9579_v2, 1 }
 0x38b   :  { %3164 = vrot.lane.b32.xlu1 %v3019_v60, %s6919_s9  ;;  %2934 = vrot.lane.b32.xlu0 %v2765_v56, %s6918_s30  ;;  %v4718_v42 = vrot.slane %v4716_v30, 6  ;;  %v4721_v12 = vrot.slane %v4719_v3, 7  ;;  %v3252_v30 = vsel %vm12370_vm9, %v12369_v48, %v12075_v35  ;;  %v12077_v3 = vrot.slane %v9651_v39, 3 }
 0x38c   :  { %v12078_v35 = vrot.slane %v9651_v39, 1  ;;  %vm12375_vm9 = vsmask.f32 7424 }
 0x38d   :  { %v9656_v41 = vpop.permute.xlu1 %2812  ;;  %v9662_v32 = vpop.permute.xlu0 %3708  ;;  %v9665_v26 = vor.u32 %v4721_v12, %v4718_v42  ;;  %v3591_v42 = vrot.slane %v9602_v20, 3  ;;  %v12372_v12 = vrot.slane %v9448_v47, 1 }
 0x38e   :  { %12367 = vst [vmem:[#allocation111_spill] sm:$0xff] %v9662_v32  ;;  %v2371_v32 = vor.u32 %v9569_v23, %v12386_v13 }
 0x38f   :  { %3192 = vrot.lane.b32.xlu1 %v3075_v51, %s6919_s9  ;;  %3361 = vrot.lane.b32.xlu0 %v3278_v59, %s6917_s29  ;;  %v4723_v56 = vsel %vm4652_vm8, %v9444_v15, %v9665_v26  ;;  %v3537_v15 = vsel %vm12371_vm11, %v9509_v28, %v9667_v8  ;;  %v12079_v59 = vrot.slane %v9602_v20, 1  ;;  %v2475_v51 = vor.u32 %v9451_v22, %v12372_v12  ;;  %v9713_v22 = vld [vmem:[#allocation2 + $0xf0] sm:$0xff] }
 0x390   :  { %6632 = vmatmul.mubr.msk.bf16.gmra.mrb[116].mxu1 %vm12106_vm6, %v4723_v56  ;;  %v12374_v28 = vrot.slane %v9495_v4, 3 }
 0x391   :  { %v9673_v60 = vpop.permute.xlu1 %3443  ;;  %v9682_v17 = vpop.permute.xlu0 %2900  ;;  %6635 = vmatprep.mubr.msk.bf16.mxu1 %vm12093_vm2, %v12175_v44  ;;  %v2480_v47 = vsel %vm12375_vm9, %v2475_v51, %v12079_v59  ;;  %v6854_v51 = vld [vmem:[#allocation2 + $0x48] sm:$0xff]  ;;  %vm12379_vm9 = vcmask 1045504   ;;  %v9742_v59 = vshll.u32 %v9651_v39, 16 }
 0x392   :  { %12368 = vst [vmem:[#allocation112_spill] sm:$0xff] %v9673_v60  ;;  %v3777_v48 = vsel %vm3750_vm10, %v12374_v28, %v12077_v3  ;;  %v12377_v28 = vrot.slane %v9495_v4, 1  ;;  %v3938_v4 = vsel %vm1044_vm5, %v6854_v51, %v9431_v5  ;;  %v12381_v51 = vrot.slane %v9549_v53, 3 }
 0x393   :  { %3423 = vrot.lane.b32.xlu1 %v3252_v30, %s6920_s10  ;;  %3688 = vrot.lane.b32.xlu0 %v3537_v15, %s6922_s2  ;;  %v9711_v15 = vor.u32 %v3591_v42, %v3590_v7  ;;  %v12081_v42 = vrot.slane %v9713_v22, 3  ;;  %v4023_v5 = vsel %vm4003_vm12, %v3938_v4, %v9320_v14  ;;  %v3021_v14 = vrot.slane %v9742_v59, 2 }
 0x394   :  { %v2739_v3 = vsel %vm2706_vm7, %v12377_v28, %v12078_v35  ;;  %v12378_v28 = vrot.slane %v9549_v53, 2  ;;  %v9769_v4 = vshrl.u32 %v9713_v22, 16  ;;  %v12387_v2 = vrot.slane %v9742_v59, 1 }
 0x395   :  { %v9697_v56 = vpop.permute.xlu1 %3880  ;;  %v9705_v45 = vpop.permute.xlu0 %3327  ;;  %v3593_v7 = vsel %vm12371_vm11, %v9547_v63, %v9711_v15  ;;  %v9745_v63 = vshrl.u32 %v9651_v39, 16  ;;  %vm12388_vm11 = vsmask.f32 7424 }
 0x396   :  { %12373 = vst [vmem:[#allocation113_spill] sm:$0xff] %v9697_v56  ;;  %v2376_v23 = vsel %vm12388_vm11, %v2371_v32, %v12387_v2 }
 0x397   :  { %3860 = vrot.lane.b32.xlu1 %v3777_v48, %s6921_s12  ;;  %2636 = vrot.lane.b32.xlu0 %v2480_v47, %s6915_s11  ;;  %v12080_v48 = vrot.slane %v9713_v22, 2 }
 0x399   :  { %v9716_v12 = vpop.permute.xlu1 %2840  ;;  %v9724_v56 = vpop.permute.xlu0 %2602  ;;  %v3280_v35 = vsel %vm12379_vm9, %v12378_v28, %v12080_v48  ;;  %v3805_v28 = vsel %vm3750_vm10, %v12381_v51, %v12081_v42  ;;  %v3076_v48 = vrot.slane %v9769_v4, 1  ;;  %vm12389_vm9 = vsmask.f32 6400 }
 0x39a   :  { %12376 = vst [vmem:[#allocation114_spill] sm:$0xff] %v9716_v12  ;;  %v9760_v12 = vshll.u32 %v9713_v22, 16  ;;  %vm12391_vm11 = vmmov %vm12389_vm9 }
 0x39b   :  { %2820 = vrot.lane.b32.xlu1 %v2739_v3, %s6916_s13  ;;  %3716 = vrot.lane.b32.xlu0 %v3593_v7, %s6922_s2 }
 0x39d   :  { %v9734_v47 = vpop.permute.xlu1 %3158  ;;  %v9747_v7 = vpop.permute.xlu0 %2928 }
 0x39e   :  { %12380 = vst [vmem:[#allocation115_spill] sm:$0xff] %v9747_v7  ;;  %v4108_v7 = vsel %vm4088_vm13, %v4023_v5, %v9520_v27  ;;  %v12384_v27 = vrot.slane %v9713_v22, 1  ;;  %v12385_v5 = vrot.slane %v9549_v53, 1 }
 0x39f   :  { %3451 = vrot.lane.b32.xlu1 %v3280_v35, %s6920_s10  ;;  %2908 = vrot.lane.b32.xlu0 %v2739_v3, %s6918_s30  ;;  %v3020_v3 = vrot.slane %v9745_v63, 1  ;;  %v4193_v51 = vsel %vm4173_vm14, %v4108_v7, %v9571_v10 }
 0x3a0   :  { %v4278_v10 = vsel %vm4258_vm15, %v4193_v51, %v9541_v58 }
 0x3a1   :  { %v9764_v60 = vpop.permute.xlu1 %3186  ;;  %v9773_v42 = vpop.permute.xlu0 %3355  ;;  %v4363_v53 = vsel %vm4343_vm0, %v4278_v10, %v9624_v24  ;;  %v3539_v10 = vrot.slane %v9742_v59, 3 }
 0x3a2   :  { %12382 = vst [vmem:[#allocation116_spill] sm:$0xff] %v9764_v60  ;;  %12383 = vst [vmem:[#allocation117_spill] sm:$0xff] %v9773_v42  ;;  %v2767_v60 = vsel %vm2706_vm7, %v12385_v5, %v12384_v27 }
 0x3a3   :  { %3888 = vrot.lane.b32.xlu1 %v3805_v28, %s6921_s12  ;;  %3335 = vrot.lane.b32.xlu0 %v3252_v30, %s6917_s29  ;;  %v9790_v28 = vor.u32 %v3021_v14, %v3020_v3  ;;  %v3077_v30 = vrot.slane %v9760_v12, 2 }
 0x3a5   :  { %v9788_v7 = vpop.permute.xlu1 %3417  ;;  %v3683_v42 = vpop.permute.xlu0 %3682  ;;  %v3023_v24 = vsel %vm12389_vm9, %v9626_v36, %v9790_v28  ;;  %v9810_v51 = vor.u32 %v3077_v30, %v3076_v48  ;;  %vm12395_vm9 = vcmask 1045504  }
 0x3a6   :  { %v4448_v58 = vsel %vm4428_vm1, %v4363_v53, %v3683_v42  ;;  %v9815_v42 = vld [vmem:[#allocation2 + $0x88] sm:$0xff] }
 0x3a7   :  { %2848 = vrot.lane.b32.xlu1 %v2767_v60, %s6916_s13  ;;  %2610 = vrot.lane.b32.xlu0 %v2376_v23, %s6915_s11  ;;  %v4533_v13 = vsel %vm4513_vm3, %v4448_v58, %v9641_v55  ;;  %v3538_v55 = vrot.slane %v9745_v63, 2  ;;  %v3079_v36 = vsel %vm12391_vm11, %v9646_v0, %v9810_v51  ;;  %v12082_v48 = vrot.slane %v9815_v42, 2 }
 0x3a8   :  { %v4609_v3 = vsel %vm4598_vm4, %v4533_v13, 1065369472  ;;  %v12394_v0 = vrot.slane %v9651_v39, 2  ;;  %vm12396_vm11 = vsmask.f32 5376  ;;  %v12405_v62 = vrot.slane %v9815_v42, 1 }
 0x3a9   :  { %v9805_v14 = vpop.permute.xlu1 %3854  ;;  %v4724_v27 = vshrl.u32 %v4609_v3, 16  ;;  %v4727_v5 = vshll.u32 %v4609_v3, 16  ;;  %v9812_v32 = vpop.permute.xlu0 %2630  ;;  %v9831_v13 = vor.u32 %v3539_v10, %v3538_v55  ;;  %v3594_v55 = vrot.slane %v9769_v4, 2 }
 0x3aa   :  { %12390 = vst [vmem:[#allocation118_spill] sm:$0xff] %v9812_v32  ;;  %v3595_v10 = vrot.slane %v9760_v12, 3 }
 0x3ab   :  { %3166 = vrot.lane.b32.xlu1 %v3023_v24, %s6919_s9  ;;  %2936 = vrot.lane.b32.xlu0 %v2767_v60, %s6918_s30  ;;  %v4726_v53 = vrot.slane %v4724_v27, 6  ;;  %v4729_v2 = vrot.slane %v4727_v5, 7  ;;  %v3254_v24 = vsel %vm12395_vm9, %v12394_v0, %v12082_v48  ;;  %v12083_v27 = vrot.slane %v9815_v42, 3 }
 0x3ac   :  { %v12399_v48 = vrot.slane %v9651_v39, 3  ;;  %vm12401_vm9 = vsmask.f32 7424 }
 0x3ad   :  { %v9820_v23 = vpop.permute.xlu1 %2814  ;;  %v9826_v30 = vpop.permute.xlu0 %3710  ;;  %v9829_v58 = vor.u32 %v4729_v2, %v4726_v53  ;;  %v12397_v2 = vrot.slane %v9602_v20, 1  ;;  %v12400_v20 = vrot.slane %v9760_v12, 1 }
 0x3ae   :  { %12392 = vst [vmem:[#allocation119_spill] sm:$0xff] %v9826_v30 }
 0x3af   :  { %3194 = vrot.lane.b32.xlu1 %v3079_v36, %s6919_s9  ;;  %3363 = vrot.lane.b32.xlu0 %v3280_v35, %s6917_s29  ;;  %v4731_v60 = vsel %vm4652_vm8, %v9665_v26, %v9829_v58  ;;  %v3541_v35 = vsel %vm12396_vm11, %v9667_v8, %v9831_v13  ;;  %v2483_v36 = vor.u32 %v9605_v50, %v12397_v2 }
 0x3b0   :  { %6636 = vmatmul.mubr.msk.bf16.gmra.mrb[120].mxu1 %vm12106_vm6, %v4731_v60  ;;  %v3779_v26 = vsel %vm3750_vm10, %v12399_v48, %v12083_v27  ;;  %v12403_v48 = vld [vmem:[#allocation11_spill] sm:$0xff] }
 0x3b1   :  { %v9837_v3 = vpop.permute.xlu1 %3445  ;;  %v9846_v5 = vpop.permute.xlu0 %2902  ;;  %6639 = vmatprep.mubr.msk.bf16.mxu1 %vm12093_vm2, %v12175_v44  ;;  %v2488_v50 = vsel %vm12401_vm9, %v2483_v36, %v12400_v20  ;;  %v12084_v36 = vrot.slane %v9146_v33, 2  ;;  %vm12408_vm9 = vcmask 1045504  }
 0x3b2   :  { %12393 = vst [vmem:[#allocation120_spill] sm:$0xff] %v9837_v3 }
 0x3b3   :  { %3425 = vrot.lane.b32.xlu1 %v3254_v24, %s6920_s10  ;;  %3690 = vrot.lane.b32.xlu0 %v3541_v35, %s6922_s2  ;;  %v5181_v53 = vpop.f32.mrb[88].mxu1  ;;  %v9875_v35 = vor.u32 %v3595_v10, %v3594_v55 }
 0x3b4   :  { %v5508_v60 = vmax.f32 %v5181_v53, 0.0  ;;  %v6605_v8 = vpop.f32.mrb[89].mxu1  ;;  %v12402_v53 = vld [vmem:[#allocation9_spill] sm:$0xff] }
 0x3b5   :  { %v9861_v0 = vpop.permute.xlu1 %3882  ;;  %v5184_v3 = vpop.f32.mrb[90].mxu1 }
 0x3b6   :  { %12398 = vst [vmem:[#allocation121_spill] sm:$0xff] %v9861_v0  ;;  %v9869_v30 = vpop.permute.xlu0 %3329  ;;  %v5590_v2 = vmul.f32 %v5508_v60, %v12402_v53  ;;  %v5509_v8 = vmax.f32 %v5184_v3, 0.0  ;;  %v6606_v0 = vpop.f32.mrb[91].mxu1  ;;  %v3597_v3 = vsel %vm12396_vm11, %v9711_v15, %v9875_v35  ;;  %v12407_v53 = vrot.slane %v9713_v22, 2 }
 0x3b7   :  { %3862 = vrot.lane.b32.xlu1 %v3779_v26, %s6921_s12  ;;  %2638 = vrot.lane.b32.xlu0 %v2488_v50, %s6915_s11  ;;  %v12406_v26 = vrot.slane %v9651_v39, 1  ;;  %v12085_v39 = vrot.slane %v9146_v33, 3  ;;  %vm12416_vm11 = vsmask.f32 7424 }
 0x3b8   :  { %v5591_v27 = vmul.f32 %v5509_v8, %v12403_v48  ;;  %v5672_v10 = vsel %vm4003_vm12, %v5590_v2, 0.0  ;;  %v9907_v15 = vsel %vm12408_vm9, %v12407_v53, %v12084_v36  ;;  %v9913_v2 = vshrl.u32 %v9815_v42, 16 }
 0x3b9   :  { %v9880_v32 = vpop.permute.xlu1 %2842  ;;  %v2741_v43 = vsel %vm2706_vm7, %v12406_v26, %v12405_v62  ;;  %v6855_v62 = vld [vmem:[#allocation2 + $0x50] sm:$0xff]  ;;  %v12086_v48 = vrot.slane %v9146_v33, 1  ;;  %vm12418_vm9 = vsmask.f32 6400 }
 0x3ba   :  { %12404 = vst [vmem:[#allocation9_spill] sm:$0xff] %v9880_v32  ;;  %v9888_v55 = vpop.permute.xlu0 %2604  ;;  %v5673_v60 = vsel %vm4003_vm12, %v5591_v27, 0.0  ;;  %v3940_v20 = vsel %vm1044_vm5, %v6855_v62, %v9560_v16  ;;  %v9910_v27 = vshll.u32 %v9815_v42, 16  ;;  %v3024_v62 = vrot.slane %v9913_v2, 1 }
 0x3bb   :  { %2822 = vrot.lane.b32.xlu1 %v2741_v43, %s6916_s13  ;;  %3718 = vrot.lane.b32.xlu0 %v3597_v3, %s6922_s2  ;;  %v5674_v0 = vadd.f32 %v5673_v60, %v5672_v10  ;;  %v4025_v16 = vsel %vm4003_vm12, %v3940_v20, %v9500_v31  ;;  %v12410_v10 = vrot.slane %v9713_v22, 3  ;;  %v12413_v32 = vrot.slane %v9742_v59, 1 }
 0x3bc   :  { %v4110_v26 = vsel %vm4088_vm13, %v4025_v16, %v9682_v17 }
 0x3bd   :  { %v9900_v50 = vpop.permute.xlu1 %3160  ;;  %v3807_v60 = vsel %vm3750_vm10, %v12410_v10, %v12085_v39  ;;  %v4195_v31 = vsel %vm4173_vm14, %v4110_v26, %v9734_v47  ;;  %v12412_v10 = vrot.slane %v9713_v22, 1  ;;  %v2379_v47 = vor.u32 %v9745_v63, %v12413_v32 }
 0x3be   :  { %v9915_v8 = vpop.permute.xlu0 %2930  ;;  %v4280_v26 = vsel %vm4258_vm15, %v4195_v31, %v9705_v45  ;;  %v12415_v45 = vrot.slane %v9910_v27, 1  ;;  %v12417_v31 = vld [vmem:[#allocation7_spill] sm:$0xff] }
 0x3bf   :  { %3453 = vrot.lane.b32.xlu1 %v9907_v15, %s6920_s10  ;;  %2910 = vrot.lane.b32.xlu0 %v2741_v43, %s6918_s30  ;;  %v3025_v43 = vrot.slane %v9910_v27, 2  ;;  %v2769_v39 = vsel %vm2706_vm7, %v12412_v10, %v12086_v48  ;;  %v4365_v22 = vsel %vm4343_vm0, %v4280_v26, %v9788_v7 }
 0x3c0   :  { %v2384_v32 = vsel %vm12416_vm11, %v2379_v47, %v12415_v45  ;;  %vm12420_vm11 = vmmov %vm12418_vm9 }
 0x3c1   :  { %v9925_v3 = vpop.permute.xlu1 %3188 }
 0x3c2   :  { %12409 = vst [vmem:[#allocation11_spill] sm:$0xff] %v9925_v3  ;;  %v9936_v20 = vpop.permute.xlu0 %3357 }
 0x3c3   :  { %12411 = vst [vmem:[#allocation122_spill] sm:$0xff] %v9936_v20  ;;  %3890 = vrot.lane.b32.xlu1 %v3807_v60, %s6921_s12  ;;  %v5189_v53 = vpop.f32.mrb[92].mxu1  ;;  %3337 = vrot.lane.b32.xlu0 %v3254_v24, %s6917_s29  ;;  %v9953_v20 = vor.u32 %v3025_v43, %v3024_v62  ;;  %v3080_v24 = vrot.slane %v9197_v37, 1 }
 0x3c4   :  { %v5510_v16 = vmax.f32 %v5189_v53, 0.0  ;;  %v6609_v36 = vpop.f32.mrb[93].mxu1  ;;  %v12414_v53 = vld [vmem:[#allocation6_spill] sm:$0xff] }
 0x3c5   :  { %v9951_v60 = vpop.permute.xlu1 %3419  ;;  %v5192_v17 = vpop.f32.mrb[94].mxu1  ;;  %v3081_v36 = vrot.slane %v9161_v1, 2  ;;  %v3027_v47 = vsel %vm12418_vm9, %v9790_v28, %v9953_v20  ;;  %vm12423_vm9 = vcmask 1045504  }
 0x3c6   :  { %v5592_v10 = vmul.f32 %v5510_v16, %v12414_v53  ;;  %v5511_v59 = vmax.f32 %v5192_v17, 0.0  ;;  %v6610_v48 = vpop.f32.mrb[95].mxu1  ;;  %v3685_v63 = vpop.permute.xlu0 %3684 }
 0x3c7   :  { %2850 = vrot.lane.b32.xlu1 %v2769_v39, %s6916_s13  ;;  %v4450_v62 = vsel %vm4428_vm1, %v4365_v22, %v3685_v63  ;;  %2612 = vrot.lane.b32.xlu0 %v2384_v32, %s6915_s11  ;;  %v3542_v48 = vrot.slane %v9913_v2, 2  ;;  %v9977_v22 = vor.u32 %v3081_v36, %v3080_v24 }
 0x3c8   :  { %v5675_v43 = vsel %vm4003_vm12, %v5592_v10, 0.0  ;;  %v5593_v3 = vmul.f32 %v5511_v59, %v12417_v31  ;;  %v4535_v7 = vsel %vm4513_vm3, %v4450_v62, %v9805_v14  ;;  %v9983_v14 = vld [vmem:[#allocation2 + $0x90] sm:$0xff] }
 0x3c9   :  { %v5676_v17 = vadd.f32 %v5675_v43, %v5674_v0  ;;  %v4610_v16 = vsel %vm4598_vm4, %v4535_v7, 1065369472  ;;  %v9972_v26 = vpop.permute.xlu1 %3856  ;;  %v3543_v0 = vrot.slane %v9910_v27, 3  ;;  %v12087_v24 = vrot.slane %v9983_v14, 2 }
 0x3ca   :  { %v5677_v53 = vsel %vm4003_vm12, %v5593_v3, 0.0  ;;  %v4732_v10 = vshrl.u32 %v4610_v16, 16  ;;  %v4735_v59 = vshll.u32 %v4610_v16, 16  ;;  %v9980_v63 = vpop.permute.xlu0 %2632  ;;  %v3083_v3 = vsel %vm12420_vm11, %v9810_v51, %v9977_v22 }
 0x3cb   :  { %12419 = vst [vmem:[#allocation6_spill] sm:$0xff] %v9980_v63  ;;  %3168 = vrot.lane.b32.xlu1 %v3027_v47, %s6919_s9  ;;  %v5678_v45 = vadd.f32 %v5677_v53, %v5676_v17  ;;  %2938 = vrot.lane.b32.xlu0 %v2769_v39, %s6918_s30  ;;  %v9998_v31 = vor.u32 %v3543_v0, %v3542_v48  ;;  %v12422_v51 = vrot.slane %v9815_v42, 2  ;;  %v12088_v48 = vrot.slane %v9983_v14, 3 }
 0x3cc   :  { %v4734_v32 = vrot.slane %v4732_v10, 6  ;;  %v4737_v62 = vrot.slane %v4735_v59, 7  ;;  %vm12424_vm11 = vsmask.f32 5376  ;;  %v3599_v47 = vrot.slane %v9161_v1, 3 }
 0x3cd   :  { %v9987_v28 = vpop.permute.xlu1 %2816  ;;  %v3256_v17 = vsel %vm12423_vm9, %v12422_v51, %v12087_v24  ;;  %v12425_v0 = vrot.slane %v9760_v12, 1  ;;  %v12428_v51 = vld [vmem:[#allocation13_spill] sm:$0xff]  ;;  %v12429_v12 = vrot.slane %v9161_v1, 1  ;;  %vm12430_vm9 = vsmask.f32 7424 }
 0x3ce   :  { %v9993_v36 = vpop.permute.xlu0 %3712  ;;  %v9996_v43 = vor.u32 %v4737_v62, %v4734_v32 }
 0x3cf   :  { %3196 = vrot.lane.b32.xlu1 %v3083_v3, %s6919_s9  ;;  %3365 = vrot.lane.b32.xlu0 %v9907_v15, %s6917_s29  ;;  %v3598_v15 = vrot.slane %v9197_v37, 2  ;;  %v2491_v32 = vor.u32 %v9769_v4, %v12425_v0  ;;  %v12427_v37 = vrot.slane %v9815_v42, 3 }
 0x3d0   :  { %v4739_v39 = vsel %vm4652_vm8, %v9829_v58, %v9996_v43  ;;  %v3545_v58 = vsel %vm12424_vm11, %v9831_v13, %v9998_v31 }
 0x3d1   :  { %v10005_v7 = vpop.permute.xlu1 %3447  ;;  %6640 = vmatmul.mubr.msk.bf16.gmra.mrb[124].mxu1 %vm12106_vm6, %v4739_v39  ;;  %v3781_v13 = vsel %vm3750_vm10, %v12427_v37, %v12088_v48  ;;  %v2496_v4 = vsel %vm12430_vm9, %v2491_v32, %v12429_v12  ;;  %v10043_v0 = vor.u32 %v3599_v47, %v3598_v15  ;;  %v12431_v48 = vld [vmem:[#allocation8_spill] sm:$0xff]  ;;  %v10057_v15 = vshll.u32 %v9983_v14, 16 }
 0x3d2   :  { %12421 = vst [vmem:[#allocation7_spill] sm:$0xff] %v10005_v7  ;;  %v10014_v16 = vpop.permute.xlu0 %2904  ;;  %6643 = vmatprep.mubr.msk.bf16.mxu1 %vm12093_vm2, %v12175_v44  ;;  %v10060_v47 = vshrl.u32 %v9983_v14, 16  ;;  %v6857_v12 = vld [vmem:[#allocation2 + $0x58] sm:$0xff]  ;;  %vm12436_vm9 = vcmask 1045504  }
 0x3d3   :  { %3427 = vrot.lane.b32.xlu1 %v3256_v17, %s6920_s10  ;;  %v5197_v53 = vpop.f32.mrb[96].mxu1  ;;  %3692 = vrot.lane.b32.xlu0 %v3545_v58, %s6922_s2 }
 0x3d4   :  { %v5512_v10 = vmax.f32 %v5197_v53, 0.0  ;;  %v6613_v59 = vpop.f32.mrb[97].mxu1 }
 0x3d5   :  { %v10028_v62 = vpop.permute.xlu1 %3884  ;;  %v5200_v3 = vpop.f32.mrb[98].mxu1 }
 0x3d6   :  { %12426 = vst [vmem:[#allocation123_spill] sm:$0xff] %v10028_v62  ;;  %v5594_v24 = vmul.f32 %v5512_v10, %v12428_v51  ;;  %v5513_v58 = vmax.f32 %v5200_v3, 0.0  ;;  %v6614_v53 = vpop.f32.mrb[99].mxu1  ;;  %v10037_v59 = vpop.permute.xlu0 %3331  ;;  %v12089_v10 = vrot.slane %v9174_v34, 2 }
 0x3d7   :  { %3864 = vrot.lane.b32.xlu1 %v3781_v13, %s6921_s12  ;;  %2640 = vrot.lane.b32.xlu0 %v2496_v4, %s6915_s11  ;;  %v12433_v53 = vrot.slane %v9983_v14, 1  ;;  %v12434_v13 = vrot.slane %v9815_v42, 1  ;;  %v10070_v42 = vld [vmem:[#allocation2 + $0x100] sm:$0xff]  ;;  %v3942_v4 = vsel %vm1044_vm5, %v6857_v12, %v9724_v56 }
 0x3d8   :  { %v5679_v37 = vsel %vm4003_vm12, %v5594_v24, 0.0  ;;  %v5595_v39 = vmul.f32 %v5513_v58, %v12431_v48  ;;  %v12090_v58 = vrot.slane %v10070_v42, 3  ;;  %v4027_v56 = vsel %vm4003_vm12, %v3942_v4, %v9656_v41 }
 0x3d9   :  { %v5680_v3 = vadd.f32 %v5679_v37, %v5678_v45  ;;  %v10049_v51 = vpop.permute.xlu1 %2844  ;;  %v2743_v1 = vsel %vm2706_vm7, %v12434_v13, %v12433_v53  ;;  %v3601_v45 = vsel %vm12424_vm11, %v9875_v35, %v10043_v0  ;;  %v12435_v37 = vrot.slane %v9146_v33, 2 }
 0x3da   :  { %12432 = vst [vmem:[#allocation13_spill] sm:$0xff] %v10049_v51  ;;  %v5681_v24 = vsel %vm4003_vm12, %v5595_v39, 0.0  ;;  %v10063_v48 = vpop.permute.xlu0 %2606  ;;  %v3028_v35 = vrot.slane %v10060_v47, 1  ;;  %v4112_v12 = vsel %vm4088_vm13, %v4027_v56, %v9846_v5  ;;  %v3084_v51 = vrot.slane %v9226_v57, 1 }
 0x3db   :  { %2824 = vrot.lane.b32.xlu1 %v2743_v1, %s6916_s13  ;;  %v5682_v32 = vadd.f32 %v5681_v24, %v5680_v3  ;;  %3720 = vrot.lane.b32.xlu0 %v3601_v45, %s6922_s2  ;;  %v10082_v53 = vsel %vm12436_vm9, %v12435_v37, %v12089_v10  ;;  %v3029_v3 = vrot.slane %v10057_v15, 2  ;;  %v12438_v24 = vrot.slane %v9146_v33, 3 }
 0x3dc   :  { %v4197_v41 = vsel %vm4173_vm14, %v4112_v12, %v9900_v50  ;;  %v12441_v56 = vrot.slane %v9910_v27, 1  ;;  %v3546_v50 = vrot.slane %v10060_v47, 2  ;;  %v3547_v12 = vrot.slane %v10057_v15, 3 }
 0x3dd   :  { %v10075_v39 = vpop.permute.xlu1 %3162  ;;  %v3809_v45 = vsel %vm3750_vm10, %v12438_v24, %v12090_v58  ;;  %v10102_v10 = vor.u32 %v3029_v3, %v3028_v35  ;;  %vm12442_vm11 = vsmask.f32 6400  ;;  %vm12445_vm9 = vsmask.f32 7424 }
 0x3de   :  { %v10086_v13 = vpop.permute.xlu0 %2932 }
 0x3df   :  { %12437 = vst [vmem:[#allocation8_spill] sm:$0xff] %v10086_v13  ;;  %3455 = vrot.lane.b32.xlu1 %v10082_v53, %s6920_s10  ;;  %2912 = vrot.lane.b32.xlu0 %v2743_v1, %s6918_s30  ;;  %v3085_v1 = vrot.slane %v9188_v18, 2  ;;  %v10117_v13 = vld [vmem:[#allocation2 + $0x98] sm:$0xff] }
 0x3e1   :  { %v10100_v37 = vpop.permute.xlu1 %3190 }
 0x3e2   :  { %12439 = vst [vmem:[#allocation124_spill] sm:$0xff] %v10100_v37  ;;  %v10108_v4 = vpop.permute.xlu0 %3359  ;;  %v2387_v37 = vor.u32 %v9913_v2, %v12441_v56  ;;  %v12443_v2 = vld [vmem:[#allocation15_spill] sm:$0xff] }
 0x3e3   :  { %12440 = vst [vmem:[#allocation125_spill] sm:$0xff] %v10108_v4  ;;  %3892 = vrot.lane.b32.xlu1 %v3809_v45, %s6921_s12  ;;  %v5205_v58 = vpop.f32.mrb[100].mxu1  ;;  %3339 = vrot.lane.b32.xlu0 %v3256_v17, %s6917_s29  ;;  %v4282_v45 = vsel %vm4258_vm15, %v4197_v41, %v9869_v30  ;;  %v12444_v30 = vrot.slane %v10057_v15, 1 }
 0x3e4   :  { %v5514_v35 = vmax.f32 %v5205_v58, 0.0  ;;  %v6617_v3 = vpop.f32.mrb[101].mxu1  ;;  %v3031_v58 = vsel %vm12442_vm11, %v9953_v20, %v10102_v10  ;;  %v4367_v27 = vsel %vm4343_vm0, %v4282_v45, %v9951_v60  ;;  %v12446_v20 = vrot.slane %v10070_v42, 1 }
 0x3e5   :  { %v10123_v24 = vpop.permute.xlu1 %3421  ;;  %v5208_v17 = vpop.f32.mrb[102].mxu1  ;;  %v10128_v3 = vor.u32 %v3085_v1, %v3084_v51  ;;  %v2392_v41 = vsel %vm12445_vm9, %v2387_v37, %v12444_v30  ;;  %v12447_v51 = vrot.slane %v9146_v33, 1  ;;  %v12092_v1 = vrot.slane %v10117_v13, 2 }
 0x3e6   :  { %v5596_v56 = vmul.f32 %v5514_v35, %v12443_v2  ;;  %v5515_v5 = vmax.f32 %v5208_v17, 0.0  ;;  %v6618_v4 = vpop.f32.mrb[103].mxu1  ;;  %v3687_v62 = vpop.permute.xlu0 %3686  ;;  %v12448_v35 = vld [vmem:[#allocation10_spill] sm:$0xff]  ;;  %v10151_v17 = vor.u32 %v3547_v12, %v3546_v50  ;;  %v3602_v2 = vrot.slane %v9226_v57, 2 }
 0x3e7   :  { %3170 = vrot.lane.b32.xlu1 %v3031_v58, %s6919_s9  ;;  %v4452_v63 = vsel %vm4428_vm1, %v4367_v27, %v3687_v62  ;;  %2614 = vrot.lane.b32.xlu0 %v2392_v41, %s6915_s11  ;;  %v10144_v60 = vsel %vm2706_vm7, %v12447_v51, %v12446_v20  ;;  %v3087_v33 = vsel %vm12442_vm11, %v9977_v22, %v10128_v3  ;;  %v12450_v57 = vrot.slane %v9983_v14, 2 }
 0x3e8   :  { %v5683_v4 = vsel %vm4003_vm12, %v5596_v56, 0.0  ;;  %v5597_v45 = vmul.f32 %v5515_v5, %v12448_v35  ;;  %v4537_v37 = vsel %vm4513_vm3, %v4452_v63, %v9972_v26  ;;  %v3603_v26 = vrot.slane %v9188_v18, 3 }
 0x3e9   :  { %v5684_v62 = vadd.f32 %v5683_v4, %v5682_v32  ;;  %v4611_v58 = vsel %vm4598_vm4, %v4537_v37, 1065369472  ;;  %v10154_v27 = vpop.permute.xlu1 %3858  ;;  %vm12451_vm9 = vcmask 1045504   ;;  %v3782_v20 = vrot.slane %v10117_v13, 3 }
 0x3ea   :  { %v5685_v56 = vsel %vm4003_vm12, %v5597_v45, 0.0  ;;  %v4740_v30 = vshrl.u32 %v4611_v58, 16  ;;  %v4743_v5 = vshll.u32 %v4611_v58, 16  ;;  %v10161_v41 = vpop.permute.xlu0 %2634  ;;  %v3258_v12 = vsel %vm12451_vm9, %v12450_v57, %v12092_v1 }
 0x3eb   :  { %12449 = vst [vmem:[#allocation15_spill] sm:$0xff] %v10161_v41  ;;  %3198 = vrot.lane.b32.xlu1 %v3087_v33, %s6919_s9  ;;  %v10165_v63 = vadd.f32 %v5685_v56, %v5684_v62  ;;  %2940 = vrot.lane.b32.xlu0 %v10144_v60, %s6918_s30  ;;  %v10178_v51 = vshll.u32 %v10117_v13, 16  ;;  %v10181_v18 = vshrl.u32 %v10117_v13, 16  ;;  %vm12453_vm11 = vsmask.f32 5376 }
 0x3ec   :  { %v4742_v32 = vrot.slane %v4740_v30, 6  ;;  %v4745_v50 = vrot.slane %v4743_v5, 7  ;;  %v3549_v35 = vsel %vm12453_vm11, %v9998_v31, %v10151_v17  ;;  %v10191_v37 = vor.u32 %v3603_v26, %v3602_v2  ;;  %vm12456_vm9 = vmmov %vm12453_vm11 }
 0x3ed   :  { %v10169_v22 = vpop.permute.xlu1 %2818  ;;  %v12455_v33 = vrot.slane %v9983_v14, 3  ;;  %v12091_v31 = vrot.slane %v10117_v13, 1  ;;  %v3032_v30 = vrot.slane %v10181_v18, 1  ;;  %v3033_v2 = vrot.slane %v10178_v51, 2 }
 0x3ee   :  { %v10183_v4 = vpop.permute.xlu0 %3714  ;;  %v10189_v45 = vor.u32 %v4745_v50, %v4742_v32  ;;  %v12458_v32 = vrot.slane %v9983_v14, 1  ;;  %vm12460_vm11 = vsmask.f32 6400 }
 0x3ef   :  { %12452 = vst [vmem:[#allocation10_spill] sm:$0xff] %v10183_v4  ;;  %3429 = vrot.lane.b32.xlu1 %v3258_v12, %s6920_s10  ;;  %3694 = vrot.lane.b32.xlu0 %v3549_v35, %s6922_s2  ;;  %v3783_v56 = vsel %vm3750_vm10, %v12455_v33, %v3782_v20  ;;  %v10222_v57 = vor.u32 %v3033_v2, %v3032_v30  ;;  %v3550_v2 = vrot.slane %v10181_v18, 2 }
 0x3f0   :  { %v4747_v62 = vsel %vm4652_vm8, %v9996_v43, %v10189_v45  ;;  %v3605_v43 = vsel %vm12456_vm9, %v10043_v0, %v10191_v37  ;;  %v2745_v50 = vsel %vm2706_vm7, %v12458_v32, %v12091_v31  ;;  %v10227_v0 = vld [vmem:[#allocation2 + $0xa0] sm:$0xff]  ;;  %v12461_v32 = vrot.slane %v10057_v15, 1 }
 0x3f1   :  { %v10197_v58 = vpop.permute.xlu1 %3449  ;;  %6644 = vmatmul.mubr.msk.bf16.gmra.mrb[128].mxu1 %vm12106_vm6, %v4747_v62  ;;  %v3035_v33 = vsel %vm12460_vm11, %v10102_v10, %v10222_v57  ;;  %v3259_v14 = vrot.slane %v10227_v0, 2  ;;  %v6858_v31 = vld [vmem:[#allocation2 + $0x60] sm:$0xff]  ;;  %vm12463_vm9 = vcmask 1045504   ;;  %v12465_v15 = vrot.slane %v10178_v51, 1 }
 0x3f2   :  { %12454 = vst [vmem:[#allocation126_spill] sm:$0xff] %v10197_v58  ;;  %v10206_v5 = vpop.permute.xlu0 %2906  ;;  %6647 = vmatprep.mubr.msk.bf16.mxu1 %vm12093_vm2, %v12175_v44  ;;  %v3944_v10 = vsel %vm1044_vm5, %v6858_v31, %v9888_v55  ;;  %vm12466_vm11 = vsmask.f32 7424 }
 0x3f3   :  { %3866 = vrot.lane.b32.xlu1 %v3783_v56, %s6921_s12  ;;  %3722 = vrot.lane.b32.xlu0 %v3605_v43, %s6922_s2  ;;  %v3551_v43 = vrot.slane %v10178_v51, 3  ;;  %v4029_v55 = vsel %vm4003_vm12, %v3944_v10, %v9820_v23  ;;  %v12469_v10 = vld [vmem:[#allocation12_spill] sm:$0xff] }
 0x3f4   :  { %v4114_v58 = vsel %vm4088_vm13, %v4029_v55, %v10014_v16 }
 0x3f5   :  { %v10215_v26 = vpop.permute.xlu1 %3886 }
 0x3f6   :  { %12457 = vst [vmem:[#allocation127_spill] sm:$0xff] %v10215_v26  ;;  %v10224_v35 = vpop.permute.xlu0 %3333 }
 0x3f7   :  { %2826 = vrot.lane.b32.xlu1 %v2745_v50, %s6916_s13  ;;  %2914 = vrot.lane.b32.xlu0 %v2745_v50, %s6918_s30  ;;  %v2395_v50 = vor.u32 %v10060_v47, %v12461_v32 }
 0x3f9   :  { %v10230_v62 = vpop.permute.xlu1 %2846  ;;  %v2400_v47 = vsel %vm12466_vm11, %v2395_v50, %v12465_v15  ;;  %v2746_v50 = vrot.slane %v10227_v0, 1  ;;  %vm12471_vm11 = vcmask 1045504  }
 0x3fa   :  { %12459 = vst [vmem:[#allocation128_spill] sm:$0xff] %v10230_v62  ;;  %v10236_v56 = vpop.permute.xlu0 %2608  ;;  %v3784_v62 = vrot.slane %v10227_v0, 3 }
 0x3fb   :  { %3172 = vrot.lane.b32.xlu1 %v3035_v33, %s6919_s9  ;;  %3341 = vrot.lane.b32.xlu0 %v3258_v12, %s6917_s29  ;;  %v12462_v33 = vrot.slane %v10117_v13, 2  ;;  %v10260_v12 = vor.u32 %v3551_v43, %v3550_v2  ;;  %v4199_v2 = vsel %vm4173_vm14, %v4114_v58, %v10075_v39  ;;  %v12467_v43 = vld [vmem:[#allocation17_spill] sm:$0xff]  ;;  %v12470_v58 = vrot.slane %v8313_v9, 2 }
 0x3fc   :  { %v3785_v4 = vsel %vm3750_vm10, %v3782_v20, %v3784_v62  ;;  %v4284_v39 = vsel %vm4258_vm15, %v4199_v2, %v10037_v59 }
 0x3fd   :  { %v10248_v1 = vpop.permute.xlu1 %3164  ;;  %v3260_v30 = vsel %vm12463_vm9, %v12462_v33, %v3259_v14  ;;  %vm12468_vm9 = vsmask.f32 5376 }
 0x3fe   :  { %v10254_v26 = vpop.permute.xlu0 %2934  ;;  %v3553_v16 = vsel %vm12468_vm9, %v10151_v17, %v10260_v12  ;;  %v4369_v17 = vsel %vm4343_vm0, %v4284_v39, %v10123_v24  ;;  %vm12477_vm9 = vsmask.f32 6400 }
 0x3ff   :  { %12464 = vst [vmem:[#allocation129_spill] sm:$0xff] %v10254_v26  ;;  %3431 = vrot.lane.b32.xlu1 %v3260_v30, %s6920_s10  ;;  %v5213_v32 = vpop.f32.mrb[104].mxu1  ;;  %2616 = vrot.lane.b32.xlu0 %v2400_v47, %s6915_s11 }
 0x400   :  { %v5516_v31 = vmax.f32 %v5213_v32, 0.0  ;;  %v6621_v33 = vpop.f32.mrb[105].mxu1 }
 0x401   :  { %v10267_v26 = vpop.permute.xlu1 %3192  ;;  %v5216_v41 = vpop.f32.mrb[106].mxu1  ;;  %v12472_v33 = vrot.slane %v10117_v13, 1  ;;  %v10311_v13 = vshll.u32 %v10227_v0, 16 }
 0x402   :  { %v5598_v15 = vmul.f32 %v5516_v31, %v12467_v43  ;;  %v5517_v47 = vmax.f32 %v5216_v41, 0.0  ;;  %v6622_v7 = vpop.f32.mrb[107].mxu1  ;;  %v10274_v23 = vpop.permute.xlu0 %3361 }
 0x403   :  { %3868 = vrot.lane.b32.xlu1 %v3785_v4, %s6921_s12  ;;  %3696 = vrot.lane.b32.xlu0 %v3553_v16, %s6922_s2  ;;  %v3262_v4 = vsel %vm12471_vm11, %v3259_v14, %v12470_v58  ;;  %v2747_v59 = vsel %vm2706_vm7, %v12472_v33, %v2746_v50  ;;  %v10314_v16 = vshrl.u32 %v10227_v0, 16  ;;  %v3037_v58 = vrot.slane %v10311_v13, 2 }
 0x404   :  { %v5687_v20 = vsel %vm4003_vm12, %v5598_v15, 0.0  ;;  %v5599_v32 = vmul.f32 %v5517_v47, %v12469_v10  ;;  %v12473_v15 = vrot.slane %v8313_v9, 3  ;;  %v12474_v0 = vrot.slane %v8313_v9, 1 }
 0x405   :  { %v5688_v41 = vadd.f32 %v5687_v20, %v10165_v63  ;;  %v10286_v7 = vpop.permute.xlu1 %3423  ;;  %v12096_v9 = vrot.slane %v10311_v13, 1  ;;  %vm12478_vm11 = vsmask.f32 7424 }
 0x406   :  { %v5689_v55 = vsel %vm4003_vm12, %v5599_v32, 0.0  ;;  %v3689_v31 = vpop.permute.xlu0 %3688  ;;  %v3787_v47 = vsel %vm3750_vm10, %v3784_v62, %v12473_v15  ;;  %v3036_v62 = vrot.slane %v10314_v16, 1 }
 0x407   :  { %3433 = vrot.lane.b32.xlu1 %v3262_v4, %s6920_s10  ;;  %v10298_v2 = vadd.f32 %v5689_v55, %v5688_v41  ;;  %v4454_v63 = vsel %vm4428_vm1, %v4369_v17, %v3689_v31  ;;  %2916 = vrot.lane.b32.xlu0 %v2747_v59, %s6918_s30  ;;  %v2749_v55 = vsel %vm2706_vm7, %v2746_v50, %v12474_v0  ;;  %v10343_v50 = vld [vmem:[#allocation2 + $0x108] sm:$0xff] }
 0x408   :  { %v4539_v14 = vsel %vm4513_vm3, %v4454_v63, %v10154_v27  ;;  %v3038_v63 = vor.u32 %v3037_v58, %v3036_v62  ;;  %v10381_v0 = vshll.u32 %v10343_v50, 16 }
 0x409   :  { %v4612_v24 = vsel %vm4598_vm4, %v4539_v14, 1065369472  ;;  %v10305_v43 = vpop.permute.xlu1 %3860 }
 0x40a   :  { %v4748_v20 = vshrl.u32 %v4612_v24, 16  ;;  %v4751_v10 = vshll.u32 %v4612_v24, 16  ;;  %v10316_v32 = vpop.permute.xlu0 %2636  ;;  %v3555_v24 = vrot.slane %v10311_v13, 3 }
 0x40b   :  { %3870 = vrot.lane.b32.xlu1 %v3787_v47, %s6921_s12  ;;  %3343 = vrot.lane.b32.xlu0 %v3260_v30, %s6917_s29 }
 0x40c   :  { %v4750_v27 = vrot.slane %v4748_v20, 6  ;;  %v4753_v39 = vrot.slane %v4751_v10, 7  ;;  %v3039_v20 = vsel %vm12477_vm9, %v10222_v57, %v3038_v63  ;;  %v12095_v10 = vrot.slane %v10343_v50, 2 }
 0x40d   :  { %v10320_v41 = vpop.permute.xlu1 %2820  ;;  %vm12481_vm9 = vcmask 1045504  }
 0x40e   :  { %v10324_v17 = vpop.permute.xlu0 %3716  ;;  %v10330_v31 = vor.u32 %v4753_v39, %v4750_v27 }
 0x40f   :  { %2828 = vrot.lane.b32.xlu1 %v2747_v59, %s6916_s13  ;;  %2918 = vrot.lane.b32.xlu0 %v2749_v55, %s6918_s30  ;;  %v3554_v59 = vrot.slane %v10314_v16, 2 }
 0x410   :  { %v4755_v30 = vsel %vm4652_vm8, %v10189_v45, %v10330_v31  ;;  %v12475_v45 = vrot.slane %v10178_v51, 1 }
 0x411   :  { %v10336_v33 = vpop.permute.xlu1 %3451  ;;  %6648 = vmatmul.mubr.msk.bf16.gmra.mrb[132].mxu1 %vm12106_vm6, %v4755_v30  ;;  %v6859_v30 = vld [vmem:[#allocation2 + $0x68] sm:$0xff] }
 0x412   :  { %v10339_v14 = vpop.permute.xlu0 %2908  ;;  %6651 = vmatprep.mubr.msk.bf16.mxu1 %vm12093_vm2, %v12175_v44  ;;  %v2403_v15 = vor.u32 %v10181_v18, %v12475_v45  ;;  %v12480_v18 = vrot.slane %v9174_v34, 2  ;;  %vm12482_vm2 = vsmask.f32 5376  ;;  %v12097_v34 = vrot.slane %v10343_v50, 3 }
 0x413   :  { %2830 = vrot.lane.b32.xlu1 %v2749_v55, %s6916_s13  ;;  %3345 = vrot.lane.b32.xlu0 %v3262_v4, %s6917_s29  ;;  %v3556_v4 = vor.u32 %v3555_v24, %v3554_v59  ;;  %v10384_v55 = vshrl.u32 %v10343_v50, 16  ;;  %v3946_v59 = vsel %vm1044_vm5, %v6859_v30, %v10063_v48 }
 0x414   :  { %v2408_v39 = vsel %vm12478_vm11, %v2403_v15, %v12096_v9  ;;  %v10372_v57 = vsel %vm12481_vm9, %v12480_v18, %v12095_v10  ;;  %vm12483_vm11 = vsmask.f32 6400  ;;  %v4031_v48 = vsel %vm4003_vm12, %v3946_v59, %v9987_v28  ;;  %vm12490_vm9 = vmmov %vm12482_vm2 }
 0x415   :  { %v10353_v47 = vpop.permute.xlu1 %3888  ;;  %v3557_v58 = vsel %vm12482_vm2, %v10260_v12, %v3556_v4  ;;  %v3043_v45 = vsel %vm12483_vm11, %v3038_v63, %v8428_v11  ;;  %v3606_v15 = vrot.slane %v10384_v55, 2  ;;  %v12485_v11 = vrot.slane %v10070_v42, 3 }
 0x416   :  { %12476 = vst [vmem:[#allocation17_spill] sm:$0xff] %v10353_v47  ;;  %v10358_v27 = vpop.permute.xlu0 %3335  ;;  %v4116_v30 = vsel %vm4088_vm13, %v4031_v48, %v10206_v5  ;;  %v3088_v9 = vrot.slane %v10384_v55, 1  ;;  %v3089_v28 = vrot.slane %v10381_v0, 2  ;;  %v12529_v47 = vld [vmem:[#allocation18_spill] sm:$0xff] }
 0x417   :  { %3174 = vrot.lane.b32.xlu1 %v3039_v20, %s6919_s9  ;;  %2618 = vrot.lane.b32.xlu0 %v2408_v39, %s6915_s11  ;;  %v3607_v20 = vrot.slane %v10381_v0, 3  ;;  %v3811_v63 = vsel %vm3750_vm10, %v12485_v11, %v12097_v34  ;;  %v4201_v59 = vsel %vm4173_vm14, %v4116_v30, %v10248_v1  ;;  %v10445_v30 = vld [vmem:[#allocation2 + $0x110] sm:$0xff] }
 0x419   :  { %v10365_v51 = vpop.permute.xlu1 %2848  ;;  %v10422_v5 = vor.u32 %v3607_v20, %v3606_v15 }
 0x41a   :  { %12479 = vst [vmem:[#allocation12_spill] sm:$0xff] %v10365_v51  ;;  %v10374_v62 = vpop.permute.xlu0 %2610 }
 0x41b   :  { %3457 = vrot.lane.b32.xlu1 %v10372_v57, %s6920_s10  ;;  %3698 = vrot.lane.b32.xlu0 %v3557_v58, %s6922_s2 }
 0x41d   :  { %v10390_v24 = vpop.permute.xlu1 %3166 }
 0x41e   :  { %v10394_v12 = vpop.permute.xlu0 %2936 }
 0x41f   :  { %12484 = vst [vmem:[#allocation130_spill] sm:$0xff] %v10394_v12  ;;  %3176 = vrot.lane.b32.xlu1 %v3043_v45, %s6919_s9  ;;  %v5221_v39 = vpop.f32.mrb[108].mxu1  ;;  %3367 = vrot.lane.b32.xlu0 %v10082_v53, %s6917_s29  ;;  %v3561_v53 = vsel %vm12482_vm2, %v3556_v4, %v8455_v49  ;;  %v12489_v4 = vld [vmem:[#allocation14_spill] sm:$0xff]  ;;  %vm12494_vm2 = vsmask.f32 7424 }
 0x420   :  { %v5518_v18 = vmax.f32 %v5221_v39, 0.0  ;;  %v6625_v58 = vpop.f32.mrb[109].mxu1  ;;  %v12487_v39 = vld [vmem:[#allocation19_spill] sm:$0xff] }
 0x421   :  { %v10410_v45 = vpop.permute.xlu1 %3194  ;;  %v5224_v10 = vpop.f32.mrb[110].mxu1 }
 0x422   :  { %12486 = vst [vmem:[#allocation131_spill] sm:$0xff] %v10410_v45  ;;  %v5600_v58 = vmul.f32 %v5518_v18, %v12487_v39  ;;  %v5519_v51 = vmax.f32 %v5224_v10, 0.0  ;;  %v6626_v11 = vpop.f32.mrb[111].mxu1  ;;  %v10419_v34 = vpop.permute.xlu0 %3363  ;;  %v4286_v45 = vsel %vm4258_vm15, %v4201_v59, %v10224_v35  ;;  %v10432_v10 = vor.u32 %v3089_v28, %v3088_v9 }
 0x423   :  { %12488 = vst [vmem:[#allocation19_spill] sm:$0xff] %v10419_v34  ;;  %3894 = vrot.lane.b32.xlu1 %v3811_v63, %s6921_s12  ;;  %3700 = vrot.lane.b32.xlu0 %v3561_v53, %s6922_s2  ;;  %v4371_v63 = vsel %vm4343_vm0, %v4286_v45, %v10286_v7  ;;  %v12491_v35 = vrot.slane %v10311_v13, 1  ;;  %v3287_v13 = vrot.slane %v10445_v30, 2  ;;  %v12493_v39 = vrot.slane %v8385_v40, 1 }
 0x424   :  { %v5691_v49 = vsel %vm4003_vm12, %v5600_v58, 0.0  ;;  %v5601_v48 = vmul.f32 %v5519_v51, %v12489_v4  ;;  %v3609_v51 = vsel %vm12490_vm9, %v10191_v37, %v10422_v5  ;;  %v3091_v37 = vsel %vm12483_vm11, %v10128_v3, %v10432_v10 }
 0x425   :  { %v5692_v1 = vadd.f32 %v5691_v49, %v10298_v2  ;;  %v10430_v18 = vpop.permute.xlu1 %3425  ;;  %v2411_v2 = vor.u32 %v10314_v16, %v12491_v35  ;;  %v12495_v3 = vrot.slane %v10343_v50, 2  ;;  %vm12496_vm9 = vcmask 1045504  }
 0x426   :  { %v5693_v15 = vsel %vm4003_vm12, %v5601_v48, 0.0  ;;  %v3691_v20 = vpop.permute.xlu0 %3690  ;;  %v12098_v48 = vrot.slane %v10445_v30, 3  ;;  %vm12500_vm11 = vmmov 0  }
 0x427   :  { %2852 = vrot.lane.b32.xlu1 %v10144_v60, %s6916_s13  ;;  %v10447_v9 = vadd.f32 %v5693_v15, %v5692_v1  ;;  %v4456_v7 = vsel %vm4428_vm1, %v4371_v63, %v3691_v20  ;;  %3724 = vrot.lane.b32.xlu0 %v3609_v51, %s6922_s2  ;;  %v10474_v4 = vsel %vm12496_vm9, %v12495_v3, %v3287_v13  ;;  %v2772_v63 = vrot.slane %v10343_v50, 1 }
 0x428   :  { %v4541_v45 = vsel %vm4513_vm3, %v4456_v7, %v10305_v43  ;;  %v2416_v43 = vsel %vm12494_vm2, %v2411_v2, %v12493_v39  ;;  %v12498_v51 = vrot.slane %v10343_v50, 3  ;;  %v10498_v2 = vshll.u32 %v10445_v30, 16 }
 0x429   :  { %v4613_v60 = vsel %vm4598_vm4, %v4541_v45, 1065369472  ;;  %v10454_v53 = vpop.permute.xlu1 %3862  ;;  %v10501_v7 = vshrl.u32 %v10445_v30, 16  ;;  %vm12504_vm9 = vsmask.f32 6400 }
 0x42a   :  { %v4756_v16 = vshrl.u32 %v4613_v60, 16  ;;  %v4759_v28 = vshll.u32 %v4613_v60, 16  ;;  %v10460_v59 = vpop.permute.xlu0 %2638  ;;  %v3813_v35 = vsel %vm3750_vm10, %v12498_v51, %v12098_v48  ;;  %v12099_v60 = vrot.slane %v10445_v30, 1 }
 0x42b   :  { %12492 = vst [vmem:[#allocation14_spill] sm:$0xff] %v10460_v59  ;;  %3200 = vrot.lane.b32.xlu1 %v3091_v37, %s6919_s9  ;;  %2620 = vrot.lane.b32.xlu0 %v2416_v43, %s6915_s11  ;;  %v3092_v37 = vrot.slane %v10501_v7, 1 }
 0x42c   :  { %v4758_v58 = vrot.slane %v4756_v16, 6  ;;  %v4761_v11 = vrot.slane %v4759_v28, 7  ;;  %v3093_v16 = vrot.slane %v10498_v2, 2 }
 0x42d   :  { %v10467_v49 = vpop.permute.xlu1 %2822 }
 0x42e   :  { %v10477_v1 = vpop.permute.xlu0 %3718  ;;  %v10481_v40 = vor.u32 %v4761_v11, %v4758_v58  ;;  %v10528_v51 = vor.u32 %v3093_v16, %v3092_v37  ;;  %v6860_v16 = vld [vmem:[#allocation2 + $0x70] sm:$0xff] }
 0x42f   :  { %3459 = vrot.lane.b32.xlu1 %v10474_v4, %s6920_s10  ;;  %2642 = vrot.lane.b32.xlu0 %v9230_v46, %s6915_s11 }
 0x430   :  { %v4763_v15 = vsel %vm4652_vm8, %v10330_v31, %v10481_v40  ;;  %v12499_v31 = vrot.slane %v10070_v42, 1  ;;  %v2511_v42 = vrot.slane %v10381_v0, 1 }
 0x431   :  { %v10489_v20 = vpop.permute.xlu1 %3453  ;;  %6652 = vmatmul.mubr.msk.bf16.gmra.mrb[136].mxu1 %vm12106_vm6, %v4763_v15  ;;  %v2775_v15 = vsel %vm2706_vm7, %v2772_v63, %v12099_v60 }
 0x432   :  { %12497 = vst [vmem:[#allocation132_spill] sm:$0xff] %v10489_v20  ;;  %v10503_v46 = vpop.permute.xlu0 %2910  ;;  %v2773_v45 = vsel %vm2706_vm7, %v12499_v31, %v2772_v63  ;;  %6655 = vmatprep.mubr.msk.bf16.mxu1 %vm12500_vm11, %v12175_v44  ;;  %v12503_v63 = vld [vmem:[#allocation16_spill] sm:$0xff] }
 0x433   :  { %3896 = vrot.lane.b32.xlu1 %v3813_v35, %s6921_s12  ;;  %2942 = vrot.lane.b32.xlu0 %v2773_v45, %s6918_s30  ;;  %v12502_v35 = vld [vmem:[#allocation21_spill] sm:$0xff] }
 0x435   :  { %v10512_v50 = vpop.permute.xlu1 %3890 }
 0x436   :  { %12501 = vst [vmem:[#allocation133_spill] sm:$0xff] %v10512_v50  ;;  %v10517_v28 = vpop.permute.xlu0 %3337 }
 0x437   :  { %2854 = vrot.lane.b32.xlu1 %v2773_v45, %s6916_s13  ;;  %v5229_v39 = vpop.f32.mrb[112].mxu1  ;;  %3369 = vrot.lane.b32.xlu0 %v10372_v57, %s6917_s29  ;;  %v2512_v57 = vsel %vm12494_vm2, %v9233_v19, %v2511_v42  ;;  %v3095_v19 = vsel %vm12504_vm9, %v10432_v10, %v10528_v51  ;;  %vm12507_vm2 = vcmask 1045504   ;;  %vm12510_vm9 = vsmask.f32 7424 }
 0x438   :  { %v5520_v43 = vmax.f32 %v5229_v39, 0.0  ;;  %v6629_v58 = vpop.f32.mrb[113].mxu1  ;;  %v10536_v39 = vld [vmem:[#allocation2 + $0x118] sm:$0xff] }
 0x439   :  { %v10523_v11 = vpop.permute.xlu1 %2850  ;;  %v5232_v3 = vpop.f32.mrb[114].mxu1 }
 0x43a   :  { %v5602_v31 = vmul.f32 %v5520_v43, %v12502_v35  ;;  %v5521_v45 = vmax.f32 %v5232_v3, 0.0  ;;  %v6630_v48 = vpop.f32.mrb[115].mxu1  ;;  %v10531_v0 = vpop.permute.xlu0 %2612  ;;  %v3948_v43 = vsel %vm1044_vm5, %v6860_v16, %v10236_v56  ;;  %v3289_v35 = vrot.slane %v10536_v39, 2 }
 0x43b   :  { %2856 = vrot.lane.b32.xlu1 %v2775_v15, %s6916_s13  ;;  %2644 = vrot.lane.b32.xlu0 %v2512_v57, %s6915_s11  ;;  %v4033_v56 = vsel %vm4003_vm12, %v3948_v43, %v10169_v22  ;;  %v3610_v16 = vrot.slane %v10501_v7, 2  ;;  %v3611_v43 = vrot.slane %v10498_v2, 3 }
 0x43c   :  { %v5695_v58 = vsel %vm4003_vm12, %v5602_v31, 0.0  ;;  %v5603_v37 = vmul.f32 %v5521_v45, %v12503_v63  ;;  %v4118_v10 = vsel %vm4088_vm13, %v4033_v56, %v10339_v14  ;;  %v10568_v63 = vshll.u32 %v10536_v39, 16 }
 0x43d   :  { %v5696_v48 = vadd.f32 %v5695_v58, %v10447_v9  ;;  %v10544_v3 = vpop.permute.xlu1 %3168  ;;  %v12100_v9 = vrot.slane %v10536_v39, 3  ;;  %v3290_v58 = vsel %vm12507_vm2, %v3287_v13, %v3289_v35  ;;  %v4203_v22 = vsel %vm4173_vm14, %v4118_v10, %v10390_v24 }
 0x43e   :  { %v5697_v57 = vsel %vm4003_vm12, %v5603_v37, 0.0  ;;  %v10551_v60 = vpop.permute.xlu0 %2938  ;;  %v10571_v37 = vshrl.u32 %v10536_v39, 16  ;;  %v2519_v14 = vrot.slane %v10498_v2, 1  ;;  %v2515_v13 = vor.u32 %v10384_v55, %v2511_v42 }
 0x43f   :  { %12505 = vst [vmem:[#allocation21_spill] sm:$0xff] %v10551_v60  ;;  %3202 = vrot.lane.b32.xlu1 %v3095_v19, %s6919_s9  ;;  %v10554_v31 = vadd.f32 %v5697_v57, %v5696_v48  ;;  %2944 = vrot.lane.b32.xlu0 %v2775_v15, %s6918_s30  ;;  %v4288_v24 = vsel %vm4258_vm15, %v4203_v22, %v10358_v27  ;;  %v12509_v57 = vrot.slane %v10445_v30, 3  ;;  %v3097_v10 = vrot.slane %v10568_v63, 2 }
 0x440   :  { %v3096_v2 = vrot.slane %v10571_v37, 1  ;;  %v4373_v55 = vsel %vm4343_vm0, %v4288_v24, %v10430_v18  ;;  %v2520_v27 = vsel %vm12510_vm9, %v2515_v13, %v2519_v14  ;;  %v3612_v42 = vor.u32 %v3611_v43, %v3610_v16 }
 0x441   :  { %v10562_v45 = vpop.permute.xlu1 %3196  ;;  %v3815_v56 = vsel %vm3750_vm10, %v12509_v57, %v12100_v9  ;;  %v12512_v18 = vrot.slane %v10445_v30, 1  ;;  %vm12513_vm2 = vsmask.f32 5376  ;;  %vm12514_vm9 = vsmask.f32 6400 }
 0x442   :  { %12506 = vst [vmem:[#allocation16_spill] sm:$0xff] %v10562_v45  ;;  %v10575_v15 = vpop.permute.xlu0 %3365 }
 0x443   :  { %12508 = vst [vmem:[#allocation134_spill] sm:$0xff] %v10575_v15  ;;  %3461 = vrot.lane.b32.xlu1 %v3290_v58, %s6920_s10  ;;  %3371 = vrot.lane.b32.xlu0 %v10474_v4, %s6917_s29  ;;  %v12511_v15 = vrot.slane %v10536_v39, 1 }
 0x445   :  { %v10587_v19 = vpop.permute.xlu1 %3427  ;;  %v2777_v24 = vsel %vm2706_vm7, %v12512_v18, %v12511_v15 }
 0x446   :  { %v3693_v4 = vpop.permute.xlu0 %3692 }
 0x447   :  { %3898 = vrot.lane.b32.xlu1 %v3815_v56, %s6921_s12  ;;  %v4458_v22 = vsel %vm4428_vm1, %v4373_v55, %v3693_v4  ;;  %2646 = vrot.lane.b32.xlu0 %v2520_v27, %s6915_s11  ;;  %v3098_v56 = vor.u32 %v3097_v10, %v3096_v2  ;;  %v10617_v55 = vld [vmem:[#allocation2 + $0x120] sm:$0xff] }
 0x448   :  { %v4543_v57 = vsel %vm4513_vm3, %v4458_v22, %v10454_v53  ;;  %v3613_v53 = vsel %vm12513_vm2, %v10422_v5, %v3612_v42  ;;  %vm12517_vm2 = vcmask 1045504   ;;  %v10640_v18 = vshll.u32 %v10617_v55, 16 }
 0x449   :  { %v4614_v9 = vsel %vm4598_vm4, %v4543_v57, 1065369472  ;;  %v10605_v48 = vpop.permute.xlu1 %3864  ;;  %v3099_v30 = vsel %vm12514_vm9, %v10528_v51, %v3098_v56  ;;  %v3816_v57 = vrot.slane %v10617_v55, 3  ;;  %vm12520_vm9 = vsmask.f32 7424 }
 0x44a   :  { %v4764_v13 = vshrl.u32 %v4614_v9, 16  ;;  %v4767_v16 = vshll.u32 %v4614_v9, 16  ;;  %v10612_v43 = vpop.permute.xlu0 %2640  ;;  %v3291_v9 = vrot.slane %v10617_v55, 2  ;;  %v3101_v50 = vrot.slane %v10640_v18, 2 }
 0x44b   :  { %2858 = vrot.lane.b32.xlu1 %v2777_v24, %s6916_s13  ;;  %3726 = vrot.lane.b32.xlu0 %v3613_v53, %s6922_s2  ;;  %v3615_v53 = vrot.slane %v10568_v63, 3 }
 0x44c   :  { %v4766_v4 = vrot.slane %v4764_v13, 6  ;;  %v4769_v27 = vrot.slane %v4767_v16, 7  ;;  %v3292_v51 = vsel %vm12517_vm2, %v3289_v35, %v3291_v9  ;;  %v10643_v13 = vshrl.u32 %v10617_v55, 16 }
 0x44d   :  { %v10620_v22 = vpop.permute.xlu1 %2824  ;;  %v2523_v35 = vor.u32 %v10501_v7, %v2519_v14  ;;  %v6861_v7 = vld [vmem:[#allocation2 + $0x78] sm:$0xff]  ;;  %vm12522_vm2 = vsmask.f32 5376 }
 0x44e   :  { %v10625_v15 = vpop.permute.xlu0 %3720  ;;  %v10628_v2 = vor.u32 %v4769_v27, %v4766_v4  ;;  %v12519_v27 = vrot.slane %v10536_v39, 3  ;;  %v3950_v14 = vsel %vm1044_vm5, %v6861_v7, %v10374_v62 }
 0x44f   :  { %12515 = vst [vmem:[#allocation135_spill] sm:$0xff] %v10625_v15  ;;  %3204 = vrot.lane.b32.xlu1 %v3099_v30, %s6919_s9  ;;  %2946 = vrot.lane.b32.xlu0 %v2777_v24, %s6918_s30  ;;  %v3614_v24 = vrot.slane %v10571_v37, 2  ;;  %v4035_v62 = vsel %vm4003_vm12, %v3950_v14, %v10320_v41 }
 0x450   :  { %v4771_v5 = vsel %vm4652_vm8, %v10481_v40, %v10628_v2  ;;  %v2527_v40 = vrot.slane %v10568_v63, 1  ;;  %v3817_v30 = vsel %vm3750_vm10, %v12519_v27, %v3816_v57 }
 0x451   :  { %v10634_v10 = vpop.permute.xlu1 %3455  ;;  %6656 = vmatmul.mubr.msk.bf16.gmra.mrb[140].mxu1 %vm12106_vm6, %v4771_v5  ;;  %v12102_v5 = vrot.slane %v10617_v55, 1  ;;  %v10667_v45 = vor.u32 %v3615_v53, %v3614_v24  ;;  %v10686_v53 = vld [vmem:[#allocation2 + $0x128] sm:$0xff] }
 0x452   :  { %12516 = vst [vmem:[#allocation136_spill] sm:$0xff] %v10634_v10  ;;  %v10645_v16 = vpop.permute.xlu0 %2912  ;;  %6659 = vmatprep.mubr.msk.bf16.mxu1 %vm12500_vm11, %v12175_v44  ;;  %v3100_v10 = vrot.slane %v10643_v13, 1  ;;  %v12103_v41 = vrot.slane %v10686_v53, 3  ;;  %v10718_v7 = vshrl.u32 %v10686_v53, 16 }
 0x453   :  { %3463 = vrot.lane.b32.xlu1 %v3292_v51, %s6920_s10  ;;  %3373 = vrot.lane.b32.xlu0 %v3290_v58, %s6917_s29  ;;  %v2528_v58 = vsel %vm12520_vm9, %v2523_v35, %v2527_v40  ;;  %v3617_v24 = vsel %vm12522_vm2, %v3612_v42, %v10667_v45  ;;  %vm12523_vm9 = vsmask.f32 6400  ;;  %vm12524_vm2 = vcmask 1045504  }
 0x454   :  { %v10679_v15 = vor.u32 %v3101_v50, %v3100_v10  ;;  %v12101_v10 = vrot.slane %v10686_v53, 2 }
 0x455   :  { %v10655_v4 = vpop.permute.xlu1 %3892 }
 0x456   :  { %12518 = vst [vmem:[#allocation137_spill] sm:$0xff] %v10655_v4  ;;  %v10663_v63 = vpop.permute.xlu0 %3339  ;;  %v12521_v4 = vrot.slane %v10536_v39, 1  ;;  %v4120_v39 = vsel %vm4088_vm13, %v4035_v62, %v10503_v46  ;;  %v3103_v50 = vsel %vm12523_vm9, %v3098_v56, %v10679_v15  ;;  %v10712_v56 = vsel %vm12524_vm2, %v3291_v9, %v12101_v10 }
 0x457   :  { %3900 = vrot.lane.b32.xlu1 %v3817_v30, %s6921_s12  ;;  %2648 = vrot.lane.b32.xlu0 %v2528_v58, %s6915_s11  ;;  %v4205_v42 = vsel %vm4173_vm14, %v4120_v39, %v10544_v3  ;;  %v10715_v3 = vshll.u32 %v10686_v53, 16  ;;  %v3619_v9 = vrot.slane %v10640_v18, 3  ;;  %vm12527_vm9 = vsmask.f32 7424 }
 0x458   :  { %v2779_v60 = vsel %vm2706_vm7, %v12521_v4, %v12102_v5  ;;  %v4290_v46 = vsel %vm4258_vm15, %v4205_v42, %v10517_v28  ;;  %v2531_v42 = vor.u32 %v10571_v37, %v2527_v40  ;;  %v12526_v37 = vrot.slane %v10640_v18, 1 }
 0x459   :  { %v10672_v27 = vpop.permute.xlu1 %3170  ;;  %vm12532_vm2 = vsmask.f32 5376 }
 0x45a   :  { %v10681_v30 = vpop.permute.xlu0 %2614 }
 0x45b   :  { %2860 = vrot.lane.b32.xlu1 %v2779_v60, %s6916_s13  ;;  %3728 = vrot.lane.b32.xlu0 %v3617_v24, %s6922_s2  ;;  %v3618_v24 = vrot.slane %v10643_v13, 2 }
 0x45d   :  { %v10693_v35 = vpop.permute.xlu1 %3198  ;;  %v10747_v40 = vor.u32 %v3619_v9, %v3618_v24 }
 0x45e   :  { %v10700_v4 = vpop.permute.xlu0 %2940 }
 0x45f   :  { %3206 = vrot.lane.b32.xlu1 %v3103_v50, %s6919_s9  ;;  %2948 = vrot.lane.b32.xlu0 %v2779_v60, %s6918_s30  ;;  %v4375_v60 = vsel %vm4343_vm0, %v4290_v46, %v10587_v19  ;;  %v3819_v19 = vsel %vm3750_vm10, %v3816_v57, %v12103_v41  ;;  %v2536_v57 = vsel %vm12527_vm9, %v2531_v42, %v12526_v37  ;;  %v12531_v42 = vrot.slane %v10617_v55, 1 }
 0x460   :  { %vm12533_vm9 = vsmask.f32 6400 }
 0x461   :  { %v10707_v58 = vpop.permute.xlu1 %3429 }
 0x462   :  { %v3695_v14 = vpop.permute.xlu0 %3694 }
 0x463   :  { %3465 = vrot.lane.b32.xlu1 %v10712_v56, %s6920_s10  ;;  %v4460_v62 = vsel %vm4428_vm1, %v4375_v60, %v3695_v14  ;;  %3375 = vrot.lane.b32.xlu0 %v3292_v51, %s6917_s29  ;;  %v5237_v50 = vpop.f32.mrb[116].mxu1  ;;  %v3104_v51 = vrot.slane %v10718_v7, 1  ;;  %v3105_v14 = vrot.slane %v10715_v3, 2 }
 0x464   :  { %v4545_v39 = vsel %vm4513_vm3, %v4460_v62, %v10605_v48  ;;  %v5522_v5 = vmax.f32 %v5237_v50, 0.0  ;;  %v6633_v60 = vpop.f32.mrb[117].mxu1 }
 0x465   :  { %v4615_v10 = vsel %vm4598_vm4, %v4545_v39, 1065369472  ;;  %v10737_v28 = vpop.permute.xlu1 %3866  ;;  %v5240_v20 = vpop.f32.mrb[118].mxu1  ;;  %v12528_v39 = vld [vmem:[#allocation23_spill] sm:$0xff]  ;;  %v10760_v9 = vor.u32 %v3105_v14, %v3104_v51  ;;  %v6862_v14 = vld [vmem:[#allocation2 + $0x80] sm:$0xff] }
 0x466   :  { %v4772_v48 = vshrl.u32 %v4615_v10, 16  ;;  %v4775_v62 = vshll.u32 %v4615_v10, 16  ;;  %v10741_v59 = vpop.permute.xlu0 %3722  ;;  %v5604_v50 = vmul.f32 %v5522_v5, %v12528_v39  ;;  %v5523_v60 = vmax.f32 %v5240_v20, 0.0  ;;  %v6634_v41 = vpop.f32.mrb[119].mxu1 }
 0x467   :  { %12525 = vst [vmem:[#allocation138_spill] sm:$0xff] %v10741_v59  ;;  %3902 = vrot.lane.b32.xlu1 %v3819_v19, %s6921_s12  ;;  %2650 = vrot.lane.b32.xlu0 %v2536_v57, %s6915_s11  ;;  %v12530_v19 = vrot.slane %v10686_v53, 1  ;;  %v12534_v57 = vrot.slane %v10686_v53, 2 }
 0x468   :  { %v4774_v46 = vrot.slane %v4772_v48, 6  ;;  %v4777_v34 = vrot.slane %v4775_v62, 7  ;;  %v5699_v10 = vsel %vm4003_vm12, %v5604_v50, 0.0  ;;  %v5605_v59 = vmul.f32 %v5523_v60, %v12529_v47  ;;  %v10771_v48 = vld [vmem:[#allocation2 + $0x130] sm:$0xff] }
 0x469   :  { %v10753_v12 = vpop.permute.xlu1 %2826  ;;  %v2781_v24 = vsel %vm2706_vm7, %v12531_v42, %v12530_v19  ;;  %v5700_v20 = vadd.f32 %v5699_v10, %v10554_v31  ;;  %v3621_v47 = vsel %vm12532_vm2, %v10667_v45, %v10747_v40  ;;  %v3952_v62 = vsel %vm1044_vm5, %v6862_v14, %v10531_v0 }
 0x46a   :  { %v10763_v5 = vpop.permute.xlu0 %2914  ;;  %v10769_v41 = vor.u32 %v4777_v34, %v4774_v46  ;;  %v5701_v55 = vsel %vm4003_vm12, %v5605_v59, 0.0  ;;  %v3107_v34 = vsel %vm12533_vm9, %v10679_v15, %v10760_v9  ;;  %v3295_v59 = vrot.slane %v10771_v48, 2 }
 0x46b   :  { %2862 = vrot.lane.b32.xlu1 %v2781_v24, %s6916_s13  ;;  %3730 = vrot.lane.b32.xlu0 %v3621_v47, %s6922_s2  ;;  %v10775_v51 = vadd.f32 %v5701_v55, %v5700_v20  ;;  %v4037_v0 = vsel %vm4003_vm12, %v3952_v62, %v10467_v49  ;;  %vm12535_vm2 = vcmask 1045504   ;;  %v10810_v50 = vshll.u32 %v10771_v48, 16 }
 0x46c   :  { %v4779_v31 = vsel %vm4652_vm8, %v10628_v2, %v10769_v41  ;;  %v3820_v2 = vrot.slane %v10771_v48, 3  ;;  %v4122_v46 = vsel %vm4088_vm13, %v4037_v0, %v10645_v16  ;;  %v10807_v39 = vsel %vm12535_vm2, %v12534_v57, %v3295_v59 }
 0x46d   :  { %v10782_v37 = vpop.permute.xlu1 %3172  ;;  %6660 = vmatmul.mubr.msk.bf16.gmra.mrb[144].mxu1 %vm12106_vm6, %v4779_v31  ;;  %v10813_v60 = vshrl.u32 %v10771_v48, 16  ;;  %v4207_v49 = vsel %vm4173_vm14, %v4122_v46, %v10672_v27  ;;  %v2543_v16 = vrot.slane %v10715_v3, 1  ;;  %v3622_v19 = vrot.slane %v10718_v7, 2 }
 0x46e   :  { %v10789_v45 = vpop.permute.xlu0 %3341  ;;  %6663 = vmatprep.mubr.msk.bf16.mxu1 %vm12500_vm11, %v12175_v44  ;;  %v3623_v42 = vrot.slane %v10715_v3, 3  ;;  %v12537_v20 = vrot.slane %v10640_v18, 1  ;;  %v4292_v55 = vsel %vm4258_vm15, %v4207_v49, %v10663_v63  ;;  %v12104_v14 = vrot.slane %v10771_v48, 1 }
 0x46f   :  { %3208 = vrot.lane.b32.xlu1 %v3107_v34, %s6919_s9  ;;  %2950 = vrot.lane.b32.xlu0 %v2781_v24, %s6918_s30  ;;  %v12536_v24 = vrot.slane %v10686_v53, 3  ;;  %v3108_v62 = vrot.slane %v10813_v60, 1  ;;  %v4377_v34 = vsel %vm4343_vm0, %v4292_v55, %v10707_v58  ;;  %vm12538_vm9 = vsmask.f32 7424  ;;  %v6863_v55 = vld [vmem:[#allocation2 + $0xa8] sm:$0xff] }
 0x470   :  { %v2539_v47 = vor.u32 %v10643_v13, %v12537_v20  ;;  %v10847_v13 = vor.u32 %v3623_v42, %v3622_v19  ;;  %v12539_v58 = vrot.slane %v10686_v53, 1  ;;  %vm12540_vm2 = vsmask.f32 5376 }
 0x471   :  { %v10800_v15 = vpop.permute.xlu1 %3431  ;;  %v3821_v27 = vsel %vm3750_vm10, %v12536_v24, %v3820_v2  ;;  %v3962_v53 = vsel %vm1044_vm5, %v6863_v55, %v9130_v29  ;;  %v2551_v55 = vrot.slane %v10810_v50, 1 }
 0x472   :  { %v10817_v10 = vpop.permute.xlu0 %2616  ;;  %v2544_v18 = vsel %vm12538_vm9, %v2539_v47, %v2543_v16  ;;  %v2783_v24 = vsel %vm2706_vm7, %v12539_v58, %v12104_v14  ;;  %v10869_v47 = vld [vmem:[#allocation2 + $0x138] sm:$0xff]  ;;  %vm12541_vm9 = vsmask.f32 6400 }
 0x473   :  { %3467 = vrot.lane.b32.xlu1 %v10807_v39, %s6920_s10  ;;  %3377 = vrot.lane.b32.xlu0 %v10712_v56, %s6917_s29  ;;  %v3109_v56 = vrot.slane %v10810_v50, 2 }
 0x475   :  { %v10836_v31 = vpop.permute.xlu1 %3868 }
 0x476   :  { %v3697_v0 = vpop.permute.xlu0 %3696 }
 0x477   :  { %3904 = vrot.lane.b32.xlu1 %v3821_v27, %s6921_s12  ;;  %v4462_v63 = vsel %vm4428_vm1, %v4377_v34, %v3697_v0  ;;  %2652 = vrot.lane.b32.xlu0 %v2544_v18, %s6915_s11  ;;  %v10861_v27 = vor.u32 %v3109_v56, %v3108_v62  ;;  %v12105_v18 = vrot.slane %v10869_v47, 2 }
 0x478   :  { %v4547_v46 = vsel %vm4513_vm3, %v4462_v63, %v10737_v28  ;;  %v3625_v28 = vsel %vm12540_vm2, %v10747_v40, %v10847_v13  ;;  %v10881_v40 = vshll.u32 %v10869_v47, 16  ;;  %v10884_v63 = vshrl.u32 %v10869_v47, 16 }
 0x479   :  { %v4616_v57 = vsel %vm4598_vm4, %v4547_v46, 1065369472  ;;  %v10854_v49 = vpop.permute.xlu1 %3433  ;;  %v3111_v0 = vsel %vm12541_vm9, %v10760_v9, %v10861_v27  ;;  %vm12542_vm2 = vcmask 1045504   ;;  %vm12543_vm9 = vsmask.f32 7424 }
 0x47a   :  { %v4780_v19 = vshrl.u32 %v4616_v57, 16  ;;  %v4783_v42 = vshll.u32 %v4616_v57, 16  ;;  %v10863_v20 = vpop.permute.xlu0 %2916  ;;  %v4047_v57 = vsel %vm4003_vm12, %v3962_v53, %v9074_v54  ;;  %v3113_v54 = vrot.slane %v10881_v40, 2 }
 0x47b   :  { %2864 = vrot.lane.b32.xlu1 %v2783_v24, %s6916_s13  ;;  %3732 = vrot.lane.b32.xlu0 %v3625_v28, %s6922_s2  ;;  %v3626_v53 = vrot.slane %v10813_v60, 2 }
 0x47c   :  { %v4782_v62 = vrot.slane %v4780_v19, 6  ;;  %v4785_v56 = vrot.slane %v4783_v42, 7  ;;  %v10905_v19 = vsel %vm12542_vm2, %v3295_v59, %v12105_v18  ;;  %v3112_v42 = vrot.slane %v10884_v63, 1 }
 0x47d   :  { %v10874_v34 = vpop.permute.xlu1 %3870  ;;  %v3627_v59 = vrot.slane %v10810_v50, 3  ;;  %v2547_v50 = vor.u32 %v10718_v7, %v2543_v16  ;;  %vm12546_vm2 = vsmask.f32 6400 }
 0x47e   :  { %v10886_v46 = vpop.permute.xlu0 %3343  ;;  %v10889_v29 = vor.u32 %v4785_v56, %v4782_v62  ;;  %v6864_v56 = vld [vmem:[#allocation2 + $0xb0] sm:$0xff] }
 0x47f   :  { %3210 = vrot.lane.b32.xlu1 %v3111_v0, %s6919_s9  ;;  %2952 = vrot.lane.b32.xlu0 %v2783_v24, %s6918_s30  ;;  %v3822_v24 = vrot.slane %v10869_v47, 3  ;;  %v3964_v0 = vsel %vm1044_vm5, %v6864_v56, %v9313_v6  ;;  %v10941_v6 = vor.u32 %v3113_v54, %v3112_v42  ;;  %v10951_v56 = vor.u32 %v3627_v59, %v3626_v53  ;;  %v12544_v42 = vld [vmem:[#allocation25_spill] sm:$0xff] }
 0x480   :  { %v4787_v9 = vsel %vm4652_vm8, %v10769_v41, %v10889_v29  ;;  %v4132_v41 = vsel %vm4088_vm13, %v4047_v57, %v9245_v25  ;;  %v10925_v25 = vld [vmem:[#allocation2 + $0x140] sm:$0xff]  ;;  %v3630_v59 = vrot.slane %v10884_v63, 2 }
 0x481   :  { %v10897_v58 = vpop.permute.xlu1 %2828  ;;  %6664 = vmatmul.mubr.msk.bf16.gmra.mrb[148].mxu1 %vm12106_vm6, %v4787_v9  ;;  %v4217_v62 = vsel %vm4173_vm14, %v4132_v41, %v9308_v21  ;;  %v6865_v9 = vld [vmem:[#allocation2 + $0x88] sm:$0xff]  ;;  %v3824_v53 = vrot.slane %v10925_v25, 3  ;;  %vm12549_vm6 = vcmask 1045504  }
 0x482   :  { %v10912_v28 = vpop.permute.xlu0 %2918  ;;  %6667 = vmatprep.mubr.msk.bf16.mxu1 %vm12500_vm11, %v12175_v44  ;;  %v3954_v14 = vsel %vm1044_vm5, %v6865_v9, %v10681_v30  ;;  %v10945_v3 = vsel %vm4258_vm15, %v4217_v62, %v9272_v38  ;;  %v2552_v30 = vsel %vm12543_vm9, %v2547_v50, %v2551_v55  ;;  %v2784_v62 = vrot.slane %v10869_v47, 1 }
 0x483   :  { %3469 = vrot.lane.b32.xlu1 %v10905_v19, %s6920_s10  ;;  %3379 = vrot.lane.b32.xlu0 %v10807_v39, %s6917_s29  ;;  %v5245_v57 = vpop.f32.mrb[120].mxu1  ;;  %v3823_v39 = vsel %vm3750_vm10, %v3820_v2, %v3822_v24  ;;  %v10956_v2 = vsel %vm4003_vm12, %v3964_v0, %v9259_v61  ;;  %v3631_v50 = vrot.slane %v10881_v40, 3  ;;  %v12545_v0 = vld [vmem:[#allocation20_spill] sm:$0xff]  ;;  %vm12547_vm9 = vsmask.f32 5376 }
 0x484   :  { %v5524_v18 = vmax.f32 %v5245_v57, 0.0  ;;  %v6637_v41 = vpop.f32.mrb[121].mxu1  ;;  %v3299_v57 = vrot.slane %v10925_v25, 2 }
 0x485   :  { %v10934_v21 = vpop.permute.xlu1 %2830  ;;  %v5248_v7 = vpop.f32.mrb[122].mxu1  ;;  %v4039_v41 = vsel %vm4003_vm12, %v3954_v14, %v10620_v22 }
 0x486   :  { %v10947_v16 = vpop.permute.xlu0 %3345  ;;  %v5606_v54 = vmul.f32 %v5524_v18, %v12544_v42  ;;  %v5525_v9 = vmax.f32 %v5248_v7, 0.0  ;;  %v6638_v38 = vpop.f32.mrb[123].mxu1  ;;  %v4124_v61 = vsel %vm4088_vm13, %v4039_v41, %v10763_v5  ;;  %v3629_v5 = vsel %vm12547_vm9, %v10847_v13, %v10951_v56 }
 0x487   :  { %3906 = vrot.lane.b32.xlu1 %v3823_v39, %s6921_s12  ;;  %2654 = vrot.lane.b32.xlu0 %v2552_v30, %s6915_s11  ;;  %v3115_v30 = vsel %vm12546_vm2, %v10861_v27, %v10941_v6  ;;  %v4209_v22 = vsel %vm4173_vm14, %v4124_v61, %v10782_v37  ;;  %v6866_v27 = vld [vmem:[#allocation2 + $0xf0] sm:$0xff]  ;;  %v6868_v61 = vld [vmem:[#allocation2 + $0x98] sm:$0xff]  ;;  %vm12554_vm2 = vsmask.f32 7424 }
 0x488   :  { %v5703_v18 = vsel %vm4003_vm12, %v5606_v54, 0.0  ;;  %v5607_v39 = vmul.f32 %v5525_v9, %v12545_v0  ;;  %v12548_v54 = vrot.slane %v10869_v47, 2  ;;  %v3980_v37 = vsel %vm1044_vm5, %v6866_v27, %v10612_v43  ;;  %v6867_v38 = vld [vmem:[#allocation2 + $0x90] sm:$0xff]  ;;  %v6869_v47 = vld [vmem:[#allocation2 + $0xa0] sm:$0xff] }
 0x489   :  { %v3175_v7 = vpop.permute.xlu1 %3174  ;;  %v5704_v14 = vadd.f32 %v5703_v18, %v10775_v51  ;;  %v3956_v51 = vsel %vm1044_vm5, %v6867_v38, %v10817_v10  ;;  %v12550_v0 = vrot.slane %v10771_v48, 1  ;;  %v11002_v43 = vshll.u32 %v10925_v25, 16 }
 0x48a   :  { %v2619_v42 = vpop.permute.xlu0 %2618  ;;  %v10985_v9 = vsel %vm12549_vm6, %v12548_v54, %v3299_v57  ;;  %v5705_v41 = vsel %vm4003_vm12, %v5607_v39, 0.0  ;;  %v11005_v10 = vshrl.u32 %v10925_v25, 16  ;;  %v4294_v39 = vsel %vm4258_vm15, %v4209_v22, %v10789_v45  ;;  %vm12552_vm6 = vmmov %vm12547_vm9 }
 0x48b   :  { %3212 = vrot.lane.b32.xlu1 %v3115_v30, %s6919_s9  ;;  %v3958_v13 = vsel %vm1044_vm5, %v6868_v61, %v2619_v42  ;;  %3734 = vrot.lane.b32.xlu0 %v3629_v5, %s6922_s2  ;;  %v10994_v18 = vadd.f32 %v5705_v41, %v5704_v14  ;;  %v2785_v30 = vsel %vm2706_vm7, %v12550_v0, %v2784_v62  ;;  %v3635_v41 = vrot.slane %v11002_v43, 3 }
 0x48c   :  { %v3825_v14 = vsel %vm3750_vm10, %v3822_v24, %v3824_v53  ;;  %v11014_v5 = vor.u32 %v3631_v50, %v3630_v59  ;;  %v2555_v48 = vor.u32 %v10813_v60, %v2551_v55  ;;  %v4065_v54 = vsel %vm4003_vm12, %v3980_v37, %v10523_v11  ;;  %v11039_v50 = vld [vmem:[#allocation2 + $0x148] sm:$0xff] }
 0x48d   :  { %v3458_v42 = vpop.permute.xlu1 %3457  ;;  %v4379_v27 = vsel %vm4343_vm0, %v4294_v39, %v10800_v15  ;;  %v4041_v45 = vsel %vm4003_vm12, %v3956_v51, %v10753_v12  ;;  %v4043_v22 = vsel %vm4003_vm12, %v3958_v13, %v10897_v58  ;;  %v4150_v24 = vsel %vm4088_vm13, %v4065_v54, %v10700_v4 }
 0x48e   :  { %v3699_v38 = vpop.permute.xlu0 %3698  ;;  %v4126_v60 = vsel %vm4088_vm13, %v4041_v45, %v10863_v20  ;;  %v2559_v15 = vrot.slane %v10881_v40, 1  ;;  %v3116_v55 = vrot.slane %v11005_v10, 1  ;;  %v3117_v59 = vrot.slane %v11002_v43, 2 }
 0x48f   :  { %3471 = vrot.lane.b32.xlu1 %v10985_v9, %s6920_s10  ;;  %v4464_v11 = vsel %vm4428_vm1, %v4379_v27, %v3699_v38  ;;  %2954 = vrot.lane.b32.xlu0 %v2785_v30, %s6918_s30  ;;  %v4211_v12 = vsel %vm4173_vm14, %v4126_v60, %v3175_v7  ;;  %v4128_v37 = vsel %vm4088_vm13, %v4043_v22, %v10912_v28  ;;  %v3634_v51 = vrot.slane %v11005_v10, 2  ;;  %v12551_v38 = vld [vmem:[#allocation92_spill] sm:$0xff] }
 0x490   :  { %v4549_v58 = vsel %vm4513_vm3, %v4464_v11, %v10836_v31  ;;  %v4235_v13 = vsel %vm4173_vm14, %v4150_v24, %v10693_v35  ;;  %v4296_v39 = vsel %vm4258_vm15, %v4211_v12, %v10886_v46  ;;  %v3301_v27 = vrot.slane %v11039_v50, 2 }
 0x491   :  { %v4617_v4 = vsel %vm4598_vm4, %v4549_v58, 1065369472  ;;  %v3177_v20 = vpop.permute.xlu1 %3176  ;;  %v11066_v60 = vor.u32 %v3117_v59, %v3116_v55  ;;  %v4381_v11 = vsel %vm4343_vm0, %v4296_v39, %v10854_v49  ;;  %v3121_v58 = vshrl.u32 %v11039_v50, 16 }
 0x492   :  { %v4788_v7 = vshrl.u32 %v4617_v4, 16  ;;  %v4791_v61 = vshll.u32 %v4617_v4, 16  ;;  %v4213_v31 = vsel %vm4173_vm14, %v4128_v37, %v3177_v20  ;;  %v3368_v0 = vpop.permute.xlu0 %3367  ;;  %v12553_v4 = vld [vmem:[#allocation96_spill] sm:$0xff]  ;;  %v2560_v49 = vsel %vm12554_vm2, %v2555_v48, %v2559_v15 }
 0x493   :  { %3908 = vrot.lane.b32.xlu1 %v3825_v14, %s6921_s12  ;;  %v4298_v28 = vsel %vm4258_vm15, %v4213_v31, %v10947_v16  ;;  %v4320_v54 = vsel %vm4258_vm15, %v4235_v13, %v3368_v0  ;;  %3381 = vrot.lane.b32.xlu0 %v10905_v19, %s6917_s29  ;;  %v3633_v16 = vsel %vm12552_vm6, %v10951_v56, %v11014_v5  ;;  %v3826_v19 = vrot.slane %v11039_v50, 3  ;;  %v11116_v0 = vld [vmem:[#allocation2 + $0x150] sm:$0xff] }
 0x494   :  { %v4790_v45 = vrot.slane %v4788_v7, 6  ;;  %v4793_v22 = vrot.slane %v4791_v61, 7  ;;  %v4383_v35 = vsel %vm4343_vm0, %v4298_v28, %v9032_v52  ;;  %v4405_v14 = vsel %vm4343_vm0, %v4320_v54, %v3458_v42 }
 0x495   :  { %v4468_v46 = vsel %vm4428_vm1, %v4383_v35, %v12551_v38  ;;  %v3895_v24 = vpop.permute.xlu1 %3894  ;;  %v11072_v42 = vor.u32 %v3635_v41, %v3634_v51  ;;  %v4387_v20 = vsel %vm4343_vm0, %v10945_v3, %v12553_v4  ;;  %v3124_v55 = vshll.u32 %v11039_v50, 16  ;;  %v12560_v38 = vld [vmem:[#allocation100_spill] sm:$0xff] }
 0x496   :  { %v3701_v12 = vpop.permute.xlu0 %3700  ;;  %v4794_v52 = vor.u32 %v4793_v22, %v4790_v45  ;;  %vm12556_vm9 = vcmask 1045504   ;;  %vm12557_vm6 = vcmask 596992   ;;  %vm12558_vm2 = vsmask.f32 6400 }
 0x497   :  { %2866 = vrot.lane.b32.xlu1 %v2785_v30, %s6916_s13  ;;  %v4466_v56 = vsel %vm4428_vm1, %v4381_v11, %v3701_v12  ;;  %3736 = vrot.lane.b32.xlu0 %v3633_v16, %s6922_s2  ;;  %v12555_v30 = vld [vmem:[#allocation42_spill] sm:$0xff]  ;;  %v11095_v3 = vsel %vm12556_vm9, %v3299_v57, %v3301_v27  ;;  %v2786_v7 = vrot.slane %v10925_v25, 1  ;;  %vm12559_vm9 = vsmask.f32 5376 }
 0x498   :  { %v4553_v59 = vsel %vm4513_vm3, %v4468_v46, %v12555_v30  ;;  %v4551_v37 = vsel %vm4513_vm3, %v4466_v56, %v10874_v34  ;;  %v4795_v51 = vsel %vm4652_vm8, %v10889_v29, %v4794_v52  ;;  %v3119_v34 = vsel %vm12558_vm2, %v10941_v6, %v11066_v60 }
 0x499   :  { %v4618_v48 = vsel %vm4598_vm4, %v4551_v37, 1065369472  ;;  %v11098_v41 = vpop.permute.xlu1 %2852  ;;  %6668 = vmatmul.mubr.msk.bf16.gmra.mrb[152].mxu1 %vm12557_vm6, %v4795_v51  ;;  %v3827_v29 = vsel %vm3750_vm10, %v3824_v53, %v3826_v19  ;;  %v3637_v13 = vsel %vm12559_vm9, %v11014_v5, %v11072_v42  ;;  %v3123_v6 = vrot.slane %v3121_v58, 1  ;;  %v6870_v51 = vld [vmem:[#allocation2 + $0xb8] sm:$0xff] }
 0x49a   :  { %v4796_v57 = vshrl.u32 %v4618_v48, 16  ;;  %v4799_v61 = vshll.u32 %v4618_v48, 16  ;;  %v3725_v31 = vpop.permute.xlu0 %3724  ;;  %6671 = vmatprep.mubr.msk.bf16.mxu1 %vm12500_vm11, %v12175_v44  ;;  %v4619_v53 = vsel %vm4598_vm4, %v4553_v59, 1065369472  ;;  %v3126_v28 = vrot.slane %v3124_v55, 2  ;;  %v12562_v48 = vld [vmem:[#allocation102_spill] sm:$0xff] }
 0x49b   :  { %3214 = vrot.lane.b32.xlu1 %v3119_v34, %s6919_s9  ;;  %v4490_v39 = vsel %vm4428_vm1, %v4405_v14, %v3725_v31  ;;  %2656 = vrot.lane.b32.xlu0 %v2560_v49, %s6915_s11  ;;  %v3638_v54 = vrot.slane %v3121_v58, 2  ;;  %v3639_v5 = vrot.slane %v3124_v55, 3  ;;  %v4134_v46 = vsel %vm4088_vm13, %v10956_v2, %v12560_v38 }
 0x49c   :  { %v4798_v45 = vrot.slane %v4796_v57, 6  ;;  %v4801_v22 = vrot.slane %v4799_v61, 7  ;;  %v11122_v35 = vsel %vm4513_vm3, %v4490_v39, %v3895_v24  ;;  %v2787_v14 = vsel %vm2706_vm7, %v2784_v62, %v2786_v7  ;;  %v12563_v57 = vld [vmem:[#allocation44_spill] sm:$0xff]  ;;  %v12566_v39 = vld [vmem:[#allocation91_spill] sm:$0xff] }
 0x49d   :  { %v11127_v16 = vpop.permute.xlu1 %3200  ;;  %v11135_v11 = vrot.slane %v11116_v0, 2  ;;  %v11140_v24 = vor.u32 %v10884_v63, %v2559_v15  ;;  %v4804_v58 = vshrl.u32 %v4619_v53, 16  ;;  %v4807_v4 = vshll.u32 %v4619_v53, 16  ;;  %v12561_v15 = vld [vmem:[#allocation99_spill] sm:$0xff] }
 0x49e   :  { %v2621_v12 = vpop.permute.xlu0 %2620  ;;  %v4802_v2 = vor.u32 %v4801_v22, %v4798_v45  ;;  %v2567_v56 = vrot.slane %v11002_v43, 1  ;;  %v11147_v49 = vor.u32 %v3126_v28, %v3123_v6  ;;  %v3828_v40 = vrot.slane %v11116_v0, 3  ;;  %v12567_v22 = vld [vmem:[#allocation101_spill] sm:$0xff] }
 0x49f   :  { %3473 = vrot.lane.b32.xlu1 %v11095_v3, %s6920_s10  ;;  %v3960_v62 = vsel %vm1044_vm5, %v6869_v47, %v2621_v12  ;;  %3738 = vrot.lane.b32.xlu0 %v3637_v13, %s6922_s2  ;;  %v11151_v63 = vrot.slane %v11039_v50, 1  ;;  %v4219_v55 = vsel %vm4173_vm14, %v4134_v46, %v12561_v15  ;;  %v11158_v37 = vor.u32 %v3639_v5, %v3638_v54  ;;  %v12565_v13 = vld [vmem:[#allocation103_spill] sm:$0xff]  ;;  %v12568_v5 = vld [vmem:[#allocation90_spill] sm:$0xff] }
 0x4a0   :  { %v4045_v30 = vsel %vm4003_vm12, %v3960_v62, %v10934_v21  ;;  %v4803_v59 = vsel %vm4652_vm8, %v4794_v52, %v4802_v2  ;;  %v3966_v34 = vsel %vm1044_vm5, %v6870_v51, %v12562_v48  ;;  %vm12564_vm2 = vcmask 1045504   ;;  %v6871_v46 = vld [vmem:[#allocation2 + $0xf8] sm:$0xff]  ;;  %v12570_v12 = vld [vmem:[#allocation98_spill] sm:$0xff] }
 0x4a1   :  { %v4130_v61 = vsel %vm4088_vm13, %v4045_v30, %v12563_v57  ;;  %v11164_v31 = vpop.permute.xlu1 %3459  ;;  %6672 = vmatmul.mubr.msk.bf16.gmra.mrb[156].mxu1 %vm12557_vm6, %v4803_v59  ;;  %v11171_v21 = vsel %vm12564_vm2, %v3301_v27, %v11135_v11  ;;  %v3130_v52 = vshrl.u32 %v11116_v0, 16  ;;  %v4472_v6 = vsel %vm4428_vm1, %v4387_v20, %v12565_v13  ;;  %v12573_v30 = vld [vmem:[#allocation97_spill] sm:$0xff]  ;;  %v12574_v51 = vld [vmem:[#allocation107_spill] sm:$0xff] }
 0x4a2   :  { %v4215_v53 = vsel %vm4173_vm14, %v4130_v61, %v12566_v39  ;;  %v2643_v28 = vpop.permute.xlu0 %2642  ;;  %6675 = vmatprep.mubr.msk.bf16.mxu1 %vm12500_vm11, %v12175_v44  ;;  %v4806_v54 = vrot.slane %v4804_v58, 6  ;;  %v4809_v45 = vrot.slane %v4807_v4, 7  ;;  %v4304_v27 = vsel %vm4258_vm15, %v4219_v55, %v12567_v22  ;;  %v12571_v58 = vld [vmem:[#allocation93_spill] sm:$0xff]  ;;  %v12575_v61 = vld [vmem:[#allocation95_spill] sm:$0xff]  ;;  %v12576_v39 = vld [vmem:[#allocation104_spill] sm:$0xff] }
 0x4a3   :  { %3910 = vrot.lane.b32.xlu1 %v3827_v29, %s6921_s12  ;;  %v4300_v38 = vsel %vm4258_vm15, %v4215_v53, %v12568_v5  ;;  %v3982_v20 = vsel %vm1044_vm5, %v6871_v46, %v2643_v28  ;;  %2956 = vrot.lane.b32.xlu0 %v2787_v14, %s6918_s30  ;;  %vm12569_vm9 = vsmask.f32 6400  ;;  %v4051_v47 = vsel %vm4003_vm12, %v3966_v34, %v12570_v12  ;;  %v12577_v53 = vld [vmem:[#allocation108_spill] sm:$0xff]  ;;  %v12578_v5 = vld [vmem:[#allocation94_spill] sm:$0xff]  ;;  %v12579_v46 = vld [vmem:[#allocation27_spill] sm:$0xff] }
 0x4a4   :  { %v3128_v29 = vsel %vm12569_vm9, %v11066_v60, %v11147_v49  ;;  %v4385_v4 = vsel %vm4343_vm0, %v4300_v38, %v12571_v58  ;;  %v5253_v62 = vpop.f32.mrb[124].mxu1  ;;  %v4067_v15 = vsel %vm4003_vm12, %v3982_v20, %v11098_v41  ;;  %vm12572_vm6 = vsmask.f32 5376 }
 0x4a5   :  { %v3641_v55 = vsel %vm12572_vm6, %v11072_v42, %v11158_v37  ;;  %v4557_v59 = vsel %vm4513_vm3, %v4472_v6, %v12573_v30  ;;  %v4136_v60 = vsel %vm4088_vm13, %v4051_v47, %v12574_v51  ;;  %v5526_v48 = vmax.f32 %v5253_v62, 0.0  ;;  %v11203_v57 = vpop.permute.xlu1 %3896  ;;  %v6641_v34 = vpop.f32.mrb[125].mxu1  ;;  %v12580_v30 = vld [vmem:[#allocation111_spill] sm:$0xff] }
 0x4a6   :  { %v4470_v13 = vsel %vm4428_vm1, %v4385_v4, %v12575_v61  ;;  %v4389_v41 = vsel %vm4343_vm0, %v4304_v27, %v12576_v39  ;;  %v4221_v28 = vsel %vm4173_vm14, %v4136_v60, %v12577_v53  ;;  %v5256_v42 = vpop.f32.mrb[126].mxu1  ;;  %v2943_v22 = vpop.permute.xlu0 %2942  ;;  %v4810_v6 = vor.u32 %v4809_v45, %v4806_v54  ;;  %v12581_v60 = vld [vmem:[#allocation22_spill] sm:$0xff] }
 0x4a7   :  { %2868 = vrot.lane.b32.xlu1 %v2787_v14, %s6916_s13  ;;  %v4555_v38 = vsel %vm4513_vm3, %v4470_v13, %v12578_v5  ;;  %v5608_v20 = vmul.f32 %v5526_v48, %v12579_v46  ;;  %v5527_v12 = vmax.f32 %v5256_v42, 0.0  ;;  %v4152_v47 = vsel %vm4088_vm13, %v4067_v15, %v2943_v22  ;;  %v6642_v58 = vpop.f32.mrb[127].mxu1  ;;  %3383 = vrot.lane.b32.xlu0 %v10985_v9, %s6917_s29  ;;  %v6872_v9 = vld [vmem:[#allocation2 + $0xc0] sm:$0xff]  ;;  %v12583_v61 = vld [vmem:[#allocation110_spill] sm:$0xff] }
 0x4a8   :  { %v4620_v27 = vsel %vm4598_vm4, %v4555_v38, 1065369472  ;;  %v4811_v4 = vsel %vm4652_vm8, %v4802_v2, %v4810_v6  ;;  %v4237_v14 = vsel %vm4173_vm14, %v4152_v47, %v11127_v16  ;;  %v4621_v62 = vsel %vm4598_vm4, %v4557_v59, 1065369472  ;;  %v12587_v58 = vld [vmem:[#allocation106_spill] sm:$0xff] }
 0x4a9   :  { %v4812_v54 = vshrl.u32 %v4620_v27, 16  ;;  %v4815_v45 = vshll.u32 %v4620_v27, 16  ;;  %v4474_v51 = vsel %vm4428_vm1, %v4389_v41, %v12580_v30  ;;  %v5707_v15 = vsel %vm4003_vm12, %v5608_v20, 0.0  ;;  %v2855_v34 = vpop.permute.xlu1 %2854  ;;  %v12584_v41 = vld [vmem:[#allocation109_spill] sm:$0xff] }
 0x4aa   :  { %v5609_v48 = vmul.f32 %v5527_v12, %v12581_v60  ;;  %vm12582_vm2 = vcmask 596992   ;;  %v3968_v2 = vsel %vm1044_vm5, %v6872_v9, %v12583_v61  ;;  %v5708_v16 = vadd.f32 %v5707_v15, %v10994_v18  ;;  %v3370_v13 = vpop.permute.xlu0 %3369  ;;  %v12585_v18 = vld [vmem:[#allocation105_spill] sm:$0xff]  ;;  %v12586_v12 = vld [vmem:[#allocation112_spill] sm:$0xff] }
 0x4ab   :  { %6676 = vmatmul.mubr.msk.bf16.gmra.mrb[160].mxu1 %vm12582_vm2, %v4811_v4  ;;  %3216 = vrot.lane.b32.xlu1 %v3128_v29, %s6919_s9  ;;  %v4814_v59 = vrot.slane %v4812_v54, 6  ;;  %v4817_v39 = vrot.slane %v4815_v45, 7  ;;  %v4306_v53 = vsel %vm4258_vm15, %v4221_v28, %v12584_v41  ;;  %v4322_v22 = vsel %vm4258_vm15, %v4237_v14, %v3370_v13  ;;  %v12589_v54 = vld [vmem:[#allocation115_spill] sm:$0xff]  ;;  %vm12593_vm6 = vmmov %vm12582_vm2 }
 0x4ac   :  { %6679 = vmatprep.mubr.msk.bf16.mxu1 %vm12500_vm11, %v12175_v44  ;;  %v5709_v42 = vsel %vm4003_vm12, %v5609_v48, 0.0  ;;  %3740 = vrot.lane.b32.xlu0 %v3641_v55, %s6922_s2  ;;  %v3133_v5 = vshll.u32 %v11116_v0, 16  ;;  %v4559_v38 = vsel %vm4513_vm3, %v4474_v51, %v12585_v18  ;;  %v11248_v20 = vsel %vm4343_vm0, %v4322_v22, %v11164_v31  ;;  %v12590_v31 = vld [vmem:[#allocation119_spill] sm:$0xff]  ;;  %v6873_v48 = vld [vmem:[#allocation2 + $0x100] sm:$0xff] }
 0x4ad   :  { %v11242_v29 = vadd.f32 %v5709_v42, %v5708_v16  ;;  %v11244_v46 = vor.u32 %v4817_v39, %v4814_v59  ;;  %v4820_v28 = vshrl.u32 %v4621_v62, 16  ;;  %v4391_v47 = vsel %vm4343_vm0, %v4306_v53, %v12586_v12  ;;  %v11254_v27 = vpop.permute.xlu1 %2856  ;;  %v11285_v13 = vld [vmem:[#allocation2 + $0x158] sm:$0xff]  ;;  %v12592_v39 = vld [vmem:[#allocation113_spill] sm:$0xff] }
 0x4ae   :  { %v4053_v55 = vsel %vm4003_vm12, %v3968_v2, %v12587_v58  ;;  %vm12588_vm9 = vsmask.f32 7424  ;;  %v4823_v14 = vshll.u32 %v4621_v62, 16  ;;  %v4476_v30 = vsel %vm4428_vm1, %v4391_v47, %v12590_v31  ;;  %v2645_v51 = vpop.permute.xlu0 %2644  ;;  %v12594_v22 = vld [vmem:[#allocation117_spill] sm:$0xff]  ;;  %v12595_v12 = vld [vmem:[#allocation120_spill] sm:$0xff] }
 0x4af   :  { %v2568_v4 = vsel %vm12588_vm9, %v11140_v24, %v2567_v56  ;;  %v4138_v45 = vsel %vm4088_vm13, %v4053_v55, %v12589_v54  ;;  %3475 = vrot.lane.b32.xlu1 %v11171_v21, %s6920_s10  ;;  %v3829_v15 = vsel %vm3750_vm10, %v3826_v19, %v3828_v40  ;;  %v4622_v60 = vsel %vm4598_vm4, %v4559_v38, 1065369472  ;;  %v12591_v24 = vld [vmem:[#allocation116_spill] sm:$0xff]  ;;  %v6874_v55 = vld [vmem:[#allocation2 + $0xc8] sm:$0xff] }
 0x4b0   :  { %v4223_v62 = vsel %vm4173_vm14, %v4138_v45, %v12591_v24  ;;  %v3984_v9 = vsel %vm1044_vm5, %v6873_v48, %v2645_v51  ;;  %2658 = vrot.lane.b32.xlu0 %v2568_v4, %s6915_s11  ;;  %v2789_v61 = vsel %vm2706_vm7, %v2786_v7, %v11151_v63  ;;  %v4819_v50 = vsel %vm4652_vm8, %v4810_v6, %v11244_v46  ;;  %v12596_v4 = vld [vmem:[#allocation118_spill] sm:$0xff] }
 0x4b1   :  { %v4069_v19 = vsel %vm4003_vm12, %v3984_v9, %v2855_v34  ;;  %v3132_v2 = vrot.slane %v3130_v52, 1  ;;  %v3135_v16 = vrot.slane %v3133_v5, 2  ;;  %v4822_v59 = vrot.slane %v4820_v28, 6  ;;  %v3203_v53 = vpop.permute.xlu1 %3202  ;;  %v11297_v28 = vld [vmem:[#allocation2 + $0x148] sm:$0x7f] }
 0x4b2   :  { %v4561_v41 = vsel %vm4513_vm3, %v4476_v30, %v12592_v39  ;;  %v3642_v25 = vrot.slane %v3130_v52, 2  ;;  %v3643_v7 = vrot.slane %v3133_v5, 3  ;;  %v4825_v6 = vrot.slane %v4823_v14, 7  ;;  %v2945_v38 = vpop.permute.xlu0 %2944  ;;  %v12597_v9 = vld [vmem:[#allocation114_spill] sm:$0xff] }
 0x4b3   :  { %6680 = vmatmul.mubr.msk.bf16.gmra.mrb[164].mxu1 %vm12593_vm6, %v4819_v50  ;;  %v4828_v42 = vshrl.u32 %v4622_v60, 16  ;;  %v4831_v34 = vshll.u32 %v4622_v60, 16  ;;  %v4308_v18 = vsel %vm4258_vm15, %v4223_v62, %v12594_v22  ;;  %3912 = vrot.lane.b32.xlu1 %v3829_v15, %s6921_s12  ;;  %v4154_v52 = vsel %vm4088_vm13, %v4069_v19, %v2945_v38  ;;  %v12598_v19 = vld [vmem:[#allocation121_spill] sm:$0xff] }
 0x4b4   :  { %6683 = vmatprep.mubr.msk.bf16.mxu1 %vm12500_vm11, %v12175_v44  ;;  %v4393_v47 = vsel %vm4343_vm0, %v4308_v18, %v12595_v12  ;;  %2958 = vrot.lane.b32.xlu0 %v2789_v61, %s6918_s30  ;;  %v3393_v5 = vrot.slane %v11285_v13, 2  ;;  %v2571_v58 = vor.u32 %v11005_v10, %v2567_v56  ;;  %v3970_v14 = vsel %vm1044_vm5, %v6874_v55, %v12596_v4  ;;  %v6875_v38 = vld [vmem:[#allocation2 + $0x108] sm:$0xff] }
 0x4b5   :  { %v4623_v54 = vsel %vm4598_vm4, %v4561_v41, 1065369472  ;;  %v4478_v45 = vsel %vm4428_vm1, %v4393_v47, %v9993_v36  ;;  %v4239_v31 = vsel %vm4173_vm14, %v4154_v52, %v3203_v53  ;;  %v3462_v30 = vpop.permute.xlu1 %3461  ;;  %v11313_v51 = vor.u32 %v3135_v16, %v3132_v2  ;;  %v12599_v53 = vld [vmem:[#allocation11_spill] sm:$0xff] }
 0x4b6   :  { %v11315_v15 = vor.u32 %v3643_v7, %v3642_v25  ;;  %v2573_v43 = vshll.u32 %v11297_v28, 16  ;;  %v3647_v10 = vshrl.u32 %v11285_v13, 16  ;;  %v4830_v56 = vrot.slane %v4828_v42, 6  ;;  %v3372_v24 = vpop.permute.xlu0 %3371 }
 0x4b7   :  { %v4833_v60 = vrot.slane %v4831_v34, 7  ;;  %2870 = vrot.lane.b32.xlu1 %v2789_v61, %s6916_s13  ;;  %v4826_v62 = vor.u32 %v4825_v6, %v4822_v59  ;;  %v3650_v48 = vshll.u32 %v11285_v13, 16  ;;  %v4836_v36 = vshrl.u32 %v4623_v54, 16 }
 0x4b8   :  { %v4055_v50 = vsel %vm4003_vm12, %v3970_v14, %v12597_v9  ;;  %v4563_v2 = vsel %vm4513_vm3, %v4478_v45, %v12598_v19  ;;  %v4324_v16 = vsel %vm4258_vm15, %v4239_v31, %v3372_v24  ;;  %3385 = vrot.lane.b32.xlu0 %v11095_v3, %s6917_s29  ;;  %v4839_v39 = vshll.u32 %v4623_v54, 16  ;;  %v12602_v14 = vld [vmem:[#allocation122_spill] sm:$0xff] }
 0x4b9   :  { %v4140_v41 = vsel %vm4088_vm13, %v4055_v50, %v9915_v8  ;;  %v4827_v61 = vsel %vm4652_vm8, %v11244_v46, %v4826_v62  ;;  %v11333_v59 = vsel %vm4343_vm0, %v4324_v16, %v3462_v30  ;;  %v11337_v7 = vpop.permute.xlu1 %3898  ;;  %vm12600_vm9 = vsmask.f32 6400  ;;  %v12603_v30 = vld [vmem:[#allocation7_spill] sm:$0xff] }
 0x4ba   :  { %v4225_v25 = vsel %vm4173_vm14, %v4140_v41, %v12599_v53  ;;  %v3137_v3 = vsel %vm12600_vm9, %v11147_v49, %v11313_v51  ;;  %v3830_v6 = vrot.slane %v11285_v13, 3  ;;  %v2878_v8 = vrot.slane %v11116_v0, 1  ;;  %v2647_v42 = vpop.permute.xlu0 %2646  ;;  %v6876_v16 = vld [vmem:[#allocation2 + $0xd0] sm:$0xff] }
 0x4bb   :  { %6684 = vmatmul.mubr.msk.bf16.gmra.mrb[168].mxu1 %vm12582_vm2, %v4827_v61  ;;  %v4624_v46 = vsel %vm4598_vm4, %v4563_v2, 1065369472  ;;  %3218 = vrot.lane.b32.xlu1 %v3137_v3, %s6919_s9  ;;  %vm12601_vm6 = vsmask.f32 5376  ;;  %v11350_v22 = vrot.slane %v2573_v43, 1  ;;  %v3649_v18 = vrot.slane %v3647_v10, 2 }
 0x4bc   :  { %v3645_v34 = vsel %vm12601_vm6, %v11158_v37, %v11315_v15  ;;  %6687 = vmatprep.mubr.msk.bf16.mxu1 %vm12500_vm11, %v12175_v44  ;;  %v4630_v49 = vsel %vm4598_vm4, %v11122_v35, 1065369472  ;;  %v3986_v12 = vsel %vm1044_vm5, %v6875_v38, %v2647_v42  ;;  %v4834_v47 = vor.u32 %v4833_v60, %v4830_v56  ;;  %v12605_v56 = vld [vmem:[#allocation10_spill] sm:$0xff] }
 0x4bd   :  { %3742 = vrot.lane.b32.xlu0 %v3645_v34, %s6922_s2  ;;  %v3652_v52 = vrot.slane %v3650_v48, 3  ;;  %v4838_v55 = vrot.slane %v4836_v36, 6  ;;  %v4841_v4 = vrot.slane %v4839_v39, 7  ;;  %v4310_v37 = vsel %vm4258_vm15, %v4225_v25, %v12602_v14  ;;  %v11364_v43 = vpop.permute.xlu1 %2858  ;;  %v12608_v25 = vld [vmem:[#allocation123_spill] sm:$0xff]  ;;  %v12611_v14 = vld [vmem:[#allocation8_spill] sm:$0xff] }
 0x4be   :  { %v4071_v54 = vsel %vm4003_vm12, %v3986_v12, %v11254_v27  ;;  %v4844_v45 = vshrl.u32 %v4624_v46, 16  ;;  %v4847_v31 = vshll.u32 %v4624_v46, 16  ;;  %v4395_v35 = vsel %vm4343_vm0, %v4310_v37, %v12603_v30  ;;  %v3727_v36 = vpop.permute.xlu0 %3726 }
 0x4bf   :  { %vm12604_vm2 = vcmask 1045504   ;;  %v4480_v60 = vsel %vm4428_vm1, %v4395_v35, %v12605_v56  ;;  %v4892_v24 = vshrl.u32 %v4630_v49, 16  ;;  %v4895_v48 = vshll.u32 %v4630_v49, 16  ;;  %v12612_v56 = vld [vmem:[#allocation124_spill] sm:$0xff] }
 0x4c0   :  { %v3394_v10 = vsel %vm12604_vm2, %v11135_v11, %v3393_v5  ;;  %vm12606_vm9 = vsmask.f32 7424  ;;  %v4492_v9 = vsel %vm4428_vm1, %v11248_v20, %v3727_v36  ;;  %v3831_v50 = vsel %vm3750_vm10, %v3828_v40, %v3830_v6 }
 0x4c1   :  { %3477 = vrot.lane.b32.xlu1 %v3394_v10, %s6920_s10  ;;  %v2576_v27 = vsel %vm12606_vm9, %v2571_v58, %v11350_v22  ;;  %v2879_v19 = vsel %vm2706_vm7, %v11151_v63, %v2878_v8  ;;  %v11387_v2 = vor.u32 %v3652_v52, %v3649_v18  ;;  %v12607_v58 = vld [vmem:[#allocation6_spill] sm:$0xff]  ;;  %v4577_v20 = vsel %vm4513_vm3, %v4492_v9, %v11203_v57  ;;  %v3205_v42 = vpop.permute.xlu1 %3204  ;;  %v12610_v57 = vld [vmem:[#allocation9_spill] sm:$0xff]  ;;  %v11414_v10 = vld [vmem:[#allocation2 + $0x160] sm:$0x1] }
 0x4c2   :  { %2660 = vrot.lane.b32.xlu0 %v2576_v27, %s6915_s11  ;;  %v3972_v39 = vsel %vm1044_vm5, %v6876_v16, %v12607_v58  ;;  %v4835_v41 = vsel %vm4652_vm8, %v4826_v62, %v4834_v47  ;;  %v11394_v61 = vor.u32 %v4841_v4, %v4838_v55  ;;  %v4846_v53 = vrot.slane %v4844_v45, 6  ;;  %v2947_v12 = vpop.permute.xlu0 %2946 }
 0x4c3   :  { %v4849_v40 = vrot.slane %v4847_v31, 7  ;;  %v4565_v3 = vsel %vm4513_vm3, %v4480_v60, %v12608_v25  ;;  %v4631_v46 = vsel %vm4598_vm4, %v4577_v20, 1065369472  ;;  %vm12609_vm7 = vcmask 596992   ;;  %v6877_v60 = vld [vmem:[#allocation2 + $0xd8] sm:$0xff] }
 0x4c4   :  { %6688 = vmatmul.mubr.msk.bf16.gmra.mrb[172].mxu1 %vm12609_vm7, %v4835_v41  ;;  %v4894_v34 = vrot.slane %v4892_v24, 6  ;;  %v4897_v18 = vrot.slane %v4895_v48, 7  ;;  %v4900_v49 = vshrl.u32 %v4631_v46, 16  ;;  %v4903_v38 = vshll.u32 %v4631_v46, 16  ;;  %v5261_v30 = vpop.f32.mrb[128].mxu1  ;;  %v12613_v24 = vld [vmem:[#allocation15_spill] sm:$0xff]  ;;  %vm12620_vm2 = vmmov %vm12609_vm7 }
 0x4c5   :  { %3914 = vrot.lane.b32.xlu1 %v3831_v50, %s6921_s12  ;;  %6691 = vmatprep.mubr.msk.bf16.mxu1 %vm12500_vm11, %v12175_v44  ;;  %v4057_v62 = vsel %vm4003_vm12, %v3972_v39, %v12610_v57  ;;  %v4156_v52 = vsel %vm4088_vm13, %v4071_v54, %v2947_v12  ;;  %v3654_v55 = vsel %vm12601_vm6, %v11315_v15, %v11387_v2  ;;  %v2577_v4 = vshrl.u32 %v11297_v28, 16  ;;  %v11421_v27 = vpop.permute.xlu1 %3463  ;;  %v6645_v9 = vpop.f32.mrb[129].mxu1  ;;  %v12614_v41 = vld [vmem:[#allocation29_spill] sm:$0xff]  ;;  %v12617_v12 = vld [vmem:[#allocation126_spill] sm:$0xff]  ;;  %vm12623_vm7 = vmmov %vm12620_vm2 }
 0x4c6   :  { %2960 = vrot.lane.b32.xlu0 %v2879_v19, %s6918_s30  ;;  %v4142_v37 = vsel %vm4088_vm13, %v4057_v62, %v12611_v14  ;;  %v4902_v45 = vrot.slane %v4900_v49, 6  ;;  %v4905_v31 = vrot.slane %v4903_v38, 7  ;;  %v4241_v35 = vsel %vm4173_vm14, %v4156_v52, %v3205_v42  ;;  %v5264_v50 = vpop.f32.mrb[130].mxu1  ;;  %v3374_v19 = vpop.permute.xlu0 %3373  ;;  %v12615_v49 = vld [vmem:[#allocation125_spill] sm:$0xff]  ;;  %v12619_v14 = vld [vmem:[#allocation24_spill] sm:$0xff]  ;;  %v12622_v9 = vld [vmem:[#allocation127_spill] sm:$0xff] }
 0x4c7   :  { %v4227_v54 = vsel %vm4173_vm14, %v4142_v37, %v12612_v56  ;;  %v3974_v48 = vsel %vm1044_vm5, %v6877_v60, %v12613_v24  ;;  %v4625_v15 = vsel %vm4598_vm4, %v4565_v3, 1065369472  ;;  %v5528_v36 = vmax.f32 %v5261_v30, 0.0  ;;  %v6646_v42 = vpop.f32.mrb[131].mxu1  ;;  %v12618_v62 = vld [vmem:[#allocation129_spill] sm:$0xff]  ;;  %v6878_v24 = vld [vmem:[#allocation2 + $0x110] sm:$0xff] }
 0x4c8   :  { %v4843_v16 = vsel %vm4652_vm8, %v4834_v47, %v11394_v61  ;;  %v11427_v58 = vor.u32 %v4849_v40, %v4846_v53  ;;  %v11429_v39 = vor.u32 %v4897_v18, %v4894_v34  ;;  %v11431_v20 = vor.u32 %v4905_v31, %v4902_v45  ;;  %v12616_v40 = vld [vmem:[#allocation13_spill] sm:$0xff]  ;;  %v2243_v18 = vld [vmem:[#allocation2 + $0x160] sm:$0x3] }
 0x4c9   :  { %2872 = vrot.lane.b32.xlu1 %v11151_v63, %s6916_s13  ;;  %v5610_v25 = vmul.f32 %v5528_v36, %v12614_v41  ;;  %v5529_v3 = vmax.f32 %v5264_v50, 0.0  ;;  %v11435_v46 = vsel %vm4258_vm15, %v4241_v35, %v3374_v19  ;;  %v3395_v63 = vrot.slane %v11414_v10, 2  ;;  %v11455_v45 = vpop.permute.xlu1 %3900 }
 0x4ca   :  { %3387 = vrot.lane.b32.xlu0 %v11171_v21, %s6917_s29  ;;  %v4312_v47 = vsel %vm4258_vm15, %v4227_v54, %v12615_v49  ;;  %v4852_v53 = vshrl.u32 %v4625_v15, 16  ;;  %v4059_v34 = vsel %vm4003_vm12, %v3974_v48, %v12616_v40  ;;  %v11447_v38 = vsel %vm4652_vm8, %v11429_v39, %v11431_v20  ;;  %v2649_v54 = vpop.permute.xlu0 %2648 }
 0x4cb   :  { %v4397_v57 = vsel %vm4343_vm0, %v4312_v47, %v12617_v12  ;;  %v4144_v21 = vsel %vm4088_vm13, %v4059_v34, %v12618_v62  ;;  %v5711_v52 = vsel %vm4003_vm12, %v5610_v25, 0.0  ;;  %v5611_v37 = vmul.f32 %v5529_v3, %v12619_v14  ;;  %v12625_v14 = vld [vmem:[#allocation130_spill] sm:$0xff] }
 0x4cc   :  { %6692 = vmatmul.mubr.msk.bf16.gmra.mrb[176].mxu1 %vm12620_vm2, %v4843_v16  ;;  %v4855_v31 = vshll.u32 %v4625_v15, 16  ;;  %v4229_v30 = vsel %vm4173_vm14, %v4144_v21, %v10267_v26  ;;  %v4482_v35 = vsel %vm4428_vm1, %v4397_v57, %v10324_v17  ;;  %v5712_v56 = vadd.f32 %v5711_v52, %v11242_v29 }
 0x4cd   :  { %3220 = vrot.lane.b32.xlu1 %v11313_v51, %s6919_s9  ;;  %6695 = vmatprep.mubr.msk.bf16.mxu1 %vm12500_vm11, %v12175_v44  ;;  %v5713_v60 = vsel %vm4003_vm12, %v5611_v37, 0.0  ;;  %v3988_v48 = vsel %vm1044_vm5, %v6878_v24, %v2649_v54  ;;  %vm12621_vm9 = vcmask 1045504   ;;  %v3832_v17 = vrot.slane %v2243_v18, 3  ;;  %v11481_v19 = vpop.permute.xlu1 %2860 }
 0x4ce   :  { %3744 = vrot.lane.b32.xlu0 %v3654_v55, %s6922_s2  ;;  %v3396_v26 = vsel %vm12621_vm9, %v3393_v5, %v3395_v63  ;;  %v11473_v29 = vadd.f32 %v5713_v60, %v5712_v56  ;;  %v4073_v51 = vsel %vm4003_vm12, %v3988_v48, %v11364_v43  ;;  %v3656_v15 = vshrl.u32 %v11414_v10, 16  ;;  %v3729_v5 = vpop.permute.xlu0 %3728  ;;  %v12627_v56 = vld [vmem:[#allocation131_spill] sm:$0xff] }
 0x4cf   :  { %v3659_v36 = vshll.u32 %v11414_v10, 16  ;;  %v4567_v50 = vsel %vm4513_vm3, %v4482_v35, %v12622_v9  ;;  %v2579_v55 = vor.u32 %v2577_v4, %v11350_v22  ;;  %v4854_v16 = vrot.slane %v4852_v53, 6  ;;  %v6879_v10 = vld [vmem:[#allocation2 + $0xe0] sm:$0xff]  ;;  %v2239_v22 = vld [vmem:[#allocation2 + $0x158] sm:$0x1]  ;;  %v6880_v9 = vld [vmem:[#allocation2 + $0xe8] sm:$0xff] }
 0x4d0   :  { %v4857_v41 = vrot.slane %v4855_v31, 7  ;;  %v4851_v25 = vsel %vm4652_vm8, %v11394_v61, %v11427_v58  ;;  %v4314_v43 = vsel %vm4258_vm15, %v4229_v30, %v10274_v23  ;;  %v3976_v3 = vsel %vm1044_vm5, %v6879_v10, %v10316_v32  ;;  %v12626_v31 = vld [vmem:[#allocation17_spill] sm:$0xff]  ;;  %v12633_v10 = vld [vmem:[#allocation12_spill] sm:$0xff] }
 0x4d1   :  { %3479 = vrot.lane.b32.xlu1 %v3396_v26, %s6920_s10  ;;  %v4494_v42 = vsel %vm4428_vm1, %v11333_v59, %v3729_v5  ;;  %v3833_v4 = vsel %vm3750_vm10, %v3830_v6, %v3832_v17  ;;  %v4626_v61 = vsel %vm4598_vm4, %v4567_v50, 1065369472  ;;  %v3658_v23 = vrot.slane %v3656_v15, 2  ;;  %v11504_v59 = vpop.permute.xlu1 %3206  ;;  %vm12628_vm10 = vmmov %vm12621_vm9  ;;  %v12630_v50 = vld [vmem:[#allocation14_spill] sm:$0xff] }
 0x4d2   :  { %2662 = vrot.lane.b32.xlu0 %v2579_v55, %s6915_s11  ;;  %v4579_v63 = vsel %vm4513_vm3, %v4494_v42, %v11337_v7  ;;  %v3661_v49 = vrot.slane %v3659_v36, 3  ;;  %v4399_v32 = vsel %vm4343_vm0, %v4314_v43, %v10336_v33  ;;  %v2949_v40 = vpop.permute.xlu0 %2948  ;;  %v3305_v34 = vrot.slane %v2239_v22, 2  ;;  %v12624_v33 = vld [vmem:[#allocation128_spill] sm:$0xff]  ;;  %v12634_v22 = vld [vmem:[#allocation21_spill] sm:$0xff]  ;;  %vm12638_vm9 = vmmov %vm12620_vm2 }
 0x4d3   :  { %v4632_v47 = vsel %vm4598_vm4, %v4579_v63, 1065369472  ;;  %v4484_v13 = vsel %vm4428_vm1, %v4399_v32, %v10477_v1  ;;  %v4860_v7 = vshrl.u32 %v4626_v61, 16  ;;  %v4061_v18 = vsel %vm4003_vm12, %v3976_v3, %v12624_v33  ;;  %v12635_v63 = vld [vmem:[#allocation16_spill] sm:$0xff]  ;;  %v12637_v33 = vld [vmem:[#allocation134_spill] sm:$0xff] }
 0x4d4   :  { %6696 = vmatmul.mubr.msk.bf16.gmra.mrb[180].mxu1 %vm12623_vm7, %v4851_v25  ;;  %v4908_v6 = vshrl.u32 %v4632_v47, 16  ;;  %v4911_v53 = vshll.u32 %v4632_v47, 16  ;;  %v11515_v12 = vsel %vm4088_vm13, %v4073_v51, %v2949_v40  ;;  %v4858_v1 = vor.u32 %v4857_v41, %v4854_v16  ;;  %v12632_v25 = vld [vmem:[#allocation135_spill] sm:$0xff]  ;;  %vm12644_vm7 = vmmov %vm12620_vm2 }
 0x4d5   :  { %6699 = vmatprep.mubr.msk.bf16.mxu1 %vm12500_vm11, %v12175_v44  ;;  %3916 = vrot.lane.b32.xlu1 %v3833_v4, %s6921_s12  ;;  %v4863_v57 = vshll.u32 %v4626_v61, 16  ;;  %v3662_v52 = vor.u32 %v3661_v49, %v3658_v23  ;;  %v4146_v37 = vsel %vm4088_vm13, %v4061_v18, %v12625_v14  ;;  %v4569_v30 = vsel %vm4513_vm3, %v4484_v13, %v12626_v31  ;;  %v11524_v35 = vpop.permute.xlu1 %3465  ;;  %v12636_v49 = vld [vmem:[#allocation133_spill] sm:$0xff] }
 0x4d6   :  { %2962 = vrot.lane.b32.xlu0 %v2878_v8, %s6918_s30  ;;  %v4910_v62 = vrot.slane %v4908_v6, 6  ;;  %v4913_v21 = vrot.slane %v4911_v53, 7  ;;  %v4231_v54 = vsel %vm4173_vm14, %v4146_v37, %v12627_v56  ;;  %v11528_v60 = vpop.permute.xlu0 %3375  ;;  %v3306_v0 = vsel %vm12628_vm10, %v11135_v11, %v3305_v34  ;;  %v12629_v11 = vld [vmem:[#allocation19_spill] sm:$0xff]  ;;  %vm12645_vm10 = vmmov %vm12620_vm2 }
 0x4d7   :  { %v4862_v24 = vrot.slane %v4860_v7, 6  ;;  %v4859_v48 = vsel %vm4652_vm8, %v11427_v58, %v4858_v1  ;;  %v4865_v26 = vrot.slane %v4863_v57, 7  ;;  %v4627_v17 = vsel %vm4598_vm4, %v4569_v30, 1065369472  ;;  %v12631_v58 = vld [vmem:[#allocation132_spill] sm:$0xff] }
 0x4d8   :  { %v11532_v8 = vor.u32 %v4913_v21, %v4910_v62  ;;  %v3663_v51 = vsel %vm12601_vm6, %v11387_v2, %v3662_v52  ;;  %v4316_v36 = vsel %vm4258_vm15, %v4231_v54, %v12629_v11  ;;  %v3978_v55 = vsel %vm1044_vm5, %v6880_v9, %v12630_v50  ;;  %vm12646_vm6 = vmmov %vm12620_vm2 }
 0x4d9   :  { %v11549_v16 = vpop.permute.xlu1 %3902  ;;  %v4401_v41 = vsel %vm4343_vm0, %v4316_v36, %v12631_v58  ;;  %v4871_v5 = vshll.u32 %v4627_v17, 16  ;;  %v4063_v3 = vsel %vm4003_vm12, %v3978_v55, %v12633_v10  ;;  %v4866_v42 = vor.u32 %v4865_v26, %v4862_v24  ;;  %v12642_v55 = vld [vmem:[#allocation31_spill] sm:$0xff] }
 0x4da   :  { %3389 = vrot.lane.b32.xlu0 %v3306_v0, %s6917_s29  ;;  %v11543_v15 = vsel %vm4652_vm8, %v11431_v20, %v11532_v8  ;;  %v11554_v2 = vpop.permute.xlu0 %2650  ;;  %v4868_v20 = vshrl.u32 %v4627_v17, 16  ;;  %v4486_v43 = vsel %vm4428_vm1, %v4401_v41, %v12632_v25  ;;  %v4148_v4 = vsel %vm4088_vm13, %v4063_v3, %v12634_v22 }
 0x4db   :  { %v4233_v23 = vsel %vm4173_vm14, %v4148_v4, %v12635_v63  ;;  %v4571_v32 = vsel %vm4513_vm3, %v4486_v43, %v12636_v49  ;;  %v4411_v47 = vsel %vm4343_vm0, %v11435_v46, %v11421_v27  ;;  %v4873_v53 = vrot.slane %v4871_v5, 7  ;;  %v12639_v27 = vld [vmem:[#allocation136_spill] sm:$0xff]  ;;  %v12643_v4 = vld [vmem:[#allocation26_spill] sm:$0xff] }
 0x4dc   :  { %6700 = vmatmul.mubr.msk.bf16.gmra.mrb[184].mxu1 %vm12620_vm2, %v4859_v48  ;;  %v4870_v6 = vrot.slane %v4868_v20, 6  ;;  %v4867_v7 = vsel %vm4652_vm8, %v4858_v1, %v4866_v42  ;;  %v4318_v18 = vsel %vm4258_vm15, %v4233_v23, %v12637_v33  ;;  %v4628_v57 = vsel %vm4598_vm4, %v4571_v32, 1065369472 }
 0x4dd   :  { %6703 = vmatprep.mubr.msk.bf16.mxu1 %vm12500_vm11, %v12175_v44  ;;  %v11565_v61 = vpop.permute.xlu1 %2862  ;;  %v4403_v46 = vsel %vm4343_vm0, %v4318_v18, %v12639_v27  ;;  %v4876_v30 = vshrl.u32 %v4628_v57, 16  ;;  %v4879_v56 = vshll.u32 %v4628_v57, 16  ;;  %v4243_v49 = vsel %vm4173_vm14, %v11515_v12, %v11504_v59 }
 0x4de   :  { %3746 = vrot.lane.b32.xlu0 %v3663_v51, %s6922_s2  ;;  %v3731_v13 = vpop.permute.xlu0 %3730  ;;  %v4874_v31 = vor.u32 %v4873_v53, %v4870_v6  ;;  %v12641_v51 = vld [vmem:[#allocation137_spill] sm:$0xff] }
 0x4df   :  { %v4496_v40 = vsel %vm4428_vm1, %v4411_v47, %v3731_v13  ;;  %v4878_v5 = vrot.slane %v4876_v30, 6  ;;  %v4881_v25 = vrot.slane %v4879_v56, 7 }
 0x4e0   :  { %v4581_v34 = vsel %vm4513_vm3, %v4496_v40, %v11455_v45  ;;  %v12640_v45 = vld [vmem:[#allocation138_spill] sm:$0xff]  ;;  %v4875_v43 = vsel %vm4652_vm8, %v4866_v42, %v4874_v31 }
 0x4e1   :  { %v4633_v62 = vsel %vm4598_vm4, %v4581_v34, 1065369472  ;;  %v11582_v21 = vpop.permute.xlu1 %3208  ;;  %v4488_v1 = vsel %vm4428_vm1, %v4403_v46, %v12640_v45  ;;  %v4882_v40 = vor.u32 %v4881_v25, %v4878_v5 }
 0x4e2   :  { %v4916_v52 = vshrl.u32 %v4633_v62, 16  ;;  %v4919_v14 = vshll.u32 %v4633_v62, 16  ;;  %v11587_v37 = vpop.permute.xlu0 %2950  ;;  %v4573_v11 = vsel %vm4513_vm3, %v4488_v1, %v12641_v51 }
 0x4e3   :  { %v4629_v3 = vsel %vm4598_vm4, %v4573_v11, 1065369472  ;;  %v4883_v18 = vsel %vm4652_vm8, %v4874_v31, %v4882_v40 }
 0x4e4   :  { %6704 = vmatmul.mubr.msk.bf16.gmra.mrb[188].mxu1 %vm12638_vm9, %v4867_v7  ;;  %v4918_v54 = vrot.slane %v4916_v52, 6  ;;  %v4921_v0 = vrot.slane %v4919_v14, 7  ;;  %v5269_v24 = vpop.f32.mrb[132].mxu1  ;;  %v4884_v13 = vshrl.u32 %v4629_v3, 16  ;;  %v4887_v6 = vshll.u32 %v4629_v3, 16  ;;  %vm12649_vm9 = vmmov %vm12620_vm2 }
 0x4e5   :  { %6707 = vmatprep.mubr.msk.bf16.mxu1 %vm12500_vm11, %v12175_v44  ;;  %v5530_v48 = vmax.f32 %v5269_v24, 0.0  ;;  %v11593_v26 = vpop.permute.xlu1 %3467  ;;  %v6649_v17 = vpop.f32.mrb[133].mxu1 }
 0x4e6   :  { %v5272_v36 = vpop.f32.mrb[134].mxu1  ;;  %v3378_v9 = vpop.permute.xlu0 %3377  ;;  %v4922_v50 = vor.u32 %v4921_v0, %v4918_v54  ;;  %v4886_v7 = vrot.slane %v4884_v13, 6  ;;  %v4889_v33 = vrot.slane %v4887_v6, 7 }
 0x4e7   :  { %v5612_v58 = vmul.f32 %v5530_v48, %v12642_v55  ;;  %v5531_v41 = vmax.f32 %v5272_v36, 0.0  ;;  %v6650_v20 = vpop.f32.mrb[135].mxu1 }
 0x4e8   :  { %v11601_v10 = vsel %vm4652_vm8, %v11532_v8, %v4922_v50  ;;  %v4328_v8 = vsel %vm4258_vm15, %v4243_v49, %v11528_v60  ;;  %v4890_v1 = vor.u32 %v4889_v33, %v4886_v7  ;;  %v12647_v49 = vld [vmem:[#allocation33_spill] sm:$0xff] }
 0x4e9   :  { %v5715_v22 = vsel %vm4003_vm12, %v5612_v58, 0.0  ;;  %v5613_v63 = vmul.f32 %v5531_v41, %v12643_v4  ;;  %v3905_v23 = vpop.permute.xlu1 %3904 }
 0x4ea   :  { %v5716_v32 = vadd.f32 %v5715_v22, %v11473_v29  ;;  %v11611_v42 = vpop.permute.xlu0 %2652  ;;  %v4413_v29 = vsel %vm4343_vm0, %v4328_v8, %v11524_v35  ;;  %v6881_v35 = vld [vmem:[#allocation2 + $0x118] sm:$0xff]  ;;  %v4891_v24 = vsel %vm4652_vm8, %v4882_v40, %v4890_v1  ;;  %v4899_v58 = vsel %vm4652_vm8, %v4890_v1, %v11429_v39 }
 0x4eb   :  { %v5717_v47 = vsel %vm4003_vm12, %v5613_v63, 0.0  ;;  %v3990_v14 = vsel %vm1044_vm5, %v6881_v35, %v11554_v2  ;;  %v12648_v40 = vld [vmem:[#allocation28_spill] sm:$0xff] }
 0x4ec   :  { %6708 = vmatmul.mubr.msk.bf16.gmra.mrb[192].mxu1 %vm12644_vm7, %v4875_v43  ;;  %v11618_v53 = vadd.f32 %v5717_v47, %v5716_v32  ;;  %v4075_v30 = vsel %vm4003_vm12, %v3990_v14, %v11481_v19  ;;  %vm12650_vm7 = vmmov %vm12620_vm2 }
 0x4ed   :  { %6711 = vmatprep.mubr.msk.bf16.mxu1 %vm12500_vm11, %v12175_v44  ;;  %v11620_v34 = vpop.permute.xlu1 %2864  ;;  %v4160_v0 = vsel %vm4088_vm13, %v4075_v30, %v11587_v37  ;;  %v6883_v30 = vld [vmem:[#allocation2 + $0x128] sm:$0xff] }
 0x4ee   :  { %v3733_v59 = vpop.permute.xlu0 %3732  ;;  %v4245_v2 = vsel %vm4173_vm14, %v4160_v0, %v11582_v21 }
 0x4ef   :  { %v4498_v12 = vsel %vm4428_vm1, %v4413_v29, %v3733_v59  ;;  %v4330_v19 = vsel %vm4258_vm15, %v4245_v2, %v3378_v9 }
 0x4f0   :  { %v4583_v60 = vsel %vm4513_vm3, %v4498_v12, %v11549_v16  ;;  %v4415_v37 = vsel %vm4343_vm0, %v4330_v19, %v11593_v26  ;;  %v6884_v19 = vld [vmem:[#allocation2 + $0x130] sm:$0xff] }
 0x4f1   :  { %v4634_v57 = vsel %vm4598_vm4, %v4583_v60, 1065369472  ;;  %v11629_v62 = vpop.permute.xlu1 %3210 }
 0x4f2   :  { %v4924_v27 = vshrl.u32 %v4634_v57, 16  ;;  %v4927_v46 = vshll.u32 %v4634_v57, 16  ;;  %v11632_v52 = vpop.permute.xlu0 %2952 }
 0x4f4   :  { %6712 = vmatmul.mubr.msk.bf16.gmra.mrb[196].mxu1 %vm12645_vm10, %v4883_v18  ;;  %v4926_v16 = vrot.slane %v4924_v27, 6  ;;  %v4929_v45 = vrot.slane %v4927_v46, 7  ;;  %v6882_v27 = vld [vmem:[#allocation2 + $0x120] sm:$0xff]  ;;  %vm12651_vm10 = vmmov %vm12620_vm2 }
 0x4f5   :  { %6715 = vmatprep.mubr.msk.bf16.mxu1 %vm12500_vm11, %v12175_v44  ;;  %v11638_v31 = vpop.permute.xlu1 %3469  ;;  %v3992_v46 = vsel %vm1044_vm5, %v6882_v27, %v11611_v42 }
 0x4f6   :  { %v3380_v56 = vpop.permute.xlu0 %3379  ;;  %v4930_v54 = vor.u32 %v4929_v45, %v4926_v16 }
 0x4f8   :  { %v11646_v48 = vsel %vm4652_vm8, %v4922_v50, %v4930_v54 }
 0x4f9   :  { %v11648_v17 = vpop.permute.xlu1 %3906 }
 0x4fa   :  { %v2655_v51 = vpop.permute.xlu0 %2654 }
 0x4fc   :  { %6716 = vmatmul.mubr.msk.bf16.gmra.mrb[200].mxu1 %vm12646_vm6, %v4891_v24  ;;  %vm12652_vm6 = vmmov %vm12620_vm2 }
 0x4fd   :  { %6719 = vmatprep.mubr.msk.bf16.mxu1 %vm12500_vm11, %v12175_v44  ;;  %v3213_v11 = vpop.permute.xlu1 %3212 }
 0x4fe   :  { %v3735_v36 = vpop.permute.xlu0 %3734 }
 0x4ff   :  { %v4500_v50 = vsel %vm4428_vm1, %v4415_v37, %v3735_v36 }
 0x500   :  { %v4585_v55 = vsel %vm4513_vm3, %v4500_v50, %v3905_v23 }
 0x501   :  { %v4635_v21 = vsel %vm4598_vm4, %v4585_v55, 1065369472  ;;  %v11663_v41 = vpop.permute.xlu1 %3471 }
 0x502   :  { %v4932_v20 = vshrl.u32 %v4635_v21, 16  ;;  %v4935_v9 = vshll.u32 %v4635_v21, 16  ;;  %v2955_v5 = vpop.permute.xlu0 %2954 }
 0x504   :  { %6720 = vmatmul.mubr.msk.bf16.gmra.mrb[204].mxu1 %vm12620_vm2, %v4899_v58  ;;  %v4934_v26 = vrot.slane %v4932_v20, 6  ;;  %v4937_v25 = vrot.slane %v4935_v9, 7  ;;  %v5277_v43 = vpop.f32.mrb[136].mxu1 }
 0x505   :  { %6723 = vmatprep.mubr.msk.bf16.mxu1 %vm12500_vm11, %v12175_v44  ;;  %v5532_v3 = vmax.f32 %v5277_v43, 0.0  ;;  %v11668_v22 = vpop.permute.xlu1 %3908  ;;  %v6653_v4 = vpop.f32.mrb[137].mxu1 }
 0x506   :  { %v5280_v39 = vpop.f32.mrb[138].mxu1  ;;  %v3382_v63 = vpop.permute.xlu0 %3381  ;;  %v11670_v23 = vor.u32 %v4937_v25, %v4934_v26 }
 0x507   :  { %v5614_v32 = vmul.f32 %v5532_v3, %v12647_v49  ;;  %v5533_v8 = vmax.f32 %v5280_v39, 0.0  ;;  %v6654_v47 = vpop.f32.mrb[139].mxu1  ;;  %v6885_v39 = vld [vmem:[#allocation2 + $0x138] sm:$0xff] }
 0x508   :  { %v11675_v13 = vsel %vm4652_vm8, %v4930_v54, %v11670_v23  ;;  %v12653_v49 = vld [vmem:[#allocation35_spill] sm:$0xff] }
 0x509   :  { %v5719_v6 = vsel %vm4003_vm12, %v5614_v32, 0.0  ;;  %v5615_v29 = vmul.f32 %v5533_v8, %v12648_v40  ;;  %v2867_v59 = vpop.permute.xlu1 %2866 }
 0x50a   :  { %v5720_v12 = vadd.f32 %v5719_v6, %v11618_v53  ;;  %v3737_v7 = vpop.permute.xlu0 %3736 }
 0x50b   :  { %v5721_v33 = vsel %vm4003_vm12, %v5615_v29, 0.0 }
 0x50c   :  { %6724 = vmatmul.mubr.msk.bf16.gmra.mrb[208].mxu1 %vm12649_vm9, %v11447_v38  ;;  %v11685_v60 = vadd.f32 %v5721_v33, %v5720_v12  ;;  %v4077_v38 = vsel %vm4003_vm12, %v3992_v46, %v11565_v61  ;;  %vm12655_vm9 = vmmov %vm12620_vm2 }
 0x50d   :  { %6727 = vmatprep.mubr.msk.bf16.mxu1 %vm12500_vm11, %v12175_v44  ;;  %v3215_v18 = vpop.permute.xlu1 %3214  ;;  %v4162_v14 = vsel %vm4088_vm13, %v4077_v38, %v11632_v52 }
 0x50e   :  { %v2657_v57 = vpop.permute.xlu0 %2656  ;;  %v4247_v45 = vsel %vm4173_vm14, %v4162_v14, %v11629_v62 }
 0x50f   :  { %v4332_v1 = vsel %vm4258_vm15, %v4247_v45, %v3380_v56 }
 0x510   :  { %v4417_v52 = vsel %vm4343_vm0, %v4332_v1, %v11638_v31  ;;  %v3996_v31 = vsel %vm1044_vm5, %v6884_v19, %v2657_v57 }
 0x511   :  { %v3474_v35 = vpop.permute.xlu1 %3473  ;;  %v4502_v56 = vsel %vm4428_vm1, %v4417_v52, %v3737_v7 }
 0x512   :  { %v3739_v53 = vpop.permute.xlu0 %3738 }
 0x514   :  { %6728 = vmatmul.mubr.msk.bf16.gmra.mrb[212].mxu1 %vm12650_vm7, %v11543_v15  ;;  %v3994_v15 = vsel %vm1044_vm5, %v6883_v30, %v2655_v51  ;;  %vm12656_vm7 = vmmov %vm12620_vm2 }
 0x515   :  { %6731 = vmatprep.mubr.msk.bf16.mxu1 %vm12500_vm11, %v12175_v44  ;;  %v11697_v16 = vpop.permute.xlu1 %3910  ;;  %v4079_v61 = vsel %vm4003_vm12, %v3994_v15, %v11620_v34 }
 0x516   :  { %v2957_v42 = vpop.permute.xlu0 %2956  ;;  %v4164_v62 = vsel %vm4088_vm13, %v4079_v61, %v2955_v5 }
 0x517   :  { %v4249_v2 = vsel %vm4173_vm14, %v4164_v62, %v3213_v11  ;;  %v4081_v11 = vsel %vm4003_vm12, %v3996_v31, %v2867_v59  ;;  %v5849_v31 = vld [vmem:[%s11941_s6] sm:$0xff] }
 0x518   :  { %v4334_v34 = vsel %vm4258_vm15, %v4249_v2, %v3382_v63  ;;  %v4166_v58 = vsel %vm4088_vm13, %v4081_v11, %v2957_v42 }
 0x519   :  { %v2869_v54 = vpop.permute.xlu1 %2868  ;;  %v4419_v50 = vsel %vm4343_vm0, %v4334_v34, %v11663_v41  ;;  %v4251_v41 = vsel %vm4173_vm14, %v4166_v58, %v3215_v18 }
 0x51a   :  { %v3384_v0 = vpop.permute.xlu0 %3383 }
 0x51b   :  { %v4336_v4 = vsel %vm4258_vm15, %v4251_v41, %v3384_v0 }
 0x51c   :  { %6732 = vmatmul.mubr.msk.bf16.gmra.mrb[216].mxu1 %vm12651_vm10, %v11601_v10  ;;  %v4587_v10 = vsel %vm4513_vm3, %v4502_v56, %v11648_v17  ;;  %v4504_v17 = vsel %vm4428_vm1, %v4419_v50, %v3739_v53  ;;  %v4421_v33 = vsel %vm4343_vm0, %v4336_v4, %v3474_v35  ;;  %vm12657_vm10 = vmmov %vm12620_vm2 }
 0x51d   :  { %6735 = vmatprep.mubr.msk.bf16.mxu1 %vm12500_vm11, %v12175_v44  ;;  %v3217_v24 = vpop.permute.xlu1 %3216  ;;  %v4636_v37 = vsel %vm4598_vm4, %v4587_v10, 1065369472 }
 0x51e   :  { %v3741_v51 = vpop.permute.xlu0 %3740  ;;  %v4940_v21 = vshrl.u32 %v4636_v37, 16  ;;  %v4943_v20 = vshll.u32 %v4636_v37, 16  ;;  %v5850_v37 = vld [vmem:[%s11941_s6 + $0x8] sm:$0xff] }
 0x51f   :  { %v4506_v46 = vsel %vm4428_vm1, %v4421_v33, %v3741_v51  ;;  %v6923_v51 = vmov 0.0|0.0  }
 0x520   :  { %v4942_v6 = vrot.slane %v4940_v21, 6  ;;  %v4945_v40 = vrot.slane %v4943_v20, 7  ;;  %6774 = vmatprep.subr.bf16.mxu0 %v6923_v51 }
 0x521   :  { %v3476_v36 = vpop.permute.xlu1 %3475 }
 0x522   :  { %v2659_v55 = vpop.permute.xlu0 %2658 }
 0x523   :  { %v3998_v63 = vsel %vm1044_vm5, %v6885_v39, %v2659_v55 }
 0x524   :  { %6736 = vmatmul.mubr.msk.bf16.gmra.mrb[220].mxu1 %vm12652_vm6, %v11646_v48  ;;  %v5285_v9 = vpop.f32.mrb[140].mxu1  ;;  %v4589_v48 = vsel %vm4513_vm3, %v4504_v17, %v11668_v22  ;;  %v12654_v22 = vld [vmem:[#allocation30_spill] sm:$0xff]  ;;  %v4083_v57 = vsel %vm4003_vm12, %v3998_v63, %v2869_v54 }
 0x525   :  { %6739 = vmatprep.mubr.msk.bf16.mxu1 %vm12500_vm11, %v12175_v44  ;;  %v5534_v5 = vmax.f32 %v5285_v9, 0.0  ;;  %v3913_v26 = vpop.permute.xlu1 %3912  ;;  %v6657_v25 = vpop.f32.mrb[141].mxu1  ;;  %v4637_v29 = vsel %vm4598_vm4, %v4589_v48, 1065369472 }
 0x526   :  { %v5288_v43 = vpop.f32.mrb[142].mxu1  ;;  %v2959_v3 = vpop.permute.xlu0 %2958  ;;  %v4948_v14 = vshrl.u32 %v4637_v29, 16  ;;  %v4951_v45 = vshll.u32 %v4637_v29, 16 }
 0x527   :  { %v5616_v32 = vmul.f32 %v5534_v5, %v12653_v49  ;;  %v5535_v8 = vmax.f32 %v5288_v43, 0.0  ;;  %v6658_v47 = vpop.f32.mrb[143].mxu1  ;;  %v4168_v53 = vsel %vm4088_vm13, %v4083_v57, %v2959_v3 }
 0x528   :  { %v4253_v1 = vsel %vm4173_vm14, %v4168_v53, %v3217_v24  ;;  %v4950_v54 = vrot.slane %v4948_v14, 6  ;;  %v4953_v61 = vrot.slane %v4951_v45, 7  ;;  %v6886_v24 = vld [vmem:[#allocation2 + $0x140] sm:$0xff] }
 0x529   :  { %v5723_v59 = vsel %vm4003_vm12, %v5616_v32, 0.0  ;;  %v5617_v12 = vmul.f32 %v5535_v8, %v12654_v22  ;;  %v2871_v7 = vpop.permute.xlu1 %2870 }
 0x52a   :  { %v5724_v18 = vadd.f32 %v5723_v59, %v11685_v60  ;;  %v3386_v27 = vpop.permute.xlu0 %3385  ;;  %v4591_v60 = vsel %vm4513_vm3, %v4506_v46, %v11697_v16  ;;  %v4954_v19 = vor.u32 %v4953_v61, %v4950_v54 }
 0x52b   :  { %v5725_v38 = vsel %vm4003_vm12, %v5617_v12, 0.0  ;;  %v4338_v15 = vsel %vm4258_vm15, %v4253_v1, %v3386_v27  ;;  %v4638_v0 = vsel %vm4598_vm4, %v4591_v60, 1065369472 }
 0x52c   :  { %6740 = vmatmul.mubr.msk.bf16.gmra.mrb[224].mxu1 %vm12620_vm2, %v11675_v13  ;;  %v11747_v42 = vadd.f32 %v5725_v38, %v5724_v18  ;;  %v4946_v13 = vor.u32 %v4945_v40, %v4942_v6  ;;  %v4423_v56 = vsel %vm4343_vm0, %v4338_v15, %v3476_v36  ;;  %v4956_v34 = vshrl.u32 %v4638_v0, 16  ;;  %v12658_v18 = vld [vmem:[#allocation37_spill] sm:$0xff] }
 0x52d   :  { %6743 = vmatprep.mubr.msk.bf16.mxu1 %vm12500_vm11, %v12175_v44  ;;  %v3219_v35 = vpop.permute.xlu1 %3218  ;;  %v6775_v36 = vpack.c.bf16 %v5850_v37, %v5849_v31 }
 0x52e   :  { %v4947_v52 = vsel %vm4652_vm8, %v11670_v23, %v4946_v13  ;;  %v4959_v23 = vshll.u32 %v4638_v0, 16  ;;  %v4958_v21 = vrot.slane %v4956_v34, 6  ;;  %v4955_v9 = vsel %vm4652_vm8, %v4946_v13, %v4954_v19 }
 0x52f   :  { %v3743_v30 = vpop.permute.xlu0 %3742  ;;  %6776 = vmatpush3.bf16.msra.mxu0 %v6775_v36 }
 0x530   :  { %v4508_v16 = vsel %vm4428_vm1, %v4423_v56, %v3743_v30  ;;  %v4961_v20 = vrot.slane %v4959_v23, 7 }
 0x531   :  { %v4593_v50 = vsel %vm4513_vm3, %v4508_v16, %v3913_v26 }
 0x532   :  { %v4639_v5 = vsel %vm4598_vm4, %v4593_v50, 1065369472  ;;  %v4962_v3 = vor.u32 %v4961_v20, %v4958_v21 }
 0x533   :  { %v3478_v62 = vpop.permute.xlu1 %3477  ;;  %v4964_v41 = vshrl.u32 %v4639_v5, 16  ;;  %v4967_v43 = vshll.u32 %v4639_v5, 16  ;;  %v12662_v5 = vld [vmem:[#allocation39_spill] sm:$0xff] }
 0x534   :  { %6744 = vmatmul.mubr.msk.bf16.gmra.mrb[228].mxu1 %vm12655_vm9, %v4947_v52  ;;  %v2661_v2 = vpop.permute.xlu0 %2660  ;;  %v4963_v40 = vsel %vm4652_vm8, %v4954_v19, %v4962_v3 }
 0x535   :  { %6747 = vmatprep.mubr.msk.bf16.mxu1 %vm12500_vm11, %v12175_v44  ;;  %v4000_v10 = vsel %vm1044_vm5, %v6886_v24, %v2661_v2  ;;  %v4966_v32 = vrot.slane %v4964_v41, 6  ;;  %v4969_v8 = vrot.slane %v4967_v43, 7 }
 0x536   :  { %v4085_v11 = vsel %vm4003_vm12, %v4000_v10, %v2871_v7 }
 0x537   :  { %v3915_v17 = vpop.permute.xlu1 %3914  ;;  %v4970_v45 = vor.u32 %v4969_v8, %v4966_v32 }
 0x538   :  { %v2961_v55 = vpop.permute.xlu0 %2960 }
 0x539   :  { %v4170_v58 = vsel %vm4088_vm13, %v4085_v11, %v2961_v55  ;;  %v4971_v56 = vsel %vm4652_vm8, %v4962_v3, %v4970_v45  ;;  %v12663_v3 = vld [vmem:[#allocation34_spill] sm:$0xff] }
 0x53a   :  { %v4255_v25 = vsel %vm4173_vm14, %v4170_v58, %v3219_v35  ;;  %v12659_v35 = vld [vmem:[#allocation32_spill] sm:$0xff] }
 0x53b   :  { %v2873_v4 = vpop.permute.xlu1 %2872 }
 0x53c   :  { %6748 = vmatmul.mubr.msk.bf16.gmra.mrb[232].mxu1 %vm12656_vm7, %v4955_v9  ;;  %v3388_v48 = vpop.permute.xlu0 %3387 }
 0x53d   :  { %6751 = vmatprep.mubr.msk.bf16.mxu1 %vm12500_vm11, %v12175_v44  ;;  %v4340_v26 = vsel %vm4258_vm15, %v4255_v25, %v3388_v48 }
 0x53e   :  { %v4425_v39 = vsel %vm4343_vm0, %v4340_v26, %v3478_v62 }
 0x53f   :  { %v3221_v33 = vpop.permute.xlu1 %3220 }
 0x540   :  { %v3745_v63 = vpop.permute.xlu0 %3744  ;;  %v5293_v6 = vpop.f32.mrb[144].mxu1 }
 0x541   :  { %v4510_v49 = vsel %vm4428_vm1, %v4425_v39, %v3745_v63  ;;  %v5536_v59 = vmax.f32 %v5293_v6, 0.0  ;;  %v6661_v22 = vpop.f32.mrb[145].mxu1  ;;  %v12665_v6 = vld [vmem:[#allocation41_spill] sm:$0xff] }
 0x542   :  { %v4595_v47 = vsel %vm4513_vm3, %v4510_v49, %v3915_v17  ;;  %v5296_v12 = vpop.f32.mrb[146].mxu1 }
 0x543   :  { %v4640_v29 = vsel %vm4598_vm4, %v4595_v47, 1065369472  ;;  %v5618_v57 = vmul.f32 %v5536_v59, %v12658_v18  ;;  %v5537_v27 = vmax.f32 %v5296_v12, 0.0  ;;  %v6662_v38 = vpop.f32.mrb[147].mxu1  ;;  %v3480_v52 = vpop.permute.xlu1 %3479  ;;  %v12666_v12 = vld [vmem:[#allocation36_spill] sm:$0xff] }
 0x544   :  { %6752 = vmatmul.mubr.msk.bf16.gmra.mrb[236].mxu1 %vm12657_vm10, %v4963_v40  ;;  %v2663_v7 = vpop.permute.xlu0 %2662  ;;  %v4972_v53 = vshrl.u32 %v4640_v29, 16  ;;  %v4975_v14 = vshll.u32 %v4640_v29, 16 }
 0x545   :  { %6755 = vmatprep.mubr.msk.bf16.mxu1 %vm12500_vm11, %v12175_v44  ;;  %v4002_v46 = vsel %vm1044_vm5, %v11297_v28, %v2663_v7  ;;  %v5727_v13 = vsel %vm4003_vm12, %v5618_v57, 0.0  ;;  %v5619_v60 = vmul.f32 %v5537_v27, %v12659_v35  ;;  %vm12660_vm5 = vmmov %vm12620_vm2 }
 0x546   :  { %v5728_v1 = vadd.f32 %v5727_v13, %v11747_v42  ;;  %v4087_v30 = vsel %vm4003_vm12, %v4002_v46, %v2873_v4  ;;  %v4974_v0 = vrot.slane %v4972_v53, 6  ;;  %v4977_v28 = vrot.slane %v4975_v14, 7  ;;  %v12667_v14 = vld [vmem:[#allocation43_spill] sm:$0xff] }
 0x547   :  { %v5729_v54 = vsel %vm4003_vm12, %v5619_v60, 0.0  ;;  %v3917_v10 = vpop.permute.xlu1 %3916 }
 0x548   :  { %v2963_v15 = vpop.permute.xlu0 %2962  ;;  %v5730_v62 = vadd.f32 %v5729_v54, %v5728_v1  ;;  %v4978_v24 = vor.u32 %v4977_v28, %v4974_v0  ;;  %v12668_v1 = vld [vmem:[#allocation38_spill] sm:$0xff] }
 0x549   :  { %v4172_v61 = vsel %vm4088_vm13, %v4087_v30, %v2963_v15  ;;  %vm12661_vm13 = vmmov %vm12620_vm2 }
 0x54a   :  { %v4257_v2 = vsel %vm4173_vm14, %v4172_v61, %v3221_v33  ;;  %v4979_v31 = vsel %vm4652_vm8, %v4970_v45, %v4978_v24  ;;  %vm12664_vm14 = vmmov %vm12620_vm2 }
 0x54c   :  { %6756 = vmatmul.mubr.msk.bf16.gmra.mrb[240].mxu1 %vm12660_vm5, %v4971_v56  ;;  %v3390_v16 = vpop.permute.xlu0 %3389  ;;  %v12669_v56 = vld [vmem:[#allocation45_spill] sm:$0xff] }
 0x54d   :  { %6759 = vmatprep.mubr.msk.bf16.mxu1 %vm12500_vm11, %v12175_v44  ;;  %v4342_v42 = vsel %vm4258_vm15, %v4257_v2, %v3390_v16  ;;  %vm5931_vm15 = vcmask 74752  }
 0x54e   :  { %v4427_v51 = vsel %vm4343_vm0, %v4342_v42, %v3480_v52 }
 0x550   :  { %v3747_v34 = vpop.permute.xlu0 %3746 }
 0x551   :  { %v4512_v23 = vsel %vm4428_vm1, %v4427_v51, %v3747_v34 }
 0x552   :  { %v4597_v19 = vsel %vm4513_vm3, %v4512_v23, %v3917_v10  ;;  %v12670_v10 = vld [vmem:[#allocation40_spill] sm:$0xff] }
 0x553   :  { %v4641_v37 = vsel %vm4598_vm4, %v4597_v19, 1065369472 }
 0x554   :  { %6760 = vmatmul.mubr.msk.bf16.gmra.mrb[244].mxu1 %vm12661_vm13, %v4979_v31  ;;  %v4980_v36 = vshrl.u32 %v4641_v37, 16  ;;  %v4983_v50 = vshll.u32 %v4641_v37, 16  ;;  %v5301_v17 = vpop.f32.mrb[148].mxu1 }
 0x555   :  { %6763 = vmatprep.mubr.msk.bf16.mxu1 %vm12500_vm11, %v12175_v44  ;;  %v5538_v58 = vmax.f32 %v5301_v17, 0.0  ;;  %v6665_v21 = vpop.f32.mrb[149].mxu1 }
 0x556   :  { %v4982_v11 = vrot.slane %v4980_v36, 6  ;;  %v4985_v55 = vrot.slane %v4983_v50, 7  ;;  %v5304_v9 = vpop.f32.mrb[150].mxu1 }
 0x557   :  { %v5620_v25 = vmul.f32 %v5538_v58, %v12662_v5  ;;  %v5539_v48 = vmax.f32 %v5304_v9, 0.0  ;;  %v6666_v26 = vpop.f32.mrb[151].mxu1 }
 0x558   :  { %v4986_v20 = vor.u32 %v4985_v55, %v4982_v11  ;;  %v12671_v11 = vld [vmem:[#allocation47_spill] sm:$0xff] }
 0x559   :  { %v5731_v43 = vsel %vm4003_vm12, %v5620_v25, 0.0  ;;  %v5621_v4 = vmul.f32 %v5539_v48, %v12663_v3 }
 0x55a   :  { %v4987_v41 = vsel %vm4652_vm8, %v4978_v24, %v4986_v20  ;;  %v5732_v44 = vadd.f32 %v5731_v43, %v5730_v62  ;;  %v12672_v20 = vld [vmem:[#allocation46_spill] sm:$0xff]  ;;  %vm5846_vm8 = vcmask 1040384  }
 0x55b   :  { %v5733_v39 = vsel %vm4003_vm12, %v5621_v4, 0.0  ;;  %v12673_v4 = vld [vmem:[#allocation49_spill] sm:$0xff] }
 0x55c   :  { %6764 = vmatmul.mubr.msk.bf16.gmra.mrb[248].mxu1 %vm12664_vm14, %v4987_v41  ;;  %v5734_v63 = vadd.f32 %v5733_v39, %v5732_v44 }
 0x56c   :  { %v5309_v49 = vpop.f32.mrb[152].mxu1 }
 0x56d   :  { %v5540_v32 = vmax.f32 %v5309_v49, 0.0  ;;  %v6669_v8 = vpop.f32.mrb[153].mxu1 }
 0x56e   :  { %v5312_v47 = vpop.f32.mrb[154].mxu1 }
 0x56f   :  { %v5622_v40 = vmul.f32 %v5540_v32, %v12665_v6  ;;  %v5541_v29 = vmax.f32 %v5312_v47, 0.0  ;;  %v6670_v59 = vpop.f32.mrb[155].mxu1  ;;  %v12674_v47 = vld [vmem:[#allocation48_spill] sm:$0xff] }
 0x571   :  { %v5735_v22 = vsel %vm4003_vm12, %v5622_v40, 0.0  ;;  %v5623_v7 = vmul.f32 %v5541_v29, %v12666_v12 }
 0x572   :  { %v5736_v33 = vadd.f32 %v5735_v22, %v5734_v63  ;;  %v12675_v22 = vld [vmem:[#allocation51_spill] sm:$0xff] }
 0x573   :  { %v5737_v18 = vsel %vm4003_vm12, %v5623_v7, 0.0 }
 0x574   :  { %v5738_v57 = vadd.f32 %v5737_v18, %v5736_v33  ;;  %v5317_v27 = vpop.f32.mrb[156].mxu1 }
 0x575   :  { %v5542_v46 = vmax.f32 %v5317_v27, 0.0  ;;  %v6673_v38 = vpop.f32.mrb[157].mxu1  ;;  %v12676_v27 = vld [vmem:[#allocation50_spill] sm:$0xff] }
 0x576   :  { %v5320_v53 = vpop.f32.mrb[158].mxu1 }
 0x577   :  { %v5624_v45 = vmul.f32 %v5542_v46, %v12667_v14  ;;  %v5543_v13 = vmax.f32 %v5320_v53, 0.0  ;;  %v6674_v35 = vpop.f32.mrb[159].mxu1 }
 0x579   :  { %v5739_v60 = vsel %vm4003_vm12, %v5624_v45, 0.0  ;;  %v5625_v30 = vmul.f32 %v5543_v13, %v12668_v1  ;;  %v12677_v1 = vld [vmem:[#allocation53_spill] sm:$0xff] }
 0x57a   :  { %v5740_v15 = vadd.f32 %v5739_v60, %v5738_v57 }
 0x57b   :  { %v5741_v54 = vsel %vm4003_vm12, %v5625_v30, 0.0 }
 0x57c   :  { %v5742_v61 = vadd.f32 %v5741_v54, %v5740_v15 }
 0x57e   :  { %v5325_v52 = vpop.f32.mrb[160].mxu1 }
 0x57f   :  { %v5544_v0 = vmax.f32 %v5325_v52, 0.0  ;;  %v6677_v28 = vpop.f32.mrb[161].mxu1  ;;  %v12678_v52 = vld [vmem:[#allocation52_spill] sm:$0xff] }
 0x580   :  { %v5328_v62 = vpop.f32.mrb[162].mxu1 }
 0x581   :  { %v5626_v2 = vmul.f32 %v5544_v0, %v12669_v56  ;;  %v5545_v16 = vmax.f32 %v5328_v62, 0.0  ;;  %v6678_v42 = vpop.f32.mrb[163].mxu1 }
 0x583   :  { %v5743_v24 = vsel %vm4003_vm12, %v5626_v2, 0.0  ;;  %v5627_v51 = vmul.f32 %v5545_v16, %v12670_v10  ;;  %v12679_v10 = vld [vmem:[#allocation55_spill] sm:$0xff] }
 0x584   :  { %v5744_v34 = vadd.f32 %v5743_v24, %v5742_v61 }
 0x585   :  { %v5745_v23 = vsel %vm4003_vm12, %v5627_v51, 0.0 }
 0x586   :  { %v5746_v19 = vadd.f32 %v5745_v23, %v5744_v34  ;;  %v5333_v31 = vpop.f32.mrb[164].mxu1 }
 0x587   :  { %v5546_v37 = vmax.f32 %v5333_v31, 0.0  ;;  %v6681_v36 = vpop.f32.mrb[165].mxu1  ;;  %v12680_v31 = vld [vmem:[#allocation54_spill] sm:$0xff] }
 0x588   :  { %v5336_v50 = vpop.f32.mrb[166].mxu1 }
 0x589   :  { %v5628_v55 = vmul.f32 %v5546_v37, %v12671_v11  ;;  %v5547_v17 = vmax.f32 %v5336_v50, 0.0  ;;  %v6682_v58 = vpop.f32.mrb[167].mxu1 }
 0x58b   :  { %v5747_v21 = vsel %vm4003_vm12, %v5628_v55, 0.0  ;;  %v5629_v9 = vmul.f32 %v5547_v17, %v12672_v20  ;;  %v12681_v20 = vld [vmem:[#allocation57_spill] sm:$0xff] }
 0x58c   :  { %v5748_v5 = vadd.f32 %v5747_v21, %v5746_v19 }
 0x58d   :  { %v5749_v25 = vsel %vm4003_vm12, %v5629_v9, 0.0 }
 0x58e   :  { %v5750_v48 = vadd.f32 %v5749_v25, %v5748_v5  ;;  %v5341_v26 = vpop.f32.mrb[168].mxu1 }
 0x58f   :  { %v5548_v41 = vmax.f32 %v5341_v26, 0.0  ;;  %v6685_v43 = vpop.f32.mrb[169].mxu1  ;;  %v12682_v26 = vld [vmem:[#allocation56_spill] sm:$0xff] }
 0x590   :  { %v5344_v3 = vpop.f32.mrb[170].mxu1 }
 0x591   :  { %v5630_v44 = vmul.f32 %v5548_v41, %v12673_v4  ;;  %v6686_v39 = vpop.f32.mrb[171].mxu1  ;;  %v5549_v49 = vmax.f32 %v5344_v3, 0.0 }
 0x593   :  { %v5751_v63 = vsel %vm4003_vm12, %v5630_v44, 0.0  ;;  %v5631_v6 = vmul.f32 %v5549_v49, %v12674_v47 }
 0x594   :  { %v11833_v32 = vadd.f32 %v5751_v63, %v5750_v48 }
 0x595   :  { %v5759_v18 = vsel %vm4003_vm12, %v5631_v6, 0.0 }
 0x597   :  { %v5349_v8 = vpop.f32.mrb[172].mxu1 }
 0x598   :  { %v5550_v40 = vmax.f32 %v5349_v8, 0.0  ;;  %v6689_v29 = vpop.f32.mrb[173].mxu1  ;;  %v12683_v8 = vld [vmem:[#allocation59_spill] sm:$0xff] }
 0x599   :  { %v5352_v59 = vpop.f32.mrb[174].mxu1 }
 0x59a   :  { %v5632_v12 = vmul.f32 %v5550_v40, %v12675_v22  ;;  %v5551_v7 = vmax.f32 %v5352_v59, 0.0  ;;  %v6690_v33 = vpop.f32.mrb[175].mxu1  ;;  %v12684_v59 = vld [vmem:[#allocation58_spill] sm:$0xff] }
 0x59c   :  { %v5760_v57 = vsel %vm4003_vm12, %v5632_v12, 0.0  ;;  %v5633_v46 = vmul.f32 %v5551_v7, %v12676_v27 }
 0x59d   :  { %v5761_v38 = vadd.f32 %v5760_v57, %v5759_v18 }
 0x59e   :  { %v5762_v53 = vsel %vm4003_vm12, %v5633_v46, 0.0 }
 0x59f   :  { %v5763_v14 = vadd.f32 %v5762_v53, %v5761_v38  ;;  %v5357_v45 = vpop.f32.mrb[176].mxu1  ;;  %v12685_v38 = vld [vmem:[#allocation61_spill] sm:$0xff] }
 0x5a0   :  { %v5552_v13 = vmax.f32 %v5357_v45, 0.0  ;;  %v6693_v35 = vpop.f32.mrb[177].mxu1 }
 0x5a1   :  { %v5360_v60 = vpop.f32.mrb[178].mxu1  ;;  %v12686_v35 = vld [vmem:[#allocation60_spill] sm:$0xff] }
 0x5a2   :  { %v5634_v30 = vmul.f32 %v5552_v13, %v12677_v1  ;;  %v5553_v15 = vmax.f32 %v5360_v60, 0.0  ;;  %v6694_v54 = vpop.f32.mrb[179].mxu1 }
 0x5a4   :  { %v5764_v61 = vsel %vm4003_vm12, %v5634_v30, 0.0  ;;  %v5635_v0 = vmul.f32 %v5553_v15, %v12678_v52 }
 0x5a5   :  { %v5765_v28 = vadd.f32 %v5764_v61, %v5763_v14 }
 0x5a6   :  { %v5766_v62 = vsel %vm4003_vm12, %v5635_v0, 0.0 }
 0x5a7   :  { %v5767_v56 = vadd.f32 %v5766_v62, %v5765_v28  ;;  %v5365_v2 = vpop.f32.mrb[180].mxu1  ;;  %v12687_v28 = vld [vmem:[#allocation63_spill] sm:$0xff] }
 0x5a8   :  { %v5554_v16 = vmax.f32 %v5365_v2, 0.0  ;;  %v6697_v42 = vpop.f32.mrb[181].mxu1 }
 0x5a9   :  { %v5368_v24 = vpop.f32.mrb[182].mxu1  ;;  %v12688_v42 = vld [vmem:[#allocation62_spill] sm:$0xff] }
 0x5aa   :  { %v5636_v51 = vmul.f32 %v5554_v16, %v12679_v10  ;;  %v5555_v34 = vmax.f32 %v5368_v24, 0.0  ;;  %v6698_v23 = vpop.f32.mrb[183].mxu1 }
 0x5ac   :  { %v5768_v19 = vsel %vm4003_vm12, %v5636_v51, 0.0  ;;  %v5637_v37 = vmul.f32 %v5555_v34, %v12680_v31 }
 0x5ad   :  { %v5769_v36 = vadd.f32 %v5768_v19, %v5767_v56 }
 0x5ae   :  { %v5770_v50 = vsel %vm4003_vm12, %v5637_v37, 0.0 }
 0x5af   :  { %v5771_v11 = vadd.f32 %v5770_v50, %v5769_v36  ;;  %v5373_v55 = vpop.f32.mrb[184].mxu1  ;;  %v12689_v36 = vld [vmem:[#allocation65_spill] sm:$0xff] }
 0x5b0   :  { %v5556_v17 = vmax.f32 %v5373_v55, 0.0  ;;  %v6701_v58 = vpop.f32.mrb[185].mxu1 }
 0x5b1   :  { %v5376_v21 = vpop.f32.mrb[186].mxu1  ;;  %v12690_v58 = vld [vmem:[#allocation64_spill] sm:$0xff] }
 0x5b2   :  { %v5638_v9 = vmul.f32 %v5556_v17, %v12681_v20  ;;  %v5557_v5 = vmax.f32 %v5376_v21, 0.0  ;;  %v6702_v25 = vpop.f32.mrb[187].mxu1 }
 0x5b4   :  { %v5772_v48 = vsel %vm4003_vm12, %v5638_v9, 0.0  ;;  %v5639_v41 = vmul.f32 %v5557_v5, %v12682_v26 }
 0x5b5   :  { %v5773_v43 = vadd.f32 %v5772_v48, %v5771_v11 }
 0x5b6   :  { %v5774_v3 = vsel %vm4003_vm12, %v5639_v41, 0.0 }
 0x5b7   :  { %v5775_v4 = vadd.f32 %v5774_v3, %v5773_v43  ;;  %v5381_v44 = vpop.f32.mrb[188].mxu1  ;;  %v12691_v43 = vld [vmem:[#allocation67_spill] sm:$0xff] }
 0x5b8   :  { %v5558_v39 = vmax.f32 %v5381_v44, 0.0  ;;  %v6705_v63 = vpop.f32.mrb[189].mxu1 }
 0x5b9   :  { %v5384_v49 = vpop.f32.mrb[190].mxu1  ;;  %v12692_v63 = vld [vmem:[#allocation66_spill] sm:$0xff] }
 0x5ba   :  { %v5640_v47 = vmul.f32 %v5558_v39, %v12683_v8  ;;  %v5559_v6 = vmax.f32 %v5384_v49, 0.0  ;;  %v6706_v40 = vpop.f32.mrb[191].mxu1 }
 0x5bc   :  { %v5776_v29 = vsel %vm4003_vm12, %v5640_v47, 0.0  ;;  %v5641_v22 = vmul.f32 %v5559_v6, %v12684_v59 }
 0x5bd   :  { %v5777_v12 = vadd.f32 %v5776_v29, %v5775_v4 }
 0x5be   :  { %v5778_v7 = vsel %vm4003_vm12, %v5641_v22, 0.0 }
 0x5bf   :  { %v5779_v33 = vadd.f32 %v5778_v7, %v5777_v12  ;;  %v5389_v18 = vpop.f32.mrb[192].mxu1  ;;  %v12693_v12 = vld [vmem:[#allocation69_spill] sm:$0xff] }
 0x5c0   :  { %v5560_v57 = vmax.f32 %v5389_v18, 0.0  ;;  %v6709_v27 = vpop.f32.mrb[193].mxu1 }
 0x5c1   :  { %v5392_v46 = vpop.f32.mrb[194].mxu1  ;;  %v12694_v27 = vld [vmem:[#allocation68_spill] sm:$0xff] }
 0x5c2   :  { %v5642_v53 = vmul.f32 %v5560_v57, %v12685_v38  ;;  %v5561_v14 = vmax.f32 %v5392_v46, 0.0  ;;  %v6710_v45 = vpop.f32.mrb[195].mxu1 }
 0x5c4   :  { %v5780_v13 = vsel %vm4003_vm12, %v5642_v53, 0.0  ;;  %v5643_v60 = vmul.f32 %v5561_v14, %v12686_v35 }
 0x5c5   :  { %v5781_v1 = vadd.f32 %v5780_v13, %v5779_v33 }
 0x5c6   :  { %v5782_v30 = vsel %vm4003_vm12, %v5643_v60, 0.0 }
 0x5c7   :  { %v5783_v15 = vadd.f32 %v5782_v30, %v5781_v1  ;;  %v5397_v54 = vpop.f32.mrb[196].mxu1  ;;  %v12695_v1 = vld [vmem:[#allocation71_spill] sm:$0xff] }
 0x5c8   :  { %v5562_v61 = vmax.f32 %v5397_v54, 0.0  ;;  %v6713_v52 = vpop.f32.mrb[197].mxu1 }
 0x5c9   :  { %v5400_v0 = vpop.f32.mrb[198].mxu1  ;;  %v12696_v52 = vld [vmem:[#allocation70_spill] sm:$0xff] }
 0x5ca   :  { %v5644_v62 = vmul.f32 %v5562_v61, %v12687_v28  ;;  %v5563_v56 = vmax.f32 %v5400_v0, 0.0  ;;  %v6714_v2 = vpop.f32.mrb[199].mxu1 }
 0x5cc   :  { %v5784_v16 = vsel %vm4003_vm12, %v5644_v62, 0.0  ;;  %v5645_v24 = vmul.f32 %v5563_v56, %v12688_v42 }
 0x5cd   :  { %v5785_v10 = vadd.f32 %v5784_v16, %v5783_v15 }
 0x5ce   :  { %v5786_v51 = vsel %vm4003_vm12, %v5645_v24, 0.0 }
 0x5cf   :  { %v5787_v34 = vadd.f32 %v5786_v51, %v5785_v10  ;;  %v5405_v23 = vpop.f32.mrb[200].mxu1  ;;  %v12697_v10 = vld [vmem:[#allocation73_spill] sm:$0xff] }
 0x5d0   :  { %v5564_v19 = vmax.f32 %v5405_v23, 0.0  ;;  %v6717_v31 = vpop.f32.mrb[201].mxu1 }
 0x5d1   :  { %v5408_v37 = vpop.f32.mrb[202].mxu1  ;;  %v12698_v31 = vld [vmem:[#allocation72_spill] sm:$0xff] }
 0x5d2   :  { %v5646_v50 = vmul.f32 %v5564_v19, %v12689_v36  ;;  %v5565_v11 = vmax.f32 %v5408_v37, 0.0  ;;  %v6718_v55 = vpop.f32.mrb[203].mxu1 }
 0x5d4   :  { %v5788_v17 = vsel %vm4003_vm12, %v5646_v50, 0.0  ;;  %v5647_v21 = vmul.f32 %v5565_v11, %v12690_v58 }
 0x5d5   :  { %v5789_v20 = vadd.f32 %v5788_v17, %v5787_v34 }
 0x5d6   :  { %v5790_v9 = vsel %vm4003_vm12, %v5647_v21, 0.0 }
 0x5d7   :  { %v5791_v5 = vadd.f32 %v5790_v9, %v5789_v20  ;;  %v5413_v25 = vpop.f32.mrb[204].mxu1  ;;  %v12699_v20 = vld [vmem:[#allocation75_spill] sm:$0xff] }
 0x5d8   :  { %v5566_v48 = vmax.f32 %v5413_v25, 0.0  ;;  %v6721_v26 = vpop.f32.mrb[205].mxu1 }
 0x5d9   :  { %v5416_v41 = vpop.f32.mrb[206].mxu1  ;;  %v12700_v26 = vld [vmem:[#allocation74_spill] sm:$0xff] }
 0x5da   :  { %v5648_v3 = vmul.f32 %v5566_v48, %v12691_v43  ;;  %v5567_v4 = vmax.f32 %v5416_v41, 0.0  ;;  %v6722_v44 = vpop.f32.mrb[207].mxu1 }
 0x5dc   :  { %v5792_v39 = vsel %vm4003_vm12, %v5648_v3, 0.0  ;;  %v5649_v49 = vmul.f32 %v5567_v4, %v12692_v63 }
 0x5dd   :  { %v5793_v8 = vadd.f32 %v5792_v39, %v5791_v5 }
 0x5de   :  { %v5794_v47 = vsel %vm4003_vm12, %v5649_v49, 0.0 }
 0x5df   :  { %v5795_v6 = vadd.f32 %v5794_v47, %v5793_v8  ;;  %v5421_v40 = vpop.f32.mrb[208].mxu1  ;;  %v12701_v8 = vld [vmem:[#allocation77_spill] sm:$0xff] }
 0x5e0   :  { %v5568_v29 = vmax.f32 %v5421_v40, 0.0  ;;  %v6725_v59 = vpop.f32.mrb[209].mxu1 }
 0x5e1   :  { %v5424_v22 = vpop.f32.mrb[210].mxu1  ;;  %v12702_v59 = vld [vmem:[#allocation76_spill] sm:$0xff] }
 0x5e2   :  { %v5650_v7 = vmul.f32 %v5568_v29, %v12693_v12  ;;  %v5569_v33 = vmax.f32 %v5424_v22, 0.0  ;;  %v6726_v18 = vpop.f32.mrb[211].mxu1 }
 0x5e4   :  { %v5796_v57 = vsel %vm4003_vm12, %v5650_v7, 0.0  ;;  %v5651_v46 = vmul.f32 %v5569_v33, %v12694_v27 }
 0x5e5   :  { %v5797_v38 = vadd.f32 %v5796_v57, %v5795_v6 }
 0x5e6   :  { %v5798_v53 = vsel %vm4003_vm12, %v5651_v46, 0.0 }
 0x5e7   :  { %v5799_v14 = vadd.f32 %v5798_v53, %v5797_v38  ;;  %v5429_v45 = vpop.f32.mrb[212].mxu1  ;;  %v12703_v38 = vld [vmem:[#allocation79_spill] sm:$0xff] }
 0x5e8   :  { %v5570_v13 = vmax.f32 %v5429_v45, 0.0  ;;  %v6729_v35 = vpop.f32.mrb[213].mxu1 }
 0x5e9   :  { %v5432_v60 = vpop.f32.mrb[214].mxu1  ;;  %v12704_v35 = vld [vmem:[#allocation78_spill] sm:$0xff] }
 0x5ea   :  { %v5652_v30 = vmul.f32 %v5570_v13, %v12695_v1  ;;  %v5571_v15 = vmax.f32 %v5432_v60, 0.0  ;;  %v6730_v54 = vpop.f32.mrb[215].mxu1 }
 0x5ec   :  { %v5800_v61 = vsel %vm4003_vm12, %v5652_v30, 0.0  ;;  %v5653_v0 = vmul.f32 %v5571_v15, %v12696_v52 }
 0x5ed   :  { %v5801_v28 = vadd.f32 %v5800_v61, %v5799_v14 }
 0x5ee   :  { %v5802_v62 = vsel %vm4003_vm12, %v5653_v0, 0.0 }
 0x5ef   :  { %v5803_v56 = vadd.f32 %v5802_v62, %v5801_v28  ;;  %v5437_v2 = vpop.f32.mrb[216].mxu1  ;;  %v12705_v28 = vld [vmem:[#allocation81_spill] sm:$0xff] }
 0x5f0   :  { %v5572_v16 = vmax.f32 %v5437_v2, 0.0  ;;  %v6733_v42 = vpop.f32.mrb[217].mxu1 }
 0x5f1   :  { %v5440_v24 = vpop.f32.mrb[218].mxu1  ;;  %v12706_v42 = vld [vmem:[#allocation80_spill] sm:$0xff] }
 0x5f2   :  { %v5654_v51 = vmul.f32 %v5572_v16, %v12697_v10  ;;  %v5573_v34 = vmax.f32 %v5440_v24, 0.0  ;;  %v6734_v23 = vpop.f32.mrb[219].mxu1 }
 0x5f4   :  { %v5804_v19 = vsel %vm4003_vm12, %v5654_v51, 0.0  ;;  %v5655_v37 = vmul.f32 %v5573_v34, %v12698_v31 }
 0x5f5   :  { %v5805_v36 = vadd.f32 %v5804_v19, %v5803_v56 }
 0x5f6   :  { %v5806_v50 = vsel %vm4003_vm12, %v5655_v37, 0.0 }
 0x5f7   :  { %v5807_v11 = vadd.f32 %v5806_v50, %v5805_v36  ;;  %v5445_v55 = vpop.f32.mrb[220].mxu1  ;;  %v12707_v36 = vld [vmem:[#allocation83_spill] sm:$0xff] }
 0x5f8   :  { %v5574_v17 = vmax.f32 %v5445_v55, 0.0  ;;  %v6737_v58 = vpop.f32.mrb[221].mxu1 }
 0x5f9   :  { %v5448_v21 = vpop.f32.mrb[222].mxu1  ;;  %v12708_v58 = vld [vmem:[#allocation82_spill] sm:$0xff] }
 0x5fa   :  { %v5656_v9 = vmul.f32 %v5574_v17, %v12699_v20  ;;  %v5575_v5 = vmax.f32 %v5448_v21, 0.0  ;;  %v6738_v25 = vpop.f32.mrb[223].mxu1 }
 0x5fc   :  { %v5808_v48 = vsel %vm4003_vm12, %v5656_v9, 0.0  ;;  %v5657_v41 = vmul.f32 %v5575_v5, %v12700_v26 }
 0x5fd   :  { %v5809_v43 = vadd.f32 %v5808_v48, %v5807_v11 }
 0x5fe   :  { %v5810_v3 = vsel %vm4003_vm12, %v5657_v41, 0.0 }
 0x5ff   :  { %v5811_v4 = vadd.f32 %v5810_v3, %v5809_v43  ;;  %v5453_v44 = vpop.f32.mrb[224].mxu1  ;;  %v12709_v43 = vld [vmem:[#allocation85_spill] sm:$0xff] }
 0x600   :  { %v5576_v39 = vmax.f32 %v5453_v44, 0.0  ;;  %v6741_v63 = vpop.f32.mrb[225].mxu1 }
 0x601   :  { %v5456_v49 = vpop.f32.mrb[226].mxu1  ;;  %v12710_v63 = vld [vmem:[#allocation84_spill] sm:$0xff] }
 0x602   :  { %v5658_v47 = vmul.f32 %v5576_v39, %v12701_v8  ;;  %v5577_v6 = vmax.f32 %v5456_v49, 0.0  ;;  %v6742_v40 = vpop.f32.mrb[227].mxu1 }
 0x604   :  { %v5812_v29 = vsel %vm4003_vm12, %v5658_v47, 0.0  ;;  %v5659_v22 = vmul.f32 %v5577_v6, %v12702_v59 }
 0x605   :  { %v5813_v12 = vadd.f32 %v5812_v29, %v5811_v4 }
 0x606   :  { %v5814_v7 = vsel %vm4003_vm12, %v5659_v22, 0.0 }
 0x607   :  { %v5815_v33 = vadd.f32 %v5814_v7, %v5813_v12  ;;  %v5461_v18 = vpop.f32.mrb[228].mxu1  ;;  %v12711_v12 = vld [vmem:[#allocation87_spill] sm:$0xff] }
 0x608   :  { %v5578_v57 = vmax.f32 %v5461_v18, 0.0  ;;  %v6745_v27 = vpop.f32.mrb[229].mxu1 }
 0x609   :  { %v5464_v46 = vpop.f32.mrb[230].mxu1  ;;  %v12712_v27 = vld [vmem:[#allocation86_spill] sm:$0xff] }
 0x60a   :  { %v5660_v53 = vmul.f32 %v5578_v57, %v12703_v38  ;;  %v5579_v14 = vmax.f32 %v5464_v46, 0.0  ;;  %v6746_v45 = vpop.f32.mrb[231].mxu1 }
 0x60c   :  { %v5816_v13 = vsel %vm4003_vm12, %v5660_v53, 0.0  ;;  %v5661_v60 = vmul.f32 %v5579_v14, %v12704_v35  ;;  %v5753_v14 = vrot.slane %v11833_v32, 4 }
 0x60d   :  { %v5817_v1 = vadd.f32 %v5816_v13, %v5815_v33 }
 0x60e   :  { %v5818_v30 = vsel %vm4003_vm12, %v5661_v60, 0.0 }
 0x60f   :  { %v5819_v15 = vadd.f32 %v5818_v30, %v5817_v1  ;;  %v5469_v54 = vpop.f32.mrb[232].mxu1  ;;  %v12713_v30 = vld [vmem:[#allocation89_spill] sm:$0xff] }
 0x610   :  { %v5580_v61 = vmax.f32 %v5469_v54, 0.0  ;;  %v6749_v52 = vpop.f32.mrb[233].mxu1 }
 0x611   :  { %v5472_v0 = vpop.f32.mrb[234].mxu1  ;;  %v5754_v52 = vadd.f32 %v5753_v14, %v11833_v32 }
 0x612   :  { %v5662_v62 = vmul.f32 %v5580_v61, %v12705_v28  ;;  %v5581_v56 = vmax.f32 %v5472_v0, 0.0  ;;  %v6750_v2 = vpop.f32.mrb[235].mxu1  ;;  %v12714_v28 = vld [vmem:[#allocation88_spill] sm:$0xff] }
 0x614   :  { %v5820_v16 = vsel %vm4003_vm12, %v5662_v62, 0.0  ;;  %v5663_v24 = vmul.f32 %v5581_v56, %v12706_v42 }
 0x615   :  { %v5821_v10 = vadd.f32 %v5820_v16, %v5819_v15  ;;  %v5755_v16 = vrot.slane %v5754_v52, 2 }
 0x616   :  { %v5822_v51 = vsel %vm4003_vm12, %v5663_v24, 0.0 }
 0x617   :  { %v5823_v34 = vadd.f32 %v5822_v51, %v5821_v10  ;;  %v5477_v23 = vpop.f32.mrb[236].mxu1  ;;  %v5756_v10 = vadd.f32 %v5755_v16, %v5754_v52 }
 0x618   :  { %v5582_v19 = vmax.f32 %v5477_v23, 0.0  ;;  %v6753_v31 = vpop.f32.mrb[237].mxu1 }
 0x619   :  { %v5480_v37 = vpop.f32.mrb[238].mxu1  ;;  %v5757_v23 = vrot.slane %v5756_v10, 1 }
 0x61a   :  { %v5664_v50 = vmul.f32 %v5582_v19, %v12707_v36  ;;  %v5583_v11 = vmax.f32 %v5480_v37, 0.0  ;;  %v6754_v55 = vpop.f32.mrb[239].mxu1 }
 0x61b   :  { %v5758_v37 = vadd.f32 %v5757_v23, %v5756_v10 }
 0x61c   :  { %v5824_v17 = vsel %vm4003_vm12, %v5664_v50, 0.0  ;;  %v5665_v21 = vmul.f32 %v5583_v11, %v12708_v58  ;;  %v6120_v11 = vld [vmem:[%s11942_s7] ss:$0 sm:$0xff] }
 0x61d   :  { %v5825_v20 = vadd.f32 %v5824_v17, %v5823_v34 }
 0x61e   :  { %v5826_v9 = vsel %vm4003_vm12, %v5665_v21, 0.0 }
 0x61f   :  { %v5827_v5 = vadd.f32 %v5826_v9, %v5825_v20  ;;  %v5485_v25 = vpop.f32.mrb[240].mxu1 }
 0x620   :  { %v5584_v48 = vmax.f32 %v5485_v25, 0.0  ;;  %v6757_v26 = vpop.f32.mrb[241].mxu1 }
 0x621   :  { %v5488_v41 = vpop.f32.mrb[242].mxu1 }
 0x622   :  { %v5666_v3 = vmul.f32 %v5584_v48, %v12709_v43  ;;  %v5585_v4 = vmax.f32 %v5488_v41, 0.0  ;;  %v6758_v44 = vpop.f32.mrb[243].mxu1 }
 0x624   :  { %v5828_v39 = vsel %vm4003_vm12, %v5666_v3, 0.0  ;;  %v5667_v49 = vmul.f32 %v5585_v4, %v12710_v63 }
 0x625   :  { %v5829_v8 = vadd.f32 %v5828_v39, %v5827_v5 }
 0x626   :  { %v5830_v47 = vsel %vm4003_vm12, %v5667_v49, 0.0 }
 0x627   :  { %v5831_v6 = vadd.f32 %v5830_v47, %v5829_v8  ;;  %v5493_v40 = vpop.f32.mrb[244].mxu1 }
 0x628   :  { %v5586_v29 = vmax.f32 %v5493_v40, 0.0  ;;  %v6761_v59 = vpop.f32.mrb[245].mxu1 }
 0x629   :  { %v5496_v22 = vpop.f32.mrb[246].mxu1 }
 0x62a   :  { %v5668_v7 = vmul.f32 %v5586_v29, %v12711_v12  ;;  %v5587_v33 = vmax.f32 %v5496_v22, 0.0  ;;  %v6762_v18 = vpop.f32.mrb[247].mxu1 }
 0x62c   :  { %v5832_v57 = vsel %vm4003_vm12, %v5668_v7, 0.0  ;;  %v5669_v46 = vmul.f32 %v5587_v33, %v12712_v27 }
 0x62d   :  { %v5833_v38 = vadd.f32 %v5832_v57, %v5831_v6 }
 0x62e   :  { %v5834_v53 = vsel %vm4003_vm12, %v5669_v46, 0.0 }
 0x62f   :  { %v5835_v45 = vadd.f32 %v5834_v53, %v5833_v38  ;;  %v5501_v13 = vpop.f32.mrb[248].mxu1 }
 0x630   :  { %v5588_v35 = vmax.f32 %v5501_v13, 0.0  ;;  %v6765_v60 = vpop.f32.mrb[249].mxu1 }
 0x631   :  { %v5504_v1 = vpop.f32.mrb[250].mxu1 }
 0x632   :  { %v5670_v15 = vmul.f32 %v5588_v35, %v12713_v30  ;;  %v5589_v54 = vmax.f32 %v5504_v1, 0.0  ;;  %v6766_v61 = vpop.f32.mrb[251].mxu1 }
 0x634   :  { %v5836_v0 = vsel %vm4003_vm12, %v5670_v15, 0.0  ;;  %v5671_v62 = vmul.f32 %v5589_v54, %v12714_v28 }
 0x635   :  { %v5837_v56 = vadd.f32 %v5836_v0, %v5835_v45 }
 0x636   :  { %v5838_v2 = vsel %vm4003_vm12, %v5671_v62, 0.0 }
 0x637   :  { %v5839_v42 = vadd.f32 %v5838_v2, %v5837_v56 }
 0x639   :  { %v5840_v24 = vrot.slane %v5839_v42, 4 }
 0x63b   :  { %v5841_v51 = vadd.f32 %v5840_v24, %v5839_v42 }
 0x63d   :  { %v5842_v34 = vrot.slane %v5841_v51, 2 }
 0x63f   :  { %v5843_v19 = vadd.f32 %v5842_v34, %v5841_v51 }
 0x641   :  { %v5844_v31 = vrot.slane %v5843_v19, 1 }
 0x643   :  { %v5845_v36 = vadd.f32 %v5844_v31, %v5843_v19 }
 0x645   :  { %v5847_v32 = vsel %vm5846_vm8, %v5758_v37, %v5845_v36 }
 0x646   :  { %v5848_v50 = vmul.f32 0.00390625, %v5847_v32 }
 0x648   :  { %6772 = vmatmul.mubr.msk.f32.vlgmr.msra.gmra.mrb[240].mxu0 %vm4003_vm12, %v5848_v50 }
 0x71b   :  { %v5927_v55 = vpop.f32.mrb[240].mxu0 }
 0x71c   :  { %v5928_v17 = vadd.f32 %v6120_v11, %v5927_v55  ;;  %v6773_v58 = vpop.f32.mrb[241].mxu0 }
 0x71e   :  { %5932 = vst.msk [vmem:[#allocation3] sm:$0x3] %vm5931_vm15, %v5928_v17 }
 0x71f   :  { %6898 = shalt.err (!%p6895_p4)
}
 0x720   :  { %s6899_s29 = scalar_lea.hbm %s11943_s8, 32 }
 0x721   :  { %p6900_p5 = scmp.ne.s32.totalorder %s11943_s8, %s6899_s29  ;;  %p6903_p6 = scmp.lt.u32.totalorder %s6899_s29, %s11943_s8 }
 0x723   :  { %p6905_p7 = pnand %p6903_p6, %p6900_p5 }
 0x725   :  { %6908 = shalt.err (!%p6905_p7)
}
 0x726   :  { %5942 = dma.vmem_to_hbm [thread:$0]  %s5940_s26, 32, %s11943_s8, [#allocation4]  }
 0x727   :  { %6909 = dma.done.wait [#allocation4], 32  }
 0x728   :  { %6910 = vsyncadd [#allocation4], 4294967264 }
 0x729   :  { %5946 = vsyncpa [#allocation4], 1 }

</bundles_post_ra>
